<compile_context>
chip_gen: v6e
topology: v6e:2x2x1
jax: 0.10.0
libtpu: 0.0.40
codegen_flags: <defaults>
</compile_context>

<pallas_src>
import functools

import numpy as np
import jax
import jax.numpy as jnp
from jax import lax
from jax.experimental import pallas as pl
from jax.experimental.pallas import tpu as pltpu

BN_EPS = 1e-5

# ConvTranspose2d(k=4, s=2, p=1): output row oh = 2*ih - 1 + kh.
# For output row parity r (oh = 2*i + r) the two contributing taps are
# (padded-input row offset a in {0,1,2}, kernel row kh):
_TAPS = (((1, 1), (0, 3)),    # r == 0
         ((1, 2), (2, 0)))    # r == 1

# Same transposed conv applied to a parity-split input (y[2i+r] = P_r[i]).
# For final-output phase u (mod 4) the two contributing taps are
# (input parity r1, padded-slab row offset a in {0,1,2}, kernel row kh):
_TAPS2 = (((0, 1, 1), (1, 0, 3)),   # u == 0
          ((0, 1, 2), (1, 1, 0)),   # u == 1
          ((0, 1, 3), (1, 1, 1)),   # u == 2
          ((0, 2, 0), (1, 1, 2)))   # u == 3


def _elu(z):
    # exp(min(z,0)) avoids overflow in the unselected branch.
    return jnp.where(z > 0, z, jnp.exp(jnp.minimum(z, 0.0)) - 1.0)


# ----------------------------------------------------------------------------
# The fused decoder kernel (one grid step == one batch block of B elements)
# ----------------------------------------------------------------------------
def _decoder_kernel(x_ref, rz_w_ref, rz_shift_ref, rz_alpha_ref,
                    d1_w_ref, d1_shift_ref, d2_w_ref, d2_shift_ref,
                    o_ref, pad_ref, ppad_ref,
                    *, B, H, W, C, HD, OD, L):
    M = B * H * W

    # Zero ONLY the 1-pixel spatial borders of the padded scratches (the
    # interiors are fully overwritten below every step, borders are never
    # written and implement the conv/deconv zero padding).
    def zero_border(ref):
        b, hp, wp, ch = ref.shape
        ref[:, 0:1, :, :] = jnp.zeros((b, 1, wp, ch), ref.dtype)
        ref[:, hp - 1:hp, :, :] = jnp.zeros((b, 1, wp, ch), ref.dtype)
        ref[:, 1:hp - 1, 0:1, :] = jnp.zeros((b, hp - 2, 1, ch), ref.dtype)
        ref[:, 1:hp - 1, wp - 1:wp, :] = jnp.zeros((b, hp - 2, 1, ch), ref.dtype)

    zero_border(pad_ref)
    zero_border(ppad_ref)

    def im2col3x3(ref, ch):
        # (B, H+2, W+2, ch) bf16 padded slab -> (M, 9*ch) bf16 patch matrix.
        xp = ref[...]
        cols = [xp[:, dy:dy + H, dx:dx + W, :].reshape(M, ch)
                for dy in range(3) for dx in range(3)]
        return jnp.concatenate(cols, axis=1)

    # --- ResidualStack of ReZero layers -------------------------------------
    x = x_ref[...]                                      # (B, H, W, C) f32
    for l in range(L):
        h = x
        for k in range(2):
            pad_ref[:, 1:H + 1, 1:W + 1, :] = h.astype(jnp.bfloat16)
            z = jnp.dot(im2col3x3(pad_ref, C), rz_w_ref[l, k],
                        preferred_element_type=jnp.float32) + rz_shift_ref[l, k]
            h = _elu(z).reshape(B, H, W, C)
        x = rz_alpha_ref[l] * h + x                     # ReZero residual (f32)

    # --- ReLU + ConvTranspose2d(C->HD, 4, s=2, p=1) + BN --------------------
    # All 4 output parities fused into ONE matmul with 4*HD lane-dense output
    # channels; result kept parity-split in a zero-padded bf16 VMEM slab.
    pad_ref[:, 1:H + 1, 1:W + 1, :] = jnp.maximum(x, 0.0).astype(jnp.bfloat16)
    z1 = jnp.dot(im2col3x3(pad_ref, C), d1_w_ref[...],
                 preferred_element_type=jnp.float32) + d1_shift_ref[...]
    ppad_ref[:, 1:H + 1, 1:W + 1, :] = (
        z1.reshape(B, H, W, 4 * HD).astype(jnp.bfloat16))

    # --- (Dropout = identity in eval) ---------------------------------------
    # --- ConvTranspose2d(HD->OD, 4, s=2, p=1) + BN --------------------------
    # All 16 final-output phases fused into ONE matmul with 16*OD lane-dense
    # output channels; one unmasked 128-lane output store.
    z2 = jnp.dot(im2col3x3(ppad_ref, 4 * HD), d2_w_ref[...],
                 preferred_element_type=jnp.float32) + d2_shift_ref[...]
    o_ref[...] = z2.reshape(B, H, W, 16 * OD)


# ----------------------------------------------------------------------------
# Wrapper: parameter folding + pallas_call + pixel shuffle + NCHW boundary
# ----------------------------------------------------------------------------
def _prep_conv3x3(w, scale):
    """(3,3,Cin,Cout) conv weight with BN scale folded -> (9*Cin, Cout) bf16."""
    ws = w * scale
    return ws.reshape(9 * w.shape[2], w.shape[3]).astype(jnp.bfloat16)


def _prep_deconv1_fused(w, scale):
    """(4,4,C,HD) deconv weight -> (9*C, 4*HD) bf16 on the 3x3 im2col basis.
    Output column block p = 2*r + c is output parity (r, c); unused taps are
    zero rows (free FLOPs, saves the per-parity concats & masked stores)."""
    ws = w * scale
    C, HD = w.shape[2], w.shape[3]
    mat = jnp.zeros((9 * C, 4 * HD), jnp.float32)
    for r in range(2):
        for c in range(2):
            p = 2 * r + c
            for (a, kh) in _TAPS[r]:
                for (b, kw) in _TAPS[c]:
                    blk = 3 * a + b
                    mat = mat.at[blk * C:(blk + 1) * C,
                                 p * HD:(p + 1) * HD].set(ws[kh, kw])
    return mat.astype(jnp.bfloat16)


def _prep_deconv2_fused(w, scale):
    """(4,4,HD,OD) deconv weight -> (9*4*HD, 16*OD) bf16 on the 3x3 im2col
    basis of the parity-split (4*HD channel) slab.  Output column block
    q = 4*u + v is the final-output phase (u, v)."""
    ws = w * scale
    HD, OD = w.shape[2], w.shape[3]
    mat = jnp.zeros((9 * 4 * HD, 16 * OD), jnp.float32)
    for u in range(4):
        for v in range(4):
            q = 4 * u + v
            for (r1, a, kh) in _TAPS2[u]:
                for (c1, b, kw) in _TAPS2[v]:
                    row = (3 * a + b) * 4 * HD + (2 * r1 + c1) * HD
                    mat = mat.at[row:row + HD,
                                 q * OD:(q + 1) * OD].set(ws[kh, kw])
    return mat.astype(jnp.bfloat16)


def _full_spec(a):
    nd = a.ndim
    return pl.BlockSpec(a.shape, lambda g: (0,) * nd)


def _pick_batch_block(n, hw):
    """Largest divisor b of n with M = b*hw <= 512 rows, keeping >= 2 grid
    steps when n >= 2 so both v7x TensorCores stay busy."""
    best = 1
    for b in range(1, n + 1):
        if n % b:
            continue
        if n >= 2 and n // b < 2:
            continue
        if b * hw <= 512:
            best = b
    return best


def decoder_forward(params, x_nchw):
    x = jnp.transpose(x_nchw, (0, 2, 3, 1)).astype(jnp.float32)   # NCHW -> NHWC
    N, H, W, C = x.shape
    L = len(params['rezero'])
    HD = params['deconv1']['w'].shape[-1]
    OD = params['deconv2']['w'].shape[-1]
    B = _pick_batch_block(N, H * W)
    G = N // B

    # Fold BN (and deconv bias) into weights / shifts; tiny XLA-side prep.
    rz_w = jnp.stack([jnp.stack([_prep_conv3x3(lp['w1'], lp['s1']),
                                 _prep_conv3x3(lp['w2'], lp['s2'])], 0)
                      for lp in params['rezero']], 0)              # (L,2,9C,C)
    rz_shift = jnp.stack([jnp.stack([lp['b1'][None, :],
                                     lp['b2'][None, :]], 0)
                          for lp in params['rezero']], 0)          # (L,2,1,C)
    rz_alpha = jnp.stack([jnp.full((1, C), lp['alpha'], jnp.float32)
                          for lp in params['rezero']], 0)          # (L,1,C)
    d1_w = _prep_deconv1_fused(params['deconv1']['w'], params['deconv1']['s'])
    d1_shift = jnp.tile(params['deconv1']['b'], 4)[None, :]        # (1, 4*HD)
    d2_w = _prep_deconv2_fused(params['deconv2']['w'], params['deconv2']['s'])
    d2_shift = jnp.tile(params['deconv2']['b'], 16)[None, :]       # (1, 16*OD)

    kern = functools.partial(_decoder_kernel, B=B, H=H, W=W, C=C,
                             HD=HD, OD=OD, L=L)

    out = pl.pallas_call(
        kern,
        out_shape=jax.ShapeDtypeStruct((N, H, W, 16 * OD), jnp.float32),
        grid=(G,),
        in_specs=[
            pl.BlockSpec((B, H, W, C), lambda g: (g, 0, 0, 0)),
            _full_spec(rz_w), _full_spec(rz_shift), _full_spec(rz_alpha),
            _full_spec(d1_w), _full_spec(d1_shift),
            _full_spec(d2_w), _full_spec(d2_shift),
        ],
        out_specs=pl.BlockSpec((B, H, W, 16 * OD), lambda g: (g, 0, 0, 0)),
        scratch_shapes=[
            pltpu.VMEM((B, H + 2, W + 2, C), jnp.bfloat16),      # padded act
            pltpu.VMEM((B, H + 2, W + 2, 4 * HD), jnp.bfloat16), # deconv1 slab
        ],
        compiler_params=pltpu.CompilerParams(
            dimension_semantics=("parallel",)),
    )(x, rz_w, rz_shift, rz_alpha, d1_w, d1_shift, d2_w, d2_shift)

    # 4x pixel-shuffle of the 16 phase channel blocks (one reshape/transpose).
    o = out.reshape(N, H, W, 4, 4, OD)
    o = jnp.transpose(o, (0, 1, 3, 2, 4, 5)).reshape(N, 4 * H, 4 * W, OD)
    return jnp.transpose(o, (0, 3, 1, 2))                          # NHWC->NCHW


# ----------------------------------------------------------------------------
# Parameter init (deterministic, synthetic)
# ----------------------------------------------------------------------------
def _bn_fold(key, C, conv_bias=None):
    """Eval-mode BatchNorm folded into per-channel (scale, shift)."""
    k1, k2, k3, k4 = jax.random.split(key, 4)
    gamma = 1.0 + 0.1 * jax.random.normal(k1, (C,), jnp.float32)
    beta = 0.1 * jax.random.normal(k2, (C,), jnp.float32)
    mean = 0.1 * jax.random.normal(k3, (C,), jnp.float32)
    var = 1.0 + 0.1 * jax.random.uniform(k4, (C,), jnp.float32)
    scale = gamma / jnp.sqrt(var + BN_EPS)
    shift = beta - mean * scale
    if conv_bias is not None:          # fold the ConvTranspose bias in as well
        shift = shift + conv_bias * scale
    return scale, shift


def init_params(key, i_dim, h_dim, o_dim, nb_r_layers):
    keys = jax.random.split(key, nb_r_layers + 2)
    rz = []
    for li in range(nb_r_layers):
        k = jax.random.split(keys[li], 5)
        fan = i_dim * 9
        w1 = jax.random.normal(k[0], (3, 3, i_dim, i_dim), jnp.float32) / np.sqrt(fan)
        s1, b1 = _bn_fold(k[1], i_dim)
        w2 = jax.random.normal(k[2], (3, 3, i_dim, i_dim), jnp.float32) / np.sqrt(fan)
        s2, b2 = _bn_fold(k[3], i_dim)
        # NOTE: PyTorch inits alpha to 0.0; a small nonzero value is used so the
        # conv branch actually contributes (same forward semantics).
        alpha = 0.1 + 0.05 * jax.random.normal(k[4], (), jnp.float32)
        rz.append(dict(w1=w1, s1=s1, b1=b1, w2=w2, s2=s2, b2=b2, alpha=alpha))

    def deconv_p(key, cin, cout):
        k = jax.random.split(key, 3)
        w = jax.random.normal(k[0], (4, 4, cin, cout), jnp.float32) / np.sqrt(cin * 16)
        bias = 0.05 * jax.random.normal(k[1], (cout,), jnp.float32)
        s, b = _bn_fold(k[2], cout, conv_bias=bias)
        return dict(w=w, s=s, b=b)

    return dict(rezero=rz,
                deconv1=deconv_p(keys[-2], i_dim, h_dim),
                deconv2=deconv_p(keys[-1], h_dim, o_dim))


# ----------------------------------------------------------------------------
# Pure-JAX reference (f32, unfused) for the correctness check
# ----------------------------------------------------------------------------
def ref_decoder(params, x_nchw):
    x = jnp.transpose(x_nchw, (0, 2, 3, 1))

    def cbe(h, w, s, b):
        y = lax.conv_general_dilated(h, w, (1, 1), 'SAME',
                                     dimension_numbers=('NHWC', 'HWIO', 'NHWC'),
                                     precision=lax.Precision.HIGHEST)
        y = y * s + b
        return _elu(y)

    for lp in params['rezero']:
        y1 = cbe(x, lp['w1'], lp['s1'], lp['b1'])
        y2 = cbe(y1, lp['w2'], lp['s2'], lp['b2'])
        x = lp['alpha'] * y2 + x
    x = jnp.maximum(x, 0.0)
    for dp in (params['deconv1'], params['deconv2']):
        w_flip = dp['w'][::-1, ::-1]                    # flipped-kernel conv
        x = lax.conv_general_dilated(x, w_flip, (1, 1), ((2, 2), (2, 2)),
                                     lhs_dilation=(2, 2),
                                     dimension_numbers=('NHWC', 'HWIO', 'NHWC'),
                                     precision=lax.Precision.HIGHEST)
        x = x * dp['s'] + dp['b']
    return jnp.transpose(x, (0, 3, 1, 2))


# ----------------------------------------------------------------------------
if __name__ == "__main__":
    key = jax.random.PRNGKey(0)
    kx, kp = jax.random.split(key)

    # Decoder(i_dim=32, h_dim=32, o_dim=8, nb_r_layers=2, r_dim=16,
    #         dec_type='quarter')   (r_dim unused in the rezero path)
    N, i_dim, h_dim, o_dim, nb_r_layers = 4, 32, 32, 8, 2
    H = W = 8

    x = jax.random.normal(kx, (N, i_dim, H, W), jnp.float32)   # NCHW like PyTorch
    params = init_params(kp, i_dim, h_dim, o_dim, nb_r_layers)

    out = jax.jit(decoder_forward)(params, x)
    out = jax.block_until_ready(out)
    assert out.shape == (N, o_dim, 4 * H, 4 * W), out.shape

    ref = ref_decoder(params, x)
    # Kernel uses bf16 MXU operands (f32 accumulation) vs. an f32 reference.
    np.testing.assert_allclose(np.asarray(out), np.asarray(ref),
                               atol=1e-2, rtol=1e-2)
    print("KERNEL_OK")
</pallas_src>

<mosaic_0001>
module attributes {stable_mosaic.version = 11 : i64} {
  func.func @_decoder_kernel(%arg0: i32, %arg1: memref<2x8x8x32xf32, #tpu.memory_space<vmem>>, %arg2: memref<2x2x288x32xbf16, #tpu.memory_space<vmem>>, %arg3: memref<2x2x1x32xf32, #tpu.memory_space<vmem>>, %arg4: memref<2x1x32xf32, #tpu.memory_space<vmem>>, %arg5: memref<288x128xbf16, #tpu.memory_space<vmem>>, %arg6: memref<1x128xf32, #tpu.memory_space<vmem>>, %arg7: memref<1152x128xbf16, #tpu.memory_space<vmem>>, %arg8: memref<1x128xf32, #tpu.memory_space<vmem>>, %arg9: memref<2x8x8x128xf32, #tpu.memory_space<vmem>>, %arg10: memref<2x10x10x32xbf16, #tpu.memory_space<vmem>>, %arg11: memref<2x10x10x128xbf16, #tpu.memory_space<vmem>>) attributes {dimension_semantics = [#tpu.dimension_semantics<parallel>], iteration_bounds = array<i64: 2>, scalar_prefetch = 0 : i64, scratch_operands = 2 : i64, tpu.core_type = #tpu.core_type<tc>, window_params = [{transform_indices = @transform_0, window_bounds = array<i64: 2, 8, 8, 32>}, {pipeline_mode = #tpu.pipeline_mode<synchronous>, transform_indices = @transform_1, window_bounds = array<i64: 2, 2, 288, 32>}, {pipeline_mode = #tpu.pipeline_mode<synchronous>, transform_indices = @transform_2, window_bounds = array<i64: 2, 2, 1, 32>}, {pipeline_mode = #tpu.pipeline_mode<synchronous>, transform_indices = @transform_3, window_bounds = array<i64: 2, 1, 32>}, {pipeline_mode = #tpu.pipeline_mode<synchronous>, transform_indices = @transform_4, window_bounds = array<i64: 288, 128>}, {pipeline_mode = #tpu.pipeline_mode<synchronous>, transform_indices = @transform_5, window_bounds = array<i64: 1, 128>}, {pipeline_mode = #tpu.pipeline_mode<synchronous>, transform_indices = @transform_6, window_bounds = array<i64: 1152, 128>}, {pipeline_mode = #tpu.pipeline_mode<synchronous>, transform_indices = @transform_7, window_bounds = array<i64: 1, 128>}, {transform_indices = @transform_8, window_bounds = array<i64: 2, 8, 8, 128>}]} {
    %cst = arith.constant 0.000000e+00 : bf16
    %0 = vector.broadcast %cst : bf16 to vector<2x1x10x32xbf16>
    %c0 = arith.constant 0 : index
    %c0_0 = arith.constant 0 : index
    %c0_1 = arith.constant 0 : index
    %c0_2 = arith.constant 0 : index
    %1 = vector.load %arg10[%c0, %c0_0, %c0_1, %c0_2] : memref<2x10x10x32xbf16, #tpu.memory_space<vmem>>, vector<2x1x10x32xbf16>
    tpu.vector_store %arg10[%c0, %c0_0, %c0_1, %c0_2], %0 {strides = array<i32>} : memref<2x10x10x32xbf16, #tpu.memory_space<vmem>>, vector<2x1x10x32xbf16>,
    %cst_3 = arith.constant 0.000000e+00 : bf16
    %2 = vector.broadcast %cst_3 : bf16 to vector<2x1x10x32xbf16>
    %c0_4 = arith.constant 0 : index
    %c9 = arith.constant 9 : index
    %c0_5 = arith.constant 0 : index
    %c0_6 = arith.constant 0 : index
    %3 = vector.load %arg10[%c0_4, %c9, %c0_5, %c0_6] : memref<2x10x10x32xbf16, #tpu.memory_space<vmem>>, vector<2x1x10x32xbf16>
    tpu.vector_store %arg10[%c0_4, %c9, %c0_5, %c0_6], %2 {strides = array<i32>} : memref<2x10x10x32xbf16, #tpu.memory_space<vmem>>, vector<2x1x10x32xbf16>,
    %cst_7 = arith.constant 0.000000e+00 : bf16
    %4 = vector.broadcast %cst_7 : bf16 to vector<2x8x1x32xbf16>
    %c0_8 = arith.constant 0 : index
    %c1 = arith.constant 1 : index
    %c0_9 = arith.constant 0 : index
    %c0_10 = arith.constant 0 : index
    %5 = vector.load %arg10[%c0_8, %c1, %c0_9, %c0_10] : memref<2x10x10x32xbf16, #tpu.memory_space<vmem>>, vector<2x8x1x32xbf16>
    tpu.vector_store %arg10[%c0_8, %c1, %c0_9, %c0_10], %4 {strides = array<i32>} : memref<2x10x10x32xbf16, #tpu.memory_space<vmem>>, vector<2x8x1x32xbf16>,
    %cst_11 = arith.constant 0.000000e+00 : bf16
    %6 = vector.broadcast %cst_11 : bf16 to vector<2x8x1x32xbf16>
    %c0_12 = arith.constant 0 : index
    %c1_13 = arith.constant 1 : index
    %c9_14 = arith.constant 9 : index
    %c0_15 = arith.constant 0 : index
    %7 = vector.load %arg10[%c0_12, %c1_13, %c9_14, %c0_15] : memref<2x10x10x32xbf16, #tpu.memory_space<vmem>>, vector<2x8x1x32xbf16>
    tpu.vector_store %arg10[%c0_12, %c1_13, %c9_14, %c0_15], %6 {strides = array<i32>} : memref<2x10x10x32xbf16, #tpu.memory_space<vmem>>, vector<2x8x1x32xbf16>,
    %cst_16 = arith.constant 0.000000e+00 : bf16
    %8 = vector.broadcast %cst_16 : bf16 to vector<2x1x10x128xbf16>
    %c0_17 = arith.constant 0 : index
    %c0_18 = arith.constant 0 : index
    %c0_19 = arith.constant 0 : index
    %c0_20 = arith.constant 0 : index
    %9 = vector.load %arg11[%c0_17, %c0_18, %c0_19, %c0_20] : memref<2x10x10x128xbf16, #tpu.memory_space<vmem>>, vector<2x1x10x128xbf16>
    tpu.vector_store %arg11[%c0_17, %c0_18, %c0_19, %c0_20], %8 {strides = array<i32>} : memref<2x10x10x128xbf16, #tpu.memory_space<vmem>>, vector<2x1x10x128xbf16>,
    %cst_21 = arith.constant 0.000000e+00 : bf16
    %10 = vector.broadcast %cst_21 : bf16 to vector<2x1x10x128xbf16>
    %c0_22 = arith.constant 0 : index
    %c9_23 = arith.constant 9 : index
    %c0_24 = arith.constant 0 : index
    %c0_25 = arith.constant 0 : index
    %11 = vector.load %arg11[%c0_22, %c9_23, %c0_24, %c0_25] : memref<2x10x10x128xbf16, #tpu.memory_space<vmem>>, vector<2x1x10x128xbf16>
    tpu.vector_store %arg11[%c0_22, %c9_23, %c0_24, %c0_25], %10 {strides = array<i32>} : memref<2x10x10x128xbf16, #tpu.memory_space<vmem>>, vector<2x1x10x128xbf16>,
    %cst_26 = arith.constant 0.000000e+00 : bf16
    %12 = vector.broadcast %cst_26 : bf16 to vector<2x8x1x128xbf16>
    %c0_27 = arith.constant 0 : index
    %c1_28 = arith.constant 1 : index
    %c0_29 = arith.constant 0 : index
    %c0_30 = arith.constant 0 : index
    %13 = vector.load %arg11[%c0_27, %c1_28, %c0_29, %c0_30] : memref<2x10x10x128xbf16, #tpu.memory_space<vmem>>, vector<2x8x1x128xbf16>
    tpu.vector_store %arg11[%c0_27, %c1_28, %c0_29, %c0_30], %12 {strides = array<i32>} : memref<2x10x10x128xbf16, #tpu.memory_space<vmem>>, vector<2x8x1x128xbf16>,
    %cst_31 = arith.constant 0.000000e+00 : bf16
    %14 = vector.broadcast %cst_31 : bf16 to vector<2x8x1x128xbf16>
    %c0_32 = arith.constant 0 : index
    %c1_33 = arith.constant 1 : index
    %c9_34 = arith.constant 9 : index
    %c0_35 = arith.constant 0 : index
    %15 = vector.load %arg11[%c0_32, %c1_33, %c9_34, %c0_35] : memref<2x10x10x128xbf16, #tpu.memory_space<vmem>>, vector<2x8x1x128xbf16>
    tpu.vector_store %arg11[%c0_32, %c1_33, %c9_34, %c0_35], %14 {strides = array<i32>} : memref<2x10x10x128xbf16, #tpu.memory_space<vmem>>, vector<2x8x1x128xbf16>,
    %c0_36 = arith.constant 0 : index
    %c0_37 = arith.constant 0 : index
    %c0_38 = arith.constant 0 : index
    %c0_39 = arith.constant 0 : index
    %16 = vector.load %arg1[%c0_36, %c0_37, %c0_38, %c0_39] : memref<2x8x8x32xf32, #tpu.memory_space<vmem>>, vector<2x8x8x32xf32>
    %17 = arith.truncf %16 : vector<2x8x8x32xf32> to vector<2x8x8x32xbf16>
    %c0_40 = arith.constant 0 : index
    %c1_41 = arith.constant 1 : index
    %c1_42 = arith.constant 1 : index
    %c0_43 = arith.constant 0 : index
    %18 = vector.load %arg10[%c0_40, %c1_41, %c1_42, %c0_43] : memref<2x10x10x32xbf16, #tpu.memory_space<vmem>>, vector<2x8x8x32xbf16>
    tpu.vector_store %arg10[%c0_40, %c1_41, %c1_42, %c0_43], %17 {strides = array<i32>} : memref<2x10x10x32xbf16, #tpu.memory_space<vmem>>, vector<2x8x8x32xbf16>,
    %c0_44 = arith.constant 0 : index
    %c0_45 = arith.constant 0 : index
    %c0_46 = arith.constant 0 : index
    %c0_47 = arith.constant 0 : index
    %19 = vector.load %arg10[%c0_44, %c0_45, %c0_46, %c0_47] : memref<2x10x10x32xbf16, #tpu.memory_space<vmem>>, vector<2x10x10x32xbf16>
    %20 = vector.extract_strided_slice %19 {offsets = [0, 0, 0, 0], sizes = [2, 8, 8, 32], strides = [1, 1, 1, 1]} : vector<2x10x10x32xbf16> to vector<2x8x8x32xbf16>
    %21 = vector.shape_cast %20 : vector<2x8x8x32xbf16> to vector<128x32xbf16>
    %22 = vector.extract_strided_slice %19 {offsets = [0, 0, 1, 0], sizes = [2, 8, 8, 32], strides = [1, 1, 1, 1]} : vector<2x10x10x32xbf16> to vector<2x8x8x32xbf16>
    %23 = vector.shape_cast %22 : vector<2x8x8x32xbf16> to vector<128x32xbf16>
    %24 = vector.extract_strided_slice %19 {offsets = [0, 0, 2, 0], sizes = [2, 8, 8, 32], strides = [1, 1, 1, 1]} : vector<2x10x10x32xbf16> to vector<2x8x8x32xbf16>
    %25 = vector.shape_cast %24 : vector<2x8x8x32xbf16> to vector<128x32xbf16>
    %26 = vector.extract_strided_slice %19 {offsets = [0, 1, 0, 0], sizes = [2, 8, 8, 32], strides = [1, 1, 1, 1]} : vector<2x10x10x32xbf16> to vector<2x8x8x32xbf16>
    %27 = vector.shape_cast %26 : vector<2x8x8x32xbf16> to vector<128x32xbf16>
    %28 = vector.extract_strided_slice %19 {offsets = [0, 1, 1, 0], sizes = [2, 8, 8, 32], strides = [1, 1, 1, 1]} : vector<2x10x10x32xbf16> to vector<2x8x8x32xbf16>
    %29 = vector.shape_cast %28 : vector<2x8x8x32xbf16> to vector<128x32xbf16>
    %30 = vector.extract_strided_slice %19 {offsets = [0, 1, 2, 0], sizes = [2, 8, 8, 32], strides = [1, 1, 1, 1]} : vector<2x10x10x32xbf16> to vector<2x8x8x32xbf16>
    %31 = vector.shape_cast %30 : vector<2x8x8x32xbf16> to vector<128x32xbf16>
    %32 = vector.extract_strided_slice %19 {offsets = [0, 2, 0, 0], sizes = [2, 8, 8, 32], strides = [1, 1, 1, 1]} : vector<2x10x10x32xbf16> to vector<2x8x8x32xbf16>
    %33 = vector.shape_cast %32 : vector<2x8x8x32xbf16> to vector<128x32xbf16>
    %34 = vector.extract_strided_slice %19 {offsets = [0, 2, 1, 0], sizes = [2, 8, 8, 32], strides = [1, 1, 1, 1]} : vector<2x10x10x32xbf16> to vector<2x8x8x32xbf16>
    %35 = vector.shape_cast %34 : vector<2x8x8x32xbf16> to vector<128x32xbf16>
    %36 = vector.extract_strided_slice %19 {offsets = [0, 2, 2, 0], sizes = [2, 8, 8, 32], strides = [1, 1, 1, 1]} : vector<2x10x10x32xbf16> to vector<2x8x8x32xbf16>
    %37 = vector.shape_cast %36 : vector<2x8x8x32xbf16> to vector<128x32xbf16>
    %38 = tpu.concatenate %21, %23, %25, %27, %29, %31, %33, %35, %37 in 1 : vector<128x32xbf16>, vector<128x32xbf16>, vector<128x32xbf16>, vector<128x32xbf16>, vector<128x32xbf16>, vector<128x32xbf16>, vector<128x32xbf16>, vector<128x32xbf16>, vector<128x32xbf16> -> vector<128x288xbf16>
    %c0_48 = arith.constant 0 : index
    %c0_49 = arith.constant 0 : index
    %c0_50 = arith.constant 0 : index
    %c0_51 = arith.constant 0 : index
    %39 = vector.load %arg2[%c0_48, %c0_49, %c0_50, %c0_51] : memref<2x2x288x32xbf16, #tpu.memory_space<vmem>>, vector<1x1x288x32xbf16>
    %40 = vector.shape_cast %39 : vector<1x1x288x32xbf16> to vector<288x32xbf16>
    %cst_52 = arith.constant dense<0.000000e+00> : vector<128x32xf32>
    %41 = tpu.matmul %38, %40, %cst_52 {dimension_numbers = #tpu.dot_dimension_numbers<[1], [0], [0], [1], [0, 0, 1, 1], [], []>} : vector<128x288xbf16>, vector<288x32xbf16>, vector<128x32xf32> -> vector<128x32xf32>
    %c0_53 = arith.constant 0 : index
    %c0_54 = arith.constant 0 : index
    %c0_55 = arith.constant 0 : index
    %c0_56 = arith.constant 0 : index
    %42 = vector.load %arg3[%c0_53, %c0_54, %c0_55, %c0_56] : memref<2x2x1x32xf32, #tpu.memory_space<vmem>>, vector<1x1x1x32xf32>
    %43 = vector.shape_cast %42 : vector<1x1x1x32xf32> to vector<1x32xf32>
    %44 = vector.broadcast %43 : vector<1x32xf32> to vector<128x32xf32>
    %45 = arith.addf %41, %44 : vector<128x32xf32>
    %cst_57 = arith.constant 0.000000e+00 : f32
    %46 = vector.broadcast %cst_57 : f32 to vector<128x32xf32>
    %47 = arith.cmpf ogt, %45, %46 : vector<128x32xf32>
    %cst_58 = arith.constant 0.000000e+00 : f32
    %48 = vector.broadcast %cst_58 : f32 to vector<128x32xf32>
    %49 = arith.minimumf %45, %48 : vector<128x32xf32>
    %50 = math.exp %49 : vector<128x32xf32>
    %cst_59 = arith.constant 1.000000e+00 : f32
    %51 = vector.broadcast %cst_59 : f32 to vector<128x32xf32>
    %52 = arith.subf %50, %51 : vector<128x32xf32>
    %53 = arith.select %47, %45, %52 : vector<128x32xi1>, vector<128x32xf32>
    %54 = vector.shape_cast %53 : vector<128x32xf32> to vector<2x8x8x32xf32>
    %55 = arith.truncf %54 : vector<2x8x8x32xf32> to vector<2x8x8x32xbf16>
    %c0_60 = arith.constant 0 : index
    %c1_61 = arith.constant 1 : index
    %c1_62 = arith.constant 1 : index
    %c0_63 = arith.constant 0 : index
    %56 = vector.load %arg10[%c0_60, %c1_61, %c1_62, %c0_63] : memref<2x10x10x32xbf16, #tpu.memory_space<vmem>>, vector<2x8x8x32xbf16>
    tpu.vector_store %arg10[%c0_60, %c1_61, %c1_62, %c0_63], %55 {strides = array<i32>} : memref<2x10x10x32xbf16, #tpu.memory_space<vmem>>, vector<2x8x8x32xbf16>,
    %c0_64 = arith.constant 0 : index
    %c0_65 = arith.constant 0 : index
    %c0_66 = arith.constant 0 : index
    %c0_67 = arith.constant 0 : index
    %57 = vector.load %arg10[%c0_64, %c0_65, %c0_66, %c0_67] : memref<2x10x10x32xbf16, #tpu.memory_space<vmem>>, vector<2x10x10x32xbf16>
    %58 = vector.extract_strided_slice %57 {offsets = [0, 0, 0, 0], sizes = [2, 8, 8, 32], strides = [1, 1, 1, 1]} : vector<2x10x10x32xbf16> to vector<2x8x8x32xbf16>
    %59 = vector.shape_cast %58 : vector<2x8x8x32xbf16> to vector<128x32xbf16>
    %60 = vector.extract_strided_slice %57 {offsets = [0, 0, 1, 0], sizes = [2, 8, 8, 32], strides = [1, 1, 1, 1]} : vector<2x10x10x32xbf16> to vector<2x8x8x32xbf16>
    %61 = vector.shape_cast %60 : vector<2x8x8x32xbf16> to vector<128x32xbf16>
    %62 = vector.extract_strided_slice %57 {offsets = [0, 0, 2, 0], sizes = [2, 8, 8, 32], strides = [1, 1, 1, 1]} : vector<2x10x10x32xbf16> to vector<2x8x8x32xbf16>
    %63 = vector.shape_cast %62 : vector<2x8x8x32xbf16> to vector<128x32xbf16>
    %64 = vector.extract_strided_slice %57 {offsets = [0, 1, 0, 0], sizes = [2, 8, 8, 32], strides = [1, 1, 1, 1]} : vector<2x10x10x32xbf16> to vector<2x8x8x32xbf16>
    %65 = vector.shape_cast %64 : vector<2x8x8x32xbf16> to vector<128x32xbf16>
    %66 = vector.extract_strided_slice %57 {offsets = [0, 1, 1, 0], sizes = [2, 8, 8, 32], strides = [1, 1, 1, 1]} : vector<2x10x10x32xbf16> to vector<2x8x8x32xbf16>
    %67 = vector.shape_cast %66 : vector<2x8x8x32xbf16> to vector<128x32xbf16>
    %68 = vector.extract_strided_slice %57 {offsets = [0, 1, 2, 0], sizes = [2, 8, 8, 32], strides = [1, 1, 1, 1]} : vector<2x10x10x32xbf16> to vector<2x8x8x32xbf16>
    %69 = vector.shape_cast %68 : vector<2x8x8x32xbf16> to vector<128x32xbf16>
    %70 = vector.extract_strided_slice %57 {offsets = [0, 2, 0, 0], sizes = [2, 8, 8, 32], strides = [1, 1, 1, 1]} : vector<2x10x10x32xbf16> to vector<2x8x8x32xbf16>
    %71 = vector.shape_cast %70 : vector<2x8x8x32xbf16> to vector<128x32xbf16>
    %72 = vector.extract_strided_slice %57 {offsets = [0, 2, 1, 0], sizes = [2, 8, 8, 32], strides = [1, 1, 1, 1]} : vector<2x10x10x32xbf16> to vector<2x8x8x32xbf16>
    %73 = vector.shape_cast %72 : vector<2x8x8x32xbf16> to vector<128x32xbf16>
    %74 = vector.extract_strided_slice %57 {offsets = [0, 2, 2, 0], sizes = [2, 8, 8, 32], strides = [1, 1, 1, 1]} : vector<2x10x10x32xbf16> to vector<2x8x8x32xbf16>
    %75 = vector.shape_cast %74 : vector<2x8x8x32xbf16> to vector<128x32xbf16>
    %76 = tpu.concatenate %59, %61, %63, %65, %67, %69, %71, %73, %75 in 1 : vector<128x32xbf16>, vector<128x32xbf16>, vector<128x32xbf16>, vector<128x32xbf16>, vector<128x32xbf16>, vector<128x32xbf16>, vector<128x32xbf16>, vector<128x32xbf16>, vector<128x32xbf16> -> vector<128x288xbf16>
    %c0_68 = arith.constant 0 : index
    %c1_69 = arith.constant 1 : index
    %c0_70 = arith.constant 0 : index
    %c0_71 = arith.constant 0 : index
    %77 = vector.load %arg2[%c0_68, %c1_69, %c0_70, %c0_71] : memref<2x2x288x32xbf16, #tpu.memory_space<vmem>>, vector<1x1x288x32xbf16>
    %78 = vector.shape_cast %77 : vector<1x1x288x32xbf16> to vector<288x32xbf16>
    %cst_72 = arith.constant dense<0.000000e+00> : vector<128x32xf32>
    %79 = tpu.matmul %76, %78, %cst_72 {dimension_numbers = #tpu.dot_dimension_numbers<[1], [0], [0], [1], [0, 0, 1, 1], [], []>} : vector<128x288xbf16>, vector<288x32xbf16>, vector<128x32xf32> -> vector<128x32xf32>
    %c0_73 = arith.constant 0 : index
    %c1_74 = arith.constant 1 : index
    %c0_75 = arith.constant 0 : index
    %c0_76 = arith.constant 0 : index
    %80 = vector.load %arg3[%c0_73, %c1_74, %c0_75, %c0_76] : memref<2x2x1x32xf32, #tpu.memory_space<vmem>>, vector<1x1x1x32xf32>
    %81 = vector.shape_cast %80 : vector<1x1x1x32xf32> to vector<1x32xf32>
    %82 = vector.broadcast %81 : vector<1x32xf32> to vector<128x32xf32>
    %83 = arith.addf %79, %82 : vector<128x32xf32>
    %cst_77 = arith.constant 0.000000e+00 : f32
    %84 = vector.broadcast %cst_77 : f32 to vector<128x32xf32>
    %85 = arith.cmpf ogt, %83, %84 : vector<128x32xf32>
    %cst_78 = arith.constant 0.000000e+00 : f32
    %86 = vector.broadcast %cst_78 : f32 to vector<128x32xf32>
    %87 = arith.minimumf %83, %86 : vector<128x32xf32>
    %88 = math.exp %87 : vector<128x32xf32>
    %cst_79 = arith.constant 1.000000e+00 : f32
    %89 = vector.broadcast %cst_79 : f32 to vector<128x32xf32>
    %90 = arith.subf %88, %89 : vector<128x32xf32>
    %91 = arith.select %85, %83, %90 : vector<128x32xi1>, vector<128x32xf32>
    %92 = vector.shape_cast %91 : vector<128x32xf32> to vector<2x8x8x32xf32>
    %c0_80 = arith.constant 0 : index
    %c0_81 = arith.constant 0 : index
    %c0_82 = arith.constant 0 : index
    %93 = vector.load %arg4[%c0_80, %c0_81, %c0_82] : memref<2x1x32xf32, #tpu.memory_space<vmem>>, vector<1x1x32xf32>
    %94 = vector.shape_cast %93 : vector<1x1x32xf32> to vector<1x32xf32>
    %95 = vector.shape_cast %94 : vector<1x32xf32> to vector<1x1x1x32xf32>
    %96 = vector.broadcast %95 : vector<1x1x1x32xf32> to vector<2x8x8x32xf32>
    %97 = arith.mulf %96, %92 : vector<2x8x8x32xf32>
    %98 = arith.addf %97, %16 : vector<2x8x8x32xf32>
    %99 = arith.truncf %98 : vector<2x8x8x32xf32> to vector<2x8x8x32xbf16>
    %c0_83 = arith.constant 0 : index
    %c1_84 = arith.constant 1 : index
    %c1_85 = arith.constant 1 : index
    %c0_86 = arith.constant 0 : index
    %100 = vector.load %arg10[%c0_83, %c1_84, %c1_85, %c0_86] : memref<2x10x10x32xbf16, #tpu.memory_space<vmem>>, vector<2x8x8x32xbf16>
    tpu.vector_store %arg10[%c0_83, %c1_84, %c1_85, %c0_86], %99 {strides = array<i32>} : memref<2x10x10x32xbf16, #tpu.memory_space<vmem>>, vector<2x8x8x32xbf16>,
    %c0_87 = arith.constant 0 : index
    %c0_88 = arith.constant 0 : index
    %c0_89 = arith.constant 0 : index
    %c0_90 = arith.constant 0 : index
    %101 = vector.load %arg10[%c0_87, %c0_88, %c0_89, %c0_90] : memref<2x10x10x32xbf16, #tpu.memory_space<vmem>>, vector<2x10x10x32xbf16>
    %102 = vector.extract_strided_slice %101 {offsets = [0, 0, 0, 0], sizes = [2, 8, 8, 32], strides = [1, 1, 1, 1]} : vector<2x10x10x32xbf16> to vector<2x8x8x32xbf16>
    %103 = vector.shape_cast %102 : vector<2x8x8x32xbf16> to vector<128x32xbf16>
    %104 = vector.extract_strided_slice %101 {offsets = [0, 0, 1, 0], sizes = [2, 8, 8, 32], strides = [1, 1, 1, 1]} : vector<2x10x10x32xbf16> to vector<2x8x8x32xbf16>
    %105 = vector.shape_cast %104 : vector<2x8x8x32xbf16> to vector<128x32xbf16>
    %106 = vector.extract_strided_slice %101 {offsets = [0, 0, 2, 0], sizes = [2, 8, 8, 32], strides = [1, 1, 1, 1]} : vector<2x10x10x32xbf16> to vector<2x8x8x32xbf16>
    %107 = vector.shape_cast %106 : vector<2x8x8x32xbf16> to vector<128x32xbf16>
    %108 = vector.extract_strided_slice %101 {offsets = [0, 1, 0, 0], sizes = [2, 8, 8, 32], strides = [1, 1, 1, 1]} : vector<2x10x10x32xbf16> to vector<2x8x8x32xbf16>
    %109 = vector.shape_cast %108 : vector<2x8x8x32xbf16> to vector<128x32xbf16>
    %110 = vector.extract_strided_slice %101 {offsets = [0, 1, 1, 0], sizes = [2, 8, 8, 32], strides = [1, 1, 1, 1]} : vector<2x10x10x32xbf16> to vector<2x8x8x32xbf16>
    %111 = vector.shape_cast %110 : vector<2x8x8x32xbf16> to vector<128x32xbf16>
    %112 = vector.extract_strided_slice %101 {offsets = [0, 1, 2, 0], sizes = [2, 8, 8, 32], strides = [1, 1, 1, 1]} : vector<2x10x10x32xbf16> to vector<2x8x8x32xbf16>
    %113 = vector.shape_cast %112 : vector<2x8x8x32xbf16> to vector<128x32xbf16>
    %114 = vector.extract_strided_slice %101 {offsets = [0, 2, 0, 0], sizes = [2, 8, 8, 32], strides = [1, 1, 1, 1]} : vector<2x10x10x32xbf16> to vector<2x8x8x32xbf16>
    %115 = vector.shape_cast %114 : vector<2x8x8x32xbf16> to vector<128x32xbf16>
    %116 = vector.extract_strided_slice %101 {offsets = [0, 2, 1, 0], sizes = [2, 8, 8, 32], strides = [1, 1, 1, 1]} : vector<2x10x10x32xbf16> to vector<2x8x8x32xbf16>
    %117 = vector.shape_cast %116 : vector<2x8x8x32xbf16> to vector<128x32xbf16>
    %118 = vector.extract_strided_slice %101 {offsets = [0, 2, 2, 0], sizes = [2, 8, 8, 32], strides = [1, 1, 1, 1]} : vector<2x10x10x32xbf16> to vector<2x8x8x32xbf16>
    %119 = vector.shape_cast %118 : vector<2x8x8x32xbf16> to vector<128x32xbf16>
    %120 = tpu.concatenate %103, %105, %107, %109, %111, %113, %115, %117, %119 in 1 : vector<128x32xbf16>, vector<128x32xbf16>, vector<128x32xbf16>, vector<128x32xbf16>, vector<128x32xbf16>, vector<128x32xbf16>, vector<128x32xbf16>, vector<128x32xbf16>, vector<128x32xbf16> -> vector<128x288xbf16>
    %c1_91 = arith.constant 1 : index
    %c0_92 = arith.constant 0 : index
    %c0_93 = arith.constant 0 : index
    %c0_94 = arith.constant 0 : index
    %121 = vector.load %arg2[%c1_91, %c0_92, %c0_93, %c0_94] : memref<2x2x288x32xbf16, #tpu.memory_space<vmem>>, vector<1x1x288x32xbf16>
    %122 = vector.shape_cast %121 : vector<1x1x288x32xbf16> to vector<288x32xbf16>
    %cst_95 = arith.constant dense<0.000000e+00> : vector<128x32xf32>
    %123 = tpu.matmul %120, %122, %cst_95 {dimension_numbers = #tpu.dot_dimension_numbers<[1], [0], [0], [1], [0, 0, 1, 1], [], []>} : vector<128x288xbf16>, vector<288x32xbf16>, vector<128x32xf32> -> vector<128x32xf32>
    %c1_96 = arith.constant 1 : index
    %c0_97 = arith.constant 0 : index
    %c0_98 = arith.constant 0 : index
    %c0_99 = arith.constant 0 : index
    %124 = vector.load %arg3[%c1_96, %c0_97, %c0_98, %c0_99] : memref<2x2x1x32xf32, #tpu.memory_space<vmem>>, vector<1x1x1x32xf32>
    %125 = vector.shape_cast %124 : vector<1x1x1x32xf32> to vector<1x32xf32>
    %126 = vector.broadcast %125 : vector<1x32xf32> to vector<128x32xf32>
    %127 = arith.addf %123, %126 : vector<128x32xf32>
    %cst_100 = arith.constant 0.000000e+00 : f32
    %128 = vector.broadcast %cst_100 : f32 to vector<128x32xf32>
    %129 = arith.cmpf ogt, %127, %128 : vector<128x32xf32>
    %cst_101 = arith.constant 0.000000e+00 : f32
    %130 = vector.broadcast %cst_101 : f32 to vector<128x32xf32>
    %131 = arith.minimumf %127, %130 : vector<128x32xf32>
    %132 = math.exp %131 : vector<128x32xf32>
    %cst_102 = arith.constant 1.000000e+00 : f32
    %133 = vector.broadcast %cst_102 : f32 to vector<128x32xf32>
    %134 = arith.subf %132, %133 : vector<128x32xf32>
    %135 = arith.select %129, %127, %134 : vector<128x32xi1>, vector<128x32xf32>
    %136 = vector.shape_cast %135 : vector<128x32xf32> to vector<2x8x8x32xf32>
    %137 = arith.truncf %136 : vector<2x8x8x32xf32> to vector<2x8x8x32xbf16>
    %c0_103 = arith.constant 0 : index
    %c1_104 = arith.constant 1 : index
    %c1_105 = arith.constant 1 : index
    %c0_106 = arith.constant 0 : index
    %138 = vector.load %arg10[%c0_103, %c1_104, %c1_105, %c0_106] : memref<2x10x10x32xbf16, #tpu.memory_space<vmem>>, vector<2x8x8x32xbf16>
    tpu.vector_store %arg10[%c0_103, %c1_104, %c1_105, %c0_106], %137 {strides = array<i32>} : memref<2x10x10x32xbf16, #tpu.memory_space<vmem>>, vector<2x8x8x32xbf16>,
    %c0_107 = arith.constant 0 : index
    %c0_108 = arith.constant 0 : index
    %c0_109 = arith.constant 0 : index
    %c0_110 = arith.constant 0 : index
    %139 = vector.load %arg10[%c0_107, %c0_108, %c0_109, %c0_110] : memref<2x10x10x32xbf16, #tpu.memory_space<vmem>>, vector<2x10x10x32xbf16>
    %140 = vector.extract_strided_slice %139 {offsets = [0, 0, 0, 0], sizes = [2, 8, 8, 32], strides = [1, 1, 1, 1]} : vector<2x10x10x32xbf16> to vector<2x8x8x32xbf16>
    %141 = vector.shape_cast %140 : vector<2x8x8x32xbf16> to vector<128x32xbf16>
    %142 = vector.extract_strided_slice %139 {offsets = [0, 0, 1, 0], sizes = [2, 8, 8, 32], strides = [1, 1, 1, 1]} : vector<2x10x10x32xbf16> to vector<2x8x8x32xbf16>
    %143 = vector.shape_cast %142 : vector<2x8x8x32xbf16> to vector<128x32xbf16>
    %144 = vector.extract_strided_slice %139 {offsets = [0, 0, 2, 0], sizes = [2, 8, 8, 32], strides = [1, 1, 1, 1]} : vector<2x10x10x32xbf16> to vector<2x8x8x32xbf16>
    %145 = vector.shape_cast %144 : vector<2x8x8x32xbf16> to vector<128x32xbf16>
    %146 = vector.extract_strided_slice %139 {offsets = [0, 1, 0, 0], sizes = [2, 8, 8, 32], strides = [1, 1, 1, 1]} : vector<2x10x10x32xbf16> to vector<2x8x8x32xbf16>
    %147 = vector.shape_cast %146 : vector<2x8x8x32xbf16> to vector<128x32xbf16>
    %148 = vector.extract_strided_slice %139 {offsets = [0, 1, 1, 0], sizes = [2, 8, 8, 32], strides = [1, 1, 1, 1]} : vector<2x10x10x32xbf16> to vector<2x8x8x32xbf16>
    %149 = vector.shape_cast %148 : vector<2x8x8x32xbf16> to vector<128x32xbf16>
    %150 = vector.extract_strided_slice %139 {offsets = [0, 1, 2, 0], sizes = [2, 8, 8, 32], strides = [1, 1, 1, 1]} : vector<2x10x10x32xbf16> to vector<2x8x8x32xbf16>
    %151 = vector.shape_cast %150 : vector<2x8x8x32xbf16> to vector<128x32xbf16>
    %152 = vector.extract_strided_slice %139 {offsets = [0, 2, 0, 0], sizes = [2, 8, 8, 32], strides = [1, 1, 1, 1]} : vector<2x10x10x32xbf16> to vector<2x8x8x32xbf16>
    %153 = vector.shape_cast %152 : vector<2x8x8x32xbf16> to vector<128x32xbf16>
    %154 = vector.extract_strided_slice %139 {offsets = [0, 2, 1, 0], sizes = [2, 8, 8, 32], strides = [1, 1, 1, 1]} : vector<2x10x10x32xbf16> to vector<2x8x8x32xbf16>
    %155 = vector.shape_cast %154 : vector<2x8x8x32xbf16> to vector<128x32xbf16>
    %156 = vector.extract_strided_slice %139 {offsets = [0, 2, 2, 0], sizes = [2, 8, 8, 32], strides = [1, 1, 1, 1]} : vector<2x10x10x32xbf16> to vector<2x8x8x32xbf16>
    %157 = vector.shape_cast %156 : vector<2x8x8x32xbf16> to vector<128x32xbf16>
    %158 = tpu.concatenate %141, %143, %145, %147, %149, %151, %153, %155, %157 in 1 : vector<128x32xbf16>, vector<128x32xbf16>, vector<128x32xbf16>, vector<128x32xbf16>, vector<128x32xbf16>, vector<128x32xbf16>, vector<128x32xbf16>, vector<128x32xbf16>, vector<128x32xbf16> -> vector<128x288xbf16>
    %c1_111 = arith.constant 1 : index
    %c1_112 = arith.constant 1 : index
    %c0_113 = arith.constant 0 : index
    %c0_114 = arith.constant 0 : index
    %159 = vector.load %arg2[%c1_111, %c1_112, %c0_113, %c0_114] : memref<2x2x288x32xbf16, #tpu.memory_space<vmem>>, vector<1x1x288x32xbf16>
    %160 = vector.shape_cast %159 : vector<1x1x288x32xbf16> to vector<288x32xbf16>
    %cst_115 = arith.constant dense<0.000000e+00> : vector<128x32xf32>
    %161 = tpu.matmul %158, %160, %cst_115 {dimension_numbers = #tpu.dot_dimension_numbers<[1], [0], [0], [1], [0, 0, 1, 1], [], []>} : vector<128x288xbf16>, vector<288x32xbf16>, vector<128x32xf32> -> vector<128x32xf32>
    %c1_116 = arith.constant 1 : index
    %c1_117 = arith.constant 1 : index
    %c0_118 = arith.constant 0 : index
    %c0_119 = arith.constant 0 : index
    %162 = vector.load %arg3[%c1_116, %c1_117, %c0_118, %c0_119] : memref<2x2x1x32xf32, #tpu.memory_space<vmem>>, vector<1x1x1x32xf32>
    %163 = vector.shape_cast %162 : vector<1x1x1x32xf32> to vector<1x32xf32>
    %164 = vector.broadcast %163 : vector<1x32xf32> to vector<128x32xf32>
    %165 = arith.addf %161, %164 : vector<128x32xf32>
    %cst_120 = arith.constant 0.000000e+00 : f32
    %166 = vector.broadcast %cst_120 : f32 to vector<128x32xf32>
    %167 = arith.cmpf ogt, %165, %166 : vector<128x32xf32>
    %cst_121 = arith.constant 0.000000e+00 : f32
    %168 = vector.broadcast %cst_121 : f32 to vector<128x32xf32>
    %169 = arith.minimumf %165, %168 : vector<128x32xf32>
    %170 = math.exp %169 : vector<128x32xf32>
    %cst_122 = arith.constant 1.000000e+00 : f32
    %171 = vector.broadcast %cst_122 : f32 to vector<128x32xf32>
    %172 = arith.subf %170, %171 : vector<128x32xf32>
    %173 = arith.select %167, %165, %172 : vector<128x32xi1>, vector<128x32xf32>
    %174 = vector.shape_cast %173 : vector<128x32xf32> to vector<2x8x8x32xf32>
    %c1_123 = arith.constant 1 : index
    %c0_124 = arith.constant 0 : index
    %c0_125 = arith.constant 0 : index
    %175 = vector.load %arg4[%c1_123, %c0_124, %c0_125] : memref<2x1x32xf32, #tpu.memory_space<vmem>>, vector<1x1x32xf32>
    %176 = vector.shape_cast %175 : vector<1x1x32xf32> to vector<1x32xf32>
    %177 = vector.shape_cast %176 : vector<1x32xf32> to vector<1x1x1x32xf32>
    %178 = vector.broadcast %177 : vector<1x1x1x32xf32> to vector<2x8x8x32xf32>
    %179 = arith.mulf %178, %174 : vector<2x8x8x32xf32>
    %180 = arith.addf %179, %98 : vector<2x8x8x32xf32>
    %cst_126 = arith.constant 0.000000e+00 : f32
    %181 = vector.broadcast %cst_126 : f32 to vector<2x8x8x32xf32>
    %182 = arith.maximumf %180, %181 : vector<2x8x8x32xf32>
    %183 = arith.truncf %182 : vector<2x8x8x32xf32> to vector<2x8x8x32xbf16>
    %c0_127 = arith.constant 0 : index
    %c1_128 = arith.constant 1 : index
    %c1_129 = arith.constant 1 : index
    %c0_130 = arith.constant 0 : index
    %184 = vector.load %arg10[%c0_127, %c1_128, %c1_129, %c0_130] : memref<2x10x10x32xbf16, #tpu.memory_space<vmem>>, vector<2x8x8x32xbf16>
    tpu.vector_store %arg10[%c0_127, %c1_128, %c1_129, %c0_130], %183 {strides = array<i32>} : memref<2x10x10x32xbf16, #tpu.memory_space<vmem>>, vector<2x8x8x32xbf16>,
    %c0_131 = arith.constant 0 : index
    %c0_132 = arith.constant 0 : index
    %c0_133 = arith.constant 0 : index
    %c0_134 = arith.constant 0 : index
    %185 = vector.load %arg10[%c0_131, %c0_132, %c0_133, %c0_134] : memref<2x10x10x32xbf16, #tpu.memory_space<vmem>>, vector<2x10x10x32xbf16>
    %186 = vector.extract_strided_slice %185 {offsets = [0, 0, 0, 0], sizes = [2, 8, 8, 32], strides = [1, 1, 1, 1]} : vector<2x10x10x32xbf16> to vector<2x8x8x32xbf16>
    %187 = vector.shape_cast %186 : vector<2x8x8x32xbf16> to vector<128x32xbf16>
    %188 = vector.extract_strided_slice %185 {offsets = [0, 0, 1, 0], sizes = [2, 8, 8, 32], strides = [1, 1, 1, 1]} : vector<2x10x10x32xbf16> to vector<2x8x8x32xbf16>
    %189 = vector.shape_cast %188 : vector<2x8x8x32xbf16> to vector<128x32xbf16>
    %190 = vector.extract_strided_slice %185 {offsets = [0, 0, 2, 0], sizes = [2, 8, 8, 32], strides = [1, 1, 1, 1]} : vector<2x10x10x32xbf16> to vector<2x8x8x32xbf16>
    %191 = vector.shape_cast %190 : vector<2x8x8x32xbf16> to vector<128x32xbf16>
    %192 = vector.extract_strided_slice %185 {offsets = [0, 1, 0, 0], sizes = [2, 8, 8, 32], strides = [1, 1, 1, 1]} : vector<2x10x10x32xbf16> to vector<2x8x8x32xbf16>
    %193 = vector.shape_cast %192 : vector<2x8x8x32xbf16> to vector<128x32xbf16>
    %194 = vector.extract_strided_slice %185 {offsets = [0, 1, 1, 0], sizes = [2, 8, 8, 32], strides = [1, 1, 1, 1]} : vector<2x10x10x32xbf16> to vector<2x8x8x32xbf16>
    %195 = vector.shape_cast %194 : vector<2x8x8x32xbf16> to vector<128x32xbf16>
    %196 = vector.extract_strided_slice %185 {offsets = [0, 1, 2, 0], sizes = [2, 8, 8, 32], strides = [1, 1, 1, 1]} : vector<2x10x10x32xbf16> to vector<2x8x8x32xbf16>
    %197 = vector.shape_cast %196 : vector<2x8x8x32xbf16> to vector<128x32xbf16>
    %198 = vector.extract_strided_slice %185 {offsets = [0, 2, 0, 0], sizes = [2, 8, 8, 32], strides = [1, 1, 1, 1]} : vector<2x10x10x32xbf16> to vector<2x8x8x32xbf16>
    %199 = vector.shape_cast %198 : vector<2x8x8x32xbf16> to vector<128x32xbf16>
    %200 = vector.extract_strided_slice %185 {offsets = [0, 2, 1, 0], sizes = [2, 8, 8, 32], strides = [1, 1, 1, 1]} : vector<2x10x10x32xbf16> to vector<2x8x8x32xbf16>
    %201 = vector.shape_cast %200 : vector<2x8x8x32xbf16> to vector<128x32xbf16>
    %202 = vector.extract_strided_slice %185 {offsets = [0, 2, 2, 0], sizes = [2, 8, 8, 32], strides = [1, 1, 1, 1]} : vector<2x10x10x32xbf16> to vector<2x8x8x32xbf16>
    %203 = vector.shape_cast %202 : vector<2x8x8x32xbf16> to vector<128x32xbf16>
    %204 = tpu.concatenate %187, %189, %191, %193, %195, %197, %199, %201, %203 in 1 : vector<128x32xbf16>, vector<128x32xbf16>, vector<128x32xbf16>, vector<128x32xbf16>, vector<128x32xbf16>, vector<128x32xbf16>, vector<128x32xbf16>, vector<128x32xbf16>, vector<128x32xbf16> -> vector<128x288xbf16>
    %c0_135 = arith.constant 0 : index
    %c0_136 = arith.constant 0 : index
    %205 = vector.load %arg5[%c0_135, %c0_136] : memref<288x128xbf16, #tpu.memory_space<vmem>>, vector<288x128xbf16>
    %cst_137 = arith.constant dense<0.000000e+00> : vector<128x128xf32>
    %206 = tpu.matmul %204, %205, %cst_137 {dimension_numbers = #tpu.dot_dimension_numbers<[1], [0], [0], [1], [0, 0, 1, 1], [], []>} : vector<128x288xbf16>, vector<288x128xbf16>, vector<128x128xf32> -> vector<128x128xf32>
    %c0_138 = arith.constant 0 : index
    %c0_139 = arith.constant 0 : index
    %207 = vector.load %arg6[%c0_138, %c0_139] : memref<1x128xf32, #tpu.memory_space<vmem>>, vector<1x128xf32>
    %208 = vector.broadcast %207 : vector<1x128xf32> to vector<128x128xf32>
    %209 = arith.addf %206, %208 : vector<128x128xf32>
    %210 = vector.shape_cast %209 : vector<128x128xf32> to vector<2x8x8x128xf32>
    %211 = arith.truncf %210 : vector<2x8x8x128xf32> to vector<2x8x8x128xbf16>
    %c0_140 = arith.constant 0 : index
    %c1_141 = arith.constant 1 : index
    %c1_142 = arith.constant 1 : index
    %c0_143 = arith.constant 0 : index
    %212 = vector.load %arg11[%c0_140, %c1_141, %c1_142, %c0_143] : memref<2x10x10x128xbf16, #tpu.memory_space<vmem>>, vector<2x8x8x128xbf16>
    tpu.vector_store %arg11[%c0_140, %c1_141, %c1_142, %c0_143], %211 {strides = array<i32>} : memref<2x10x10x128xbf16, #tpu.memory_space<vmem>>, vector<2x8x8x128xbf16>,
    %c0_144 = arith.constant 0 : index
    %c0_145 = arith.constant 0 : index
    %c0_146 = arith.constant 0 : index
    %c0_147 = arith.constant 0 : index
    %213 = vector.load %arg11[%c0_144, %c0_145, %c0_146, %c0_147] : memref<2x10x10x128xbf16, #tpu.memory_space<vmem>>, vector<2x10x10x128xbf16>
    %214 = vector.extract_strided_slice %213 {offsets = [0, 0, 0, 0], sizes = [2, 8, 8, 128], strides = [1, 1, 1, 1]} : vector<2x10x10x128xbf16> to vector<2x8x8x128xbf16>
    %215 = vector.shape_cast %214 : vector<2x8x8x128xbf16> to vector<128x128xbf16>
    %216 = vector.extract_strided_slice %213 {offsets = [0, 0, 1, 0], sizes = [2, 8, 8, 128], strides = [1, 1, 1, 1]} : vector<2x10x10x128xbf16> to vector<2x8x8x128xbf16>
    %217 = vector.shape_cast %216 : vector<2x8x8x128xbf16> to vector<128x128xbf16>
    %218 = vector.extract_strided_slice %213 {offsets = [0, 0, 2, 0], sizes = [2, 8, 8, 128], strides = [1, 1, 1, 1]} : vector<2x10x10x128xbf16> to vector<2x8x8x128xbf16>
    %219 = vector.shape_cast %218 : vector<2x8x8x128xbf16> to vector<128x128xbf16>
    %220 = vector.extract_strided_slice %213 {offsets = [0, 1, 0, 0], sizes = [2, 8, 8, 128], strides = [1, 1, 1, 1]} : vector<2x10x10x128xbf16> to vector<2x8x8x128xbf16>
    %221 = vector.shape_cast %220 : vector<2x8x8x128xbf16> to vector<128x128xbf16>
    %222 = vector.extract_strided_slice %213 {offsets = [0, 1, 1, 0], sizes = [2, 8, 8, 128], strides = [1, 1, 1, 1]} : vector<2x10x10x128xbf16> to vector<2x8x8x128xbf16>
    %223 = vector.shape_cast %222 : vector<2x8x8x128xbf16> to vector<128x128xbf16>
    %224 = vector.extract_strided_slice %213 {offsets = [0, 1, 2, 0], sizes = [2, 8, 8, 128], strides = [1, 1, 1, 1]} : vector<2x10x10x128xbf16> to vector<2x8x8x128xbf16>
    %225 = vector.shape_cast %224 : vector<2x8x8x128xbf16> to vector<128x128xbf16>
    %226 = vector.extract_strided_slice %213 {offsets = [0, 2, 0, 0], sizes = [2, 8, 8, 128], strides = [1, 1, 1, 1]} : vector<2x10x10x128xbf16> to vector<2x8x8x128xbf16>
    %227 = vector.shape_cast %226 : vector<2x8x8x128xbf16> to vector<128x128xbf16>
    %228 = vector.extract_strided_slice %213 {offsets = [0, 2, 1, 0], sizes = [2, 8, 8, 128], strides = [1, 1, 1, 1]} : vector<2x10x10x128xbf16> to vector<2x8x8x128xbf16>
    %229 = vector.shape_cast %228 : vector<2x8x8x128xbf16> to vector<128x128xbf16>
    %230 = vector.extract_strided_slice %213 {offsets = [0, 2, 2, 0], sizes = [2, 8, 8, 128], strides = [1, 1, 1, 1]} : vector<2x10x10x128xbf16> to vector<2x8x8x128xbf16>
    %231 = vector.shape_cast %230 : vector<2x8x8x128xbf16> to vector<128x128xbf16>
    %232 = tpu.concatenate %215, %217, %219, %221, %223, %225, %227, %229, %231 in 1 : vector<128x128xbf16>, vector<128x128xbf16>, vector<128x128xbf16>, vector<128x128xbf16>, vector<128x128xbf16>, vector<128x128xbf16>, vector<128x128xbf16>, vector<128x128xbf16>, vector<128x128xbf16> -> vector<128x1152xbf16>
    %c0_148 = arith.constant 0 : index
    %c0_149 = arith.constant 0 : index
    %233 = vector.load %arg7[%c0_148, %c0_149] : memref<1152x128xbf16, #tpu.memory_space<vmem>>, vector<1152x128xbf16>
    %cst_150 = arith.constant dense<0.000000e+00> : vector<128x128xf32>
    %234 = tpu.matmul %232, %233, %cst_150 {dimension_numbers = #tpu.dot_dimension_numbers<[1], [0], [0], [1], [0, 0, 1, 1], [], []>} : vector<128x1152xbf16>, vector<1152x128xbf16>, vector<128x128xf32> -> vector<128x128xf32>
    %c0_151 = arith.constant 0 : index
    %c0_152 = arith.constant 0 : index
    %235 = vector.load %arg8[%c0_151, %c0_152] : memref<1x128xf32, #tpu.memory_space<vmem>>, vector<1x128xf32>
    %236 = vector.broadcast %235 : vector<1x128xf32> to vector<128x128xf32>
    %237 = arith.addf %234, %236 : vector<128x128xf32>
    %238 = vector.shape_cast %237 : vector<128x128xf32> to vector<2x8x8x128xf32>
    %c0_153 = arith.constant 0 : index
    %c0_154 = arith.constant 0 : index
    %c0_155 = arith.constant 0 : index
    %c0_156 = arith.constant 0 : index
    %239 = vector.load %arg9[%c0_153, %c0_154, %c0_155, %c0_156] : memref<2x8x8x128xf32, #tpu.memory_space<vmem>>, vector<2x8x8x128xf32>
    tpu.vector_store %arg9[%c0_153, %c0_154, %c0_155, %c0_156], %238 {strides = array<i32>} : memref<2x8x8x128xf32, #tpu.memory_space<vmem>>, vector<2x8x8x128xf32>,
    return
  }
  func.func @transform_0(%arg0: i32) -> (i32, i32, i32, i32) {
    %c0_i32 = arith.constant 0 : i32
    %c0_i32_0 = arith.constant 0 : i32
    %c0_i32_1 = arith.constant 0 : i32
    %c0_i32_2 = arith.constant 0 : i32
    return %arg0, %c0_i32, %c0_i32_0, %c0_i32_1 : i32, i32, i32, i32
  }
  func.func @transform_1(%arg0: i32) -> (i32, i32, i32, i32) {
    %c0_i32 = arith.constant 0 : i32
    %c0_i32_0 = arith.constant 0 : i32
    %c0_i32_1 = arith.constant 0 : i32
    %c0_i32_2 = arith.constant 0 : i32
    %c0_i32_3 = arith.constant 0 : i32
    return %c0_i32, %c0_i32_0, %c0_i32_1, %c0_i32_2 : i32, i32, i32, i32
  }
  func.func @transform_2(%arg0: i32) -> (i32, i32, i32, i32) {
    %c0_i32 = arith.constant 0 : i32
    %c0_i32_0 = arith.constant 0 : i32
    %c0_i32_1 = arith.constant 0 : i32
    %c0_i32_2 = arith.constant 0 : i32
    %c0_i32_3 = arith.constant 0 : i32
    return %c0_i32, %c0_i32_0, %c0_i32_1, %c0_i32_2 : i32, i32, i32, i32
  }
  func.func @transform_3(%arg0: i32) -> (i32, i32, i32) {
    %c0_i32 = arith.constant 0 : i32
    %c0_i32_0 = arith.constant 0 : i32
    %c0_i32_1 = arith.constant 0 : i32
    %c0_i32_2 = arith.constant 0 : i32
    return %c0_i32, %c0_i32_0, %c0_i32_1 : i32, i32, i32
  }
  func.func @transform_4(%arg0: i32) -> (i32, i32) {
    %c0_i32 = arith.constant 0 : i32
    %c0_i32_0 = arith.constant 0 : i32
    %c0_i32_1 = arith.constant 0 : i32
    return %c0_i32, %c0_i32_0 : i32, i32
  }
  func.func @transform_5(%arg0: i32) -> (i32, i32) {
    %c0_i32 = arith.constant 0 : i32
    %c0_i32_0 = arith.constant 0 : i32
    %c0_i32_1 = arith.constant 0 : i32
    return %c0_i32, %c0_i32_0 : i32, i32
  }
  func.func @transform_6(%arg0: i32) -> (i32, i32) {
    %c0_i32 = arith.constant 0 : i32
    %c0_i32_0 = arith.constant 0 : i32
    %c0_i32_1 = arith.constant 0 : i32
    return %c0_i32, %c0_i32_0 : i32, i32
  }
  func.func @transform_7(%arg0: i32) -> (i32, i32) {
    %c0_i32 = arith.constant 0 : i32
    %c0_i32_0 = arith.constant 0 : i32
    %c0_i32_1 = arith.constant 0 : i32
    return %c0_i32, %c0_i32_0 : i32, i32
  }
  func.func @transform_8(%arg0: i32) -> (i32, i32, i32, i32) {
    %c0_i32 = arith.constant 0 : i32
    %c0_i32_0 = arith.constant 0 : i32
    %c0_i32_1 = arith.constant 0 : i32
    %c0_i32_2 = arith.constant 0 : i32
    return %arg0, %c0_i32, %c0_i32_0, %c0_i32_1 : i32, i32, i32, i32
  }
}

</mosaic_0001>

<bundles_post_ra>
// kernel: tile.13
= control target key start
LH: loop header
LB: loop body
LE: loop exit
PB: predicated region body
PF: predicated region fallthrough
CT: control target
= control target key end

     0   :  { %2 = vsyncpa [#allocation1], 0  ;;  %s42_s6 = smov [#allocation0]   ;;  %s59_s0 = inlined_call_operand.hbm [shape: f32[32], index: 0, kind: input, shape index: {}]   ;;  %s60_s1 = inlined_call_operand.vmem [shape: f32[4,32], index: 1, kind: output, shape index: {}]  }
   0x1   :  { %s9_s7 = sshll.u32 %s42_s6, 4  ;;  %s10_s7 = int_to_ptr.vmem [resolvable:$true] %s9_s7 }
   0x2   :  { %s28_s8 = scalar_lea.vmem %s10_s7, 16  ;;  %s32_s9 = scalar_lea.vmem %s10_s7, 32 }
   0x3   :  { %p29_p0 = scmp.ne.s32.totalorder %s10_s7, %s28_s8  ;;  %p33_p1 = scmp.lt.s32.totalorder %s10_s7, %s10_s7 }
   0x4   :  { %p34_p2 = scmp.lt.s32.totalorder %s32_s9, %s28_s8 }
   0x6   :  { %p35_p3 = por %p34_p2, %p33_p1 }
   0x8   :  { %p36_p4 = pnand %p35_p3, %p29_p0 }
   0xa   :  { %39 = shalt.err (!%p36_p4)
}
   0xb   :  { %12 = dma.hbm_to_vmem [thread:$0]  %s59_s0, 16, %s10_s7, [#allocation1]  }
   0xc   :  { %40 = dma.done.wait [#allocation1], 16  }
   0xd   :  { %41 = vsyncadd [#allocation1], 4294967280  ;;  %v16_v0 = vld [vmem:[#allocation0] ss:$0 sm:$0xff] }
   0xe   :  { %17 = vst [vmem:[%s60_s1] sm:$0xf] %v16_v0 }
   0xf   :  { %18 = vsyncpa [#allocation1], 1 }

// kernel: tile.14
= control target key start
LH: loop header
LB: loop body
LE: loop exit
PB: predicated region body
PF: predicated region fallthrough
CT: control target
= control target key end

     0   :  { %vm8_vm0 = vcmask 261120   ;;  %s40_s8 = smov 32   ;;  %s41_s9 = smov 64   ;;  %vm14_vm1 = vcmask 1048320   ;;  %vm20_vm2 = vcmask 785920   ;;  %vm26_vm3 = vcmask 523520   ;;  %s58_s0 = inlined_call_operand.vmem [shape: f32[4,32], index: 0, kind: input, shape index: {}]   ;;  %s59_s1 = inlined_call_operand.vmem [shape: f32[1,128], index: 1, kind: output, shape index: {}]  }
   0x1   :  { %v5_v0 = vld [vmem:[%s58_s0] sm:$0xf]  ;;  %s39_s0 = smov 96  }
   0x2   :  { %6 = vst [vmem:[#allocation1] sm:$0xf] %v5_v0 }
   0x9   :  { %v11_v1 = vld [vmem:[#allocation1 + $0x3] sm:$0x1]   ;;  %v23_v2 = vld [vmem:[#allocation1 + $0x1] sm:$0x1]   ;;  %v7_v3 = vld [vmem:[#allocation1] sm:$0x1]  }
   0xa   :  { %12 = vrot.lane.b32.xlu0 %v11_v1, %s39_s0  ;;  %24 = vrot.lane.b32.xlu1 %v23_v2, %s40_s8  ;;  %v17_v4 = vld [vmem:[#allocation1 + $0x2] sm:$0x1]   ;;  %9 = vst.msk [vmem:[#allocation0] sm:$0x1] %vm8_vm0, %v7_v3  }
   0xe   :  { %18 = vrot.lane.b32.xlu0 %v17_v4, %s41_s9 }
  0x7c   :  { %v13_v5 = vpop.permute.xlu0 %12   ;;  %v25_v6 = vpop.permute.xlu1 %24  }
  0x7d   :  { %15 = vst.msk [vmem:[#allocation0] sm:$0x1] %vm14_vm1, %v13_v5  }
  0x80   :  { %v19_v7 = vpop.permute.xlu0 %18  }
  0x81   :  { %21 = vst.msk [vmem:[#allocation0] sm:$0x1] %vm20_vm2, %v19_v7  }
  0x82   :  { %27 = vst.msk [vmem:[#allocation0] sm:$0x1] %vm26_vm3, %v25_v6  }
  0x89   :  { %v32_v8 = vld [vmem:[#allocation0] sm:$0x1] }
  0x8a   :  { %35 = vst [vmem:[%s59_s1] sm:$0x1] %v32_v8 }

// kernel: tile.18
= control target key start
LH: loop header
LB: loop body
LE: loop exit
PB: predicated region body
PF: predicated region fallthrough
CT: control target
= control target key end

     0   :  { %2 = vsyncpa [#allocation1], 0  ;;  %s45_s6 = smov [#allocation0]   ;;  %s65_s0 = inlined_call_operand.hbm [shape: f32[8], index: 0, kind: input, shape index: {}]   ;;  %s66_s1 = inlined_call_operand.vmem [shape: f32[16,8], index: 1, kind: output, shape index: {}]  }
   0x1   :  { %s9_s7 = sshll.u32 %s45_s6, 4  ;;  %s10_s7 = int_to_ptr.vmem [resolvable:$true] %s9_s7 }
   0x2   :  { %s31_s8 = scalar_lea.vmem %s10_s7, 16  ;;  %s35_s9 = scalar_lea.vmem %s10_s7, 32 }
   0x3   :  { %p32_p0 = scmp.ne.s32.totalorder %s10_s7, %s31_s8  ;;  %p36_p1 = scmp.lt.s32.totalorder %s10_s7, %s10_s7 }
   0x4   :  { %p37_p2 = scmp.lt.s32.totalorder %s35_s9, %s31_s8 }
   0x6   :  { %p38_p3 = por %p37_p2, %p36_p1 }
   0x8   :  { %p39_p4 = pnand %p38_p3, %p32_p0 }
   0xa   :  { %42 = shalt.err (!%p39_p4)
}
   0xb   :  { %12 = dma.hbm_to_vmem [thread:$0]  %s65_s0, 16, %s10_s7, [#allocation1]  }
   0xc   :  { %43 = dma.done.wait [#allocation1], 16  }
   0xd   :  { %44 = vsyncadd [#allocation1], 4294967280  ;;  %v16_v0 = vld [vmem:[#allocation0] ss:$0 sm:$0xff] }
   0xe   :  { %17 = vst [vmem:[%s66_s1] sm:$0xff] %v16_v0  ;;  %21 = vst [vmem:[%s66_s1 + $0x8] sm:$0xff] %v16_v0 }
   0xf   :  { %20 = vsyncpa [#allocation1], 1 }

// kernel: tile.19
= control target key start
LH: loop header
LB: loop body
LE: loop exit
PB: predicated region body
PF: predicated region fallthrough
CT: control target
= control target key end

     0   :  { %s133_s10 = smov 120   ;;  %s134_s11 = smov 104   ;;  %vm3_vm0 = vcmask 64512   ;;  %vm9_vm1 = vcmask 1048512   ;;  %vm15_vm2 = vcmask 982912   ;;  %vm21_vm3 = vcmask 917312   ;;  %s209_s0 = inlined_call_operand.vmem [shape: f32[16,8], index: 0, kind: input, shape index: {}]   ;;  %s210_s1 = inlined_call_operand.vmem [shape: f32[1,128], index: 1, kind: output, shape index: {}]  }
   0x1   :  { %v103_v0 = vld [vmem:[%s209_s0 + $0xf] sm:$0x1]   ;;  %v105_v1 = vld [vmem:[%s209_s0 + $0xd] sm:$0x1]   ;;  %v104_v2 = vld [vmem:[%s209_s0 + $0xe] sm:$0x1]  }
   0x2   :  { %7 = vrot.lane.b32.xlu0 %v103_v0, %s133_s10  ;;  %19 = vrot.lane.b32.xlu1 %v105_v1, %s134_s11  ;;  %v106_v3 = vld [vmem:[%s209_s0 + $0xc] sm:$0x1]   ;;  %s135_s16 = smov 112   ;;  %s136_s17 = smov 96   ;;  %v107_v4 = vld [vmem:[%s209_s0 + $0xb] sm:$0x1]  }
   0x3   :  { %v108_v5 = vld [vmem:[%s209_s0 + $0xa] sm:$0x1]   ;;  %v2_v6 = vld [vmem:[%s209_s0] sm:$0x1]   ;;  %s137_s24 = smov 88   ;;  %s138_s25 = smov 80  }
   0x4   :  { %4 = vst.msk [vmem:[#allocation0] sm:$0x1] %vm3_vm0, %v2_v6   ;;  %v109_v7 = vld [vmem:[%s209_s0 + $0x9] sm:$0x1]   ;;  %v110_v8 = vld [vmem:[%s209_s0 + $0x8] sm:$0x1]  }
   0x5   :  { %s139_s30 = smov 72   ;;  %s140_s2 = smov 64   ;;  %v111_v9 = vld [vmem:[%s209_s0 + $0x7] sm:$0x1]   ;;  %v112_v10 = vld [vmem:[%s209_s0 + $0x6] sm:$0x1]  }
   0x6   :  { %13 = vrot.lane.b32.xlu0 %v104_v2, %s135_s16  ;;  %25 = vrot.lane.b32.xlu1 %v106_v3, %s136_s17  ;;  %s141_s7 = smov 56   ;;  %s142_s8 = smov 48   ;;  %v113_v11 = vld [vmem:[%s209_s0 + $0x5] sm:$0x1]   ;;  %v114_v12 = vld [vmem:[%s209_s0 + $0x4] sm:$0x1]  }
   0x7   :  { %s143_s13 = smov 40   ;;  %s144_s14 = smov 32   ;;  %v115_v13 = vld [vmem:[%s209_s0 + $0x3] sm:$0x1]   ;;  %v116_v14 = vld [vmem:[%s209_s0 + $0x2] sm:$0x1]  }
   0x8   :  { %s145_s19 = smov 24   ;;  %s146_s20 = smov 16   ;;  %v117_v15 = vld [vmem:[%s209_s0 + $0x1] sm:$0x1]   ;;  %vm27_vm4 = vcmask 851712   ;;  %vm33_vm5 = vcmask 786112  }
   0x9   :  { %s147_s0 = smov 8   ;;  %vm39_vm6 = vcmask 720512   ;;  %vm45_vm7 = vcmask 654912   ;;  %vm51_vm8 = vcmask 589312   ;;  %vm57_vm9 = vcmask 523712  }
   0xa   :  { %31 = vrot.lane.b32.xlu0 %v107_v4, %s137_s24  ;;  %37 = vrot.lane.b32.xlu1 %v108_v5, %s138_s25  ;;  %vm63_vm10 = vcmask 458112   ;;  %vm69_vm11 = vcmask 392512   ;;  %vm75_vm12 = vcmask 326912   ;;  %vm81_vm13 = vcmask 261312  }
   0xb   :  { %vm87_vm14 = vcmask 195712   ;;  %vm93_vm15 = vcmask 130112  }
   0xe   :  { %43 = vrot.lane.b32.xlu0 %v109_v7, %s139_s30  ;;  %49 = vrot.lane.b32.xlu1 %v110_v8, %s140_s2 }
  0x12   :  { %55 = vrot.lane.b32.xlu0 %v111_v9, %s141_s7  ;;  %61 = vrot.lane.b32.xlu1 %v112_v10, %s142_s8 }
  0x16   :  { %67 = vrot.lane.b32.xlu0 %v113_v11, %s143_s13  ;;  %73 = vrot.lane.b32.xlu1 %v114_v12, %s144_s14 }
  0x1a   :  { %79 = vrot.lane.b32.xlu0 %v115_v13, %s145_s19  ;;  %85 = vrot.lane.b32.xlu1 %v116_v14, %s146_s20 }
  0x1e   :  { %91 = vrot.lane.b32.xlu0 %v117_v15, %s147_s0 }
  0x74   :  { %v8_v16 = vpop.permute.xlu0 %7   ;;  %v20_v17 = vpop.permute.xlu1 %19  }
  0x75   :  { %10 = vst.msk [vmem:[#allocation0] sm:$0x1] %vm9_vm1, %v8_v16  }
  0x78   :  { %v14_v18 = vpop.permute.xlu0 %13   ;;  %v26_v19 = vpop.permute.xlu1 %25  }
  0x79   :  { %16 = vst.msk [vmem:[#allocation0] sm:$0x1] %vm15_vm2, %v14_v18  }
  0x7a   :  { %22 = vst.msk [vmem:[#allocation0] sm:$0x1] %vm21_vm3, %v20_v17  }
  0x7b   :  { %28 = vst.msk [vmem:[#allocation0] sm:$0x1] %vm27_vm4, %v26_v19  }
  0x7c   :  { %v32_v20 = vpop.permute.xlu0 %31   ;;  %v38_v21 = vpop.permute.xlu1 %37  }
  0x7d   :  { %34 = vst.msk [vmem:[#allocation0] sm:$0x1] %vm33_vm5, %v32_v20  }
  0x7e   :  { %40 = vst.msk [vmem:[#allocation0] sm:$0x1] %vm39_vm6, %v38_v21  }
  0x80   :  { %v44_v22 = vpop.permute.xlu0 %43   ;;  %v50_v23 = vpop.permute.xlu1 %49  }
  0x81   :  { %46 = vst.msk [vmem:[#allocation0] sm:$0x1] %vm45_vm7, %v44_v22  }
  0x82   :  { %52 = vst.msk [vmem:[#allocation0] sm:$0x1] %vm51_vm8, %v50_v23  }
  0x84   :  { %v56_v24 = vpop.permute.xlu0 %55   ;;  %v62_v25 = vpop.permute.xlu1 %61  }
  0x85   :  { %58 = vst.msk [vmem:[#allocation0] sm:$0x1] %vm57_vm9, %v56_v24  }
  0x86   :  { %64 = vst.msk [vmem:[#allocation0] sm:$0x1] %vm63_vm10, %v62_v25  }
  0x88   :  { %v68_v26 = vpop.permute.xlu0 %67   ;;  %v74_v27 = vpop.permute.xlu1 %73  }
  0x89   :  { %70 = vst.msk [vmem:[#allocation0] sm:$0x1] %vm69_vm11, %v68_v26  }
  0x8a   :  { %76 = vst.msk [vmem:[#allocation0] sm:$0x1] %vm75_vm12, %v74_v27  }
  0x8c   :  { %v80_v28 = vpop.permute.xlu0 %79   ;;  %v86_v29 = vpop.permute.xlu1 %85  }
  0x8d   :  { %82 = vst.msk [vmem:[#allocation0] sm:$0x1] %vm81_vm13, %v80_v28  }
  0x8e   :  { %88 = vst.msk [vmem:[#allocation0] sm:$0x1] %vm87_vm14, %v86_v29  }
  0x90   :  { %v92_v30 = vpop.permute.xlu0 %91  }
  0x91   :  { %94 = vst.msk [vmem:[#allocation0] sm:$0x1] %vm93_vm15, %v92_v30  }
  0x98   :  { %v99_v31 = vld [vmem:[#allocation0] sm:$0x1] }
  0x99   :  { %102 = vst [vmem:[%s210_s1] sm:$0x1] %v99_v31 }

// kernel: decoder_forward.1
= control target key start
LH: loop header
LB: loop body
LE: loop exit
PB: predicated region body
PF: predicated region fallthrough
CT: control target
= control target key end

     0   :  { %s12777_s27 = smov 0   ;;  %s18406_s0 = inlined_call_operand.vmem [shape: f32[4,8,8,32], index: 0, kind: input, shape index: {}]   ;;  %s18407_s1 = inlined_call_operand.vmem [shape: bf16[2,2,288,32], index: 1, kind: input, shape index: {}]   ;;  %s18408_s2 = inlined_call_operand.vmem [shape: f32[2,2,1,32], index: 2, kind: input, shape index: {}]   ;;  %s18409_s3 = inlined_call_operand.vmem [shape: f32[2,1,32], index: 3, kind: input, shape index: {}]   ;;  %s18410_s4 = inlined_call_operand.vmem [shape: bf16[288,128], index: 4, kind: input, shape index: {}]   ;;  %s18411_s5 = inlined_call_operand.vmem [shape: f32[1,128], index: 5, kind: input, shape index: {}]   ;;  %s18412_s6 = inlined_call_operand.vmem [shape: bf16[1152,128], index: 6, kind: input, shape index: {}]   ;;  %s18413_s7 = inlined_call_operand.vmem [shape: f32[1,128], index: 7, kind: input, shape index: {}]   ;;  %s18414_s8 = inlined_call_operand.vmem [shape: f32[4,8,8,128], index: 8, kind: output, shape index: {}]  }
   0x1 LB: > { %s10456_s28 = sadd.s32 4294967295, %s12726_s27   ;;  %p10460_p0 = scmp.ge.s32.totalorder %s12726_s27, 1  ;;  %s12726_s27 = sphi %s12777_s27, %s18_s27  }
   0x2   : > { %p264_p1 = scmp.lt.s32.totalorder %s12726_s27, 3 }
   0x4   : > { %p265_p2 = pnand %p10460_p0, %p264_p1 }
   0x6   : > { %268 = sbr.rel (%p265_p2) target bundleno = 2534 (0x9e6), region = 52 }
   0xb   : > { %s10461_s29 = sshll.u32 %s10456_s28, 1  ;;  %vm317_vm0 = vcmask 253952   ;;  %vm328_vm1 = vsmask.f32 256  ;;  %v18452_v0 = vmov 0  ;;  %vm315_vm5 = vcmask 257024  }
   0xc   : > { %p301_p3 = scmp.lt.s32.totalorder %s10461_s29, 3  ;;  %vm12787_vm2 = vmand %vm317_vm0, %vm328_vm1  ;;  %v339_v1 = vld [vmem:[#allocation2 + $0x20] sm:$0x1]  ;;  %v342_v2 = vld [vmem:[#allocation2 + $0x28] sm:$0x1]  ;;  %v12728_v23 = vmov 0  }
   0xd   : > { %v18453_v0 = vsel %vm12787_vm2, 4294967295, %v18452_v0  ;;  %v340_v3 = vsel %vm12787_vm2, 0, %v339_v1  ;;  %v343_v4 = vsel %vm12787_vm2, 0, %v342_v2  ;;  %vm378_vm3 = vsmask.f32 7938  ;;  %s12729_s12 = smov 64  }
   0xe   : > { %18454 = vst [vmem:[#allocation4_spill] sm:$0xff] %v18453_v0  ;;  %v333_v5 = vld [vmem:[#allocation2 + $0x10] sm:$0x1]  ;;  %s18588_s29 = smov (!%p301_p3, %s10461_s29), 3  ;;  %341 = vst [vmem:[#allocation2 + $0x20] sm:$0x1] %v340_v3 }
   0xf   : > { %344 = vst [vmem:[#allocation2 + $0x28] sm:$0x1] %v343_v4  ;;  %v334_v6 = vsel %vm12787_vm2, 0, %v333_v5  ;;  %v336_v7 = vld [vmem:[#allocation2 + $0x18] sm:$0x1]  ;;  %vm12805_vm4 = vmand %vm317_vm0, %vm378_vm3  ;;  %s11395_s30 = sshll.u32 %s18588_s29, 6 }
  0x10   : > { %v345_v8 = vld [vmem:[#allocation2 + $0x30] sm:$0x1]  ;;  %335 = vst [vmem:[#allocation2 + $0x10] sm:$0x1] %v334_v6  ;;  %v337_v9 = vsel %vm12787_vm2, 0, %v336_v7  ;;  %s12819_s11 = scalar_lea.vmem %s18406_s0, %s11395_s30  ;;  %vm12846_vm6 = vmand %vm315_vm5, %vm378_vm3  ;;  %v18457_v46 = vmov 0  ;;  %s18324_s22 = scalar_lea.vmem %s18414_s8, %s11395_s30 }
  0x11   : > { %v346_v10 = vsel %vm12787_vm2, 0, %v345_v8  ;;  %v348_v11 = vld [vmem:[#allocation2 + $0x38] sm:$0x1]  ;;  %v330_v12 = vld [vmem:[#allocation2 + $0x8] sm:$0x1]  ;;  %v541_v20 = vld [vmem:[%s12819_s11 + $0x20] sm:$0xff] }
  0x12   : > { %338 = vst [vmem:[#allocation2 + $0x18] sm:$0x1] %v337_v9  ;;  %347 = vst [vmem:[#allocation2 + $0x30] sm:$0x1] %v346_v10  ;;  %v349_v14 = vsel %vm12787_vm2, 0, %v348_v11  ;;  %v331_v15 = vsel %vm12787_vm2, 0, %v330_v12  ;;  %v11401_v25 = vpack.c.bf16 %v541_v20, %v541_v20 }
  0x13   : > { %v380_v16 = vld [vmem:[#allocation2 + $0xc] sm:$0x1]  ;;  %350 = vst [vmem:[#allocation2 + $0x38] sm:$0x1] %v349_v14  ;;  %332 = vst [vmem:[#allocation2 + $0x8] sm:$0x1] %v331_v15 }
  0x14   : > { %v381_v17 = vsel %vm12805_vm4, 0, %v380_v16  ;;  %v383_v18 = vld [vmem:[#allocation2 + $0x14] sm:$0x1]  ;;  %v540_v19 = vld [vmem:[%s12819_s11 + $0x18] sm:$0xff]  ;;  %v538_v21 = vld [vmem:[%s12819_s11 + $0x8] sm:$0xff]  ;;  %v650_v36 = vshrl.u32 %v11401_v25, 16 }
  0x15   : > { %382 = vst [vmem:[#allocation2 + $0xc] sm:$0x1] %v381_v17  ;;  %v384_v22 = vsel %vm12805_vm4, 0, %v383_v18  ;;  %316 = vst.msk [vmem:[#allocation2] sm:$0xf] %vm315_vm5, %v12728_v23  ;;  %v11400_v24 = vpack.c.bf16 %v540_v19, %v540_v19  ;;  %v539_v26 = vld [vmem:[%s12819_s11 + $0x10] sm:$0xff]  ;;  %v11398_v27 = vpack.c.bf16 %v538_v21, %v538_v21 }
  0x16   : > { %318 = vst.msk [vmem:[#allocation2 + $0x4] sm:$0x1] %vm317_vm0, %v12728_v23  ;;  %320 = vst.msk [vmem:[#allocation2 + $0x54] sm:$0x1] %vm317_vm0, %v12728_v23  ;;  %v542_v28 = vld [vmem:[%s12819_s11 + $0x28] sm:$0xff]  ;;  %v543_v29 = vld [vmem:[%s12819_s11 + $0x30] sm:$0xff]  ;;  %v11399_v30 = vpack.c.bf16 %v539_v26, %v539_v26 }
  0x17   : > { %319 = vst.msk [vmem:[#allocation2 + $0x50] sm:$0xf] %vm315_vm5, %v12728_v23  ;;  %322 = vst.msk [vmem:[#allocation2 + $0x48] sm:$0xf] %vm315_vm5, %v12728_v23  ;;  %v11402_v31 = vpack.c.bf16 %v542_v28, %v542_v28  ;;  %v11403_v32 = vpack.c.bf16 %v543_v29, %v543_v29  ;;  %v537_v33 = vld [vmem:[%s12819_s11] sm:$0xff]  ;;  %v642_v34 = vshrl.u32 %v11400_v24, 16 }
  0x18   : > { %323 = vst.msk [vmem:[#allocation2 + $0x4c] sm:$0x1] %vm317_vm0, %v12728_v23  ;;  %325 = vst.msk [vmem:[#allocation2 + $0x9c] sm:$0x1] %vm317_vm0, %v12728_v23  ;;  %v645_v35 = vshll.u32 %v11400_v24, 16  ;;  %v653_v37 = vshll.u32 %v11401_v25, 16  ;;  %v11397_v45 = vpack.c.bf16 %v537_v33, %v537_v33 }
  0x19   : > { %324 = vst.msk [vmem:[#allocation2 + $0x98] sm:$0xf] %vm315_vm5, %v12728_v23  ;;  %428 = vst [vmem:[#allocation3] sm:$0xf] %v12728_v23  ;;  %v626_v38 = vshrl.u32 %v11398_v27, 16  ;;  %v629_v39 = vshll.u32 %v11398_v27, 16 }
  0x1a   : > { %429 = vst [vmem:[#allocation3 + $0x4] sm:$0x1] %v12728_v23  ;;  %430 = vst [vmem:[#allocation3 + $0x50] sm:$0xf] %v12728_v23  ;;  %v634_v40 = vshrl.u32 %v11399_v30, 16  ;;  %v637_v41 = vshll.u32 %v11399_v30, 16 }
  0x1b   : > { %431 = vst [vmem:[#allocation3 + $0x54] sm:$0x1] %v12728_v23  ;;  %433 = vst [vmem:[#allocation3 + $0x48] sm:$0xf] %v12728_v23  ;;  %v12840_v42 = vrot.slane %v642_v34, 7  ;;  %v12842_v43 = vrot.slane %v650_v36, 7 }
  0x1c   : > { %434 = vst [vmem:[#allocation3 + $0x4c] sm:$0x1] %v12728_v23  ;;  %435 = vst [vmem:[#allocation3 + $0x98] sm:$0xf] %v12728_v23  ;;  %v797_v44 = vld [vmem:[#allocation2 + $0x20] sm:$0xf] }
  0x1d   : > { %436 = vst [vmem:[#allocation3 + $0x9c] sm:$0x1] %v12728_v23  ;;  %385 = vst [vmem:[#allocation2 + $0x14] sm:$0x1] %v384_v22  ;;  %v18458_v46 = vsel %vm12846_vm6, 4294967295, %v18457_v46  ;;  %v628_v48 = vrot.slane %v626_v38, 7  ;;  %v647_v53 = vor.u32 %v645_v35, %v12840_v42  ;;  %v655_v54 = vor.u32 %v653_v37, %v12842_v43 }
  0x1e   : > { %18459 = vst [vmem:[#allocation5_spill] sm:$0xff] %v18458_v46  ;;  %v803_v47 = vld [vmem:[#allocation2 + $0x28] sm:$0xf]  ;;  %v12850_v49 = vrot.slane %v634_v40, 7  ;;  %v658_v50 = vshrl.u32 %v11402_v31, 16  ;;  %v661_v51 = vshll.u32 %v11402_v31, 16 }
  0x1f   : > { %v386_v52 = vld [vmem:[#allocation2 + $0x1c] sm:$0x1]  ;;  %v785_v55 = vld [vmem:[#allocation2 + $0x10] sm:$0xf]  ;;  %v791_v56 = vld [vmem:[#allocation2 + $0x18] sm:$0xf]  ;;  %v631_v59 = vor.u32 %v629_v39, %v628_v48  ;;  %v798_v2 = vsel %vm12846_vm6, %v647_v53, %v797_v44  ;;  %v804_v3 = vsel %vm12846_vm6, %v655_v54, %v803_v47 }
  0x20   : > { %v666_v57 = vshrl.u32 %v11403_v32, 16  ;;  %v669_v58 = vshll.u32 %v11403_v32, 16  ;;  %v639_v60 = vor.u32 %v637_v41, %v12850_v49  ;;  %v12855_v61 = vrot.slane %v658_v50, 7  ;;  %v809_v62 = vld [vmem:[#allocation2 + $0x30] sm:$0xf]  ;;  %v544_v31 = vld [vmem:[%s12819_s11 + $0x38] sm:$0xff] }
  0x21   : > { %v815_v63 = vld [vmem:[#allocation2 + $0x38] sm:$0xf]  ;;  %v618_v1 = vshrl.u32 %v11397_v45, 16  ;;  %v621_v5 = vshll.u32 %v11397_v45, 16  ;;  %v779_v6 = vld [vmem:[#allocation2 + $0x8] sm:$0xf]  ;;  %v786_v9 = vsel %vm12846_vm6, %v631_v59, %v785_v55  ;;  %v12903_v47 = vpack.c.bf16 %v544_v31, %v544_v31 }
  0x22   : > { %v12861_v4 = vrot.slane %v666_v57, 7  ;;  %v782_v7 = vld [vmem:[#allocation2 + $0xc] sm:$0x1]  ;;  %vm1174_vm7 = vcmask 1042432   ;;  %v389_v8 = vld [vmem:[#allocation2 + $0x24] sm:$0x1]  ;;  %v792_v10 = vsel %vm12846_vm6, %v639_v60, %v791_v56  ;;  %v663_v11 = vor.u32 %v661_v51, %v12855_v61 }
  0x23   : > { %799 = vst [vmem:[#allocation2 + $0x20] sm:$0xf] %v798_v2  ;;  %805 = vst [vmem:[#allocation2 + $0x28] sm:$0xf] %v804_v3  ;;  %v620_v12 = vrot.slane %v618_v1, 7  ;;  %v632_v17 = vrot.slane %v628_v48, 4 }
  0x24   : > { %v788_v14 = vld [vmem:[#allocation2 + $0x14] sm:$0x1]  ;;  %v392_v15 = vld [vmem:[#allocation2 + $0x2c] sm:$0x1]  ;;  %787 = vst [vmem:[#allocation2 + $0x10] sm:$0xf] %v786_v9  ;;  %v671_v16 = vor.u32 %v669_v58, %v12861_v4  ;;  %v810_v21 = vsel %vm12846_vm6, %v663_v11, %v809_v62 }
  0x25   : > { %793 = vst [vmem:[#allocation2 + $0x18] sm:$0xf] %v792_v10  ;;  %v387_v18 = vsel %vm12805_vm4, 0, %v386_v52  ;;  %v390_v19 = vsel %vm12805_vm4, 0, %v389_v8  ;;  %v395_v20 = vld [vmem:[#allocation2 + $0x34] sm:$0x1]  ;;  %v623_v22 = vor.u32 %v621_v5, %v620_v12  ;;  %v789_v27 = vsel %vm12787_vm2, %v632_v17, %v788_v14 }
  0x26   : > { %v624_v23 = vrot.slane %v620_v12, 4  ;;  %vm1175_vm8 = vcmask 1046532   ;;  %388 = vst [vmem:[#allocation2 + $0x1c] sm:$0x1] %v387_v18  ;;  %391 = vst [vmem:[#allocation2 + $0x24] sm:$0x1] %v390_v19  ;;  %v816_v26 = vsel %vm12846_vm6, %v671_v16, %v815_v63 }
  0x27   : > { %v12875_v24 = vld [vmem:[#allocation2] sm:$0xf]  ;;  %811 = vst [vmem:[#allocation2 + $0x30] sm:$0xf] %v810_v21  ;;  %v393_v28 = vsel %vm12805_vm4, 0, %v392_v15  ;;  %v780_v32 = vsel %vm12846_vm6, %v623_v22, %v779_v6  ;;  %v640_v34 = vrot.slane %v12850_v49, 4  ;;  %vm12936_vm9 = vmor %vm1174_vm7, %vm1175_vm8 }
  0x28   : > { %v351_v25 = vld [vmem:[#allocation2 + $0x40] sm:$0x1]  ;;  %v398_v29 = vld [vmem:[#allocation2 + $0x3c] sm:$0x1]  ;;  %v401_v30 = vld [vmem:[#allocation2 + $0x44] sm:$0x1]  ;;  %v783_v33 = vsel %vm12787_vm2, %v624_v23, %v782_v7 }
  0x29   : > { %817 = vst [vmem:[#allocation2 + $0x38] sm:$0xf] %v816_v26  ;;  %790 = vst [vmem:[#allocation2 + $0x14] sm:$0x1] %v789_v27  ;;  %v396_v35 = vsel %vm12805_vm4, 0, %v395_v20  ;;  %v648_v37 = vrot.slane %v12840_v42, 4 }
  0x2a   : > { %394 = vst [vmem:[#allocation2 + $0x2c] sm:$0x1] %v393_v28  ;;  %v12891_v36 = vld [vmem:[#allocation2 + $0x4] sm:$0x1]  ;;  %781 = vst [vmem:[#allocation2 + $0x8] sm:$0xf] %v780_v32 }
  0x2b   : > { %784 = vst [vmem:[#allocation2 + $0xc] sm:$0x1] %v783_v33  ;;  %397 = vst [vmem:[#allocation2 + $0x34] sm:$0x1] %v396_v35  ;;  %v656_v38 = vrot.slane %v12842_v43, 4  ;;  %v664_v39 = vrot.slane %v12855_v61, 4 }
  0x2c   : > { %v352_v40 = vsel %vm12787_vm2, 0, %v351_v25  ;;  %v10483_v41 = vrot.slane %v12875_v24, 9  ;;  %v399_v44 = vsel %vm12805_vm4, 0, %v398_v29  ;;  %v402_v45 = vsel %vm12805_vm4, 0, %v401_v30  ;;  %v12905_v42 = vld [vmem:[#allocation2 + $0x48] sm:$0xf] }
  0x2d   : > { %353 = vst [vmem:[#allocation2 + $0x40] sm:$0x1] %v352_v40  ;;  %v545_v48 = vld [vmem:[%s12819_s11 + $0x40] sm:$0xff]  ;;  %v12910_v49 = vld [vmem:[#allocation2 + $0x28] sm:$0xf]  ;;  %v1179_v50 = vrot.slane %v12891_v36, 5 }
  0x2e   : > { %v12908_v43 = vld [vmem:[#allocation2 + $0x20] sm:$0xf]  ;;  %400 = vst [vmem:[#allocation2 + $0x3c] sm:$0x1] %v399_v44  ;;  %403 = vst [vmem:[#allocation2 + $0x44] sm:$0x1] %v402_v45  ;;  %v12957_v10 = vpack.c.bf16 %v545_v48, %v545_v48 }
  0x2f   : > { %v672_v51 = vrot.slane %v12861_v4, 4  ;;  %v12916_v52 = vcombine.low %v12908_v43, %v12910_v49  ;;  %v12918_v53 = vld [vmem:[#allocation2 + $0x10] sm:$0xf]  ;;  %v12920_v54 = vld [vmem:[#allocation2 + $0x18] sm:$0xf]  ;;  %v10487_v55 = vrot.slane %v12908_v43, 9  ;;  %v12955_v9 = vsel %vm12936_vm9, %v10483_v41, %v1179_v50 }
  0x30   : > { %v10501_v56 = vrot.slane %v12905_v42, 9  ;;  %v12926_v57 = vcombine.low %v12918_v53, %v12920_v54  ;;  %v10485_v58 = vrot.slane %v12918_v53, 9  ;;  %v794_v59 = vld [vmem:[#allocation2 + $0x1c] sm:$0x1]  ;;  %v800_v60 = vld [vmem:[#allocation2 + $0x24] sm:$0x1]  ;;  %v10528_v23 = vcombine.low %v12920_v54, %v12908_v43 }
  0x31   : > { %v10488_v61 = vrot.slane %v12910_v49, 9  ;;  %1493 = vrot.lane.b32.xlu0 %v12916_v52, %s12729_s12  ;;  %v12932_v62 = vld [vmem:[#allocation2 + $0x30] sm:$0xf]  ;;  %v795_v1 = vsel %vm12787_vm2, %v640_v34, %v794_v59  ;;  %v801_v2 = vsel %vm12787_vm2, %v648_v37, %v800_v60  ;;  %v674_v3 = vshrl.u32 %v12903_v47, 16  ;;  %v546_v5 = vld [vmem:[%s12819_s11 + $0x48] sm:$0xff]  ;;  %s12730_s13 = smov 96  }
  0x32   : > { %v677_v4 = vshll.u32 %v12903_v47, 16  ;;  %1491 = vrot.lane.b32.xlu1 %v12926_v57, %s12729_s12  ;;  %v12949_v6 = vld [vmem:[#allocation2 + $0x38] sm:$0xf]  ;;  %v12951_v7 = vld [vmem:[#allocation2 + $0x14] sm:$0x1]  ;;  %v10486_v16 = vrot.slane %v12920_v54, 9  ;;  %v12983_v30 = vpack.c.bf16 %v546_v5, %v546_v5 }
  0x33   : > { %796 = vst [vmem:[#allocation2 + $0x1c] sm:$0x1] %v795_v1  ;;  %802 = vst [vmem:[#allocation2 + $0x24] sm:$0x1] %v801_v2  ;;  %v806_v8 = vld [vmem:[#allocation2 + $0x2c] sm:$0x1]  ;;  %v12961_v11 = vcombine.low %v12932_v62, %v12949_v6 }
  0x34   : > { %v12963_v12 = vld [vmem:[#allocation2 + $0x8] sm:$0xf]  ;;  %v12965_v14 = vld [vmem:[#allocation2 + $0xc] sm:$0x1]  ;;  %v1187_v15 = vrot.slane %v12951_v7, 5  ;;  %v807_v17 = vsel %vm12787_vm2, %v656_v38, %v806_v8  ;;  %v676_v22 = vrot.slane %v674_v3, 7  ;;  %v10529_v38 = vcombine.low %v12910_v49, %v12932_v62 }
  0x35   : > { %v10527_v18 = vcombine.low %v12963_v12, %v12918_v53  ;;  %v10484_v19 = vrot.slane %v12963_v12, 9  ;;  %v1183_v20 = vrot.slane %v12965_v14, 5  ;;  %808 = vst [vmem:[#allocation2 + $0x2c] sm:$0x1] %v807_v17  ;;  %v812_v21 = vld [vmem:[#allocation2 + $0x34] sm:$0x1]  ;;  %1495 = vrot.lane.b32.xlu0 %v12961_v11, %s12729_s12 }
  0x36   : > { %vm915_vm10 = vsmask.f32 3328  ;;  %vm916_vm11 = vsmask.f32 7440  ;;  %v1188_v25 = vsel %vm12936_vm9, %v10485_v58, %v1187_v15  ;;  %v813_v26 = vsel %vm12787_vm2, %v664_v39, %v812_v21  ;;  %v818_v27 = vld [vmem:[#allocation2 + $0x3c] sm:$0x1] }
  0x37   : > { %v821_v28 = vld [vmem:[#allocation2 + $0x40] sm:$0xf]  ;;  %v824_v29 = vld [vmem:[#allocation2 + $0x44] sm:$0x1]  ;;  %1435 = vrot.lane.b32.xlu1 %v10527_v18, %s12730_s13  ;;  %v12988_v31 = vsel %vm12936_vm9, %v10484_v19, %v1183_v20  ;;  %814 = vst [vmem:[#allocation2 + $0x34] sm:$0x1] %v813_v26  ;;  %v679_v32 = vor.u32 %v677_v4, %v676_v22  ;;  %v819_v34 = vsel %vm12787_vm2, %v672_v51, %v818_v27  ;;  %vm13046_vm12 = vmor %vm915_vm10, %vm916_vm11 }
  0x38   : > { %v680_v33 = vrot.slane %v676_v22, 4  ;;  %v547_v35 = vld [vmem:[%s12819_s11 + $0x50] sm:$0xff]  ;;  %v10543_v37 = vcombine.low %v12988_v31, %v1188_v25  ;;  %v10489_v39 = vrot.slane %v12932_v62, 9  ;;  %820 = vst [vmem:[#allocation2 + $0x3c] sm:$0x1] %v819_v34  ;;  %v919_v40 = vshrl.u32 %v12875_v24, 16 }
  0x39   : > { %v822_v41 = vsel %vm12846_vm6, %v679_v32, %v821_v28  ;;  %v922_v45 = vshll.u32 %v12875_v24, 16  ;;  %v928_v47 = vshll.u32 %v12891_v36, 16  ;;  %s12731_s14 = smov 32   ;;  %v10519_v51 = vcombine.low %v12955_v9, %v12988_v31 }
  0x3a   : > { %v825_v44 = vsel %vm12787_vm2, %v680_v33, %v824_v29  ;;  %1471 = vrot.lane.b32.xlu0 %v10543_v37, %s12731_s14  ;;  %v13005_v48 = vld [vmem:[#allocation2 + $0x1c] sm:$0x1]  ;;  %v13007_v50 = vld [vmem:[#allocation2 + $0x24] sm:$0x1]  ;;  %823 = vst [vmem:[#allocation2 + $0x40] sm:$0xf] %v822_v41  ;;  %v13012_v60 = vpack.c.bf16 %v547_v35, %v547_v35 }
  0x3b   : > { %826 = vst [vmem:[#allocation2 + $0x44] sm:$0x1] %v825_v44  ;;  %v921_v58 = vrot.slane %v919_v40, 4  ;;  %v933_v59 = vshrl.u32 %v12963_v12, 16  ;;  %1437 = vrot.lane.b32.xlu1 %v10528_v23, %s12730_s13  ;;  %v1191_v24 = vrot.slane %v13005_v48, 5  ;;  %v1195_v36 = vrot.slane %v13007_v50, 5 }
  0x3c   : > { %v10490_v1 = vrot.slane %v12949_v6, 9  ;;  %v924_v2 = vrot.slane %v922_v45, 5  ;;  %v13018_v3 = vld [vmem:[#allocation2 + $0x2c] sm:$0x1]  ;;  %v936_v5 = vshll.u32 %v12963_v12, 16  ;;  %v942_v8 = vshll.u32 %v12965_v14, 16 }
  0x3d   : > { %v935_v4 = vrot.slane %v933_v59, 4  ;;  %v947_v9 = vshrl.u32 %v12918_v53, 16  ;;  %v1192_v15 = vsel %vm12936_vm9, %v10486_v16, %v1191_v24  ;;  %v1196_v17 = vsel %vm12936_vm9, %v10487_v55, %v1195_v36 }
  0x3e   : > { %v1199_v18 = vrot.slane %v13018_v3, 5  ;;  %v925_v19 = vor.u32 %v924_v2, %v921_v58  ;;  %v10544_v20 = vcombine.low %v1192_v15, %v1196_v17  ;;  %v13030_v21 = vld [vmem:[#allocation2 + $0x34] sm:$0x1]  ;;  %v13032_v22 = vcombine.low %v1188_v25, %v1192_v15  ;;  %v12302_v15 = vld [vmem:[%s18407_s1 + $0x38] sm:$0xff]  }
  0x3f   : > { %v930_v12 = vrot.slane %v928_v47, 5  ;;  %v938_v14 = vrot.slane %v936_v5, 5  ;;  %1439 = vrot.lane.b32.xlu1 %v10529_v38, %s12730_s13  ;;  %v1203_v23 = vrot.slane %v13030_v21, 5  ;;  %v13040_v55 = vld [vmem:[#allocation2 + $0x3c] sm:$0x1]  ;;  %v944_v27 = vrot.slane %v942_v8, 5 }
  0x40   : > { %v1200_v16 = vsel %vm12936_vm9, %v10488_v61, %v1199_v18  ;;  %v926_v26 = vrot.slane %v925_v19, 4  ;;  %1473 = vrot.lane.b32.xlu0 %v10544_v20, %s12731_s14  ;;  %v1207_v25 = vrot.slane %v13040_v55, 5  ;;  %v949_v31 = vrot.slane %v947_v9, 4 }
  0x41   : > { %v939_v29 = vor.u32 %v938_v14, %v935_v4  ;;  %v950_v61 = vshll.u32 %v12918_v53, 16  ;;  %v13053_v32 = vsel %vm12936_vm9, %v10489_v39, %v1203_v23  ;;  %v13055_v33 = vld [vmem:[#allocation2 + $0x40] sm:$0xf]  ;;  %v13059_v35 = vcombine.low %v1196_v17, %v1200_v16 }
  0x42   : > { %v13057_v34 = vld [vmem:[#allocation2 + $0x44] sm:$0x1]  ;;  %v956_v37 = vshll.u32 %v12951_v7, 16  ;;  %v961_v38 = vshrl.u32 %v12920_v54, 16  ;;  %v10545_v40 = vcombine.low %v1200_v16, %v13053_v32  ;;  %v13066_v41 = vsel %vm12936_vm9, %v10490_v1, %v1207_v25 }
  0x43   : > { %v10499_v53 = vrot.slane %v13055_v33, 9  ;;  %v1275_v39 = vrot.slane %v13057_v34, 5  ;;  %1409 = vrot.lane.b32.xlu1 %v10519_v51, %s12729_s12  ;;  %v931_v44 = vsel %vm13046_vm12, %v926_v26, %v930_v12  ;;  %v940_v45 = vrot.slane %v939_v29, 4  ;;  %v12301_v51 = vld [vmem:[%s18407_s1 + $0x78] sm:$0xff]   ;;  %v12303_v26 = vld [vmem:[%s18407_s1 + $0x70] sm:$0xff]  }
  0x44   : > { %v952_v47 = vrot.slane %v950_v61, 5  ;;  %v963_v7 = vrot.slane %v961_v38, 4  ;;  %1475 = vrot.lane.b32.xlu0 %v10545_v40, %s12731_s14  ;;  %v964_v59 = vshll.u32 %v12920_v54, 16  ;;  %v970_v24 = vshll.u32 %v13005_v48, 16  ;;  %11493 = vmatprep.subr.bf16.mxu0 %v12301_v51  ;;  %v12307_v51 = vld [vmem:[%s18407_s1 + $0x60] sm:$0xff]  }
  0x45   : > { %v13076_v58 = vsel %vm12936_vm9, %v10499_v53, %v1275_v39  ;;  %v975_v36 = vshrl.u32 %v12908_v43, 16  ;;  %v13088_v2 = vsel %vm13046_vm12, %v940_v45, %v944_v27  ;;  %v958_v5 = vrot.slane %v956_v37, 5  ;;  %11494 = vmatpush3.bf16.msra.mxu0 %v12302_v15  ;;  %v12305_v37 = vld [vmem:[%s18407_s1 + $0x68] sm:$0xff]  }
  0x46   : > { %v10546_v1 = vcombine.low %v13066_v41, %v13076_v58  ;;  %v953_v4 = vor.u32 %v952_v47, %v949_v31  ;;  %v10511_v8 = vcombine.low %v931_v44, %v13088_v2  ;;  %v966_v54 = vrot.slane %v964_v59, 5  ;;  %11495 = vmatprep.subr.bf16.mxu0 %v12303_v26  ;;  %v12306_v44 = vld [vmem:[%s18407_s1 + $0x28] sm:$0xff]   ;;  %v357_v26 = vld [vmem:[#allocation2 + $0x60] sm:$0x1] }
  0x47   : > { %v972_v9 = vrot.slane %v970_v24, 5  ;;  %v977_v48 = vrot.slane %v975_v36, 4  ;;  %1411 = vrot.lane.b32.xlu1 %v13032_v22, %s12729_s12  ;;  %v978_v18 = vshll.u32 %v12908_v43, 16  ;;  %v984_v19 = vshll.u32 %v13007_v50, 16 }
  0x48   : > { %v954_v17 = vrot.slane %v953_v4, 4  ;;  %v989_v20 = vshrl.u32 %v12910_v49, 16  ;;  %1477 = vrot.lane.b32.xlu0 %v10546_v1, %s12731_s14  ;;  %v967_v12 = vor.u32 %v966_v54, %v963_v7  ;;  %v992_v14 = vshll.u32 %v12910_v49, 16  ;;  %v12304_v49 = vld [vmem:[%s18407_s1 + $0x30] sm:$0xff]   ;;  %v13137_v1 = vld [vmem:[#allocation2 + $0x4c] sm:$0x1] }
  0x49   : > { %v998_v16 = vshll.u32 %v13018_v3, 16  ;;  %v1003_v23 = vshrl.u32 %v12932_v62, 16  ;;  %v980_v50 = vrot.slane %v978_v18, 5  ;;  %v986_v27 = vrot.slane %v984_v19, 5  ;;  %11496 = vmatpush3.bf16.msra.mxu0 %v12304_v49 }
  0x4a   : > { %v13108_v43 = vsel %vm13046_vm12, %v954_v17, %v958_v5  ;;  %v991_v25 = vrot.slane %v989_v20, 4  ;;  %v968_v29 = vrot.slane %v967_v12, 4  ;;  %v994_v31 = vrot.slane %v992_v14, 5  ;;  %11497 = vmatprep.subr.bf16.mxu0 %v12305_v37  ;;  %v12308_v12 = vld [vmem:[%s18407_s1 + $0x20] sm:$0xff]  }
  0x4b   : > { %v10535_v3 = vcombine.low %v13088_v2, %v13108_v43  ;;  %v1000_v61 = vrot.slane %v998_v16, 5  ;;  %1413 = vrot.lane.b32.xlu1 %v13059_v35, %s12729_s12  ;;  %v981_v38 = vor.u32 %v980_v50, %v977_v48  ;;  %v1005_v40 = vrot.slane %v1003_v23, 4  ;;  %v354_v23 = vld [vmem:[#allocation2 + $0x58] sm:$0x1]  ;;  %v404_v50 = vld [vmem:[#allocation2 + $0x5c] sm:$0x1] }
  0x4c   : > { %v1006_v53 = vshll.u32 %v12932_v62, 16  ;;  %v1012_v39 = vshll.u32 %v13030_v21, 16  ;;  %1369 = vrot.lane.b32.xlu0 %v10511_v8, %s12731_s14  ;;  %v13128_v45 = vsel %vm13046_vm12, %v968_v29, %v972_v9  ;;  %v995_v47 = vor.u32 %v994_v31, %v991_v25 }
  0x4d   : > { %v1017_v7 = vshrl.u32 %v12949_v6, 16  ;;  %v1020_v59 = vshll.u32 %v12949_v6, 16  ;;  %v10512_v62 = vcombine.low %v13108_v43, %v13128_v45  ;;  %v982_v21 = vrot.slane %v981_v38, 4  ;;  %11498 = vmatpush3.bf16.msra.mxu0 %v12306_v44 }
  0x4e   : > { %v1008_v24 = vrot.slane %v1006_v53, 5  ;;  %v1014_v36 = vrot.slane %v1012_v39, 5  ;;  %v996_v4 = vrot.slane %v995_v47, 4  ;;  %v1026_v54 = vshll.u32 %v13040_v55, 16  ;;  %11499 = vmatprep.subr.bf16.mxu0 %v12307_v51  ;;  %v13177_v39 = vld [vmem:[#allocation2 + $0x50] sm:$0xf] }
  0x4f   : > { %v1019_v5 = vrot.slane %v1017_v7, 4  ;;  %v1022_v8 = vrot.slane %v1020_v59, 5  ;;  %1371 = vrot.lane.b32.xlu1 %v10512_v62, %s12731_s14  ;;  %v13143_v9 = vsel %vm13046_vm12, %v982_v21, %v986_v27  ;;  %v10551_v15 = vcombine.low %v13055_v33, %v12905_v42  ;;  %v12309_v27 = vld [vmem:[%s18407_s1 + $0x58] sm:$0xff]   ;;  %v13191_v51 = vld [vmem:[#allocation2 + $0x54] sm:$0x1] }
  0x50   : > { %v1009_v48 = vor.u32 %v1008_v24, %v1005_v40  ;;  %v13149_v17 = vcombine.low %v13053_v32, %v13066_v41  ;;  %1511 = vrot.lane.b32.xlu0 %v10512_v62, %s12730_s13  ;;  %v13154_v18 = vsel %vm13046_vm12, %v996_v4, %v1000_v61  ;;  %v10536_v55 = vcombine.low %v13128_v45, %v13143_v9  ;;  %v407_v61 = vld [vmem:[#allocation2 + $0x64] sm:$0x1]  ;;  %v12311_v4 = vld [vmem:[%s18407_s1 + $0x50] sm:$0xff]  }
  0x51   : > { %v1023_v19 = vor.u32 %v1022_v8, %v1019_v5  ;;  %v1028_v20 = vrot.slane %v1026_v54, 5  ;;  %v10513_v32 = vcombine.low %v13143_v9, %v13154_v18  ;;  %v1242_v14 = vshrl.u32 %v13055_v33, 16  ;;  %11500 = vmatpush3.bf16.msra.mxu0 %v12308_v12 }
  0x52   : > { %v1010_v41 = vrot.slane %v1009_v48, 4  ;;  %v1245_v16 = vshll.u32 %v13055_v33, 16  ;;  %v1251_v49 = vshll.u32 %v13057_v34, 16  ;;  %v1282_v29 = vshrl.u32 %v12905_v42, 16  ;;  %v12310_v34 = vld [vmem:[%s18407_s1 + $0x18] sm:$0xff]   ;;  %11501 = vmatprep.subr.bf16.mxu0 %v12309_v27 }
  0x53   : > { %v1024_v25 = vrot.slane %v1023_v19, 4  ;;  %v1285_v31 = vshll.u32 %v12905_v42, 16  ;;  %1373 = vrot.lane.b32.xlu1 %v10513_v32, %s12731_s14  ;;  %v1244_v38 = vrot.slane %v1242_v14, 4  ;;  %v1291_v53 = vshll.u32 %v13137_v1, 16  ;;  %v12313_v19 = vld [vmem:[%s18407_s1 + $0x88] sm:$0xff]   ;;  %v12312_v14 = vld [vmem:[%s18407_s1 + $0x10] sm:$0xff]  }
  0x54   : > { %v13174_v37 = vsel %vm13046_vm12, %v1010_v41, %v1014_v36  ;;  %v1247_v40 = vrot.slane %v1245_v16, 5  ;;  %1513 = vrot.lane.b32.xlu0 %v10513_v32, %s12730_s13  ;;  %v1253_v7 = vrot.slane %v1251_v49, 5  ;;  %v1284_v59 = vrot.slane %v1282_v29, 4  ;;  %v360_v27 = vld [vmem:[#allocation2 + $0x68] sm:$0x1]  ;;  %12135 = vmatprep.subr.bf16.mxu1 %v12313_v19 }
  0x55   : > { %v13185_v44 = vsel %vm13046_vm12, %v1024_v25, %v1028_v20  ;;  %v10537_v47 = vcombine.low %v13154_v18, %v13174_v37  ;;  %v1287_v24 = vrot.slane %v1285_v31, 5  ;;  %v1293_v36 = vrot.slane %v1291_v53, 5  ;;  %11502 = vmatpush3.bf16.msra.mxu0 %v12310_v34  ;;  %v549_v34 = vld [vmem:[%s12819_s11 + $0x60] sm:$0xff]  ;;  %12136 = vmatpush3.bf16.msra.mxu1 %v12313_v19 }
  0x56   : > { %v10514_v62 = vcombine.low %v13174_v37, %v13185_v44  ;;  %v1248_v21 = vor.u32 %v1247_v40, %v1244_v38  ;;  %v10530_v5 = vcombine.low %v12949_v6, %v13055_v33  ;;  %v355_v8 = vsel %vm12787_vm2, 0, %v354_v23  ;;  %11503 = vmatprep.subr.bf16.mxu0 %v12311_v4 }
  0x57   : > { %v358_v54 = vsel %vm12787_vm2, 0, %v357_v26  ;;  %v405_v48 = vsel %vm12805_vm4, 0, %v404_v50  ;;  %v1288_v12 = vor.u32 %v1287_v24, %v1284_v59  ;;  %356 = vst [vmem:[#allocation2 + $0x58] sm:$0x1] %v355_v8  ;;  %v408_v32 = vsel %vm12805_vm4, 0, %v407_v61  ;;  %v548_v61 = vld [vmem:[%s12819_s11 + $0x58] sm:$0xff] }
  0x58   : > { %1375 = vrot.lane.b32.xlu1 %v10514_v62, %s12731_s14  ;;  %v1249_v20 = vrot.slane %v1248_v21, 4  ;;  %359 = vst [vmem:[#allocation2 + $0x60] sm:$0x1] %v358_v54  ;;  %406 = vst [vmem:[#allocation2 + $0x5c] sm:$0x1] %v405_v48  ;;  %v682_v41 = vshrl.u32 %v12957_v10, 16  ;;  %1515 = vrot.lane.b32.xlu0 %v10514_v62, %s12730_s13 }
  0x59   : > { %409 = vst [vmem:[#allocation2 + $0x64] sm:$0x1] %v408_v32  ;;  %v685_v16 = vshll.u32 %v12957_v10, 16  ;;  %v690_v23 = vshrl.u32 %v12983_v30, 16  ;;  %v693_v26 = vshll.u32 %v12983_v30, 16  ;;  %v1031_v50 = vshrl.u32 %v13177_v39, 16  ;;  %11504 = vmatpush3.bf16.msra.mxu0 %v12312_v14 }
  0x5a   : > { %v13221_v25 = vsel %vm13046_vm12, %v1249_v20, %v1253_v7  ;;  %v1289_v49 = vrot.slane %v1288_v12, 4  ;;  %v684_v29 = vrot.slane %v682_v41, 7  ;;  %v1034_v31 = vshll.u32 %v13177_v39, 16  ;;  %v12314_v10 = vld [vmem:[%s18407_s1 + $0x48] sm:$0xff]   ;;  %v12316_v59 = vld [vmem:[%s18407_s1 + $0x80] sm:$0xff]  }
  0x5b   : > { %v10538_v30 = vcombine.low %v13185_v44, %v13221_v25  ;;  %v692_v38 = vrot.slane %v690_v23, 7  ;;  %v1033_v40 = vrot.slane %v1031_v50, 4  ;;  %v1040_v53 = vshll.u32 %v13191_v51, 16  ;;  %v12315_v7 = vld [vmem:[%s18407_s1 + $0x8] sm:$0xff]   ;;  %v363_v32 = vld [vmem:[#allocation2 + $0x70] sm:$0x1]  ;;  %11505 = vmatprep.subr.bf16.mxu0 %v12314_v10  ;;  %12137 = vmatprep.subr.bf16.mxu1 %v12316_v59 }
  0x5c   : > { %1415 = vrot.lane.b32.xlu1 %v13149_v17, %s12729_s12  ;;  %v1294_v62 = vsel %vm13046_vm12, %v1289_v49, %v1293_v36  ;;  %v687_v21 = vor.u32 %v685_v16, %v684_v29  ;;  %v688_v24 = vrot.slane %v684_v29, 4  ;;  %v1036_v4 = vrot.slane %v1034_v31, 5  ;;  %v550_v8 = vld [vmem:[%s12819_s11 + $0x68] sm:$0xff]  ;;  %1497 = vrot.lane.b32.xlu0 %v10551_v15, %s12729_s12  ;;  %v413_v41 = vld [vmem:[#allocation2 + $0x74] sm:$0x1]  ;;  %v12317_v15 = vld [vmem:[%s18407_s1 + $0x40] sm:$0xff]  }
  0x5d   : > { %v10553_v54 = vcombine.low %v13221_v25, %v1294_v62  ;;  %v695_v48 = vor.u32 %v693_v26, %v692_v38  ;;  %v696_v19 = vrot.slane %v692_v38, 4  ;;  %v13248_v20 = vrot.slane %v1040_v53, 5  ;;  %v410_v12 = vld [vmem:[#allocation2 + $0x6c] sm:$0x1]  ;;  %v366_v14 = vld [vmem:[#allocation2 + $0x78] sm:$0x1]  ;;  %12138 = vmatpush3.bf16.msra.mxu1 %v12316_v59  ;;  %11506 = vmatpush3.bf16.msra.mxu0 %v12315_v7 }
  0x5e   : > { %v1037_v36 = vor.u32 %v1036_v4, %v1033_v40  ;;  %v361_v16 = vsel %vm12787_vm2, 0, %v360_v27  ;;  %v698_v23 = vshrl.u32 %v13012_v60, 16  ;;  %v701_v50 = vshll.u32 %v13012_v60, 16  ;;  %v827_v26 = vld [vmem:[#allocation2 + $0x58] sm:$0xf]  ;;  %11507 = vmatprep.subr.bf16.mxu0 %v12317_v15 }
  0x5f   : > { %v830_v49 = vld [vmem:[#allocation2 + $0x5c] sm:$0x1]  ;;  %v833_v29 = vld [vmem:[#allocation2 + $0x60] sm:$0xf]  ;;  %362 = vst [vmem:[#allocation2 + $0x68] sm:$0x1] %v361_v16  ;;  %v13257_v31 = vpack.c.bf16 %v548_v61, %v548_v61  ;;  %v828_v60 = vsel %vm12846_vm6, %v687_v21, %v827_v26  ;;  %v11409_v40 = vpack.c.bf16 %v549_v34, %v549_v34  ;;  %v13274_v59 = vpack.c.bf16 %v550_v8, %v550_v8 }
  0x60   : > { %1441 = vrot.lane.b32.xlu1 %v10530_v5, %s12730_s13  ;;  %v831_v27 = vsel %vm12787_vm2, %v688_v24, %v830_v49  ;;  %v834_v10 = vsel %vm12846_vm6, %v695_v48, %v833_v29  ;;  %v836_v38 = vld [vmem:[#allocation2 + $0x64] sm:$0x1]  ;;  %v416_v61 = vld [vmem:[#allocation2 + $0x7c] sm:$0x1]  ;;  %v369_v53 = vld [vmem:[#allocation2 + $0x80] sm:$0x1]  ;;  %1517 = vrot.lane.b32.xlu0 %v10553_v54, %s12730_s13 }
  0x61   : > { %v419_v62 = vld [vmem:[#allocation2 + $0x84] sm:$0x1]  ;;  %829 = vst [vmem:[#allocation2 + $0x58] sm:$0xf] %v828_v60  ;;  %832 = vst [vmem:[#allocation2 + $0x5c] sm:$0x1] %v831_v27  ;;  %v837_v6 = vsel %vm12787_vm2, %v696_v19, %v836_v38 }
  0x62   : > { %835 = vst [vmem:[#allocation2 + $0x60] sm:$0xf] %v834_v10  ;;  %v13272_v33 = vrot.slane %v1037_v36, 4  ;;  %v700_v5 = vrot.slane %v698_v23, 7  ;;  %v372_v21 = vld [vmem:[#allocation2 + $0x88] sm:$0x1] }
  0x63   : > { %v12318_v34 = vld [vmem:[%s18407_s1] sm:$0xff]   ;;  %838 = vst [vmem:[#allocation2 + $0x64] sm:$0x1] %v837_v6  ;;  %v10491_v24 = vrot.slane %v13177_v39, 9  ;;  %v411_v4 = vsel %vm12805_vm4, 0, %v410_v12  ;;  %v364_v54 = vsel %vm12787_vm2, 0, %v363_v32 }
  0x64   : > { %v414_v8 = vsel %vm12805_vm4, 0, %v413_v41  ;;  %v703_v48 = vor.u32 %v701_v50, %v700_v5  ;;  %v1211_v7 = vrot.slane %v13191_v51, 5  ;;  %412 = vst [vmem:[#allocation2 + $0x6c] sm:$0x1] %v411_v4  ;;  %365 = vst [vmem:[#allocation2 + $0x70] sm:$0x1] %v364_v54  ;;  %11508 = vmatpush3.bf16.msra.mxu0 %v12318_v34 }
  0x65   : > { %415 = vst [vmem:[#allocation2 + $0x74] sm:$0x1] %v414_v8  ;;  %v706_v19 = vshrl.u32 %v13257_v31, 16  ;;  %v551_v36 = vld [vmem:[%s12819_s11 + $0x70] sm:$0xff]  ;;  %v709_v39 = vshll.u32 %v13257_v31, 16  ;;  %v367_v12 = vsel %vm12787_vm2, 0, %v366_v14 }
  0x66   : > { %v714_v16 = vshrl.u32 %v11409_v40, 16  ;;  %v717_v32 = vshll.u32 %v11409_v40, 16  ;;  %368 = vst [vmem:[#allocation2 + $0x78] sm:$0x1] %v367_v12  ;;  %v417_v41 = vsel %vm12805_vm4, 0, %v416_v61  ;;  %v370_v51 = vsel %vm12787_vm2, 0, %v369_v53 }
  0x67   : > { %v708_v23 = vrot.slane %v706_v19, 7  ;;  %v420_v50 = vsel %vm12805_vm4, 0, %v419_v62  ;;  %v839_v15 = vld [vmem:[#allocation2 + $0x68] sm:$0xf]  ;;  %v704_v26 = vrot.slane %v700_v5, 4  ;;  %v722_v29 = vshrl.u32 %v13274_v59, 16 }
  0x68   : > { %v13298_v49 = vrot.slane %v714_v16, 7  ;;  %418 = vst [vmem:[#allocation2 + $0x7c] sm:$0x1] %v417_v41  ;;  %371 = vst [vmem:[#allocation2 + $0x80] sm:$0x1] %v370_v51  ;;  %v373_v31 = vsel %vm12787_vm2, 0, %v372_v21  ;;  %v840_v14 = vsel %vm12846_vm6, %v703_v48, %v839_v15  ;;  %v1043_v61 = vsel %vm13046_vm12, %v13272_v33, %v13248_v20 }
  0x69   : > { %421 = vst [vmem:[#allocation2 + $0x84] sm:$0x1] %v420_v50  ;;  %v712_v60 = vrot.slane %v708_v23, 4  ;;  %v725_v27 = vshll.u32 %v13274_v59, 16  ;;  %374 = vst [vmem:[#allocation2 + $0x88] sm:$0x1] %v373_v31  ;;  %v711_v53 = vor.u32 %v709_v39, %v708_v23  ;;  %v13315_v6 = vpack.c.bf16 %v551_v36, %v551_v36 }
  0x6a   : > { %v13306_v10 = vld [vmem:[#allocation2 + $0x58] sm:$0xf]  ;;  %v898_v38 = vld [vmem:[#allocation2 + $0x5c] sm:$0x1]  ;;  %v13308_v40 = vld [vmem:[#allocation2 + $0x60] sm:$0xf]  ;;  %v719_v62 = vor.u32 %v717_v32, %v13298_v49  ;;  %v13335_v50 = vsel %vm12936_vm9, %v10491_v24, %v1211_v7 }
  0x6b   : > { %841 = vst [vmem:[#allocation2 + $0x68] sm:$0xf] %v840_v14  ;;  %v900_v5 = vld [vmem:[#allocation2 + $0x64] sm:$0x1]  ;;  %v10492_v21 = vrot.slane %v13306_v10, 9  ;;  %v1215_v34 = vrot.slane %v898_v38, 5 }
  0x6c   : > { %v10493_v4 = vrot.slane %v13308_v40, 9  ;;  %v1045_v54 = vshrl.u32 %v13306_v10, 16  ;;  %v1219_v8 = vrot.slane %v900_v5, 5  ;;  %v1048_v48 = vshll.u32 %v13306_v10, 16  ;;  %v842_v12 = vld [vmem:[#allocation2 + $0x6c] sm:$0x1] }
  0x6d   : > { %v1054_v19 = vshll.u32 %v898_v38, 16  ;;  %v1059_v20 = vshrl.u32 %v13308_v40, 16  ;;  %v13324_v33 = vsel %vm12936_vm9, %v10492_v21, %v1215_v34  ;;  %v843_v39 = vsel %vm12787_vm2, %v704_v26, %v842_v12  ;;  %v845_v32 = vld [vmem:[#allocation2 + $0x70] sm:$0xf]  ;;  %v848_v23 = vld [vmem:[#allocation2 + $0x74] sm:$0x1] }
  0x6e   : > { %v1047_v36 = vrot.slane %v1045_v54, 4  ;;  %v1062_v16 = vshll.u32 %v13308_v40, 16  ;;  %v13331_v41 = vsel %vm12936_vm9, %v10493_v4, %v1219_v8  ;;  %v1050_v51 = vrot.slane %v1048_v48, 5  ;;  %844 = vst [vmem:[#allocation2 + $0x6c] sm:$0x1] %v843_v39 }
  0x6f   : > { %v851_v15 = vld [vmem:[#allocation2 + $0x78] sm:$0xf]  ;;  %v730_v31 = vshrl.u32 %v13315_v6, 16  ;;  %v10547_v26 = vcombine.low %v13324_v33, %v13331_v41  ;;  %v1061_v14 = vrot.slane %v1059_v20, 4  ;;  %v1068_v21 = vshll.u32 %v900_v5, 16 }
  0x70   : > { %v1064_v38 = vrot.slane %v1062_v16, 5  ;;  %v1051_v34 = vor.u32 %v1050_v51, %v1047_v36  ;;  %v1056_v54 = vrot.slane %v1054_v19, 5  ;;  %v846_v4 = vsel %vm12846_vm6, %v711_v53, %v845_v32  ;;  %v854_v24 = vld [vmem:[#allocation2 + $0x7c] sm:$0x1]  ;;  %v857_v39 = vld [vmem:[#allocation2 + $0x80] sm:$0xf] }
  0x71   : > { %v849_v8 = vsel %vm12787_vm2, %v712_v60, %v848_v23  ;;  %1479 = vrot.lane.b32.xlu0 %v10547_v26, %s12731_s14  ;;  %v1070_v12 = vrot.slane %v1068_v21, 5  ;;  %847 = vst [vmem:[#allocation2 + $0x70] sm:$0xf] %v846_v4  ;;  %v852_v5 = vsel %vm12846_vm6, %v719_v62, %v851_v15  ;;  %v720_v19 = vrot.slane %v13298_v49, 4  ;;  %v422_v16 = vld [vmem:[#allocation2 + $0x8c] sm:$0x1] }
  0x72   : > { %v13345_v7 = vld [vmem:[#allocation2 + $0x68] sm:$0xf]  ;;  %v1065_v48 = vor.u32 %v1064_v38, %v1061_v14  ;;  %850 = vst [vmem:[#allocation2 + $0x74] sm:$0x1] %v849_v8  ;;  %v1052_v20 = vrot.slane %v1051_v34, 4  ;;  %v10523_v32 = vcombine.low %v13335_v50, %v13324_v33  ;;  %v724_v49 = vrot.slane %v722_v29, 7 }
  0x73   : > { %v13352_v53 = vcombine.low %v13308_v40, %v13345_v7  ;;  %v1073_v60 = vshrl.u32 %v13345_v7, 16  ;;  %v1076_v36 = vshll.u32 %v13345_v7, 16  ;;  %853 = vst [vmem:[#allocation2 + $0x78] sm:$0xf] %v852_v5  ;;  %v855_v62 = vsel %vm12787_vm2, %v720_v19, %v854_v24  ;;  %v860_v51 = vld [vmem:[#allocation2 + $0x84] sm:$0x1] }
  0x74   : > { %v1066_v23 = vrot.slane %v1065_v48, 4  ;;  %v13364_v15 = vsel %vm13046_vm12, %v1052_v20, %v1056_v54  ;;  %v10494_v38 = vrot.slane %v13345_v7, 9  ;;  %856 = vst [vmem:[#allocation2 + $0x7c] sm:$0x1] %v855_v62  ;;  %v727_v29 = vor.u32 %v725_v27, %v724_v49  ;;  %v425_v8 = vld [vmem:[#allocation2 + $0x94] sm:$0x1] }
  0x75   : > { %v1075_v26 = vrot.slane %v1073_v60, 4  ;;  %v1078_v14 = vrot.slane %v1076_v36, 5  ;;  %v10515_v21 = vcombine.low %v1043_v61, %v13364_v15  ;;  %1499 = vrot.lane.b32.xlu0 %v13352_v53, %s12729_s12  ;;  %v902_v33 = vld [vmem:[#allocation2 + $0x6c] sm:$0x1]  ;;  %v728_v34 = vrot.slane %v724_v49, 4 }
  0x76   : > { %v13372_v50 = vsel %vm13046_vm12, %v1066_v23, %v1070_v12  ;;  %v1082_v4 = vshll.u32 %v902_v33, 16  ;;  %v1223_v24 = vrot.slane %v902_v33, 5  ;;  %v858_v61 = vsel %vm12846_vm6, %v727_v29, %v857_v39  ;;  %v12684_v25 = vld [vmem:[#allocation2 + $0x50] sm:$0xf] }
  0x77   : > { %v1079_v54 = vor.u32 %v1078_v14, %v1075_v26  ;;  %1377 = vrot.lane.b32.xlu1 %v10515_v21, %s12731_s14  ;;  %v861_v48 = vsel %vm12787_vm2, %v728_v34, %v860_v51  ;;  %v732_v12 = vrot.slane %v730_v31, 7  ;;  %v423_v59 = vsel %vm12805_vm4, 0, %v422_v16  ;;  %859 = vst [vmem:[#allocation2 + $0x80] sm:$0xf] %v858_v61  ;;  %v552_v51 = vld [vmem:[%s12819_s11 + $0x78] sm:$0xff] }
  0x78   : > { %v1084_v5 = vrot.slane %v1082_v4, 5  ;;  %v10531_v19 = vcombine.low %v13306_v10, %v13308_v40  ;;  %v13387_v20 = vld [vmem:[#allocation2 + $0x70] sm:$0xf]  ;;  %862 = vst [vmem:[#allocation2 + $0x84] sm:$0x1] %v861_v48  ;;  %v733_v16 = vshll.u32 %v13315_v6, 16  ;;  %v1224_v10 = vsel %vm12936_vm9, %v10494_v38, %v1223_v24 }
  0x79   : > { %v1080_v27 = vrot.slane %v1079_v54, 4  ;;  %v904_v60 = vld [vmem:[#allocation2 + $0x74] sm:$0x1]  ;;  %424 = vst [vmem:[#allocation2 + $0x8c] sm:$0x1] %v423_v59  ;;  %v10495_v36 = vrot.slane %v13387_v20, 9 }
  0x7a   : > { %v1227_v39 = vrot.slane %v904_v60, 5  ;;  %v13390_v23 = vld [vmem:[#allocation2 + $0x78] sm:$0xf]  ;;  %v1087_v31 = vshrl.u32 %v13387_v20, 16  ;;  %v1090_v40 = vshll.u32 %v13387_v20, 16  ;;  %v1096_v49 = vshll.u32 %v904_v60, 16 }
  0x7b   : > { %v13396_v62 = vsel %vm13046_vm12, %v1080_v27, %v1084_v5  ;;  %1417 = vrot.lane.b32.xlu1 %v10523_v32, %s12729_s12  ;;  %v906_v6 = vld [vmem:[#allocation2 + $0x7c] sm:$0x1]  ;;  %v1101_v33 = vshrl.u32 %v13390_v23, 16  ;;  %v1104_v38 = vshll.u32 %v13390_v23, 16  ;;  %v863_v34 = vld [vmem:[#allocation2 + $0x88] sm:$0xf]  ;;  %v735_v27 = vor.u32 %v733_v16, %v732_v12 }
  0x7c   : > { %v10516_v26 = vcombine.low %v13372_v50, %v13396_v62  ;;  %v13407_v14 = vsel %vm12936_vm9, %v10495_v36, %v1227_v39  ;;  %v1089_v21 = vrot.slane %v1087_v31, 4  ;;  %v1092_v29 = vrot.slane %v1090_v40, 5 }
  0x7d   : > { %v10548_v54 = vcombine.low %v1224_v10, %v13407_v14  ;;  %v1098_v32 = vrot.slane %v1096_v49, 5  ;;  %v1103_v4 = vrot.slane %v1101_v33, 4  ;;  %v1110_v24 = vshll.u32 %v906_v6, 16 }
  0x7e   : > { %1519 = vrot.lane.b32.xlu0 %v10516_v26, %s12730_s13  ;;  %v1093_v61 = vor.u32 %v1092_v29, %v1089_v21  ;;  %v1106_v48 = vrot.slane %v1104_v38, 5  ;;  %v10496_v59 = vrot.slane %v13390_v23, 9  ;;  %v13415_v5 = vld [vmem:[#allocation2 + $0x80] sm:$0xf]  ;;  %v1231_v36 = vrot.slane %v906_v6, 5 }
  0x7f   : > { %1443 = vrot.lane.b32.xlu1 %v10531_v19, %s12730_s13  ;;  %v908_v60 = vld [vmem:[#allocation2 + $0x84] sm:$0x1]  ;;  %v736_v39 = vrot.slane %v732_v12, 4  ;;  %v13417_v31 = vpack.c.bf16 %v552_v51, %v552_v51  ;;  %v13421_v40 = vcombine.low %v13387_v20, %v13390_v23  ;;  %v1112_v21 = vrot.slane %v1110_v24, 5  ;;  %v375_v38 = vld [vmem:[#allocation2 + $0x90] sm:$0x1] }
  0x80   : > { %v1094_v49 = vrot.slane %v1093_v61, 4  ;;  %v1107_v33 = vor.u32 %v1106_v48, %v1103_v4  ;;  %v866_v29 = vld [vmem:[#allocation2 + $0x8c] sm:$0x1]  ;;  %v10497_v19 = vrot.slane %v13415_v5, 9  ;;  %v1235_v16 = vrot.slane %v908_v60, 5 }
  0x81   : > { %v864_v12 = vsel %vm12846_vm6, %v735_v27, %v863_v34  ;;  %v867_v51 = vsel %vm12787_vm2, %v736_v39, %v866_v29  ;;  %v1115_v24 = vshrl.u32 %v13415_v5, 16  ;;  %v1315_v61 = vrot.slane %v13137_v1, 5 }
  0x82   : > { %1481 = vrot.lane.b32.xlu0 %v10548_v54, %s12731_s14  ;;  %v13431_v6 = vsel %vm13046_vm12, %v1094_v49, %v1098_v32  ;;  %v1108_v4 = vrot.slane %v1107_v33, 4  ;;  %865 = vst [vmem:[#allocation2 + $0x88] sm:$0xf] %v864_v12  ;;  %868 = vst [vmem:[#allocation2 + $0x8c] sm:$0x1] %v867_v51  ;;  %v1118_v54 = vshll.u32 %v13415_v5, 16  ;;  %v13438_v34 = vcombine.low %v13331_v41, %v1224_v10 }
  0x83   : > { %1379 = vrot.lane.b32.xlu1 %v10516_v26, %s12731_s14  ;;  %v10540_v48 = vcombine.low %v13396_v62, %v13431_v6  ;;  %v1124_v27 = vshll.u32 %v908_v60, 16  ;;  %v1117_v39 = vrot.slane %v1115_v24, 4  ;;  %v1232_v41 = vsel %vm12936_vm9, %v10496_v59, %v1231_v36  ;;  %v13456_v60 = vld [vmem:[#allocation2 + $0x98] sm:$0xf] }
  0x84   : > { %v13444_v32 = vsel %vm13046_vm12, %v1108_v4, %v1112_v21  ;;  %v1120_v49 = vrot.slane %v1118_v54, 5  ;;  %v376_v10 = vsel %vm12787_vm2, 0, %v375_v38  ;;  %v426_v26 = vsel %vm12805_vm4, 0, %v425_v8  ;;  %v13468_v8 = vld [vmem:[#allocation2 + $0x9c] sm:$0x1] }
  0x85   : > { %v10517_v1 = vcombine.low %v13431_v6, %v13444_v32  ;;  %v13460_v33 = vsel %vm12936_vm9, %v10497_v19, %v1235_v16  ;;  %v1126_v29 = vrot.slane %v1124_v27, 5  ;;  %377 = vst [vmem:[#allocation2 + $0x90] sm:$0x1] %v376_v10  ;;  %427 = vst [vmem:[#allocation2 + $0x94] sm:$0x1] %v426_v26  ;;  %v738_v12 = vshrl.u32 %v13417_v31, 16 }
  0x86   : > { %1501 = vrot.lane.b32.xlu0 %v13421_v40, %s12729_s12  ;;  %v1121_v21 = vor.u32 %v1120_v49, %v1117_v39  ;;  %v10532_v59 = vcombine.low %v13345_v7, %v13387_v20  ;;  %v741_v13 = vshll.u32 %v13417_v31, 16  ;;  %v10502_v36 = vrot.slane %v13456_v60, 9 }
  0x87   : > { %1419 = vrot.lane.b32.xlu1 %v13438_v34, %s12729_s12  ;;  %v740_v19 = vrot.slane %v738_v12, 7  ;;  %v1296_v16 = vshrl.u32 %v13456_v60, 16  ;;  %vm1531_vm13 = vcmask 261120   ;;  %v10549_v51 = vcombine.low %v1232_v41, %v13460_v33 }
  0x88   : > { %v1122_v38 = vrot.slane %v1121_v21, 4  ;;  %v1319_v7 = vrot.slane %v13468_v8, 5  ;;  %v1299_v20 = vshll.u32 %v13456_v60, 16  ;;  %12139 = vmatprep.mubr.msk.bf16.mxu1 %vm1531_vm13, %v13032_v22  ;;  %v1316_v31 = vsel %vm12936_vm9, %v10501_v56, %v1315_v61 }
  0x89   : > { %v13474_v4 = vld [vmem:[#allocation2 + $0x88] sm:$0xf]  ;;  %v910_v24 = vld [vmem:[#allocation2 + $0x8c] sm:$0x1]  ;;  %12140 = vmatmul.mubr.msk.bf16.vlgmr.msra.gmra.mxu1 %vm1531_vm13, %v13059_v35  ;;  %v743_v22 = vor.u32 %v741_v13, %v740_v19  ;;  %v744_v10 = vrot.slane %v740_v19, 4  ;;  %v1298_v26 = vrot.slane %v1296_v16, 4  ;;  %v10555_v13 = vcombine.low %v13076_v58, %v1316_v31 }
  0x8a   : > { %1521 = vrot.lane.b32.xlu0 %v10517_v1, %s12730_s13  ;;  %v13486_v54 = vsel %vm13046_vm12, %v1122_v38, %v1126_v29  ;;  %v1129_v27 = vshrl.u32 %v13474_v4, 16  ;;  %v1132_v39 = vshll.u32 %v13474_v4, 16  ;;  %v1138_v49 = vshll.u32 %v910_v24, 16  ;;  %12143 = vmatprep.mubr.msk.bf16.mxu1 %vm1531_vm13, %v13149_v17 }
  0x8b   : > { %1445 = vrot.lane.b32.xlu1 %v10532_v59, %s12730_s13  ;;  %v10541_v42 = vcombine.low %v13444_v32, %v13486_v54  ;;  %v1305_v21 = vshll.u32 %v13468_v8, 16  ;;  %v13501_v35 = vcombine.low %v13415_v5, %v13474_v4  ;;  %v1301_v38 = vrot.slane %v1299_v20, 5 }
  0x8c   : > { %v1131_v56 = vrot.slane %v1129_v27, 4  ;;  %v1134_v61 = vrot.slane %v1132_v39, 5  ;;  %v1140_v29 = vrot.slane %v1138_v49, 5  ;;  %v869_v12 = vld [vmem:[#allocation2 + $0x90] sm:$0xf]  ;;  %v10498_v27 = vrot.slane %v13474_v4, 9 }
  0x8d   : > { %v872_v59 = vld [vmem:[#allocation2 + $0x94] sm:$0x1]  ;;  %v870_v17 = vsel %vm12846_vm6, %v743_v22, %v869_v12  ;;  %v1239_v39 = vrot.slane %v910_v24, 5  ;;  %v1307_v20 = vrot.slane %v1305_v21, 5  ;;  %vm1556_vm14 = vcmask 523264  }
  0x8e   : > { %1483 = vrot.lane.b32.xlu0 %v10549_v51, %s12731_s14  ;;  %v1135_v19 = vor.u32 %v1134_v61, %v1131_v56  ;;  %v873_v16 = vsel %vm12787_vm2, %v744_v10, %v872_v59  ;;  %v10525_v51 = vcombine.low %v13407_v14, %v1232_v41  ;;  %871 = vst [vmem:[#allocation2 + $0x90] sm:$0xf] %v870_v17  ;;  %vm1573_vm15 = vcmask 785408  }
  0x8f   : > { %1381 = vrot.lane.b32.xlu1 %v10517_v1, %s12731_s14  ;;  %874 = vst [vmem:[#allocation2 + $0x94] sm:$0x1] %v873_v16  ;;  %v10533_v1 = vcombine.low %v13390_v23, %v13415_v5  ;;  %v1302_v41 = vor.u32 %v1301_v38, %v1298_v26  ;;  %v1240_v22 = vsel %vm12936_vm9, %v10498_v27, %v1239_v39 }
  0x90   : > { %v1136_v49 = vrot.slane %v1135_v19, 4  ;;  %v10526_v5 = vcombine.low %v13460_v33, %v1240_v22 }
  0x91   : > { %12144 = vmatmul.mubr.msk.bf16.gmra.mxu1 %vm1531_vm13, %v10555_v13  ;;  %v1303_v12 = vrot.slane %v1302_v41, 4  ;;  %v1320_v13 = vsel %vm12936_vm9, %v10502_v36, %v1319_v7 }
  0x92   : > { %1503 = vrot.lane.b32.xlu0 %v13501_v35, %s12729_s12  ;;  %v13515_v58 = vsel %vm13046_vm12, %v1136_v49, %v1140_v29  ;;  %12147 = vmatprep.mubr.msk.bf16.mxu1 %vm1531_vm13, %v13438_v34 }
  0x93   : > { %1421 = vrot.lane.b32.xlu1 %v10525_v51, %s12729_s12  ;;  %v10518_v14 = vcombine.low %v13486_v54, %v13515_v58 }
  0x95   : > { %v911_v24 = vld [vmem:[#allocation2 + $0x90] sm:$0xf] }
  0x96   : > { %1523 = vrot.lane.b32.xlu0 %v10518_v14, %s12730_s13  ;;  %v912_v31 = vld [vmem:[#allocation2 + $0x94] sm:$0x1]  ;;  %v10500_v10 = vrot.slane %v911_v24, 9  ;;  %v1256_v61 = vshrl.u32 %v911_v24, 16  ;;  %v1259_v21 = vshll.u32 %v911_v24, 16  ;;  %v10552_v33 = vcombine.low %v911_v24, %v13456_v60 }
  0x97   : > { %1447 = vrot.lane.b32.xlu1 %v10533_v1, %s12730_s13  ;;  %v1279_v56 = vrot.slane %v912_v31, 5  ;;  %v1265_v29 = vshll.u32 %v912_v31, 16  ;;  %v10534_v8 = vcombine.low %v13474_v4, %v911_v24 }
  0x98   : > { %v1258_v34 = vrot.slane %v1256_v61, 4  ;;  %v1261_v59 = vrot.slane %v1259_v21, 5  ;;  %v12683_v61 = vld [vmem:[#allocation2 + $0x8] sm:$0xf] }
  0x99   : > { %v1280_v23 = vsel %vm12936_vm9, %v10500_v10, %v1279_v56  ;;  %v1267_v38 = vrot.slane %v1265_v29, 5  ;;  %12148 = vmatmul.mubr.msk.bf16.gmra.mxu1 %vm1531_vm13, %v10525_v51  ;;  %v1308_v51 = vsel %vm13046_vm12, %v1303_v12, %v1307_v20  ;;  %v12682_v56 = vld [vmem:[#allocation2] sm:$0xf] }
  0x9a   : > { %v10550_v26 = vcombine.low %v1240_v22, %v1280_v23  ;;  %12151 = vmatprep.mubr.msk.bf16.mxu1 %vm1531_vm13, %v10526_v5  ;;  %v1262_v19 = vor.u32 %v1261_v59, %v1258_v34  ;;  %v10556_v17 = vcombine.low %v1280_v23, %v1320_v13  ;;  %v10503_v21 = vcombine.low %v12682_v56, %v12683_v61 }
  0x9b   : > { %1383 = vrot.lane.b32.xlu1 %v10518_v14, %s12731_s14  ;;  %v18464_v56 = vcombine.low %v13364_v15, %v13372_v50 }
  0x9c   : > { %1485 = vrot.lane.b32.xlu0 %v10550_v26, %s12731_s14  ;;  %v1263_v16 = vrot.slane %v1262_v19, 4 }
  0x9e   : > { %v13550_v36 = vsel %vm13046_vm12, %v1263_v16, %v1267_v38 }
  0x9f   : > { %1423 = vrot.lane.b32.xlu1 %v10526_v5, %s12729_s12  ;;  %v10542_v7 = vcombine.low %v13515_v58, %v13550_v36  ;;  %v10554_v60 = vcombine.low %v13550_v36, %v1308_v51  ;;  %v12323_v58 = vld [vmem:[%s18407_s1 + $0x110] sm:$0xff]  }
  0xa0   : > { %1505 = vrot.lane.b32.xlu0 %v10552_v33, %s12729_s12 }
  0xa1   : > { %12152 = vmatmul.mubr.msk.bf16.gmra.mxu1 %vm1531_vm13, %v10556_v17 }
  0xa3   : > { %1449 = vrot.lane.b32.xlu1 %v10534_v8, %s12730_s13  ;;  %v1494_v27 = vpop.permute.xlu0 %1493 }
  0xa4   : > { %1525 = vrot.lane.b32.xlu0 %v10554_v60, %s12730_s13  ;;  %v1492_v39 = vpop.permute.xlu1 %1491 }
  0xa7   : > { %v1496_v4 = vpop.permute.xlu0 %1495 }
  0xa9   : > { %v1436_v49 = vpop.permute.xlu1 %1435 }
  0xac   : > { %v1472_v20 = vpop.permute.xlu0 %1471 }
  0xad   : > { %v1438_v14 = vpop.permute.xlu1 %1437  ;;  %v1600_v5 = vsel %vm1531_vm13, %v10535_v3, %v1472_v20 }
  0xae   : > { %v1623_v38 = vsel %vm1556_vm14, %v1600_v5, %v1492_v39 }
  0xb1   : > { %v1440_v1 = vpop.permute.xlu1 %1439 }
  0xb2   : > { %v1474_v41 = vpop.permute.xlu0 %1473 }
  0xb3   : > { %v1603_v13 = vsel %vm1531_vm13, %v10536_v55, %v1474_v41 }
  0xb4   : > { %v1625_v19 = vsel %vm1556_vm14, %v1603_v13, %v1494_v27 }
  0xb5   : > { %v1410_v24 = vpop.permute.xlu1 %1409 }
  0xb6   : > { %v1476_v31 = vpop.permute.xlu0 %1475 }
  0xb7   : > { %v1606_v45 = vsel %vm1531_vm13, %v10537_v47, %v1476_v31 }
  0xb8   : > { %v1627_v8 = vsel %vm1556_vm14, %v1606_v45, %v1496_v4 }
  0xb9   : > { %v1412_v22 = vpop.permute.xlu1 %1411 }
  0xba   : > { %v1478_v10 = vpop.permute.xlu0 %1477 }
  0xbb   : > { %v1609_v47 = vsel %vm1531_vm13, %v10538_v30, %v1478_v10  ;;  %v12685_v30 = vld [vmem:[#allocation2 + $0x58] sm:$0xf] }
  0xbd   : > { %v1414_v29 = vpop.permute.xlu1 %1413 }
  0xbe   : > { %v1370_v23 = vpop.permute.xlu0 %1369 }
  0xbf   : > { %v1534_v34 = vsel %vm1531_vm13, %v10503_v21, %v1370_v23 }
  0xc0   : > { %v1558_v26 = vsel %vm1556_vm14, %v1534_v34, %v1410_v24 }
  0xc1   : > { %v1372_v12 = vpop.permute.xlu1 %1371  ;;  %v1575_v2 = vsel %vm1573_vm15, %v1558_v26, %v1436_v49 }
  0xc2   : > { %v1512_v59 = vpop.permute.xlu0 %1511  ;;  %v1537_v43 = vsel %vm1531_vm13, %v12926_v57, %v1372_v12 }
  0xc3   : > { %v1639_v33 = vsel %vm1573_vm15, %v1623_v38, %v1512_v59  ;;  %v1560_v9 = vsel %vm1556_vm14, %v1537_v43, %v1412_v22  ;;  %v10507_v22 = vcombine.low %v12684_v25, %v12685_v30 }
  0xc4   : > { %1869 = vmatprep.mubr.bf16.mxu0 %v1639_v33  ;;  %v1578_v51 = vsel %vm1573_vm15, %v1560_v9, %v1438_v14 }
  0xc5   : > { %1870 = vmatmul.mubr.bf16.vlgmr.msra.gmra.mxu0 %v1575_v2  ;;  %v1374_v17 = vpop.permute.xlu1 %1373 }
  0xc6   : > { %v1514_v3 = vpop.permute.xlu0 %1513  ;;  %v1540_v27 = vsel %vm1531_vm13, %v12916_v52, %v1374_v17 }
  0xc7   : > { %v1642_v16 = vsel %vm1573_vm15, %v1625_v19, %v1514_v3  ;;  %v1562_v18 = vsel %vm1556_vm14, %v1540_v27, %v1414_v29 }
  0xc8   : > { %1877 = vmatprep.mubr.bf16.mxu0 %v1642_v16  ;;  %v1581_v14 = vsel %vm1573_vm15, %v1562_v18, %v1440_v1 }
  0xca   : > { %v1516_v55 = vpop.permute.xlu0 %1515  ;;  %v1376_v57 = vpop.permute.xlu1 %1375 }
  0xcb   : > { %v1645_v60 = vsel %vm1573_vm15, %v1627_v8, %v1516_v55  ;;  %v1543_v4 = vsel %vm1531_vm13, %v12961_v11, %v1376_v57 }
  0xcd   : > { %1878 = vmatmul.mubr.bf16.gmra.mxu0 %v1578_v51 }
  0xce   : > { %1885 = vmatprep.mubr.bf16.mxu0 %v1645_v60  ;;  %v1498_v39 = vpop.permute.xlu0 %1497  ;;  %v1416_v49 = vpop.permute.xlu1 %1415 }
  0xcf   : > { %v1629_v20 = vsel %vm1556_vm14, %v1609_v47, %v1498_v39  ;;  %v1564_v41 = vsel %vm1556_vm14, %v1543_v4, %v1416_v49 }
  0xd2   : > { %v1518_v37 = vpop.permute.xlu0 %1517  ;;  %v1442_v24 = vpop.permute.xlu1 %1441 }
  0xd3   : > { %v1648_v52 = vsel %vm1573_vm15, %v1629_v20, %v1518_v37  ;;  %v1584_v31 = vsel %vm1573_vm15, %v1564_v41, %v1442_v24  ;;  %v13645_v41 = vld [vmem:[%s18408_s2] ss:$0 sm:$0xff] }
  0xd5   : > { %1886 = vmatmul.mubr.bf16.gmra.mxu0 %v1581_v14 }
  0xd6   : > { %1893 = vmatprep.mubr.bf16.mxu0 %v1648_v52 }
  0xdd   : > { %1894 = vmatmul.mubr.bf16.gmra.mxu0 %v1584_v31 }
  0xe3   : > { %v1480_v44 = vpop.permute.xlu0 %1479 }
  0xe4   : > { %v1612_v1 = vsel %vm1531_vm13, %v18464_v56, %v1480_v44 }
  0xe7   : > { %v1500_v11 = vpop.permute.xlu0 %1499 }
  0xe8   : > { %v1631_v21 = vsel %vm1556_vm14, %v1612_v1, %v1500_v11 }
  0xe9   : > { %v1378_v10 = vpop.permute.xlu1 %1377 }
  0xea   : > { %v1546_v61 = vsel %vm1531_vm13, %v10507_v22, %v1378_v10 }
  0xed   : > { %v1418_v29 = vpop.permute.xlu1 %1417 }
  0xee   : > { %v1566_v23 = vsel %vm1556_vm14, %v1546_v61, %v1418_v29 }
  0xf0   : > { %v1520_v5 = vpop.permute.xlu0 %1519 }
  0xf1   : > { %v1651_v34 = vsel %vm1573_vm15, %v1631_v21, %v1520_v5  ;;  %v1444_v12 = vpop.permute.xlu1 %1443  ;;  %v13652_v21 = vld [vmem:[#allocation2] sm:$0xf] }
  0xf2   : > { %1901 = vmatprep.mubr.bf16.mxu0 %v1651_v34  ;;  %v1587_v26 = vsel %vm1573_vm15, %v1566_v23, %v1444_v12 }
  0xf3   : > { %1902 = vmatmul.mubr.bf16.gmra.mxu0 %v1587_v26 }
  0xf4   : > { %v1482_v59 = vpop.permute.xlu0 %1481 }
  0xf5   : > { %v1380_v38 = vpop.permute.xlu1 %1379  ;;  %v1615_v15 = vsel %vm1531_vm13, %v10540_v48, %v1482_v59  ;;  %v2488_v59 = vshrl.u32 %v13652_v21, 16 }
  0xf6   : > { %v1549_v13 = vsel %vm1531_vm13, %v13352_v53, %v1380_v38  ;;  %v2491_v38 = vshll.u32 %v13652_v21, 16 }
  0xf8   : > { %v1502_v50 = vpop.permute.xlu0 %1501 }
  0xf9   : > { %v1633_v33 = vsel %vm1556_vm14, %v1615_v15, %v1502_v50  ;;  %v1420_v2 = vpop.permute.xlu1 %1419 }
  0xfa   : > { %v1568_v43 = vsel %vm1556_vm14, %v1549_v13, %v1420_v2 }
  0xfc   : > { %v1522_v3 = vpop.permute.xlu0 %1521 }
  0xfd   : > { %v1654_v19 = vsel %vm1573_vm15, %v1633_v33, %v1522_v3  ;;  %v1446_v17 = vpop.permute.xlu1 %1445 }
  0xfe   : > { %1909 = vmatprep.mubr.bf16.mxu0 %v1654_v19  ;;  %v1590_v16 = vsel %vm1573_vm15, %v1568_v43, %v1446_v17  ;;  %v2490_v17 = vrot.slane %v2488_v59, 4 }
  0xff   : > { %1910 = vmatmul.mubr.bf16.gmra.mxu0 %v1590_v16  ;;  %v2493_v16 = vrot.slane %v2491_v38, 5 }
 0x100   : > { %v1484_v62 = vpop.permute.xlu0 %1483 }
 0x101   : > { %v1382_v6 = vpop.permute.xlu1 %1381  ;;  %v1618_v53 = vsel %vm1531_vm13, %v10541_v42, %v1484_v62 }
 0x102   : > { %v1552_v45 = vsel %vm1531_vm13, %v13421_v40, %v1382_v6 }
 0x104   : > { %v1504_v48 = vpop.permute.xlu0 %1503 }
 0x105   : > { %v1635_v9 = vsel %vm1556_vm14, %v1618_v53, %v1504_v48  ;;  %v1422_v55 = vpop.permute.xlu1 %1421 }
 0x106   : > { %v1570_v51 = vsel %vm1556_vm14, %v1552_v45, %v1422_v55 }
 0x108   : > { %v1524_v8 = vpop.permute.xlu0 %1523 }
 0x109   : > { %v1657_v57 = vsel %vm1573_vm15, %v1635_v9, %v1524_v8  ;;  %v1448_v60 = vpop.permute.xlu1 %1447  ;;  %v13668_v8 = vld [vmem:[#allocation2 + $0x48] sm:$0xf] }
 0x10a   : > { %1917 = vmatprep.mubr.bf16.mxu0 %v1657_v57  ;;  %v1593_v27 = vsel %vm1573_vm15, %v1570_v51, %v1448_v60  ;;  %v2448_v51 = vld [vmem:[#allocation2 + $0x4] sm:$0x1]  ;;  %v2494_v60 = vor.u32 %v2493_v16, %v2490_v17 }
 0x10b   : > { %1918 = vmatmul.mubr.bf16.gmra.mxu0 %v1593_v27  ;;  %v2497_v27 = vshll.u32 %v2448_v51, 16 }
 0x10d   : > { %v1384_v32 = vpop.permute.xlu1 %1383 }
 0x10e   : > { %v1486_v54 = vpop.permute.xlu0 %1485  ;;  %v1555_v42 = vsel %vm1531_vm13, %v13501_v35, %v1384_v32  ;;  %v12321_v35 = vld [vmem:[%s18407_s1 + $0x118] sm:$0xff]  }
 0x10f   : > { %v1621_v40 = vsel %vm1531_vm13, %v10542_v7, %v1486_v54  ;;  %12155 = vmatprep.subr.bf16.mxu0 %v12321_v35 }
 0x110   : > { %12156 = vmatpush3.bf16.msra.mxu0 %v12321_v35  ;;  %v2745_v35 = vrot.slane %v2448_v51, 5 }
 0x111   : > { %v1424_v39 = vpop.permute.xlu1 %1423  ;;  %12157 = vmatprep.subr.bf16.mxu0 %v12323_v58 }
 0x112   : > { %v1506_v18 = vpop.permute.xlu0 %1505  ;;  %v1572_v37 = vsel %vm1556_vm14, %v1555_v42, %v1424_v39  ;;  %v13674_v39 = vld [vmem:[#allocation2 + $0x4c] sm:$0x1] }
 0x113   : > { %v1637_v47 = vsel %vm1556_vm14, %v1621_v40, %v1506_v18  ;;  %v2848_v18 = vshrl.u32 %v13668_v8, 16  ;;  %v2857_v17 = vshll.u32 %v13674_v39, 16 }
 0x114   : > { %12158 = vmatpush3.bf16.msra.mxu0 %v12323_v58  ;;  %v13681_v58 = vrot.slane %v2494_v60, 4 }
 0x115   : > { %v1450_v49 = vpop.permute.xlu1 %1449 }
 0x116   : > { %v1526_v4 = vpop.permute.xlu0 %1525  ;;  %v1596_v20 = vsel %vm1573_vm15, %v1572_v37, %v1450_v49  ;;  %v2851_v37 = vshll.u32 %v13668_v8, 16 }
 0x117   : > { %v1660_v14 = vsel %vm1573_vm15, %v1637_v47, %v1526_v4 }
 0x118   : > { %1925 = vmatprep.mubr.bf16.mxu0 %v1660_v14 }
 0x119   : > { %1926 = vmatmul.mubr.bf16.gmra.mxu0 %v1596_v20  ;;  %v10616_v20 = vrot.slane %v13652_v21, 9 }
 0x149   : > { %v12141_v36 = vpop.f32.mrf.mxu1 }
 0x14b   : > { %v1968_v52 = vpop.f32.mrf.mxu1 }
 0x14d   : > { %v12142_v30 = vpop.f32.mrf.mxu1 }
 0x14f   : > { %v1971_v29 = vpop.f32.mrf.mxu1 }
 0x151   : > { %v13660_v33 = vpop.f32.mrf.mxu1 }
 0x153   : > { %v1984_v48 = vpop.f32.mrf.mxu1 }
 0x155   : > { %v13672_v42 = vpop.f32.mrf.mxu1 }
 0x185   : > { %v11509_v7 = vpop.f32.mrf.mxu0 }
 0x187   : > { %v11510_v24 = vpop.f32.mrf.mxu0 }
 0x188   : > { %v11511_v31 = vadd.f32 %v11510_v24, %v11509_v7  ;;  %v10634_v7 = vrot.slane %v13668_v8, 9 }
 0x189   : > { %v11512_v44 = vpop.f32.mrf.mxu0 }
 0x18a   : > { %v1872_v25 = vadd.f32 %v11511_v31, %v13645_v41  ;;  %v2881_v31 = vrot.slane %v13674_v39, 5 }
 0x18b   : > { %v11513_v22 = vpop.f32.mrf.mxu0 }
 0x18c   : > { %v13648_v10 = vadd.f32 %v1968_v52, %v1872_v25  ;;  %v11514_v11 = vadd.f32 %v11513_v22, %v11512_v44  ;;  %v1987_v25 = vpop.f32.mrf.mxu1  ;;  %v2850_v22 = vrot.slane %v2848_v18, 4  ;;  %v13706_v38 = vsel %vm12936_vm9, %v10634_v7, %v2881_v31 }
 0x18d   : > { %v11515_v56 = vpop.f32.mrf.mxu0 }
 0x18e   : > { %v2047_v1 = vmin.f32 %v13648_v10, 0.0  ;;  %v1875_v61 = vadd.f32 %v11514_v11, %v13645_v41  ;;  %v2853_v11 = vrot.slane %v2851_v37, 5  ;;  %vm2031_vm0 = vcmp.gt.f32.partialorder %v13648_v10, 0.0  ;;  %v2354_v37 = vld [vmem:[#allocation2 + $0xc] sm:$0x1] }
 0x18f   : > { %v11516_v23 = vpop.f32.mrf.mxu0 }
 0x190   : > { %v2063_v5 = vmul.f32 1.442695, %v2047_v1  ;;  %v13654_v34 = vadd.f32 %v1971_v29, %v1875_v61  ;;  %v11517_v12 = vadd.f32 %v11516_v23, %v11515_v56  ;;  %v13694_v23 = vsel %vm12936_vm9, %v10616_v20, %v2745_v35 }
 0x191   : > { %v11518_v26 = vpop.f32.mrf.mxu0 }
 0x192   : > { %12554 = vpow2.f32 %v2063_v5  ;;  %v2048_v15 = vmin.f32 %v13654_v34, 0.0  ;;  %v1880_v50 = vadd.f32 %v11517_v12, %v13645_v41  ;;  %v13700_v12 = vld [vmem:[#allocation2 + $0x50] sm:$0xf]  ;;  %vm2032_vm4 = vcmp.gt.f32.partialorder %v13654_v34, 0.0 }
 0x193   : > { %v11519_v13 = vpop.f32.mrf.mxu0 }
 0x194   : > { %v2065_v2 = vmul.f32 1.442695, %v2048_v15  ;;  %v13662_v43 = vadd.f32 %v12141_v36, %v1880_v50  ;;  %v11520_v3 = vadd.f32 %v11519_v13, %v11518_v26  ;;  %v13683_v36 = vrot.slane %v2497_v27, 5  ;;  %v13708_v15 = vld [vmem:[#allocation2 + $0x54] sm:$0x1] }
 0x195   : > { %v11521_v19 = vpop.f32.mrf.mxu0 }
 0x196   : > { %12556 = vpow2.f32 %v2065_v2  ;;  %v2049_v62 = vmin.f32 %v13662_v43, 0.0  ;;  %v1883_v6 = vadd.f32 %v11520_v3, %v13645_v41  ;;  %v2500_v5 = vsel %vm13046_vm12, %v13681_v58, %v13683_v36 }
 0x197   : > { %v11522_v53 = vpop.f32.mrf.mxu0  ;;  %vm2033_vm5 = vcmp.gt.f32.partialorder %v13662_v43, 0.0 }
 0x198   : > { %v2067_v45 = vmul.f32 1.442695, %v2049_v62  ;;  %v13666_v9 = vadd.f32 %v12142_v30, %v1883_v6  ;;  %v11523_v55 = vadd.f32 %v11522_v53, %v11521_v19  ;;  %v2854_v19 = vor.u32 %v2853_v11, %v2850_v22  ;;  %v2357_v22 = vld [vmem:[#allocation2 + $0x10] sm:$0xf] }
 0x199   : > { %v11524_v57 = vpop.f32.mrf.mxu0  ;;  %v10624_v6 = vrot.slane %v13700_v12, 9 }
 0x19a   : > { %12558 = vpow2.f32 %v2067_v45  ;;  %v2050_v32 = vmin.f32 %v13666_v9, 0.0  ;;  %v1888_v54 = vadd.f32 %v11523_v55, %v13645_v41  ;;  %v2777_v45 = vrot.slane %v13708_v15, 5 }
 0x19b   : > { %v11525_v40 = vpop.f32.mrf.mxu0  ;;  %vm2034_vm7 = vcmp.gt.f32.partialorder %v13666_v9, 0.0 }
 0x19c   : > { %v2069_v47 = vmul.f32 1.442695, %v2050_v32  ;;  %v13678_v49 = vadd.f32 %v1984_v48, %v1888_v54  ;;  %v11526_v4 = vadd.f32 %v11525_v40, %v11524_v57  ;;  %v2600_v57 = vshrl.u32 %v13700_v12, 16  ;;  %v2351_v54 = vld [vmem:[#allocation2 + $0x8] sm:$0xf] }
 0x19d   : > { %v11527_v14 = vpop.f32.mrf.mxu0 }
 0x19e   : > { %12560 = vpow2.f32 %v2069_v47  ;;  %v2051_v52 = vmin.f32 %v13678_v49, 0.0  ;;  %v1891_v24 = vadd.f32 %v11526_v4, %v13645_v41  ;;  %v13725_v4 = vrot.slane %v2854_v19, 4 }
 0x19f   : > { %v12555_v44 = vpop.eup %12554  ;;  %v11528_v30 = vpop.f32.mrf.mxu0  ;;  %vm2035_vm8 = vcmp.gt.f32.partialorder %v13678_v49, 0.0 }
 0x1a0   : > { %v10584_v56 = vadd.f32 -1.0, %v12555_v44  ;;  %v2071_v1 = vmul.f32 1.442695, %v2051_v52  ;;  %v13689_v61 = vadd.f32 %v1987_v25, %v1891_v24  ;;  %v11529_v21 = vadd.f32 %v11528_v30, %v11527_v14 }
 0x1a1   : > { %v11530_v29 = vpop.f32.mrf.mxu0 }
 0x1a2   : > { %v2111_v26 = vsel %vm2031_vm0, %v13648_v10, %v10584_v56  ;;  %12562 = vpow2.f32 %v2071_v1  ;;  %v2052_v59 = vmin.f32 %v13689_v61, 0.0  ;;  %v1896_v2 = vadd.f32 %v11529_v21, %v13645_v41  ;;  %v2360_v56 = vld [vmem:[#allocation2 + $0x14] sm:$0x1] }
 0x1a3   : > { %v12557_v50 = vpop.eup %12556  ;;  %v11413_v13 = vpack.c.bf16 %v2111_v26, %v2111_v26  ;;  %v11531_v3 = vpop.f32.mrf.mxu0  ;;  %vm2036_vm10 = vcmp.gt.f32.partialorder %v13689_v61, 0.0 }
 0x1a4   : > { %v10585_v16 = vadd.f32 -1.0, %v12557_v50  ;;  %v2073_v62 = vmul.f32 1.442695, %v2052_v59  ;;  %v11532_v10 = vadd.f32 %v11531_v3, %v11530_v29  ;;  %v13715_v48 = vadd.f32 %v13660_v33, %v1896_v2  ;;  %v13738_v50 = vpop.f32.mrf.mxu1 }
 0x1a5   : > { %v2192_v53 = vshrl.u32 %v11413_v13, 16  ;;  %v2195_v32 = vshll.u32 %v11413_v13, 16 }
 0x1a6   : > { %v2112_v55 = vsel %vm2032_vm4, %v13654_v34, %v10585_v16  ;;  %12564 = vpow2.f32 %v2073_v62  ;;  %v1899_v51 = vadd.f32 %v11532_v10, %v13645_v41  ;;  %v2053_v18 = vmin.f32 %v13715_v48, 0.0 }
 0x1a7   : > { %v12559_v60 = vpop.eup %12558  ;;  %v2194_v27 = vrot.slane %v2192_v53, 7  ;;  %v11414_v40 = vpack.c.bf16 %v2112_v55, %v2112_v55  ;;  %v2603_v34 = vshll.u32 %v13700_v12, 16  ;;  %v2363_v53 = vld [vmem:[#allocation2 + $0x18] sm:$0xf]  ;;  %vm2037_vm11 = vcmp.gt.f32.partialorder %v13715_v48, 0.0 }
 0x1a8   : > { %v10586_v47 = vadd.f32 -1.0, %v12559_v60  ;;  %v13723_v33 = vadd.f32 %v13672_v42, %v1899_v51  ;;  %v2075_v24 = vmul.f32 1.442695, %v2053_v18  ;;  %v2366_v51 = vld [vmem:[#allocation2 + $0x1c] sm:$0x1] }
 0x1a9   : > { %v2197_v20 = vor.u32 %v2195_v32, %v2194_v27  ;;  %v2198_v14 = vrot.slane %v2194_v27, 4  ;;  %v2200_v35 = vshrl.u32 %v11414_v40, 16  ;;  %v2203_v7 = vshll.u32 %v11414_v40, 16 }
 0x1aa   : > { %v2113_v52 = vsel %vm2033_vm5, %v13662_v43, %v10586_v47  ;;  %v2054_v31 = vmin.f32 %v13723_v33, 0.0  ;;  %12566 = vpow2.f32 %v2075_v24  ;;  %v13735_v43 = vrot.slane %v2600_v57, 4 }
 0x1ab   : > { %v12561_v44 = vpop.eup %12560  ;;  %v2352_v42 = vsel %vm12846_vm6, %v2197_v20, %v2351_v54  ;;  %v2355_v25 = vsel %vm12787_vm2, %v2198_v14, %v2354_v37  ;;  %v2202_v30 = vrot.slane %v2200_v35, 7  ;;  %v11415_v11 = vpack.c.bf16 %v2113_v52, %v2113_v52  ;;  %v2000_v37 = vpop.f32.mrf.mxu1 }
 0x1ac   : > { %2353 = vst [vmem:[#allocation2 + $0x8] sm:$0xf] %v2352_v42  ;;  %2356 = vst [vmem:[#allocation2 + $0xc] sm:$0x1] %v2355_v25  ;;  %v10587_v1 = vadd.f32 -1.0, %v12561_v44  ;;  %v13741_v3 = vrot.slane %v2603_v34, 5  ;;  %v13755_v27 = vsel %vm12936_vm9, %v10624_v6, %v2777_v45 }
 0x1ad   : > { %v2077_v21 = vmul.f32 1.442695, %v2054_v31  ;;  %v2205_v29 = vor.u32 %v2203_v7, %v2202_v30  ;;  %v2206_v26 = vrot.slane %v2202_v30, 4  ;;  %v2208_v59 = vshrl.u32 %v11415_v11, 16  ;;  %v2369_v34 = vld [vmem:[#allocation2 + $0x20] sm:$0xf] }
 0x1ae   : > { %v2211_v13 = vshll.u32 %v11415_v11, 16  ;;  %v2114_v2 = vsel %vm2034_vm7, %v13666_v9, %v10587_v1  ;;  %v13749_v9 = vrot.slane %v2857_v17, 5  ;;  %v2609_v32 = vshll.u32 %v13708_v15, 16  ;;  %v12338_v1 = vld [vmem:[%s18407_s1 + $0x108] sm:$0xff]  }
 0x1af   : > { %12568 = vpow2.f32 %v2077_v21  ;;  %v12563_v19 = vpop.eup %12562  ;;  %v2358_v16 = vsel %vm12846_vm6, %v2205_v29, %v2357_v22  ;;  %v2361_v62 = vsel %vm12787_vm2, %v2206_v26, %v2360_v56  ;;  %v2210_v10 = vrot.slane %v2208_v59, 7  ;;  %v13774_v56 = vpop.f32.mrf.mxu1  ;;  %v12339_v21 = vld [vmem:[%s18407_s1 + $0xc8] sm:$0xff]   ;;  %v12340_v29 = vld [vmem:[%s18407_s1 + $0x100] sm:$0xff]   ;;  %11567 = vmatprep.subr.bf16.mxu1 %v12338_v1 }
 0x1b0   : > { %v11416_v55 = vpack.c.bf16 %v2114_v2, %v2114_v2  ;;  %2359 = vst [vmem:[#allocation2 + $0x10] sm:$0xf] %v2358_v16  ;;  %2362 = vst [vmem:[#allocation2 + $0x14] sm:$0x1] %v2361_v62  ;;  %v10588_v57 = vadd.f32 -1.0, %v12563_v19  ;;  %v2606_v12 = vor.u32 %v13741_v3, %v13735_v43  ;;  %vm2038_vm0 = vcmp.gt.f32.partialorder %v13723_v33, 0.0  ;;  %11568 = vmatpush3.bf16.msra.mxu1 %v12339_v21 }
 0x1b1   : > { %v2213_v54 = vor.u32 %v2211_v13, %v2210_v10  ;;  %v2214_v40 = vrot.slane %v2210_v10, 4  ;;  %11569 = vmatprep.subr.bf16.mxu1 %v12340_v29 }
 0x1b2   : > { %v2216_v18 = vshrl.u32 %v11416_v55, 16  ;;  %v2219_v47 = vshll.u32 %v11416_v55, 16  ;;  %v2115_v39 = vsel %vm2035_vm8, %v13678_v49, %v10588_v57  ;;  %v2372_v49 = vld [vmem:[#allocation2 + $0x24] sm:$0x1] }
 0x1b3   : > { %v11533_v60 = vpop.f32.mrf.mxu0  ;;  %v12565_v6 = vpop.eup %12564  ;;  %v2364_v45 = vsel %vm12846_vm6, %v2213_v54, %v2363_v53  ;;  %v2367_v20 = vsel %vm12787_vm2, %v2214_v40, %v2366_v51  ;;  %v11417_v35 = vpack.c.bf16 %v2115_v39, %v2115_v39  ;;  %v13767_v7 = vld [vmem:[#allocation2 + $0x8] sm:$0xf]  ;;  %v13769_v52 = vld [vmem:[#allocation2 + $0xc] sm:$0x1] }
 0x1b4   : > { %v2218_v14 = vrot.slane %v2216_v18, 7  ;;  %2365 = vst [vmem:[#allocation2 + $0x18] sm:$0xf] %v2364_v45  ;;  %2368 = vst [vmem:[#allocation2 + $0x1c] sm:$0x1] %v2367_v20  ;;  %v10589_v24 = vadd.f32 -1.0, %v12565_v6  ;;  %v2003_v6 = vpop.f32.mrf.mxu1 }
 0x1b5   : > { %v11534_v17 = vpop.f32.mrf.mxu0  ;;  %v10617_v42 = vrot.slane %v13767_v7, 9  ;;  %v2749_v25 = vrot.slane %v13769_v52, 5  ;;  %v2224_v11 = vshrl.u32 %v11417_v35, 16  ;;  %v2227_v26 = vshll.u32 %v11417_v35, 16  ;;  %v2375_v53 = vld [vmem:[#allocation2 + $0x28] sm:$0xf] }
 0x1b6   : > { %v11535_v31 = vadd.f32 %v11534_v17, %v11533_v60  ;;  %v2221_v30 = vor.u32 %v2219_v47, %v2218_v14  ;;  %v2222_v22 = vrot.slane %v2218_v14, 4  ;;  %v2116_v59 = vsel %vm2036_vm10, %v13689_v61, %v10589_v24  ;;  %v2378_v61 = vld [vmem:[#allocation2 + $0x2c] sm:$0x1]  ;;  %v12341_v18 = vld [vmem:[%s18407_s1 + $0xc0] sm:$0xff]  }
 0x1b7   : > { %v11536_v44 = vpop.f32.mrf.mxu0  ;;  %v13791_v19 = vsel %vm12936_vm9, %v10617_v42, %v2749_v25  ;;  %v2226_v10 = vrot.slane %v2224_v11, 7  ;;  %v11418_v55 = vpack.c.bf16 %v2116_v59, %v2116_v59  ;;  %v13797_v51 = vld [vmem:[#allocation2 + $0x10] sm:$0xf]  ;;  %v13804_v40 = vld [vmem:[#allocation2 + $0x14] sm:$0x1]  ;;  %v12567_v47 = vpop.eup %12566  ;;  %11570 = vmatpush3.bf16.msra.mxu1 %v12341_v18 }
 0x1b8   : > { %v1904_v2 = vadd.f32 %v11535_v31, %v13645_v41  ;;  %v2370_v16 = vsel %vm12846_vm6, %v2221_v30, %v2369_v34  ;;  %v2373_v62 = vsel %vm12787_vm2, %v2222_v22, %v2372_v49  ;;  %v10652_v54 = vcombine.low %v13694_v23, %v13791_v19  ;;  %v2381_v42 = vld [vmem:[#allocation2 + $0x30] sm:$0xf]  ;;  %v2384_v30 = vld [vmem:[#allocation2 + $0x34] sm:$0x1] }
 0x1b9   : > { %v11537_v13 = vpop.f32.mrf.mxu0  ;;  %2371 = vst [vmem:[#allocation2 + $0x20] sm:$0xf] %v2370_v16  ;;  %2374 = vst [vmem:[#allocation2 + $0x24] sm:$0x1] %v2373_v62  ;;  %v2229_v34 = vor.u32 %v2227_v26, %v2226_v10  ;;  %v2230_v39 = vrot.slane %v2226_v10, 4  ;;  %v2232_v17 = vshrl.u32 %v11418_v55, 16 }
 0x1ba   : > { %v11538_v57 = vadd.f32 %v11537_v13, %v11536_v44  ;;  %v13800_v60 = vadd.f32 %v2000_v37, %v1904_v2  ;;  %v10618_v45 = vrot.slane %v13797_v51, 9  ;;  %v12342_v37 = vld [vmem:[%s18407_s1 + $0xf8] sm:$0xff]   ;;  %v2235_v23 = vshll.u32 %v11418_v55, 16  ;;  %2975 = vrot.lane.b32.xlu1 %v10652_v54, %s12729_s12 }
 0x1bb   : > { %v10590_v20 = vadd.f32 -1.0, %v12567_v47  ;;  %v2376_v24 = vsel %vm12846_vm6, %v2229_v34, %v2375_v53  ;;  %v2379_v31 = vsel %vm12787_vm2, %v2230_v39, %v2378_v61  ;;  %v2234_v44 = vrot.slane %v2232_v17, 7  ;;  %v12343_v26 = vld [vmem:[%s18407_s1 + $0xb8] sm:$0xff]   ;;  %11571 = vmatprep.subr.bf16.mxu1 %v12342_v37  ;;  %v12345_v37 = vld [vmem:[%s18407_s1 + $0xb0] sm:$0xff]  }
 0x1bc   : > { %v2055_v14 = vmin.f32 %v13800_v60, 0.0  ;;  %v1907_v35 = vadd.f32 %v11538_v57, %v13645_v41  ;;  %v12569_v49 = vpop.eup %12568  ;;  %v2753_v25 = vrot.slane %v13804_v40, 5  ;;  %2377 = vst [vmem:[#allocation2 + $0x28] sm:$0xf] %v2376_v24  ;;  %2380 = vst [vmem:[#allocation2 + $0x2c] sm:$0x1] %v2379_v31  ;;  %11572 = vmatpush3.bf16.msra.mxu1 %v12343_v26 }
 0x1bd   : > { %v2117_v22 = vsel %vm2037_vm11, %v13715_v48, %v10590_v20  ;;  %v10591_v11 = vadd.f32 -1.0, %v12569_v49  ;;  %v2237_v59 = vor.u32 %v2235_v23, %v2234_v44  ;;  %v2238_v13 = vrot.slane %v2234_v44, 4  ;;  %v12344_v48 = vld [vmem:[%s18407_s1 + $0xf0] sm:$0xff]   ;;  %v13838_v55 = vld [vmem:[#allocation2 + $0x18] sm:$0xf]  ;;  %v12346_v49 = vld [vmem:[%s18407_s1 + $0xe8] sm:$0xff]  }
 0x1be   : > { %v2079_v1 = vmul.f32 1.442695, %v2055_v14  ;;  %v13824_v29 = vadd.f32 %v2003_v6, %v1907_v35  ;;  %v11419_v2 = vpack.c.bf16 %v2117_v22, %v2117_v22  ;;  %v2754_v16 = vsel %vm12936_vm9, %v10618_v45, %v2753_v25  ;;  %v13840_v61 = vld [vmem:[#allocation2 + $0x1c] sm:$0x1]  ;;  %11573 = vmatprep.subr.bf16.mxu1 %v12344_v48  ;;  %v2387_v24 = vld [vmem:[#allocation2 + $0x38] sm:$0xf] }
 0x1bf   : > { %v11539_v21 = vpop.f32.mrf.mxu0  ;;  %v2118_v62 = vsel %vm2038_vm0, %v13723_v33, %v10591_v11  ;;  %v2502_v57 = vshrl.u32 %v13767_v7, 16  ;;  %v2382_v54 = vsel %vm12846_vm6, %v2237_v59, %v2381_v42  ;;  %v2385_v18 = vsel %vm12787_vm2, %v2238_v13, %v2384_v30  ;;  %v2393_v26 = vld [vmem:[#allocation2 + $0x40] sm:$0xf]  ;;  %v12347_v48 = vld [vmem:[%s18407_s1 + $0xa8] sm:$0xff]  }
 0x1c0   : > { %12570 = vpow2.f32 %v2079_v1  ;;  %v2056_v53 = vmin.f32 %v13824_v29, 0.0  ;;  %v2240_v47 = vshrl.u32 %v11419_v2, 16  ;;  %v2243_v34 = vshll.u32 %v11419_v2, 16  ;;  %2383 = vst [vmem:[#allocation2 + $0x30] sm:$0xf] %v2382_v54  ;;  %11574 = vmatpush3.bf16.msra.mxu1 %v12345_v37 }
 0x1c1   : > { %v11540_v10 = vpop.f32.mrf.mxu0  ;;  %2386 = vst [vmem:[#allocation2 + $0x34] sm:$0x1] %v2385_v18  ;;  %v11420_v33 = vpack.c.bf16 %v2118_v62, %v2118_v62  ;;  %v10676_v45 = vcombine.low %v13791_v19, %v2754_v16  ;;  %v10619_v20 = vrot.slane %v13838_v55, 9  ;;  %v2757_v14 = vrot.slane %v13840_v61, 5  ;;  %v2390_v19 = vld [vmem:[#allocation2 + $0x3c] sm:$0x1]  ;;  %11575 = vmatprep.subr.bf16.mxu1 %v12346_v49 }
 0x1c2   : > { %v11541_v39 = vadd.f32 %v11540_v10, %v11539_v21  ;;  %v2081_v17 = vmul.f32 1.442695, %v2056_v53  ;;  %v2242_v23 = vrot.slane %v2240_v47, 7  ;;  %v10660_v35 = vcombine.low %v13767_v7, %v13797_v51  ;;  %v2396_v53 = vld [vmem:[#allocation2 + $0x44] sm:$0x1] }
 0x1c3   : > { %v11542_v6 = vpop.f32.mrf.mxu0  ;;  %v2248_v31 = vshrl.u32 %v11420_v33, 16  ;;  %v2251_v44 = vshll.u32 %v11420_v33, 16  ;;  %3037 = vrot.lane.b32.xlu0 %v10676_v45, %s12731_s14  ;;  %v13862_v1 = vsel %vm12936_vm9, %v10619_v20, %v2757_v14  ;;  %v2504_v2 = vrot.slane %v2502_v57, 4  ;;  %v13882_v18 = vld [vmem:[#allocation2 + $0x20] sm:$0xf] }
 0x1c4   : > { %v1912_v42 = vadd.f32 %v11541_v39, %v13645_v41  ;;  %12572 = vpow2.f32 %v2081_v17  ;;  %v2245_v30 = vor.u32 %v2243_v34, %v2242_v23  ;;  %v2246_v22 = vrot.slane %v2242_v23, 4  ;;  %3001 = vrot.lane.b32.xlu1 %v10660_v35, %s12730_s13  ;;  %v12349_v57 = vld [vmem:[%s18407_s1 + $0xe0] sm:$0xff]   ;;  %v13904_v23 = vld [vmem:[#allocation2 + $0x28] sm:$0xf]  ;;  %v13906_v20 = vld [vmem:[#allocation2 + $0x2c] sm:$0x1]  ;;  %11576 = vmatpush3.bf16.msra.mxu1 %v12347_v48 }
 0x1c5   : > { %v11543_v25 = vpop.f32.mrf.mxu0  ;;  %v2250_v21 = vrot.slane %v2248_v31, 7  ;;  %v13869_v13 = vcombine.low %v2754_v16, %v13862_v1  ;;  %v2505_v16 = vshll.u32 %v13767_v7, 16  ;;  %v13890_v39 = vld [vmem:[#allocation2 + $0x24] sm:$0x1]  ;;  %v2860_v7 = vsel %vm13046_vm12, %v13725_v4, %v13749_v9  ;;  %11577 = vmatprep.subr.bf16.mxu1 %v12349_v57 }
 0x1c6   : > { %v11544_v11 = vadd.f32 %v11543_v25, %v11542_v6  ;;  %v13866_v59 = vadd.f32 %v13738_v50, %v1912_v42  ;;  %v2388_v62 = vsel %vm12846_vm6, %v2245_v30, %v2387_v24  ;;  %v2391_v10 = vsel %vm12787_vm2, %v2246_v22, %v2390_v19  ;;  %v13879_v50 = vpop.f32.mrf.mxu1  ;;  %v12351_v30 = vld [vmem:[%s18407_s1 + $0xd8] sm:$0xff]  }
 0x1c7   : > { %2389 = vst [vmem:[#allocation2 + $0x38] sm:$0xf] %v2388_v62  ;;  %2392 = vst [vmem:[#allocation2 + $0x3c] sm:$0x1] %v2391_v10  ;;  %v2253_v47 = vor.u32 %v2251_v44, %v2250_v21  ;;  %v2254_v34 = vrot.slane %v2250_v21, 4  ;;  %12159 = vmatprep.mubr.msk.bf16.mxu0 %vm1531_vm13, %v13869_v13  ;;  %v2507_v6 = vrot.slane %v2505_v16, 5  ;;  %v13902_v37 = vcombine.low %v13797_v51, %v13838_v55 }
 0x1c8   : > { %v1915_v54 = vadd.f32 %v11544_v11, %v13645_v41  ;;  %v2057_v33 = vmin.f32 %v13866_v59, 0.0  ;;  %v2511_v45 = vshll.u32 %v13769_v52, 16  ;;  %v10620_v24 = vrot.slane %v13882_v18, 9  ;;  %v12350_v52 = vld [vmem:[%s18407_s1 + $0xa0] sm:$0xff]   ;;  %v2016_v31 = vpop.f32.mrf.mxu1 }
 0x1c9   : > { %v2394_v14 = vsel %vm12846_vm6, %v2253_v47, %v2393_v26  ;;  %v2397_v35 = vsel %vm12787_vm2, %v2254_v34, %v2396_v53  ;;  %v2508_v44 = vor.u32 %v2507_v6, %v2504_v2  ;;  %3057 = vrot.lane.b32.xlu0 %v13902_v37, %s12729_s12  ;;  %v13922_v42 = vrot.slane %v2606_v12, 4  ;;  %11578 = vmatpush3.bf16.msra.mxu1 %v12350_v52  ;;  %v12352_v47 = vld [vmem:[%s18407_s1 + $0x98] sm:$0xff]  }
 0x1ca   : > { %v13897_v17 = vadd.f32 %v13774_v56, %v1915_v54  ;;  %v2083_v49 = vmul.f32 1.442695, %v2057_v33  ;;  %2395 = vst [vmem:[#allocation2 + $0x40] sm:$0xf] %v2394_v14  ;;  %2398 = vst [vmem:[#allocation2 + $0x44] sm:$0x1] %v2397_v35  ;;  %v13942_v54 = vpop.f32.mrf.mxu1  ;;  %11579 = vmatprep.subr.bf16.mxu1 %v12351_v30 }
 0x1cb   : > { %v11545_v56 = vpop.f32.mrf.mxu0  ;;  %v13926_v25 = vrot.slane %v2609_v32, 5  ;;  %v2761_v11 = vrot.slane %v13890_v39, 5  ;;  %v10621_v21 = vrot.slane %v13904_v23, 9  ;;  %v2765_v26 = vrot.slane %v13906_v20, 5  ;;  %v12353_v14 = vld [vmem:[%s18407_s1 + $0xd0] sm:$0xff]  }
 0x1cc   : > { %v2058_v19 = vmin.f32 %v13897_v17, 0.0  ;;  %12574 = vpow2.f32 %v2083_v49  ;;  %v2509_v2 = vrot.slane %v2508_v44, 4  ;;  %v2513_v15 = vrot.slane %v2511_v45, 5  ;;  %v12354_v30 = vld [vmem:[%s18407_s1 + $0x90] sm:$0xff]  }
 0x1cd   : > { %v11546_v22 = vpop.f32.mrf.mxu0  ;;  %v12571_v43 = vpop.eup %12570  ;;  %vm2039_vm4 = vcmp.gt.f32.partialorder %v13800_v60, 0.0  ;;  %v2762_v62 = vsel %vm12936_vm9, %v10620_v24, %v2761_v11  ;;  %v13939_v10 = vsel %vm12936_vm9, %v10621_v21, %v2765_v26  ;;  %v2519_v24 = vshll.u32 %v13797_v51, 16  ;;  %11580 = vmatpush3.bf16.msra.mxu1 %v12352_v47 }
 0x1ce   : > { %v2085_v3 = vmul.f32 1.442695, %v2058_v19  ;;  %v11547_v12 = vadd.f32 %v11546_v22, %v11545_v56  ;;  %v10592_v32 = vadd.f32 -1.0, %v12571_v43  ;;  %v13946_v16 = vsel %vm13046_vm12, %v2509_v2, %v2513_v15  ;;  %11581 = vmatprep.subr.bf16.mxu1 %v12353_v14  ;;  %v2399_v2 = vld [vmem:[#allocation2 + $0x58] sm:$0xf] }
 0x1cf   : > { %v11548_v48 = vpop.f32.mrf.mxu0  ;;  %v10677_v57 = vcombine.low %v13862_v1, %v2762_v62  ;;  %v10644_v6 = vcombine.low %v2500_v5, %v13946_v16  ;;  %v13960_v45 = vcombine.low %v2762_v62, %v13939_v10  ;;  %v2516_v1 = vshrl.u32 %v13797_v51, 16  ;;  %v2402_v15 = vld [vmem:[#allocation2 + $0x5c] sm:$0x1] }
 0x1d0   : > { %12576 = vpow2.f32 %v2085_v3  ;;  %v1920_v53 = vadd.f32 %v11547_v12, %v13645_v41  ;;  %v2119_v34 = vsel %vm2039_vm4, %v13800_v60, %v10592_v32  ;;  %vm2040_vm5 = vcmp.gt.f32.partialorder %v13824_v29, 0.0 }
 0x1d1   : > { %v11549_v33 = vpop.f32.mrf.mxu0  ;;  %v12573_v35 = vpop.eup %12572  ;;  %v11421_v49 = vpack.c.bf16 %v2119_v34, %v2119_v34  ;;  %3039 = vrot.lane.b32.xlu0 %v10677_v57, %s12731_s14  ;;  %2935 = vrot.lane.b32.xlu1 %v10644_v6, %s12731_s14  ;;  %v2518_v36 = vrot.slane %v2516_v1, 4  ;;  %v2525_v5 = vshll.u32 %v13804_v40, 16  ;;  %vm2041_vm7 = vcmp.gt.f32.partialorder %v13866_v59, 0.0 }
 0x1d2   : > { %v11550_v60 = vadd.f32 %v11549_v33, %v11548_v48  ;;  %v13966_v56 = vadd.f32 %v2016_v31, %v1920_v53  ;;  %v10593_v58 = vadd.f32 -1.0, %v12573_v35  ;;  %12160 = vmatmul.mubr.msk.bf16.vlgmr.msra.gmra.mxu0 %vm1531_vm13, %v13960_v45  ;;  %v2019_v31 = vpop.f32.mrf.mxu1  ;;  %v13979_v51 = vcombine.low %v13882_v18, %v13904_v23  ;;  %11582 = vmatpush3.bf16.msra.mxu1 %v12354_v30 }
 0x1d3   : > { %v2256_v52 = vshrl.u32 %v11421_v49, 16  ;;  %v2530_v44 = vshrl.u32 %v13838_v55, 16  ;;  %v10661_v11 = vcombine.low %v13838_v55, %v13882_v18  ;;  %v2521_v21 = vrot.slane %v2519_v24, 5 }
 0x1d4   : > { %v2059_v19 = vmin.f32 %v13966_v56, 0.0  ;;  %v2120_v22 = vsel %vm2040_vm5, %v13824_v29, %v10593_v58  ;;  %v1923_v40 = vadd.f32 %v11550_v60, %v13645_v41  ;;  %v2259_v43 = vshll.u32 %v11421_v49, 16  ;;  %v14002_v58 = vld [vmem:[#allocation2 + $0x30] sm:$0xf] }
 0x1d5   : > { %v2258_v26 = vrot.slane %v2256_v52, 7  ;;  %v11422_v3 = vpack.c.bf16 %v2120_v22, %v2120_v22  ;;  %3059 = vrot.lane.b32.xlu0 %v13979_v51, %s12729_s12  ;;  %vm2042_vm8 = vcmp.gt.f32.partialorder %v13897_v17, 0.0  ;;  %2977 = vrot.lane.b32.xlu1 %v13869_v13, %s12729_s12  ;;  %v2522_v29 = vor.u32 %v2521_v21, %v2518_v36 }
 0x1d6   : > { %v2087_v12 = vmul.f32 1.442695, %v2059_v19  ;;  %v13992_v32 = vadd.f32 %v2019_v31, %v1923_v40  ;;  %v2527_v48 = vrot.slane %v2525_v5, 5  ;;  %v2533_v62 = vshll.u32 %v13838_v55, 16  ;;  %v2405_v55 = vld [vmem:[#allocation2 + $0x60] sm:$0xf] }
 0x1d7   : > { %v2261_v53 = vor.u32 %v2259_v43, %v2258_v26  ;;  %v2262_v57 = vrot.slane %v2258_v26, 4  ;;  %v2264_v47 = vshrl.u32 %v11422_v3, 16  ;;  %v2532_v34 = vrot.slane %v2530_v44, 4  ;;  %v2408_v5 = vld [vmem:[#allocation2 + $0x64] sm:$0x1] }
 0x1d8   : > { %v2267_v33 = vshll.u32 %v11422_v3, 16  ;;  %12578 = vpow2.f32 %v2087_v12  ;;  %v2060_v6 = vmin.f32 %v13992_v32, 0.0  ;;  %v2523_v14 = vrot.slane %v2522_v29, 4  ;;  %v14010_v26 = vld [vmem:[#allocation2 + $0x34] sm:$0x1] }
 0x1d9   : > { %v11551_v1 = vpop.f32.mrf.mxu0  ;;  %v12575_v35 = vpop.eup %12574  ;;  %v2400_v49 = vsel %vm12846_vm6, %v2261_v53, %v2399_v2  ;;  %v2403_v13 = vsel %vm12787_vm2, %v2262_v57, %v2402_v15  ;;  %v2266_v60 = vrot.slane %v2264_v47, 7  ;;  %v2535_v24 = vrot.slane %v2533_v62, 5  ;;  %3003 = vrot.lane.b32.xlu1 %v10661_v11, %s12730_s13 }
 0x1da   : > { %2401 = vst [vmem:[#allocation2 + $0x58] sm:$0xf] %v2400_v49  ;;  %2404 = vst [vmem:[#allocation2 + $0x5c] sm:$0x1] %v2403_v13  ;;  %v10594_v36 = vadd.f32 -1.0, %v12575_v35  ;;  %v14007_v31 = vsel %vm13046_vm12, %v2523_v14, %v2527_v48  ;;  %v2539_v44 = vshll.u32 %v13840_v61, 16 }
 0x1db   : > { %v2089_v52 = vmul.f32 1.442695, %v2060_v6  ;;  %v11552_v19 = vpop.f32.mrf.mxu0  ;;  %v2269_v30 = vor.u32 %v2267_v33, %v2266_v60  ;;  %v2270_v22 = vrot.slane %v2266_v60, 4  ;;  %v2536_v21 = vor.u32 %v2535_v24, %v2532_v34  ;;  %v14039_v60 = vld [vmem:[#allocation2 + $0x3c] sm:$0x1] }
 0x1dc   : > { %v11553_v40 = vadd.f32 %v11552_v19, %v11551_v1  ;;  %v2121_v3 = vsel %vm2041_vm7, %v13866_v59, %v10594_v36  ;;  %v10668_v11 = vcombine.low %v13946_v16, %v14007_v31  ;;  %v10622_v2 = vrot.slane %v14002_v58, 9  ;;  %v14028_v1 = vld [vmem:[#allocation2 + $0x38] sm:$0xf]  ;;  %v2411_v24 = vld [vmem:[#allocation2 + $0x68] sm:$0xf] }
 0x1dd   : > { %v12577_v43 = vpop.eup %12576  ;;  %12580 = vpow2.f32 %v2089_v52  ;;  %v11554_v12 = vpop.f32.mrf.mxu0  ;;  %v11423_v15 = vpack.c.bf16 %v2121_v3, %v2121_v3  ;;  %v2406_v61 = vsel %vm12846_vm6, %v2269_v30, %v2405_v55  ;;  %v2409_v29 = vsel %vm12787_vm2, %v2270_v22, %v2408_v5  ;;  %v2414_v52 = vld [vmem:[#allocation2 + $0x6c] sm:$0x1] }
 0x1de   : > { %v10595_v48 = vadd.f32 -1.0, %v12577_v43  ;;  %2407 = vst [vmem:[#allocation2 + $0x60] sm:$0xf] %v2406_v61  ;;  %2410 = vst [vmem:[#allocation2 + $0x64] sm:$0x1] %v2409_v29  ;;  %v1928_v62 = vadd.f32 %v11553_v40, %v13645_v41  ;;  %v2537_v53 = vrot.slane %v2536_v21, 4 }
 0x1df   : > { %v11555_v59 = vpop.f32.mrf.mxu0  ;;  %v2541_v57 = vrot.slane %v2539_v44, 5  ;;  %v2769_v47 = vrot.slane %v14010_v26, 5  ;;  %v2272_v34 = vshrl.u32 %v11423_v15, 16  ;;  %vm2043_vm10 = vcmp.gt.f32.partialorder %v13966_v56, 0.0  ;;  %v14053_v43 = vld [vmem:[#allocation2 + $0x40] sm:$0xf] }
 0x1e0   : > { %v2122_v33 = vsel %vm2042_vm8, %v13897_v17, %v10595_v48  ;;  %v11556_v6 = vadd.f32 %v11555_v59, %v11554_v12  ;;  %v14031_v35 = vadd.f32 %v13879_v50, %v1928_v62  ;;  %v2275_v17 = vshll.u32 %v11423_v15, 16  ;;  %v14057_v15 = vld [vmem:[#allocation2 + $0x44] sm:$0x1]  ;;  %v2417_v48 = vld [vmem:[#allocation2 + $0x70] sm:$0xf] }
 0x1e1   : > { %v11424_v14 = vpack.c.bf16 %v2122_v33, %v2122_v33  ;;  %v14035_v49 = vsel %vm13046_vm12, %v2537_v53, %v2541_v57  ;;  %v2770_v13 = vsel %vm12936_vm9, %v10622_v2, %v2769_v47  ;;  %v2274_v55 = vrot.slane %v2272_v34, 7  ;;  %v2420_v62 = vld [vmem:[#allocation2 + $0x74] sm:$0x1] }
 0x1e2   : > { %v1931_v36 = vadd.f32 %v11556_v6, %v13645_v41  ;;  %v10645_v5 = vcombine.low %v14007_v31, %v14035_v49  ;;  %v2061_v19 = vmin.f32 %v14031_v35, 0.0  ;;  %v10678_v44 = vcombine.low %v13939_v10, %v2770_v13 }
 0x1e3   : > { %v2280_v50 = vshrl.u32 %v11424_v14, 16  ;;  %v10623_v30 = vrot.slane %v14028_v1, 9  ;;  %v2277_v22 = vor.u32 %v2275_v17, %v2274_v55  ;;  %v2278_v40 = vrot.slane %v2274_v55, 4 }
 0x1e4   : > { %v14048_v21 = vadd.f32 %v13942_v54, %v1931_v36  ;;  %2937 = vrot.lane.b32.xlu1 %v10645_v5, %s12731_s14  ;;  %3077 = vrot.lane.b32.xlu0 %v10645_v5, %s12730_s13  ;;  %v2773_v41 = vrot.slane %v14039_v60, 5  ;;  %v2283_v12 = vshll.u32 %v11424_v14, 16  ;;  %v2091_v2 = vmul.f32 1.442695, %v2061_v19 }
 0x1e5   : > { %v2282_v3 = vrot.slane %v2280_v50, 7  ;;  %v10662_v10 = vcombine.low %v13904_v23, %v14002_v58  ;;  %v12579_v61 = vpop.eup %12578  ;;  %v2412_v54 = vsel %vm12846_vm6, %v2277_v22, %v2411_v24  ;;  %v2415_v29 = vsel %vm12787_vm2, %v2278_v40, %v2414_v52 }
 0x1e6   : > { %v2062_v59 = vmin.f32 %v14048_v21, 0.0  ;;  %v14066_v53 = vcombine.low %v14002_v58, %v14028_v1  ;;  %2413 = vst [vmem:[#allocation2 + $0x68] sm:$0xf] %v2412_v54  ;;  %2416 = vst [vmem:[#allocation2 + $0x6c] sm:$0x1] %v2415_v29  ;;  %v10596_v34 = vadd.f32 -1.0, %v12579_v61  ;;  %12582 = vpow2.f32 %v2091_v2 }
 0x1e7   : > { %v2285_v57 = vor.u32 %v2283_v12, %v2282_v3  ;;  %v2286_v47 = vrot.slane %v2282_v3, 4  ;;  %v14071_v6 = vsel %vm12936_vm9, %v10623_v30, %v2773_v41  ;;  %v10632_v14 = vrot.slane %v14053_v43, 9  ;;  %v2423_v2 = vld [vmem:[#allocation2 + $0x78] sm:$0xf]  ;;  %v2426_v29 = vld [vmem:[#allocation2 + $0x7c] sm:$0x1] }
 0x1e8   : > { %v2093_v33 = vmul.f32 1.442695, %v2062_v59  ;;  %3041 = vrot.lane.b32.xlu0 %v10678_v44, %s12731_s14  ;;  %2979 = vrot.lane.b32.xlu1 %v13960_v45, %s12729_s12  ;;  %v2841_v55 = vrot.slane %v14057_v15, 5  ;;  %v2123_v36 = vsel %vm2043_vm10, %v13966_v56, %v10596_v34  ;;  %v14085_v5 = vcombine.low %v2770_v13, %v14071_v6 }
 0x1e9   : > { %v2418_v17 = vsel %vm12846_vm6, %v2285_v57, %v2417_v48  ;;  %v2421_v24 = vsel %vm12787_vm2, %v2286_v47, %v2420_v62  ;;  %v11425_v45 = vpack.c.bf16 %v2123_v36, %v2123_v36  ;;  %v2544_v19 = vshrl.u32 %v13882_v18, 16  ;;  %v14110_v57 = vld [vmem:[#allocation2 + $0x60] sm:$0xf] }
 0x1ea   : > { %v12581_v52 = vpop.eup %12580  ;;  %2419 = vst [vmem:[#allocation2 + $0x70] sm:$0xf] %v2418_v17  ;;  %2422 = vst [vmem:[#allocation2 + $0x74] sm:$0x1] %v2421_v24  ;;  %12584 = vpow2.f32 %v2093_v33  ;;  %v14089_v50 = vsel %vm12936_vm9, %v10632_v14, %v2841_v55  ;;  %12163 = vmatprep.mubr.msk.bf16.mxu0 %vm1531_vm13, %v14085_v5  ;;  %v2547_v13 = vshll.u32 %v13882_v18, 16  ;;  %v2553_v30 = vshll.u32 %v13890_v39, 16 }
 0x1eb   : > { %v10597_v44 = vadd.f32 -1.0, %v12581_v52  ;;  %v10688_v56 = vcombine.low %v14089_v50, %v13706_v38  ;;  %v2288_v22 = vshrl.u32 %v11425_v45, 16  ;;  %vm2044_vm11 = vcmp.gt.f32.partialorder %v13992_v32, 0.0  ;;  %v14114_v14 = vld [vmem:[#allocation2 + $0x64] sm:$0x1] }
 0x1ec   : > { %3005 = vrot.lane.b32.xlu1 %v10662_v10, %s12730_s13  ;;  %3061 = vrot.lane.b32.xlu0 %v14066_v53, %s12729_s12  ;;  %v2546_v40 = vrot.slane %v2544_v19, 4  ;;  %v2558_v41 = vshrl.u32 %v13904_v23, 16  ;;  %v2291_v3 = vshll.u32 %v11425_v45, 16  ;;  %v2549_v38 = vrot.slane %v2547_v13, 5 }
 0x1ed   : > { %v2124_v12 = vsel %vm2044_vm11, %v13992_v32, %v10597_v44  ;;  %12164 = vmatmul.mubr.msk.bf16.gmra.mxu0 %vm1531_vm13, %v10688_v56  ;;  %v2561_v18 = vshll.u32 %v13904_v23, 16  ;;  %v2290_v39 = vrot.slane %v2288_v22, 7  ;;  %vm2045_vm0 = vcmp.gt.f32.partialorder %v14031_v35, 0.0  ;;  %v14116_v55 = vld [vmem:[#allocation2 + $0x68] sm:$0xf] }
 0x1ee   : > { %v11426_v61 = vpack.c.bf16 %v2124_v12, %v2124_v12  ;;  %v2560_v10 = vrot.slane %v2558_v41, 4  ;;  %v2567_v54 = vshll.u32 %v13906_v20, 16  ;;  %v2550_v48 = vor.u32 %v2549_v38, %v2546_v40  ;;  %v14119_v52 = vld [vmem:[#allocation2 + $0x6c] sm:$0x1]  ;;  %v2429_v56 = vld [vmem:[#allocation2 + $0x80] sm:$0xf] }
 0x1ef   : > { %v2555_v62 = vrot.slane %v2553_v30, 5  ;;  %v2563_v59 = vrot.slane %v2561_v18, 5  ;;  %v10684_v32 = vcombine.low %v14053_v43, %v13668_v8  ;;  %v2293_v47 = vor.u32 %v2291_v3, %v2290_v39  ;;  %v2432_v30 = vld [vmem:[#allocation2 + $0x84] sm:$0x1] }
 0x1f0   : > { %v2294_v34 = vrot.slane %v2290_v39, 4  ;;  %v2296_v23 = vshrl.u32 %v11426_v61, 16  ;;  %v10679_v33 = vcombine.low %v14071_v6, %v14089_v50  ;;  %v2299_v20 = vshll.u32 %v11426_v61, 16 }
 0x1f1   : > { %vm2046_vm4 = vcmp.gt.f32.partialorder %v14048_v21, 0.0  ;;  %v2551_v17 = vrot.slane %v2550_v48, 4  ;;  %v2564_v24 = vor.u32 %v2563_v59, %v2560_v10  ;;  %v2569_v36 = vrot.slane %v2567_v54, 5 }
 0x1f2   : > { %v2424_v45 = vsel %vm12846_vm6, %v2293_v47, %v2423_v2  ;;  %v2427_v19 = vsel %vm12787_vm2, %v2294_v34, %v2426_v29  ;;  %v2298_v44 = vrot.slane %v2296_v23, 7  ;;  %v10626_v13 = vrot.slane %v14110_v57, 9 }
 0x1f3   : > { %2425 = vst [vmem:[#allocation2 + $0x78] sm:$0xf] %v2424_v45  ;;  %2428 = vst [vmem:[#allocation2 + $0x7c] sm:$0x1] %v2427_v19  ;;  %v14128_v22 = vsel %vm13046_vm12, %v2551_v17, %v2555_v62  ;;  %v2565_v40 = vrot.slane %v2564_v24, 4  ;;  %v2785_v41 = vrot.slane %v14114_v14, 5  ;;  %v12583_v12 = vpop.eup %12582 }
 0x1f4   : > { %v10627_v3 = vrot.slane %v14116_v55, 9  ;;  %v2301_v38 = vor.u32 %v2299_v20, %v2298_v44  ;;  %v2302_v18 = vrot.slane %v2298_v44, 4  ;;  %v10669_v39 = vcombine.low %v14035_v49, %v14128_v22 }
 0x1f5   : > { %v2789_v2 = vrot.slane %v14119_v52, 5  ;;  %v10598_v61 = vadd.f32 -1.0, %v12583_v12  ;;  %v14137_v10 = vsel %vm13046_vm12, %v2565_v40, %v2569_v36  ;;  %v14141_v54 = vsel %vm12936_vm9, %v10626_v13, %v2785_v41 }
 0x1f6   : > { %v2572_v29 = vshrl.u32 %v14002_v58, 16  ;;  %v2430_v48 = vsel %vm12846_vm6, %v2301_v38, %v2429_v56  ;;  %v2433_v62 = vsel %vm12787_vm2, %v2302_v18, %v2432_v30  ;;  %v10646_v59 = vcombine.low %v14128_v22, %v14137_v10 }
 0x1f7   : > { %v14152_v47 = vsel %vm12936_vm9, %v10627_v3, %v2789_v2  ;;  %v12585_v34 = vpop.eup %12584  ;;  %2431 = vst [vmem:[#allocation2 + $0x80] sm:$0xf] %v2430_v48  ;;  %2434 = vst [vmem:[#allocation2 + $0x84] sm:$0x1] %v2433_v62  ;;  %v2125_v23 = vsel %vm2045_vm0, %v14031_v35, %v10598_v61  ;;  %v2575_v24 = vshll.u32 %v14002_v58, 16  ;;  %v2581_v19 = vshll.u32 %v14010_v26, 16 }
 0x1f8   : > { %v14159_v20 = vcombine.low %v14141_v54, %v14152_v47  ;;  %v2574_v17 = vrot.slane %v2572_v29, 4  ;;  %v11427_v36 = vpack.c.bf16 %v2125_v23, %v2125_v23  ;;  %v10599_v45 = vadd.f32 -1.0, %v12585_v34  ;;  %2939 = vrot.lane.b32.xlu1 %v10646_v59, %s12731_s14  ;;  %3079 = vrot.lane.b32.xlu0 %v10646_v59, %s12730_s13  ;;  %v2435_v3 = vld [vmem:[#allocation2 + $0x88] sm:$0xf]  ;;  %v2438_v29 = vld [vmem:[#allocation2 + $0x8c] sm:$0x1] }
 0x1f9   : > { %v2586_v44 = vshrl.u32 %v14028_v1, 16  ;;  %v2577_v35 = vrot.slane %v2575_v24, 5  ;;  %v2589_v56 = vshll.u32 %v14028_v1, 16  ;;  %v2595_v13 = vshll.u32 %v14039_v60, 16  ;;  %v14183_v23 = vld [vmem:[#allocation2 + $0x58] sm:$0xf] }
 0x1fa   : > { %12167 = vmatprep.mubr.msk.bf16.mxu0 %vm1531_vm13, %v14159_v20  ;;  %v2808_v58 = vshrl.u32 %v14053_v43, 16  ;;  %v2304_v30 = vshrl.u32 %v11427_v36, 16  ;;  %v2307_v40 = vshll.u32 %v11427_v36, 16  ;;  %v2126_v41 = vsel %vm2046_vm4, %v14048_v21, %v10599_v45  ;;  %v2441_v36 = vld [vmem:[#allocation2 + $0x90] sm:$0xf] }
 0x1fb   : > { %v10663_v26 = vcombine.low %v14028_v1, %v14053_v43  ;;  %v11428_v12 = vpack.c.bf16 %v2126_v41, %v2126_v41  ;;  %v2578_v38 = vor.u32 %v2577_v35, %v2574_v17  ;;  %v2588_v18 = vrot.slane %v2586_v44, 4  ;;  %v2444_v45 = vld [vmem:[#allocation2 + $0x94] sm:$0x1]  ;;  %v14208_v41 = vld [vmem:[#allocation2 + $0x98] sm:$0xf] }
 0x1fc   : > { %v2591_v2 = vrot.slane %v2589_v56, 5  ;;  %v2306_v61 = vrot.slane %v2304_v30, 7  ;;  %3063 = vrot.lane.b32.xlu0 %v10684_v32, %s12729_s12  ;;  %2981 = vrot.lane.b32.xlu1 %v14085_v5, %s12729_s12  ;;  %v2583_v60 = vrot.slane %v2581_v19, 5  ;;  %v2597_v21 = vrot.slane %v2595_v13, 5  ;;  %v14186_v32 = vld [vmem:[#allocation2 + $0x5c] sm:$0x1] }
 0x1fd   : > { %v2811_v48 = vshll.u32 %v14053_v43, 16  ;;  %v2312_v1 = vshrl.u32 %v11428_v12, 16  ;;  %v2579_v62 = vrot.slane %v2578_v38, 4  ;;  %v2810_v34 = vrot.slane %v2808_v58, 4  ;;  %v14192_v56 = vld [vmem:[#allocation2 + $0x70] sm:$0xf] }
 0x1fe   : > { %v2592_v59 = vor.u32 %v2591_v2, %v2588_v18  ;;  %v2309_v17 = vor.u32 %v2307_v40, %v2306_v61  ;;  %v2310_v24 = vrot.slane %v2306_v61, 4  ;;  %v2817_v8 = vshll.u32 %v14057_v15, 16  ;;  %v14206_v40 = vld [vmem:[#allocation2 + $0x74] sm:$0x1]  ;;  %v14214_v50 = vld [vmem:[#allocation2 + $0x78] sm:$0xf] }
 0x1ff   : > { %v2813_v44 = vrot.slane %v2811_v48, 5  ;;  %v2314_v5 = vrot.slane %v2312_v1, 7  ;;  %v2315_v19 = vshll.u32 %v11428_v12, 16  ;;  %v14190_v43 = vsel %vm13046_vm12, %v2579_v62, %v2583_v60 }
 0x200   : > { %v2593_v35 = vrot.slane %v2592_v59, 4  ;;  %v2436_v13 = vsel %vm12846_vm6, %v2309_v17, %v2435_v3  ;;  %v2439_v58 = vsel %vm12787_vm2, %v2310_v24, %v2438_v29  ;;  %3043 = vrot.lane.b32.xlu0 %v10679_v33, %s12731_s14  ;;  %3007 = vrot.lane.b32.xlu1 %v10663_v26, %s12730_s13  ;;  %v10670_v15 = vcombine.low %v14137_v10, %v14190_v43  ;;  %v14216_v33 = vld [vmem:[#allocation2 + $0x7c] sm:$0x1] }
 0x201   : > { %v10625_v30 = vrot.slane %v14183_v23, 9  ;;  %2437 = vst [vmem:[#allocation2 + $0x88] sm:$0xf] %v2436_v13  ;;  %2440 = vst [vmem:[#allocation2 + $0x8c] sm:$0x1] %v2439_v58  ;;  %v2317_v3 = vor.u32 %v2315_v19, %v2314_v5  ;;  %v2318_v12 = vrot.slane %v2314_v5, 4  ;;  %v2814_v6 = vor.u32 %v2813_v44, %v2810_v34 }
 0x202   : > { %v14212_v38 = vsel %vm13046_vm12, %v2593_v35, %v2597_v21  ;;  %v2819_v18 = vrot.slane %v2817_v8, 5  ;;  %v2781_v2 = vrot.slane %v14186_v32, 5  ;;  %v10628_v61 = vrot.slane %v14192_v56, 9  ;;  %v14222_v29 = vld [vmem:[#allocation2 + $0x9c] sm:$0x1] }
 0x203   : > { %v10647_v26 = vcombine.low %v14190_v43, %v14212_v38  ;;  %v2442_v60 = vsel %vm12846_vm6, %v2317_v3, %v2441_v36  ;;  %v2445_v21 = vsel %vm12787_vm2, %v2318_v12, %v2444_v45  ;;  %v2815_v48 = vrot.slane %v2814_v6, 4  ;;  %v14241_v45 = vld [vmem:[#allocation2 + $0x80] sm:$0xf]  ;;  %v14261_v13 = vld [vmem:[#allocation2 + $0x84] sm:$0x1] }
 0x204   : > { %v2793_v1 = vrot.slane %v14206_v40, 5  ;;  %2443 = vst [vmem:[#allocation2 + $0x90] sm:$0xf] %v2442_v60  ;;  %2446 = vst [vmem:[#allocation2 + $0x94] sm:$0x1] %v2445_v21  ;;  %v2782_v62 = vsel %vm12936_vm9, %v10625_v30, %v2781_v2  ;;  %v10629_v59 = vrot.slane %v14214_v50, 9  ;;  %v2612_v12 = vsel %vm13046_vm12, %v13922_v42, %v13926_v25 }
 0x205   : > { %2941 = vrot.lane.b32.xlu1 %v10647_v26, %s12731_s14  ;;  %3081 = vrot.lane.b32.xlu0 %v10647_v26, %s12730_s13  ;;  %v2797_v34 = vrot.slane %v14216_v33, 5  ;;  %v2614_v17 = vshrl.u32 %v14183_v23, 16  ;;  %v14238_v24 = vsel %vm13046_vm12, %v2815_v48, %v2819_v18  ;;  %v10656_v36 = vcombine.low %v13755_v27, %v2782_v62 }
 0x206   : > { %v10635_v44 = vrot.slane %v14208_v41, 9  ;;  %v2885_v8 = vrot.slane %v14222_v29, 5  ;;  %v10671_v5 = vcombine.low %v14212_v38, %v14238_v24  ;;  %v10686_v19 = vcombine.low %v14238_v24, %v2860_v7 }
 0x207   : > { %v14255_v35 = vsel %vm12936_vm9, %v10628_v61, %v2793_v1  ;;  %v14259_v27 = vsel %vm12936_vm9, %v10629_v59, %v2797_v34  ;;  %v2616_v30 = vrot.slane %v2614_v17, 4  ;;  %v2617_v3 = vshll.u32 %v14183_v23, 16 }
 0x208   : > { %v14265_v58 = vcombine.low %v14255_v35, %v14259_v27  ;;  %v2623_v4 = vshll.u32 %v14186_v32, 16  ;;  %v10680_v9 = vcombine.low %v2782_v62, %v14141_v54  ;;  %v10664_v7 = vcombine.low %v14183_v23, %v14110_v57  ;;  %v14278_v6 = vld [vmem:[#allocation2 + $0x88] sm:$0xf]  ;;  %v14280_v26 = vld [vmem:[#allocation2 + $0x8c] sm:$0x1] }
 0x209   : > { %3083 = vrot.lane.b32.xlu0 %v10686_v19, %s12730_s13  ;;  %2983 = vrot.lane.b32.xlu1 %v10656_v36, %s12729_s12  ;;  %v10630_v32 = vrot.slane %v14241_v45, 9  ;;  %v2619_v18 = vrot.slane %v2617_v3, 5  ;;  %v2801_v54 = vrot.slane %v14261_v13, 5  ;;  %v10631_v61 = vrot.slane %v14278_v6, 9 }
 0x20a   : > { %12168 = vmatmul.mubr.msk.bf16.gmra.mxu0 %vm1531_vm13, %v14265_v58  ;;  %v2625_v2 = vrot.slane %v2623_v4, 5  ;;  %v2805_v60 = vrot.slane %v14280_v26, 5  ;;  %v2628_v21 = vshrl.u32 %v14110_v57, 16  ;;  %v2631_v42 = vshll.u32 %v14110_v57, 16 }
 0x20b   : > { %v2637_v25 = vshll.u32 %v14114_v14, 16  ;;  %v2620_v48 = vor.u32 %v2619_v18, %v2616_v30  ;;  %v2642_v1 = vshrl.u32 %v14116_v55, 16  ;;  %v2645_v62 = vshll.u32 %v14116_v55, 16  ;;  %v14293_v59 = vld [vmem:[#allocation2 + $0x90] sm:$0xf] }
 0x20c   : > { %v14295_v34 = vld [vmem:[#allocation2 + $0x94] sm:$0x1]  ;;  %v2886_v17 = vsel %vm12936_vm9, %v10635_v44, %v2885_v8  ;;  %v14303_v36 = vsel %vm12936_vm9, %v10630_v32, %v2801_v54  ;;  %v14307_v14 = vsel %vm12936_vm9, %v10631_v61, %v2805_v60  ;;  %v2630_v19 = vrot.slane %v2628_v21, 4 }
 0x20d   : > { %3045 = vrot.lane.b32.xlu0 %v10680_v9, %s12731_s14  ;;  %3009 = vrot.lane.b32.xlu1 %v10664_v7, %s12730_s13  ;;  %v2633_v30 = vrot.slane %v2631_v42, 5  ;;  %v2621_v3 = vrot.slane %v2620_v48, 4  ;;  %v14311_v4 = vcombine.low %v14303_v36, %v14307_v14  ;;  %v2644_v44 = vrot.slane %v2642_v1, 4 }
 0x20e   : > { %v2647_v8 = vrot.slane %v2645_v62, 5  ;;  %v14315_v9 = vcombine.low %v14110_v57, %v14116_v55  ;;  %v10633_v32 = vrot.slane %v14293_v59, 9  ;;  %v2845_v18 = vrot.slane %v14295_v34, 5 }
 0x20f   : > { %v2634_v7 = vor.u32 %v2633_v30, %v2630_v19  ;;  %v14321_v54 = vsel %vm13046_vm12, %v2621_v3, %v2625_v2  ;;  %12171 = vmatprep.mubr.msk.bf16.mxu0 %vm1531_vm13, %v14311_v4  ;;  %v2651_v60 = vshll.u32 %v14119_v52, 16  ;;  %v2639_v42 = vrot.slane %v2637_v25, 5 }
 0x210   : > { %v2648_v61 = vor.u32 %v2647_v8, %v2644_v44  ;;  %v10648_v21 = vcombine.low %v2612_v12, %v14321_v54  ;;  %v14331_v48 = vsel %vm12936_vm9, %v10633_v32, %v2845_v18  ;;  %v2656_v62 = vshrl.u32 %v14192_v56, 16 }
 0x211   : > { %3065 = vrot.lane.b32.xlu0 %v14315_v9, %s12729_s12  ;;  %v2635_v57 = vrot.slane %v2634_v7, 4  ;;  %v10689_v2 = vcombine.low %v14331_v48, %v2886_v17  ;;  %v10681_v52 = vcombine.low %v14152_v47, %v14255_v35  ;;  %v2659_v25 = vshll.u32 %v14192_v56, 16 }
 0x212   : > { %v2649_v1 = vrot.slane %v2648_v61, 4  ;;  %2943 = vrot.lane.b32.xlu1 %v10648_v21, %s12731_s14  ;;  %v2670_v19 = vshrl.u32 %v14214_v50, 16  ;;  %v2653_v30 = vrot.slane %v2651_v60, 5  ;;  %v2658_v17 = vrot.slane %v2656_v62, 4 }
 0x213   : > { %v14340_v12 = vsel %vm13046_vm12, %v2635_v57, %v2639_v42  ;;  %12172 = vmatmul.mubr.msk.bf16.gmra.mxu0 %vm1531_vm13, %v10689_v2  ;;  %v2673_v44 = vshll.u32 %v14214_v50, 16  ;;  %v10665_v47 = vcombine.low %v14116_v55, %v14192_v56  ;;  %v2661_v35 = vrot.slane %v2659_v25, 5 }
 0x214   : > { %v10672_v3 = vcombine.low %v14321_v54, %v14340_v12  ;;  %v2665_v8 = vshll.u32 %v14206_v40, 16  ;;  %v2672_v7 = vrot.slane %v2670_v19, 4  ;;  %v14354_v32 = vcombine.low %v14192_v56, %v14214_v50 }
 0x215   : > { %3047 = vrot.lane.b32.xlu0 %v10681_v52, %s12731_s14  ;;  %v14358_v18 = vsel %vm13046_vm12, %v2649_v1, %v2653_v30  ;;  %v2675_v61 = vrot.slane %v2673_v44, 5  ;;  %v2684_v60 = vshrl.u32 %v14241_v45, 16  ;;  %v2662_v21 = vor.u32 %v2661_v35, %v2658_v17 }
 0x216   : > { %2985 = vrot.lane.b32.xlu1 %v14159_v20, %s12729_s12  ;;  %v2679_v55 = vshll.u32 %v14216_v33, 16  ;;  %v2687_v40 = vshll.u32 %v14241_v45, 16  ;;  %v2698_v57 = vshrl.u32 %v14278_v6, 16  ;;  %v2693_v2 = vshll.u32 %v14261_v13, 16 }
 0x217   : > { %v2676_v42 = vor.u32 %v2675_v61, %v2672_v7  ;;  %v2686_v56 = vrot.slane %v2684_v60, 4  ;;  %v2701_v1 = vshll.u32 %v14278_v6, 16  ;;  %v2663_v62 = vrot.slane %v2662_v21, 4 }
 0x218   : > { %v2667_v52 = vrot.slane %v2665_v8, 5  ;;  %v2689_v25 = vrot.slane %v2687_v40, 5  ;;  %v2700_v20 = vrot.slane %v2698_v57, 4  ;;  %v10649_v33 = vcombine.low %v14340_v12, %v14358_v18 }
 0x219   : > { %3067 = vrot.lane.b32.xlu0 %v14354_v32, %s12729_s12  ;;  %v2703_v19 = vrot.slane %v2701_v1, 5  ;;  %v2677_v13 = vrot.slane %v2676_v42, 4  ;;  %v2822_v44 = vshrl.u32 %v14293_v59, 16  ;;  %v2681_v35 = vrot.slane %v2679_v55, 5 }
 0x21a   : > { %3011 = vrot.lane.b32.xlu1 %v10665_v47, %s12730_s13  ;;  %v14375_v30 = vsel %vm13046_vm12, %v2663_v62, %v2667_v52  ;;  %v2690_v17 = vor.u32 %v2689_v25, %v2686_v56  ;;  %v2695_v7 = vrot.slane %v2693_v2, 5  ;;  %v2825_v47 = vshll.u32 %v14293_v59, 16 }
 0x21b   : > { %v10673_v8 = vcombine.low %v14358_v18, %v14375_v30  ;;  %v2704_v60 = vor.u32 %v2703_v19, %v2700_v20  ;;  %v2824_v21 = vrot.slane %v2822_v44, 4  ;;  %v10682_v40 = vcombine.low %v14259_v27, %v14303_v36 }
 0x21c   : > { %v2691_v61 = vrot.slane %v2690_v17, 4  ;;  %v2707_v57 = vshll.u32 %v14280_v26, 16  ;;  %v14388_v55 = vsel %vm13046_vm12, %v2677_v13, %v2681_v35  ;;  %v2827_v56 = vrot.slane %v2825_v47, 5 }
 0x21d   : > { %3085 = vrot.lane.b32.xlu0 %v10649_v33, %s12730_s13  ;;  %v2831_v2 = vshll.u32 %v14295_v34, 16  ;;  %v2705_v27 = vrot.slane %v2704_v60, 4  ;;  %v14402_v36 = vcombine.low %v14241_v45, %v14278_v6  ;;  %v2862_v20 = vshrl.u32 %v14208_v41, 16 }
 0x21e   : > { %2945 = vrot.lane.b32.xlu1 %v10649_v33, %s12731_s14  ;;  %v14392_v42 = vsel %vm13046_vm12, %v2691_v61, %v2695_v7  ;;  %v2828_v26 = vor.u32 %v2827_v56, %v2824_v21  ;;  %v2709_v62 = vrot.slane %v2707_v57, 5  ;;  %v2865_v34 = vshll.u32 %v14208_v41, 16 }
 0x21f   : > { %v10674_v1 = vcombine.low %v14388_v55, %v14392_v42  ;;  %v2833_v25 = vrot.slane %v2831_v2, 5  ;;  %v10666_v33 = vcombine.low %v14214_v50, %v14241_v45  ;;  %v10650_v17 = vcombine.low %v14375_v30, %v14388_v55 }
 0x220   : > { %v2829_v52 = vrot.slane %v2828_v26, 4  ;;  %v2864_v50 = vrot.slane %v2862_v20, 4  ;;  %v2867_v45 = vrot.slane %v2865_v34, 5  ;;  %v10683_v44 = vcombine.low %v14307_v14, %v14331_v48  ;;  %v12686_v26 = vld [vmem:[#allocation2] sm:$0xf] }
 0x221   : > { %3049 = vrot.lane.b32.xlu0 %v10682_v40, %s12731_s14  ;;  %v2871_v7 = vshll.u32 %v14222_v29, 16  ;;  %v10685_v14 = vcombine.low %v14293_v59, %v14208_v41  ;;  %v10667_v48 = vcombine.low %v14278_v6, %v14293_v59 }
 0x222   : > { %2987 = vrot.lane.b32.xlu1 %v14265_v58, %s12729_s12  ;;  %v14412_v58 = vsel %vm13046_vm12, %v2705_v27, %v2709_v62  ;;  %v14416_v19 = vsel %vm13046_vm12, %v2829_v52, %v2833_v25  ;;  %v2868_v35 = vor.u32 %v2867_v45, %v2864_v50  ;;  %v12687_v62 = vld [vmem:[#allocation2 + $0x8] sm:$0xf] }
 0x223   : > { %v10675_v13 = vcombine.low %v14412_v58, %v14416_v19  ;;  %v10651_v61 = vcombine.low %v14392_v42, %v14412_v58  ;;  %v2873_v21 = vrot.slane %v2871_v7, 5  ;;  %v10636_v52 = vcombine.low %v12686_v26, %v12687_v62  ;;  %v12360_v58 = vld [vmem:[%s18407_s1 + $0x1a0] sm:$0xff]  }
 0x224   : > { %v2869_v60 = vrot.slane %v2868_v35, 4 }
 0x225   : > { %3069 = vrot.lane.b32.xlu0 %v14402_v36, %s12729_s12 }
 0x226   : > { %3013 = vrot.lane.b32.xlu1 %v10666_v33, %s12730_s13  ;;  %v2874_v29 = vsel %vm13046_vm12, %v2869_v60, %v2873_v21 }
 0x229   : > { %3087 = vrot.lane.b32.xlu0 %v10650_v17, %s12730_s13 }
 0x22a   : > { %2947 = vrot.lane.b32.xlu1 %v10650_v17, %s12731_s14 }
 0x22c   : > { %v2976_v47 = vpop.permute.xlu1 %2975 }
 0x22d   : > { %3051 = vrot.lane.b32.xlu0 %v10683_v44, %s12731_s14 }
 0x22e   : > { %2989 = vrot.lane.b32.xlu1 %v14311_v4, %s12729_s12  ;;  %v10687_v4 = vcombine.low %v14416_v19, %v2874_v29 }
 0x231   : > { %3089 = vrot.lane.b32.xlu0 %v10651_v61, %s12730_s13 }
 0x232   : > { %2949 = vrot.lane.b32.xlu1 %v10651_v61, %s12731_s14 }
 0x235   : > { %3071 = vrot.lane.b32.xlu0 %v10685_v14, %s12729_s12  ;;  %v3038_v40 = vpop.permute.xlu0 %3037 }
 0x236   : > { %3015 = vrot.lane.b32.xlu1 %v10667_v48, %s12730_s13  ;;  %v3002_v57 = vpop.permute.xlu1 %3001  ;;  %v3163_v20 = vsel %vm1531_vm13, %v10668_v11, %v3038_v40 }
 0x239   : > { %3091 = vrot.lane.b32.xlu0 %v10687_v4, %s12730_s13 }
 0x23b   : > { %v3058_v56 = vpop.permute.xlu0 %3057 }
 0x23c   : > { %v3186_v33 = vsel %vm1556_vm14, %v3163_v20, %v3058_v56 }
 0x243   : > { %v2936_v2 = vpop.permute.xlu1 %2935  ;;  %v3040_v41 = vpop.permute.xlu0 %3039 }
 0x244   : > { %v3099_v6 = vsel %vm1531_vm13, %v10636_v52, %v2936_v2  ;;  %v3166_v31 = vsel %vm1531_vm13, %v10669_v39, %v3040_v41 }
 0x245   : > { %v3122_v34 = vsel %vm1556_vm14, %v3099_v6, %v2976_v47 }
 0x246   : > { %v3138_v44 = vsel %vm1573_vm15, %v3122_v34, %v3002_v57  ;;  %v12688_v34 = vld [vmem:[#allocation2 + $0x50] sm:$0xf] }
 0x247   : > { %v2978_v27 = vpop.permute.xlu1 %2977  ;;  %v3060_v25 = vpop.permute.xlu0 %3059 }
 0x248   : > { %v3188_v21 = vsel %vm1556_vm14, %v3166_v31, %v3060_v25 }
 0x24b   : > { %v3004_v59 = vpop.permute.xlu1 %3003 }
 0x256   : > { %v3078_v17 = vpop.permute.xlu0 %3077  ;;  %v2938_v45 = vpop.permute.xlu1 %2937 }
 0x257   : > { %v3202_v50 = vsel %vm1573_vm15, %v3186_v33, %v3078_v17  ;;  %v3102_v16 = vsel %vm1531_vm13, %v13902_v37, %v2938_v45 }
 0x258   : > { %3434 = vmatprep.mubr.bf16.mxu1 %v3202_v50  ;;  %v3124_v11 = vsel %vm1556_vm14, %v3102_v16, %v2978_v27 }
 0x259   : > { %3435 = vmatmul.mubr.bf16.vlgmr.msra.gmra.mxu1 %v3138_v44  ;;  %v3141_v4 = vsel %vm1573_vm15, %v3124_v11, %v3004_v59 }
 0x25a   : > { %v2980_v35 = vpop.permute.xlu1 %2979  ;;  %v3042_v7 = vpop.permute.xlu0 %3041 }
 0x25b   : > { %v3169_v39 = vsel %vm1531_vm13, %v10670_v15, %v3042_v7 }
 0x25e   : > { %v3006_v61 = vpop.permute.xlu1 %3005  ;;  %v3062_v60 = vpop.permute.xlu0 %3061 }
 0x25f   : > { %v3190_v56 = vsel %vm1556_vm14, %v3169_v39, %v3062_v60 }
 0x26a   : > { %v2940_v14 = vpop.permute.xlu1 %2939  ;;  %v3080_v29 = vpop.permute.xlu0 %3079 }
 0x26b   : > { %v3205_v48 = vsel %vm1573_vm15, %v3188_v21, %v3080_v29  ;;  %v3105_v37 = vsel %vm1531_vm13, %v13979_v51, %v2940_v14 }
 0x26c   : > { %3442 = vmatprep.mubr.bf16.mxu1 %v3205_v48  ;;  %v3126_v57 = vsel %vm1556_vm14, %v3105_v37, %v2980_v35 }
 0x26d   : > { %3443 = vmatmul.mubr.bf16.gmra.mxu1 %v3141_v4  ;;  %v3144_v26 = vsel %vm1573_vm15, %v3126_v57, %v3006_v61 }
 0x26e   : > { %v2982_v47 = vpop.permute.xlu1 %2981  ;;  %v3064_v40 = vpop.permute.xlu0 %3063 }
 0x272   : > { %v3008_v49 = vpop.permute.xlu1 %3007  ;;  %v3044_v22 = vpop.permute.xlu0 %3043 }
 0x273   : > { %v3172_v27 = vsel %vm1531_vm13, %v10671_v5, %v3044_v22 }
 0x274   : > { %v3192_v62 = vsel %vm1556_vm14, %v3172_v27, %v3064_v40 }
 0x277   : > { %v2942_v2 = vpop.permute.xlu1 %2941  ;;  %v3082_v41 = vpop.permute.xlu0 %3081 }
 0x278   : > { %v3208_v51 = vsel %vm1573_vm15, %v3190_v56, %v3082_v41  ;;  %v3108_v10 = vsel %vm1531_vm13, %v14066_v53, %v2942_v2  ;;  %v10640_v53 = vcombine.low %v12688_v34, %v14183_v23 }
 0x279   : > { %3450 = vmatprep.mubr.bf16.mxu1 %v3208_v51  ;;  %v3128_v38 = vsel %vm1556_vm14, %v3108_v10, %v2982_v47 }
 0x27a   : > { %3451 = vmatmul.mubr.bf16.gmra.mxu1 %v3144_v26  ;;  %v3147_v25 = vsel %vm1573_vm15, %v3128_v38, %v3008_v49 }
 0x27b   : > { %v2984_v43 = vpop.permute.xlu1 %2983  ;;  %v3084_v15 = vpop.permute.xlu0 %3083 }
 0x27c   : > { %v3211_v52 = vsel %vm1573_vm15, %v3192_v62, %v3084_v15 }
 0x27d   : > { %3458 = vmatprep.mubr.bf16.mxu1 %v3211_v52 }
 0x27f   : > { %v3010_v24 = vpop.permute.xlu1 %3009  ;;  %v3046_v5 = vpop.permute.xlu0 %3045 }
 0x280   : > { %v3175_v44 = vsel %vm1531_vm13, %v10672_v3, %v3046_v5 }
 0x282   : > { %3459 = vmatmul.mubr.bf16.gmra.mxu1 %v3147_v25 }
 0x283   : > { %v3066_v6 = vpop.permute.xlu0 %3065 }
 0x284   : > { %v2944_v59 = vpop.permute.xlu1 %2943  ;;  %v3194_v7 = vsel %vm1556_vm14, %v3175_v44, %v3066_v6 }
 0x285   : > { %v3111_v17 = vsel %vm1531_vm13, %v10640_v53, %v2944_v59 }
 0x286   : > { %v3130_v35 = vsel %vm1556_vm14, %v3111_v17, %v2984_v43  ;;  %v14533_v43 = vld [vmem:[%s18408_s2 + $0x1] ss:$0 sm:$0xff] }
 0x287   : > { %v3048_v20 = vpop.permute.xlu0 %3047  ;;  %v3150_v23 = vsel %vm1573_vm15, %v3130_v35, %v3010_v24 }
 0x288   : > { %v2986_v33 = vpop.permute.xlu1 %2985  ;;  %v3178_v3 = vsel %vm1531_vm13, %v10673_v8, %v3048_v20 }
 0x28b   : > { %v3068_v50 = vpop.permute.xlu0 %3067 }
 0x28c   : > { %v3012_v45 = vpop.permute.xlu1 %3011  ;;  %v3196_v29 = vsel %vm1556_vm14, %v3178_v3, %v3068_v50  ;;  %v14541_v3 = vld [vmem:[%s18409_s3] ss:$0 sm:$0xff] }
 0x28f   : > { %v3086_v61 = vpop.permute.xlu0 %3085 }
 0x290   : > { %v3214_v60 = vsel %vm1573_vm15, %v3194_v7, %v3086_v61  ;;  %v2946_v16 = vpop.permute.xlu1 %2945 }
 0x291   : > { %3466 = vmatprep.mubr.bf16.mxu1 %v3214_v60  ;;  %v3114_v21 = vsel %vm1531_vm13, %v14315_v9, %v2946_v16 }
 0x292   : > { %3467 = vmatmul.mubr.bf16.gmra.mxu1 %v3150_v23  ;;  %v3132_v14 = vsel %vm1556_vm14, %v3114_v21, %v2986_v33  ;;  %v12161_v19 = vpop.f32.mrf.mxu0 }
 0x293   : > { %v3050_v31 = vpop.permute.xlu0 %3049  ;;  %v3153_v40 = vsel %vm1573_vm15, %v3132_v14, %v3012_v45  ;;  %v4051_v45 = vld [vmem:[#allocation2] sm:$0xf] }
 0x294   : > { %v2988_v11 = vpop.permute.xlu1 %2987  ;;  %v3181_v18 = vsel %vm1531_vm13, %v10674_v1, %v3050_v31  ;;  %v3533_v10 = vpop.f32.mrf.mxu0  ;;  %v4092_v35 = vshrl.u32 %v4051_v45, 16  ;;  %v4095_v7 = vshll.u32 %v4051_v45, 16 }
 0x296   : > { %v12162_v24 = vpop.f32.mrf.mxu0  ;;  %v4094_v23 = vrot.slane %v4092_v35, 4  ;;  %v4097_v31 = vrot.slane %v4095_v7, 5 }
 0x297   : > { %v3070_v54 = vpop.permute.xlu0 %3069 }
 0x298   : > { %v3014_v12 = vpop.permute.xlu1 %3013  ;;  %v3198_v8 = vsel %vm1556_vm14, %v3181_v18, %v3070_v54  ;;  %v3536_v34 = vpop.f32.mrf.mxu0 }
 0x29b   : > { %v3088_v48 = vpop.permute.xlu0 %3087 }
 0x29c   : > { %v3217_v4 = vsel %vm1573_vm15, %v3196_v29, %v3088_v48  ;;  %v2948_v47 = vpop.permute.xlu1 %2947  ;;  %v4052_v48 = vld [vmem:[#allocation2 + $0x4] sm:$0x1] }
 0x29d   : > { %3474 = vmatprep.mubr.bf16.mxu1 %v3217_v4  ;;  %v3117_v9 = vsel %vm1531_vm13, %v14354_v32, %v2948_v47  ;;  %v4101_v4 = vshll.u32 %v4052_v48, 16  ;;  %v4098_v47 = vor.u32 %v4097_v31, %v4094_v23 }
 0x29e   : > { %3475 = vmatmul.mubr.bf16.gmra.mxu1 %v3153_v40  ;;  %v3134_v30 = vsel %vm1556_vm14, %v3117_v9, %v2988_v11 }
 0x29f   : > { %v3052_v37 = vpop.permute.xlu0 %3051  ;;  %v3156_v56 = vsel %vm1573_vm15, %v3134_v30, %v3014_v12 }
 0x2a0   : > { %v2990_v49 = vpop.permute.xlu1 %2989  ;;  %v3184_v55 = vsel %vm1531_vm13, %v10675_v13, %v3052_v37 }
 0x2a3   : > { %v3090_v22 = vpop.permute.xlu0 %3089 }
 0x2a4   : > { %v3220_v39 = vsel %vm1573_vm15, %v3198_v8, %v3090_v22  ;;  %v2950_v57 = vpop.permute.xlu1 %2949  ;;  %v10787_v8 = vrot.slane %v4051_v45, 9 }
 0x2a5   : > { %3482 = vmatprep.mubr.bf16.mxu1 %v3220_v39  ;;  %v3120_v2 = vsel %vm1531_vm13, %v14402_v36, %v2950_v57  ;;  %v12358_v36 = vld [vmem:[%s18407_s1 + $0x1a8] sm:$0xff]  }
 0x2a6   : > { %3483 = vmatmul.mubr.bf16.gmra.mxu1 %v3156_v56  ;;  %v3136_v51 = vsel %vm1556_vm14, %v3120_v2, %v2990_v49  ;;  %12175 = vmatprep.subr.bf16.mxu0 %v12358_v36  ;;  %v4349_v56 = vrot.slane %v4052_v48, 5 }
 0x2a7   : > { %v3072_v32 = vpop.permute.xlu0 %3071  ;;  %12176 = vmatpush3.bf16.msra.mxu0 %v12358_v36 }
 0x2a8   : > { %v3016_v42 = vpop.permute.xlu1 %3015  ;;  %v3200_v1 = vsel %vm1556_vm14, %v3184_v55, %v3072_v32  ;;  %12177 = vmatprep.subr.bf16.mxu0 %v12360_v58  ;;  %v12689_v32 = vld [vmem:[%s12819_s11] sm:$0xff] }
 0x2a9   : > { %v3159_v26 = vsel %vm1573_vm15, %v3136_v51, %v3016_v42  ;;  %v14555_v42 = vrot.slane %v4101_v4, 5 }
 0x2ab   : > { %v3092_v41 = vpop.permute.xlu0 %3091  ;;  %12178 = vmatpush3.bf16.msra.mxu0 %v12360_v58 }
 0x2ac   : > { %v3223_v27 = vsel %vm1573_vm15, %v3200_v1, %v3092_v41  ;;  %v14557_v1 = vrot.slane %v4098_v47, 4 }
 0x2ad   : > { %3490 = vmatprep.mubr.bf16.mxu1 %v3223_v27  ;;  %v14547_v18 = vpop.f32.mrf.mxu0 }
 0x2ae   : > { %3491 = vmatmul.mubr.bf16.gmra.mxu1 %v3159_v26 }
 0x2af   : > { %v3549_v51 = vpop.f32.mrf.mxu0 }
 0x319   : > { %v11583_v13 = vpop.f32.mrf.mxu1 }
 0x31b   : > { %v11584_v15 = vpop.f32.mrf.mxu1 }
 0x31c   : > { %v11585_v62 = vadd.f32 %v11584_v15, %v11583_v13  ;;  %v14565_v13 = vld [vmem:[#allocation2 + $0x4c] sm:$0x1] }
 0x31d   : > { %v11586_v52 = vpop.f32.mrf.mxu1 }
 0x31e   : > { %v3437_v38 = vadd.f32 %v11585_v62, %v14533_v43  ;;  %v14567_v62 = vld [vmem:[#allocation2 + $0x50] sm:$0xf] }
 0x31f   : > { %v11587_v5 = vpop.f32.mrf.mxu1  ;;  %v10795_v35 = vrot.slane %v14567_v62, 9  ;;  %v4204_v47 = vshrl.u32 %v14567_v62, 16 }
 0x320   : > { %v3534_v25 = vadd.f32 %v3533_v10, %v3437_v38  ;;  %v11588_v6 = vadd.f32 %v11587_v5, %v11586_v52  ;;  %v12690_v38 = vld [vmem:[%s12819_s11 + $0x8] sm:$0xff] }
 0x322   : > { %v3612_v59 = vmin.f32 %v3534_v25, 0.0  ;;  %v3440_v20 = vadd.f32 %v11588_v6, %v14533_v43  ;;  %vm3596_vm5 = vcmp.gt.f32.partialorder %v3534_v25, 0.0  ;;  %v4104_v6 = vsel %vm13046_vm12, %v14557_v1, %v14555_v42 }
 0x324   : > { %v3628_v53 = vmul.f32 1.442695, %v3612_v59  ;;  %v3537_v33 = vadd.f32 %v3536_v34, %v3440_v20  ;;  %v14580_v59 = vld [vmem:[#allocation2 + $0x54] sm:$0x1] }
 0x326   : > { %12586 = vpow2.f32 %v3628_v53  ;;  %v3613_v17 = vmin.f32 %v3537_v33, 0.0  ;;  %vm3597_vm7 = vcmp.gt.f32.partialorder %v3537_v33, 0.0  ;;  %v4485_v53 = vrot.slane %v14565_v13, 5 }
 0x328   : > { %v3630_v50 = vmul.f32 1.442695, %v3613_v17 }
 0x32a   : > { %12588 = vpow2.f32 %v3630_v50 }
 0x32d   : > { %v11589_v44 = vpop.f32.mrf.mxu1 }
 0x32f   : > { %v11590_v61 = vpop.f32.mrf.mxu1 }
 0x330   : > { %v11591_v60 = vadd.f32 %v11590_v61, %v11589_v44 }
 0x331   : > { %v11592_v16 = vpop.f32.mrf.mxu1 }
 0x332   : > { %v3445_v11 = vadd.f32 %v11591_v60, %v14533_v43  ;;  %v4381_v60 = vrot.slane %v14580_v59, 5 }
 0x333   : > { %v12587_v21 = vpop.eup %12586  ;;  %v11593_v54 = vpop.f32.mrf.mxu1 }
 0x334   : > { %v10754_v12 = vadd.f32 -1.0, %v12587_v21  ;;  %v14543_v14 = vadd.f32 %v12161_v19, %v3445_v11  ;;  %v11594_v29 = vadd.f32 %v11593_v54, %v11592_v16  ;;  %v14563_v19 = vld [vmem:[#allocation2 + $0x48] sm:$0xf] }
 0x335   : > { %v10805_v34 = vrot.slane %v14563_v19, 9  ;;  %v4452_v16 = vshrl.u32 %v14563_v19, 16  ;;  %v3955_v11 = vld [vmem:[#allocation2 + $0x8] sm:$0xf] }
 0x336   : > { %v3676_v40 = vsel %vm3596_vm5, %v3534_v25, %v10754_v12  ;;  %v3614_v9 = vmin.f32 %v14543_v14, 0.0  ;;  %v3448_v37 = vadd.f32 %v11594_v29, %v14533_v43  ;;  %v14574_v25 = vsel %vm12936_vm9, %v10787_v8, %v4349_v56  ;;  %v3958_v29 = vld [vmem:[#allocation2 + $0xc] sm:$0x1] }
 0x337   : > { %v12589_v49 = vpop.eup %12588  ;;  %v3699_v30 = vmul.f32 %v14541_v3, %v3676_v40  ;;  %v4455_v12 = vshll.u32 %v14563_v19, 16  ;;  %v4207_v40 = vshll.u32 %v14567_v62, 16  ;;  %v3964_v19 = vld [vmem:[#allocation2 + $0x14] sm:$0x1]  ;;  %vm3598_vm8 = vcmp.gt.f32.partialorder %v14543_v14, 0.0 }
 0x338   : > { %v10755_v22 = vadd.f32 -1.0, %v12589_v49  ;;  %v3632_v39 = vmul.f32 1.442695, %v3614_v9  ;;  %v14550_v57 = vadd.f32 %v12162_v24, %v3448_v37 }
 0x339   : > { %v14553_v2 = vadd.f32 %v12689_v32, %v3699_v30  ;;  %v14611_v62 = vrot.slane %v4455_v12, 5 }
 0x33a   : > { %v11595_v55 = vpop.f32.mrf.mxu1  ;;  %v3677_v41 = vsel %vm3597_vm7, %v3537_v33, %v10755_v22  ;;  %12590 = vpow2.f32 %v3632_v39  ;;  %v3615_v27 = vmin.f32 %v14550_v57, 0.0  ;;  %v14585_v33 = vpop.f32.mrf.mxu0  ;;  %vm3599_vm10 = vcmp.gt.f32.partialorder %v14550_v57, 0.0 }
 0x33b   : > { %18465 = vst [vmem:[#allocation6_spill] sm:$0xff] %v14553_v2  ;;  %v11429_v26 = vpack.c.bf16 %v14553_v2, %v14553_v2  ;;  %v3700_v36 = vmul.f32 %v14541_v3, %v3677_v41 }
 0x33c   : > { %v11596_v58 = vpop.f32.mrf.mxu1  ;;  %v3634_v10 = vmul.f32 1.442695, %v3615_v27  ;;  %v3552_v9 = vpop.f32.mrf.mxu0 }
 0x33d   : > { %v11597_v15 = vadd.f32 %v11596_v58, %v11595_v55  ;;  %v3796_v52 = vshrl.u32 %v11429_v26, 16  ;;  %v14570_v24 = vadd.f32 %v12690_v38, %v3700_v36  ;;  %v3799_v50 = vshll.u32 %v11429_v26, 16  ;;  %v3961_v58 = vld [vmem:[#allocation2 + $0x10] sm:$0xf] }
 0x33e   : > { %v11598_v5 = vpop.f32.mrf.mxu1  ;;  %12592 = vpow2.f32 %v3634_v10  ;;  %v4461_v55 = vshll.u32 %v14565_v13, 16  ;;  %v14606_v26 = vrot.slane %v4452_v16, 4  ;;  %v4213_v36 = vshll.u32 %v14580_v59, 16 }
 0x33f   : > { %18466 = vst [vmem:[#allocation7_spill] sm:$0xff] %v14570_v24  ;;  %v3453_v20 = vadd.f32 %v11597_v15, %v14533_v43  ;;  %v3798_v17 = vrot.slane %v3796_v52, 7  ;;  %v11430_v45 = vpack.c.bf16 %v14570_v24, %v14570_v24  ;;  %v14619_v59 = vrot.slane %v4207_v40, 5 }
 0x340   : > { %v11599_v44 = vpop.f32.mrf.mxu1  ;;  %v14631_v16 = vsel %vm12936_vm9, %v10795_v35, %v4381_v60  ;;  %v4458_v35 = vor.u32 %v14611_v62, %v14606_v26  ;;  %v12376_v26 = vld [vmem:[%s18407_s1 + $0x190] sm:$0xff]  }
 0x341   : > { %v14590_v7 = vadd.f32 %v3549_v51, %v3453_v20  ;;  %v11600_v61 = vadd.f32 %v11599_v44, %v11598_v5  ;;  %v3801_v23 = vor.u32 %v3799_v50, %v3798_v17  ;;  %v3802_v31 = vrot.slane %v3798_v17, 4  ;;  %v12377_v62 = vld [vmem:[%s18407_s1 + $0x150] sm:$0xff]  }
 0x342   : > { %v3804_v21 = vshrl.u32 %v11430_v45, 16  ;;  %v11601_v54 = vpop.f32.mrf.mxu1  ;;  %v3807_v8 = vshll.u32 %v11430_v45, 16  ;;  %v14617_v20 = vrot.slane %v4204_v47, 4  ;;  %v12691_v47 = vld [vmem:[%s12819_s11 + $0x10] sm:$0xff] }
 0x343   : > { %v3616_v48 = vmin.f32 %v14590_v7, 0.0  ;;  %v3456_v4 = vadd.f32 %v11600_v61, %v14533_v43  ;;  %v3956_v37 = vsel %vm12846_vm6, %v3801_v23, %v3955_v11  ;;  %v3959_v49 = vsel %vm12787_vm2, %v3802_v31, %v3958_v29 }
 0x344   : > { %v3806_v30 = vrot.slane %v3804_v21, 7  ;;  %v11602_v22 = vpop.f32.mrf.mxu1  ;;  %3957 = vst [vmem:[#allocation2 + $0x8] sm:$0xf] %v3956_v37  ;;  %3960 = vst [vmem:[#allocation2 + $0xc] sm:$0x1] %v3959_v49  ;;  %v14627_v61 = vsel %vm12936_vm9, %v10805_v34, %v4485_v53  ;;  %v14633_v23 = vrot.slane %v4461_v55, 5  ;;  %v4210_v60 = vor.u32 %v14619_v59, %v14617_v20 }
 0x345   : > { %v3636_v39 = vmul.f32 1.442695, %v3616_v48  ;;  %v14603_v56 = vadd.f32 %v3552_v9, %v3456_v4  ;;  %v11603_v32 = vadd.f32 %v11602_v22, %v11601_v54  ;;  %v14637_v11 = vrot.slane %v4213_v36, 5  ;;  %v14660_v22 = vpop.f32.mrf.mxu0 }
 0x346   : > { %v3809_v41 = vor.u32 %v3807_v8, %v3806_v30  ;;  %v3810_v27 = vrot.slane %v3806_v30, 4  ;;  %v11604_v51 = vpop.f32.mrf.mxu1  ;;  %vm3600_vm11 = vcmp.gt.f32.partialorder %v14590_v7, 0.0 }
 0x347   : > { %12594 = vpow2.f32 %v3636_v39  ;;  %v3617_v10 = vmin.f32 %v14603_v56, 0.0  ;;  %v3461_v15 = vadd.f32 %v11603_v32, %v14533_v43  ;;  %v12591_v52 = vpop.eup %12590  ;;  %vm3601_vm0 = vcmp.gt.f32.partialorder %v14603_v56, 0.0 }
 0x348   : > { %v3962_v13 = vsel %vm12846_vm6, %v3809_v41, %v3961_v58  ;;  %v3965_v38 = vsel %vm12787_vm2, %v3810_v27, %v3964_v19  ;;  %v11605_v5 = vpop.f32.mrf.mxu1  ;;  %v10756_v17 = vadd.f32 -1.0, %v12591_v52  ;;  %v12692_v19 = vld [vmem:[%s12819_s11 + $0x18] sm:$0xff] }
 0x349   : > { %3963 = vst [vmem:[#allocation2 + $0x10] sm:$0xf] %v3962_v13  ;;  %3966 = vst [vmem:[#allocation2 + $0x14] sm:$0x1] %v3965_v38  ;;  %v3638_v50 = vmul.f32 1.442695, %v3617_v10  ;;  %v14622_v45 = vadd.f32 %v14547_v18, %v3461_v15  ;;  %v11606_v44 = vadd.f32 %v11605_v5, %v11604_v51 }
 0x34a   : > { %v3678_v31 = vsel %vm3598_vm8, %v14543_v14, %v10756_v17 }
 0x34b   : > { %12596 = vpow2.f32 %v3638_v50  ;;  %v3618_v18 = vmin.f32 %v14622_v45, 0.0  ;;  %v12593_v21 = vpop.eup %12592  ;;  %v3701_v54 = vmul.f32 %v14541_v3, %v3678_v31  ;;  %v3464_v34 = vadd.f32 %v11606_v44, %v14533_v43  ;;  %v14641_v53 = vld [vmem:[#allocation2 + $0x8] sm:$0xf]  ;;  %v4054_v12 = vld [vmem:[#allocation2 + $0xc] sm:$0x1]  ;;  %v3565_v44 = vpop.f32.mrf.mxu0 }
 0x34c   : > { %v10757_v14 = vadd.f32 -1.0, %v12593_v21  ;;  %v10788_v48 = vrot.slane %v14641_v53, 9  ;;  %v4353_v4 = vrot.slane %v4054_v12, 5  ;;  %v4106_v37 = vshrl.u32 %v14641_v53, 16 }
 0x34d   : > { %v3640_v29 = vmul.f32 1.442695, %v3618_v18  ;;  %v14649_v40 = vadd.f32 %v12691_v47, %v3701_v54  ;;  %v14653_v9 = vadd.f32 %v14585_v33, %v3464_v34  ;;  %v4109_v8 = vshll.u32 %v14641_v53, 16 }
 0x34e   : > { %v3679_v49 = vsel %vm3599_vm10, %v14550_v57, %v10757_v14  ;;  %v4354_v30 = vsel %vm12936_vm9, %v10788_v48, %v4353_v4  ;;  %v4115_v36 = vshll.u32 %v4054_v12, 16  ;;  %v4108_v5 = vrot.slane %v4106_v37, 4 }
 0x34f   : > { %18467 = vst [vmem:[#allocation8_spill] sm:$0xff] %v14649_v40  ;;  %12598 = vpow2.f32 %v3640_v29  ;;  %v11431_v39 = vpack.c.bf16 %v14649_v40, %v14649_v40  ;;  %v3702_v32 = vmul.f32 %v14541_v3, %v3679_v49  ;;  %v3619_v33 = vmin.f32 %v14653_v9, 0.0  ;;  %v12373_v29 = vld [vmem:[%s18407_s1 + $0x198] sm:$0xff]  }
 0x350   : > { %v14667_v55 = vld [vmem:[#allocation2 + $0x10] sm:$0xf]  ;;  %v14669_v57 = vld [vmem:[#allocation2 + $0x14] sm:$0x1]  ;;  %v10823_v41 = vcombine.low %v14574_v25, %v4354_v30  ;;  %v4111_v17 = vrot.slane %v4109_v8, 5  ;;  %v4117_v14 = vrot.slane %v4115_v36, 5  ;;  %11641 = vmatprep.subr.bf16.mxu1 %v12373_v29 }
 0x351   : > { %v10789_v27 = vrot.slane %v14667_v55, 9  ;;  %v4357_v51 = vrot.slane %v14669_v57, 5  ;;  %v3812_v58 = vshrl.u32 %v11431_v39, 16  ;;  %v14675_v10 = vadd.f32 %v12692_v19, %v3702_v32  ;;  %v3967_v8 = vld [vmem:[#allocation2 + $0x18] sm:$0xf] }
 0x352   : > { %v3642_v15 = vmul.f32 1.442695, %v3619_v33  ;;  %v11607_v52 = vpop.f32.mrf.mxu1  ;;  %v10831_v13 = vcombine.low %v14641_v53, %v14667_v55  ;;  %v3815_v38 = vshll.u32 %v11431_v39, 16  ;;  %4579 = vrot.lane.b32.xlu1 %v10823_v41, %s12729_s12  ;;  %v4112_v12 = vor.u32 %v4111_v17, %v4108_v5  ;;  %v3970_v39 = vld [vmem:[#allocation2 + $0x1c] sm:$0x1] }
 0x353   : > { %18468 = vst [vmem:[#allocation9_spill] sm:$0xff] %v14675_v10  ;;  %v14683_v25 = vsel %vm12936_vm9, %v10789_v27, %v4357_v51  ;;  %v3814_v31 = vrot.slane %v3812_v58, 7  ;;  %v11432_v18 = vpack.c.bf16 %v14675_v10, %v14675_v10  ;;  %v4120_v49 = vshrl.u32 %v14667_v55, 16  ;;  %v14698_v51 = vpop.f32.mrf.mxu0 }
 0x354   : > { %v12595_v50 = vpop.eup %12594  ;;  %12600 = vpow2.f32 %v3642_v15  ;;  %v11608_v21 = vpop.f32.mrf.mxu1  ;;  %v10847_v54 = vcombine.low %v4354_v30, %v14683_v25  ;;  %v4113_v41 = vrot.slane %v4112_v12, 4  ;;  %v14731_v29 = vrot.slane %v4458_v35, 4  ;;  %v12378_v35 = vld [vmem:[%s18407_s1 + $0x188] sm:$0xff]  }
 0x355   : > { %v10758_v34 = vadd.f32 -1.0, %v12595_v50  ;;  %v11609_v53 = vadd.f32 %v11608_v21, %v11607_v52  ;;  %v3817_v48 = vor.u32 %v3815_v38, %v3814_v31  ;;  %v3818_v4 = vrot.slane %v3814_v31, 4  ;;  %v12375_v52 = vld [vmem:[%s18407_s1 + $0x158] sm:$0xff]  }
 0x356   : > { %v3820_v47 = vshrl.u32 %v11432_v18, 16  ;;  %v11610_v37 = vpop.f32.mrf.mxu1  ;;  %4641 = vrot.lane.b32.xlu0 %v10847_v54, %s12731_s14  ;;  %v3823_v32 = vshll.u32 %v11432_v18, 16  ;;  %4605 = vrot.lane.b32.xlu1 %v10831_v13, %s12730_s13  ;;  %v14712_v17 = vsel %vm13046_vm12, %v4113_v41, %v4117_v14  ;;  %v12693_v18 = vld [vmem:[%s12819_s11 + $0x20] sm:$0xff]  ;;  %vm3602_vm4 = vcmp.gt.f32.partialorder %v14622_v45, 0.0 }
 0x357   : > { %v3680_v30 = vsel %vm3600_vm11, %v14590_v7, %v10758_v34  ;;  %v3469_v33 = vadd.f32 %v11609_v53, %v14533_v43  ;;  %v3968_v36 = vsel %vm12846_vm6, %v3817_v48, %v3967_v8  ;;  %v3971_v58 = vsel %vm12787_vm2, %v3818_v4, %v3970_v39  ;;  %11642 = vmatpush3.bf16.msra.mxu1 %v12375_v52  ;;  %v3976_v34 = vld [vmem:[#allocation2 + $0x24] sm:$0x1]  ;;  %v3568_v4 = vpop.f32.mrf.mxu0 }
 0x358   : > { %v12597_v27 = vpop.eup %12596  ;;  %v3822_v19 = vrot.slane %v3820_v47, 7  ;;  %v3703_v15 = vmul.f32 %v14541_v3, %v3680_v30  ;;  %v11611_v7 = vpop.f32.mrf.mxu1  ;;  %3969 = vst [vmem:[#allocation2 + $0x18] sm:$0xf] %v3968_v36  ;;  %3972 = vst [vmem:[#allocation2 + $0x1c] sm:$0x1] %v3971_v58  ;;  %v10815_v54 = vcombine.low %v4104_v6, %v14712_v17  ;;  %vm3603_vm5 = vcmp.gt.f32.partialorder %v14653_v9, 0.0  ;;  %11643 = vmatprep.subr.bf16.mxu1 %v12376_v26 }
 0x359   : > { %v10759_v13 = vadd.f32 -1.0, %v12597_v27  ;;  %v14708_v38 = vadd.f32 %v3565_v44, %v3469_v33  ;;  %v11612_v5 = vadd.f32 %v11611_v7, %v11610_v37  ;;  %v3973_v44 = vld [vmem:[#allocation2 + $0x20] sm:$0xf]  ;;  %v14757_v41 = vrot.slane %v4120_v49, 4 }
 0x35a   : > { %v3825_v50 = vor.u32 %v3823_v32, %v3822_v19  ;;  %v3826_v31 = vrot.slane %v3822_v19, 4  ;;  %v14715_v21 = vadd.f32 %v12693_v18, %v3703_v15  ;;  %4539 = vrot.lane.b32.xlu1 %v10815_v54, %s12731_s14  ;;  %v12694_v32 = vld [vmem:[%s12819_s11 + $0x28] sm:$0xff]  ;;  %v4123_v58 = vshll.u32 %v14667_v55, 16  ;;  %v12380_v15 = vld [vmem:[%s18407_s1 + $0x180] sm:$0xff]  }
 0x35b   : > { %v3681_v53 = vsel %vm3601_vm0, %v14603_v56, %v10759_v13  ;;  %v3620_v12 = vmin.f32 %v14708_v38, 0.0  ;;  %v3472_v14 = vadd.f32 %v11612_v5, %v14533_v43  ;;  %11644 = vmatpush3.bf16.msra.mxu1 %v12377_v62  ;;  %v12379_v19 = vld [vmem:[%s18407_s1 + $0x148] sm:$0xff]   ;;  %vm3604_vm7 = vcmp.gt.f32.partialorder %v14708_v38, 0.0 }
 0x35c   : > { %18469 = vst [vmem:[#allocation10_spill] sm:$0xff] %v14715_v21  ;;  %v12599_v48 = vpop.eup %12598  ;;  %v3974_v42 = vsel %vm12846_vm6, %v3825_v50, %v3973_v44  ;;  %v3977_v1 = vsel %vm12787_vm2, %v3826_v31, %v3976_v34  ;;  %v11433_v6 = vpack.c.bf16 %v14715_v21, %v14715_v21  ;;  %v3704_v56 = vmul.f32 %v14541_v3, %v3681_v53 }
 0x35d   : > { %3975 = vst [vmem:[#allocation2 + $0x20] sm:$0xf] %v3974_v42  ;;  %3978 = vst [vmem:[#allocation2 + $0x24] sm:$0x1] %v3977_v1  ;;  %v10760_v47 = vadd.f32 -1.0, %v12599_v48  ;;  %v14751_v8 = vadd.f32 %v3568_v4, %v3472_v14  ;;  %11645 = vmatprep.subr.bf16.mxu1 %v12378_v35  ;;  %v12381_v35 = vld [vmem:[%s18407_s1 + $0x140] sm:$0xff]  }
 0x35e   : > { %v3644_v37 = vmul.f32 1.442695, %v3620_v12  ;;  %v3828_v39 = vshrl.u32 %v11433_v6, 16  ;;  %v14754_v30 = vadd.f32 %v12694_v32, %v3704_v56  ;;  %v11613_v33 = vpop.f32.mrf.mxu1  ;;  %v3831_v49 = vshll.u32 %v11433_v6, 16  ;;  %v3979_v42 = vld [vmem:[#allocation2 + $0x28] sm:$0xf] }
 0x35f   : > { %v3682_v27 = vsel %vm3602_vm4, %v14622_v45, %v10760_v47  ;;  %v3621_v36 = vmin.f32 %v14751_v8, 0.0  ;;  %v14771_v13 = vld [vmem:[#allocation2 + $0x18] sm:$0xf]  ;;  %v14773_v5 = vld [vmem:[#allocation2 + $0x1c] sm:$0x1]  ;;  %v12695_v6 = vld [vmem:[%s12819_s11 + $0x30] sm:$0xff]  ;;  %11646 = vmatpush3.bf16.msra.mxu1 %v12379_v19 }
 0x360   : > { %18470 = vst [vmem:[#allocation11_spill] sm:$0xff] %v14754_v30  ;;  %12602 = vpow2.f32 %v3644_v37  ;;  %v3830_v7 = vrot.slane %v3828_v39, 7  ;;  %v11434_v52 = vpack.c.bf16 %v14754_v30, %v14754_v30  ;;  %v3705_v45 = vmul.f32 %v14541_v3, %v3682_v27  ;;  %v11614_v50 = vpop.f32.mrf.mxu1  ;;  %v3982_v1 = vld [vmem:[#allocation2 + $0x2c] sm:$0x1]  ;;  %11647 = vmatprep.subr.bf16.mxu1 %v12380_v15  ;;  %v12383_v27 = vld [vmem:[%s18407_s1 + $0x178] sm:$0xff]   ;;  %v14806_v15 = vpop.f32.mrf.mxu0 }
 0x361   : > { %v12601_v31 = vpop.eup %12600  ;;  %v3646_v18 = vmul.f32 1.442695, %v3621_v36  ;;  %v10790_v54 = vrot.slane %v14771_v13, 9  ;;  %v4361_v44 = vrot.slane %v14773_v5, 5  ;;  %v11615_v34 = vadd.f32 %v11614_v50, %v11613_v33  ;;  %v3985_v36 = vld [vmem:[#allocation2 + $0x30] sm:$0xf] }
 0x362   : > { %v3833_v53 = vor.u32 %v3831_v49, %v3830_v7  ;;  %v3834_v12 = vrot.slane %v3830_v7, 4  ;;  %v3836_v14 = vshrl.u32 %v11434_v52, 16  ;;  %v3839_v48 = vshll.u32 %v11434_v52, 16  ;;  %v11616_v4 = vpop.f32.mrf.mxu1  ;;  %v3988_v50 = vld [vmem:[#allocation2 + $0x34] sm:$0x1] }
 0x363   : > { %v14778_v56 = vadd.f32 %v12695_v6, %v3705_v45  ;;  %v10761_v26 = vadd.f32 -1.0, %v12601_v31  ;;  %12604 = vpow2.f32 %v3646_v18  ;;  %v14782_v62 = vsel %vm12936_vm9, %v10790_v54, %v4361_v44  ;;  %11648 = vmatpush3.bf16.msra.mxu1 %v12381_v35 }
 0x364   : > { %v3980_v47 = vsel %vm12846_vm6, %v3833_v53, %v3979_v42  ;;  %v3983_v37 = vsel %vm12787_vm2, %v3834_v12, %v3982_v1  ;;  %v3838_v39 = vrot.slane %v3836_v14, 7  ;;  %v10824_v32 = vcombine.low %v14683_v25, %v14782_v62  ;;  %v11617_v33 = vpop.f32.mrf.mxu1  ;;  %v14812_v54 = vld [vmem:[#allocation2 + $0x20] sm:$0xf]  ;;  %v14819_v53 = vld [vmem:[#allocation2 + $0x24] sm:$0x1]  ;;  %v12384_v14 = vld [vmem:[%s18407_s1 + $0x138] sm:$0xff]   ;;  %11649 = vmatprep.subr.bf16.mxu1 %v12383_v27 }
 0x365   : > { %18471 = vst [vmem:[#allocation12_spill] sm:$0xff] %v14778_v56  ;;  %3981 = vst [vmem:[#allocation2 + $0x28] sm:$0xf] %v3980_v47  ;;  %v11435_v19 = vpack.c.bf16 %v14778_v56, %v14778_v56  ;;  %v3683_v7 = vsel %vm3603_vm5, %v14653_v9, %v10761_v26  ;;  %v3477_v49 = vadd.f32 %v11615_v34, %v14533_v43  ;;  %v14821_v12 = vrot.slane %v4123_v58, 5  ;;  %v12385_v58 = vld [vmem:[%s18407_s1 + $0x170] sm:$0xff]  }
 0x366   : > { %3984 = vst [vmem:[#allocation2 + $0x2c] sm:$0x1] %v3983_v37  ;;  %v14804_v25 = vcombine.low %v14667_v55, %v14771_v13  ;;  %v3841_v52 = vor.u32 %v3839_v48, %v3838_v39  ;;  %v3842_v45 = vrot.slane %v3838_v39, 4  ;;  %v3706_v31 = vmul.f32 %v14541_v3, %v3683_v7  ;;  %4581 = vrot.lane.b32.xlu1 %v10824_v32, %s12729_s12  ;;  %v11619_v9 = vpop.f32.mrf.mxu1  ;;  %v3581_v39 = vpop.f32.mrf.mxu0 }
 0x367   : > { %v11618_v18 = vadd.f32 %v11617_v33, %v11616_v4  ;;  %12179 = vmatprep.mubr.msk.bf16.mxu0 %vm1531_vm13, %v10824_v32  ;;  %v3844_v55 = vshrl.u32 %v11435_v19, 16  ;;  %v3847_v44 = vshll.u32 %v11435_v19, 16  ;;  %v14815_v34 = vadd.f32 %v14660_v22, %v3477_v49  ;;  %v12696_v22 = vld [vmem:[%s12819_s11 + $0x38] sm:$0xff]  ;;  %11650 = vmatpush3.bf16.msra.mxu1 %v12384_v14 }
 0x368   : > { %4661 = vrot.lane.b32.xlu0 %v14804_v25, %s12729_s12  ;;  %v3986_v48 = vsel %vm12846_vm6, %v3841_v52, %v3985_v36  ;;  %v3989_v4 = vsel %vm12787_vm2, %v3842_v45, %v3988_v50  ;;  %v14831_v42 = vadd.f32 %v12696_v22, %v3706_v31  ;;  %v11620_v6 = vpop.f32.mrf.mxu1  ;;  %v10791_v37 = vrot.slane %v14812_v54, 9  ;;  %v3991_v32 = vld [vmem:[#allocation2 + $0x38] sm:$0xf]  ;;  %v3994_v45 = vld [vmem:[#allocation2 + $0x3c] sm:$0x1]  ;;  %11651 = vmatprep.subr.bf16.mxu1 %v12385_v58  ;;  %v12387_v22 = vld [vmem:[%s18407_s1 + $0x168] sm:$0xff]  }
 0x369   : > { %v3480_v1 = vadd.f32 %v11618_v18, %v14533_v43  ;;  %3987 = vst [vmem:[#allocation2 + $0x30] sm:$0xf] %v3986_v48  ;;  %3990 = vst [vmem:[#allocation2 + $0x34] sm:$0x1] %v3989_v4  ;;  %v3846_v26 = vrot.slane %v3844_v55, 7  ;;  %v3622_v35 = vmin.f32 %v14815_v34, 0.0  ;;  %v11621_v47 = vadd.f32 %v11620_v6, %v11619_v9 }
 0x36a   : > { %18472 = vst [vmem:[#allocation13_spill] sm:$0xff] %v14831_v42  ;;  %v11436_v33 = vpack.c.bf16 %v14831_v42, %v14831_v42  ;;  %v4365_v27 = vrot.slane %v14819_v53, 5  ;;  %v10832_v19 = vcombine.low %v14771_v13, %v14812_v54  ;;  %v11622_v7 = vpop.f32.mrf.mxu1  ;;  %v12386_v18 = vld [vmem:[%s18407_s1 + $0x130] sm:$0xff]   ;;  %vm3605_vm8 = vcmp.gt.f32.partialorder %v14751_v8, 0.0 }
 0x36b   : > { %v14842_v36 = vadd.f32 %v14698_v51, %v3480_v1  ;;  %v3849_v49 = vor.u32 %v3847_v44, %v3846_v26  ;;  %v3850_v52 = vrot.slane %v3846_v26, 4  ;;  %v3648_v50 = vmul.f32 1.442695, %v3622_v35  ;;  %v14861_v26 = vpop.f32.mrf.mxu0  ;;  %11652 = vmatpush3.bf16.msra.mxu1 %v12386_v18 }
 0x36c   : > { %v3485_v31 = vadd.f32 %v11621_v47, %v14533_v43  ;;  %v3852_v51 = vshrl.u32 %v11436_v33, 16  ;;  %v3855_v55 = vshll.u32 %v11436_v33, 16  ;;  %4607 = vrot.lane.b32.xlu1 %v10832_v19, %s12730_s13  ;;  %v11623_v4 = vpop.f32.mrf.mxu1  ;;  %v4129_v44 = vshll.u32 %v14669_v57, 16  ;;  %11653 = vmatprep.subr.bf16.mxu1 %v12387_v22 }
 0x36d   : > { %v12603_v9 = vpop.eup %12602  ;;  %v3623_v48 = vmin.f32 %v14842_v36, 0.0  ;;  %v3992_v14 = vsel %vm12846_vm6, %v3849_v49, %v3991_v32  ;;  %v3995_v1 = vsel %vm12787_vm2, %v3850_v52, %v3994_v45  ;;  %12606 = vpow2.f32 %v3648_v50 }
 0x36e   : > { %v10762_v6 = vadd.f32 -1.0, %v12603_v9  ;;  %3993 = vst [vmem:[#allocation2 + $0x38] sm:$0xf] %v3992_v14  ;;  %3996 = vst [vmem:[#allocation2 + $0x3c] sm:$0x1] %v3995_v1  ;;  %v3854_v35 = vrot.slane %v3852_v51, 7  ;;  %v14863_v57 = vadd.f32 %v3581_v39, %v3485_v31  ;;  %v14867_v58 = vsel %vm12936_vm9, %v10791_v37, %v4365_v27  ;;  %v11625_v33 = vpop.f32.mrf.mxu1 }
 0x36f   : > { %v3650_v47 = vmul.f32 1.442695, %v3623_v48  ;;  %v10848_v19 = vcombine.low %v14782_v62, %v14867_v58  ;;  %v11624_v49 = vadd.f32 %v11623_v4, %v11622_v7  ;;  %v4126_v52 = vor.u32 %v14821_v12, %v14757_v41  ;;  %v3997_v31 = vld [vmem:[#allocation2 + $0x40] sm:$0xf]  ;;  %v4000_v27 = vld [vmem:[#allocation2 + $0x44] sm:$0x1]  ;;  %v3584_v12 = vpop.f32.mrf.mxu0 }
 0x370   : > { %v3684_v32 = vsel %vm3604_vm7, %v14708_v38, %v10762_v6  ;;  %v12605_v45 = vpop.eup %12604  ;;  %v3857_v39 = vor.u32 %v3855_v55, %v3854_v35  ;;  %v3858_v50 = vrot.slane %v3854_v35, 4  ;;  %v3624_v62 = vmin.f32 %v14863_v57, 0.0  ;;  %v12697_v9 = vld [vmem:[%s12819_s11 + $0x40] sm:$0xff]  ;;  %v11626_v48 = vpop.f32.mrf.mxu1 }
 0x371   : > { %v3707_v37 = vmul.f32 %v14541_v3, %v3684_v32  ;;  %12608 = vpow2.f32 %v3650_v47  ;;  %v10763_v38 = vadd.f32 -1.0, %v12605_v45  ;;  %4643 = vrot.lane.b32.xlu0 %v10848_v19, %s12731_s14  ;;  %v3488_v41 = vadd.f32 %v11624_v49, %v14533_v43  ;;  %v14896_v19 = vld [vmem:[#allocation2 + $0x28] sm:$0xf]  ;;  %v12389_v49 = vld [vmem:[%s18407_s1 + $0x160] sm:$0xff]  }
 0x372   : > { %v3998_v7 = vsel %vm12846_vm6, %v3857_v39, %v3997_v31  ;;  %v4001_v18 = vsel %vm12787_vm2, %v3858_v50, %v4000_v27  ;;  %v4127_v55 = vrot.slane %v4126_v52, 4  ;;  %v3652_v22 = vmul.f32 1.442695, %v3624_v62  ;;  %v12698_v39 = vld [vmem:[%s12819_s11 + $0x48] sm:$0xff]  ;;  %v11628_v27 = vpop.f32.mrf.mxu1 }
 0x373   : > { %v14886_v51 = vadd.f32 %v12697_v9, %v3707_v37  ;;  %3999 = vst [vmem:[#allocation2 + $0x40] sm:$0xf] %v3998_v7  ;;  %4002 = vst [vmem:[#allocation2 + $0x44] sm:$0x1] %v4001_v18  ;;  %v3685_v4 = vsel %vm3605_vm8, %v14751_v8, %v10763_v38  ;;  %v14889_v14 = vadd.f32 %v3584_v12, %v3488_v41  ;;  %v4131_v1 = vrot.slane %v4129_v44, 5  ;;  %v12388_v8 = vld [vmem:[%s18407_s1 + $0x128] sm:$0xff]  }
 0x374   : > { %v3708_v35 = vmul.f32 %v14541_v3, %v3685_v4  ;;  %v4134_v47 = vshrl.u32 %v14771_v13, 16  ;;  %v4137_v32 = vshll.u32 %v14771_v13, 16  ;;  %vm3606_vm10 = vcmp.gt.f32.partialorder %v14815_v34, 0.0  ;;  %v14913_v37 = vld [vmem:[#allocation2 + $0x2c] sm:$0x1]  ;;  %11654 = vmatpush3.bf16.msra.mxu1 %v12388_v8  ;;  %v12390_v7 = vld [vmem:[%s18407_s1 + $0x120] sm:$0xff]  }
 0x375   : > { %18473 = vst [vmem:[#allocation14_spill] sm:$0xff] %v14886_v51  ;;  %v11437_v6 = vpack.c.bf16 %v14886_v51, %v14886_v51  ;;  %12610 = vpow2.f32 %v3652_v22  ;;  %v3625_v44 = vmin.f32 %v14889_v14, 0.0  ;;  %v14908_v52 = vsel %vm13046_vm12, %v4127_v55, %v4131_v1  ;;  %11655 = vmatprep.subr.bf16.mxu1 %v12389_v49  ;;  %v11629_v49 = vpop.f32.mrf.mxu1 }
 0x376   : > { %v14911_v50 = vadd.f32 %v12698_v39, %v3708_v35  ;;  %v4136_v31 = vrot.slane %v4134_v47, 4  ;;  %v4139_v62 = vrot.slane %v4137_v32, 5  ;;  %v4143_v41 = vshll.u32 %v14773_v5, 16 }
 0x377   : > { %v3860_v13 = vshrl.u32 %v11437_v6, 16  ;;  %v3863_v45 = vshll.u32 %v11437_v6, 16  ;;  %v3654_v38 = vmul.f32 1.442695, %v3625_v44  ;;  %v14918_v12 = vcombine.low %v14812_v54, %v14896_v19  ;;  %v4003_v44 = vld [vmem:[#allocation2 + $0x58] sm:$0xf] }
 0x378   : > { %18474 = vst [vmem:[#allocation15_spill] sm:$0xff] %v14911_v50  ;;  %v11438_v9 = vpack.c.bf16 %v14911_v50, %v14911_v50  ;;  %v11627_v55 = vadd.f32 %v11626_v48, %v11625_v33  ;;  %v10792_v4 = vrot.slane %v14896_v19, 9  ;;  %v4140_v22 = vor.u32 %v4139_v62, %v4136_v31  ;;  %11656 = vmatpush3.bf16.msra.mxu1 %v12390_v7 }
 0x379   : > { %v3862_v18 = vrot.slane %v3860_v13, 7  ;;  %12612 = vpow2.f32 %v3654_v38  ;;  %v4145_v1 = vrot.slane %v4143_v41, 5  ;;  %4663 = vrot.lane.b32.xlu0 %v14918_v12, %s12729_s12  ;;  %v4369_v5 = vrot.slane %v14913_v37, 5  ;;  %v4006_v13 = vld [vmem:[#allocation2 + $0x5c] sm:$0x1] }
 0x37a   : > { %v12607_v6 = vpop.eup %12606  ;;  %v3868_v32 = vshrl.u32 %v11438_v9, 16  ;;  %v3871_v8 = vshll.u32 %v11438_v9, 16  ;;  %v4141_v48 = vrot.slane %v4140_v22, 4  ;;  %v3493_v39 = vadd.f32 %v11627_v55, %v14533_v43 }
 0x37b   : > { %v3865_v35 = vor.u32 %v3863_v45, %v3862_v18  ;;  %v3866_v47 = vrot.slane %v3862_v18, 4  ;;  %v10764_v33 = vadd.f32 -1.0, %v12607_v6  ;;  %v14932_v31 = vsel %vm12936_vm9, %v10792_v4, %v4369_v5  ;;  %v4009_v6 = vld [vmem:[#allocation2 + $0x60] sm:$0xf] }
 0x37c   : > { %v3870_v62 = vrot.slane %v3868_v32, 7  ;;  %v10825_v41 = vcombine.low %v14867_v58, %v14932_v31  ;;  %v14945_v9 = vsel %vm13046_vm12, %v4141_v48, %v4145_v1  ;;  %v14948_v55 = vadd.f32 %v14806_v15, %v3493_v39  ;;  %v4012_v58 = vld [vmem:[#allocation2 + $0x64] sm:$0x1]  ;;  %v14959_v32 = vld [vmem:[#allocation2 + $0x34] sm:$0x1] }
 0x37d   : > { %v4004_v38 = vsel %vm12846_vm6, %v3865_v35, %v4003_v44  ;;  %v4007_v45 = vsel %vm12787_vm2, %v3866_v47, %v4006_v13  ;;  %v3686_v18 = vsel %vm3606_vm10, %v14815_v34, %v10764_v33  ;;  %v11630_v4 = vadd.f32 %v11629_v49, %v11628_v27  ;;  %v14957_v27 = vld [vmem:[#allocation2 + $0x30] sm:$0xf] }
 0x37e   : > { %v12609_v7 = vpop.eup %12608  ;;  %4005 = vst [vmem:[#allocation2 + $0x58] sm:$0xf] %v4004_v38  ;;  %4008 = vst [vmem:[#allocation2 + $0x5c] sm:$0x1] %v4007_v45  ;;  %v3873_v22 = vor.u32 %v3871_v8, %v3870_v62  ;;  %v3874_v5 = vrot.slane %v3870_v62, 4  ;;  %v3709_v35 = vmul.f32 %v14541_v3, %v3686_v18  ;;  %12180 = vmatmul.mubr.msk.bf16.vlgmr.msra.gmra.mxu0 %vm1531_vm13, %v10825_v41  ;;  %vm3607_vm11 = vcmp.gt.f32.partialorder %v14842_v36, 0.0 }
 0x37f   : > { %v10765_v47 = vadd.f32 -1.0, %v12609_v7  ;;  %v10816_v34 = vcombine.low %v14908_v52, %v14945_v9  ;;  %v3626_v1 = vmin.f32 %v14948_v55, 0.0  ;;  %v3496_v15 = vadd.f32 %v11630_v4, %v14533_v43  ;;  %v12699_v44 = vld [vmem:[%s12819_s11 + $0x50] sm:$0xff]  ;;  %v12700_v7 = vld [vmem:[%s12819_s11 + $0x58] sm:$0xff] }
 0x380   : > { %v4010_v8 = vsel %vm12846_vm6, %v3873_v22, %v4009_v6  ;;  %v4013_v49 = vsel %vm12787_vm2, %v3874_v5, %v4012_v58  ;;  %v14966_v13 = vadd.f32 %v12699_v44, %v3709_v35  ;;  %vm3608_vm0 = vcmp.gt.f32.partialorder %v14863_v57, 0.0 }
 0x381   : > { %v3687_v33 = vsel %vm3607_vm11, %v14842_v36, %v10765_v47  ;;  %4011 = vst [vmem:[#allocation2 + $0x60] sm:$0xf] %v4010_v8  ;;  %4014 = vst [vmem:[#allocation2 + $0x64] sm:$0x1] %v4013_v49  ;;  %4541 = vrot.lane.b32.xlu1 %v10816_v34, %s12731_s14  ;;  %v3656_v48 = vmul.f32 1.442695, %v3626_v1  ;;  %4681 = vrot.lane.b32.xlu0 %v10816_v34, %s12730_s13  ;;  %v14974_v39 = vadd.f32 %v14861_v26, %v3496_v15 }
 0x382   : > { %18475 = vst [vmem:[#allocation16_spill] sm:$0xff] %v14966_v13  ;;  %v3710_v43 = vmul.f32 %v14541_v3, %v3687_v33  ;;  %v12611_v38 = vpop.eup %12610  ;;  %v11439_v45 = vpack.c.bf16 %v14966_v13, %v14966_v13  ;;  %vm3609_vm4 = vcmp.gt.f32.partialorder %v14889_v14, 0.0  ;;  %v10793_v36 = vrot.slane %v14957_v27, 9 }
 0x383   : > { %v4373_v62 = vrot.slane %v14959_v32, 5  ;;  %v10766_v4 = vadd.f32 -1.0, %v12611_v38  ;;  %12614 = vpow2.f32 %v3656_v48  ;;  %v4148_v22 = vshrl.u32 %v14812_v54, 16 }
 0x384   : > { %v14982_v18 = vadd.f32 %v12700_v7, %v3710_v43  ;;  %v3876_v5 = vshrl.u32 %v11439_v45, 16  ;;  %v3627_v26 = vmin.f32 %v14974_v39, 0.0  ;;  %v10833_v6 = vcombine.low %v14896_v19, %v14957_v27 }
 0x385   : > { %v14990_v58 = vsel %vm12936_vm9, %v10793_v36, %v4373_v62  ;;  %v3879_v35 = vshll.u32 %v11439_v45, 16  ;;  %v3688_v34 = vsel %vm3608_vm0, %v14863_v57, %v10766_v4  ;;  %4583 = vrot.lane.b32.xlu1 %v10825_v41, %s12729_s12  ;;  %v4151_v33 = vshll.u32 %v14812_v54, 16  ;;  %v4015_v41 = vld [vmem:[#allocation2 + $0x68] sm:$0xf]  ;;  %v12701_v62 = vld [vmem:[%s12819_s11 + $0x60] sm:$0xff] }
 0x386   : > { %18476 = vst [vmem:[#allocation17_spill] sm:$0xff] %v14982_v18  ;;  %v11440_v47 = vpack.c.bf16 %v14982_v18, %v14982_v18  ;;  %v10849_v1 = vcombine.low %v14932_v31, %v14990_v58  ;;  %v12613_v15 = vpop.eup %12612  ;;  %v3878_v8 = vrot.slane %v3876_v5, 7  ;;  %v3711_v49 = vmul.f32 %v14541_v3, %v3688_v34  ;;  %v4018_v31 = vld [vmem:[#allocation2 + $0x6c] sm:$0x1] }
 0x387   : > { %v3658_v44 = vmul.f32 1.442695, %v3627_v26  ;;  %v10767_v48 = vadd.f32 -1.0, %v12613_v15  ;;  %v4150_v38 = vrot.slane %v4148_v22, 4  ;;  %v4157_v57 = vshll.u32 %v14819_v53, 16 }
 0x388   : > { %v3884_v43 = vshrl.u32 %v11440_v47, 16  ;;  %4645 = vrot.lane.b32.xlu0 %v10849_v1, %s12731_s14  ;;  %v3881_v45 = vor.u32 %v3879_v35, %v3878_v8  ;;  %v3882_v36 = vrot.slane %v3878_v8, 4  ;;  %v15005_v7 = vadd.f32 %v12701_v62, %v3711_v49  ;;  %v4021_v35 = vld [vmem:[#allocation2 + $0x70] sm:$0xf]  ;;  %v4024_v1 = vld [vmem:[#allocation2 + $0x74] sm:$0x1] }
 0x389   : > { %12616 = vpow2.f32 %v3658_v44  ;;  %v3887_v5 = vshll.u32 %v11440_v47, 16  ;;  %v3689_v54 = vsel %vm3609_vm4, %v14889_v14, %v10767_v48  ;;  %4609 = vrot.lane.b32.xlu1 %v10833_v6, %s12730_s13  ;;  %v4153_v26 = vrot.slane %v4151_v33, 5  ;;  %v15020_v49 = vld [vmem:[#allocation2 + $0x38] sm:$0xf]  ;;  %v12702_v33 = vld [vmem:[%s12819_s11 + $0x68] sm:$0xff] }
 0x38a   : > { %18477 = vst [vmem:[#allocation18_spill] sm:$0xff] %v15005_v7  ;;  %v3886_v4 = vrot.slane %v3884_v43, 7  ;;  %v4016_v53 = vsel %vm12846_vm6, %v3881_v45, %v4015_v41  ;;  %v4019_v22 = vsel %vm12787_vm2, %v3882_v36, %v4018_v31  ;;  %v11441_v34 = vpack.c.bf16 %v15005_v7, %v15005_v7  ;;  %v15240_v7 = vld [vmem:[#allocation2 + $0x9c] sm:$0x1] }
 0x38b   : > { %v3712_v47 = vmul.f32 %v14541_v3, %v3689_v54  ;;  %vm3610_vm5 = vcmp.gt.f32.partialorder %v14948_v55, 0.0  ;;  %4017 = vst [vmem:[#allocation2 + $0x68] sm:$0xf] %v4016_v53  ;;  %4020 = vst [vmem:[#allocation2 + $0x6c] sm:$0x1] %v4019_v22  ;;  %v4154_v15 = vor.u32 %v4153_v26, %v4150_v38  ;;  %v4162_v8 = vshrl.u32 %v14896_v19, 16 }
 0x38c   : > { %v3889_v14 = vor.u32 %v3887_v5, %v3886_v4  ;;  %v3890_v6 = vrot.slane %v3886_v4, 4  ;;  %v3892_v44 = vshrl.u32 %v11441_v34, 16  ;;  %v4159_v48 = vrot.slane %v4157_v57, 5  ;;  %v15026_v3 = vld [vmem:[#allocation2 + $0x3c] sm:$0x1] }
 0x38d   : > { %v15023_v43 = vadd.f32 %v12702_v33, %v3712_v47  ;;  %v4165_v45 = vshll.u32 %v14896_v19, 16  ;;  %v3895_v38 = vshll.u32 %v11441_v34, 16  ;;  %v4164_v62 = vrot.slane %v4162_v8, 4  ;;  %v15041_v22 = vld [vmem:[#allocation2 + $0x40] sm:$0xf] }
 0x38e   : > { %v4022_v36 = vsel %vm12846_vm6, %v3889_v14, %v4021_v35  ;;  %v4025_v41 = vsel %vm12787_vm2, %v3890_v6, %v4024_v1  ;;  %v3894_v31 = vrot.slane %v3892_v44, 7  ;;  %v4171_v57 = vshll.u32 %v14913_v37, 16  ;;  %v15043_v1 = vld [vmem:[#allocation2 + $0x44] sm:$0x1]  ;;  %v4027_v8 = vld [vmem:[#allocation2 + $0x78] sm:$0xf] }
 0x38f   : > { %18478 = vst [vmem:[#allocation19_spill] sm:$0xff] %v15023_v43  ;;  %4023 = vst [vmem:[#allocation2 + $0x70] sm:$0xf] %v4022_v36  ;;  %v11442_v4 = vpack.c.bf16 %v15023_v43, %v15023_v43  ;;  %v4167_v5 = vrot.slane %v4165_v45, 5  ;;  %v4155_v19 = vrot.slane %v4154_v15, 4  ;;  %v10794_v54 = vrot.slane %v15020_v49, 9 }
 0x390   : > { %4026 = vst [vmem:[#allocation2 + $0x74] sm:$0x1] %v4025_v41  ;;  %v4377_v26 = vrot.slane %v15026_v3, 5  ;;  %v15039_v53 = vcombine.low %v14957_v27, %v15020_v49  ;;  %v12615_v35 = vpop.eup %12614  ;;  %v3897_v34 = vor.u32 %v3895_v38, %v3894_v31  ;;  %v3898_v47 = vrot.slane %v3894_v31, 4  ;;  %v4030_v37 = vld [vmem:[#allocation2 + $0x7c] sm:$0x1] }
 0x391   : > { %v3900_v14 = vshrl.u32 %v11442_v4, 16  ;;  %v3903_v6 = vshll.u32 %v11442_v4, 16  ;;  %v10768_v15 = vadd.f32 -1.0, %v12615_v35  ;;  %v4168_v44 = vor.u32 %v4167_v5, %v4164_v62  ;;  %v12703_v35 = vld [vmem:[%s18409_s3] ss:$0 sm:$0xff] }
 0x392   : > { %v4173_v33 = vrot.slane %v4171_v57, 5  ;;  %v15047_v45 = vsel %vm12936_vm9, %v10794_v54, %v4377_v26  ;;  %4665 = vrot.lane.b32.xlu0 %v15039_v53, %s12729_s12  ;;  %v4028_v36 = vsel %vm12846_vm6, %v3897_v34, %v4027_v8  ;;  %v4031_v41 = vsel %vm12787_vm2, %v3898_v47, %v4030_v37  ;;  %v4033_v47 = vld [vmem:[#allocation2 + $0x80] sm:$0xf] }
 0x393   : > { %v3902_v38 = vrot.slane %v3900_v14, 7  ;;  %v10826_v31 = vcombine.low %v14990_v58, %v15047_v45  ;;  %4029 = vst [vmem:[#allocation2 + $0x78] sm:$0xf] %v4028_v36  ;;  %4032 = vst [vmem:[#allocation2 + $0x7c] sm:$0x1] %v4031_v41  ;;  %v3690_v62 = vsel %vm3610_vm5, %v14948_v55, %v10768_v15  ;;  %v4169_v4 = vrot.slane %v4168_v44, 4 }
 0x394   : > { %v10803_v5 = vrot.slane %v15041_v22, 9  ;;  %v4445_v57 = vrot.slane %v15043_v1, 5  ;;  %v3713_v34 = vmul.f32 %v12703_v35, %v3690_v62  ;;  %vm3611_vm7 = vcmp.gt.f32.partialorder %v14974_v39, 0.0  ;;  %v4036_v55 = vld [vmem:[#allocation2 + $0x84] sm:$0x1]  ;;  %v12704_v36 = vld [vmem:[%s12819_s11 + $0x70] sm:$0xff] }
 0x395   : > { %v3905_v54 = vor.u32 %v3903_v6, %v3902_v38  ;;  %v3906_v26 = vrot.slane %v3902_v38, 4  ;;  %12183 = vmatprep.mubr.msk.bf16.mxu0 %vm1531_vm13, %v10826_v31  ;;  %v15069_v14 = vsel %vm13046_vm12, %v4155_v19, %v4159_v48  ;;  %v15073_v6 = vsel %vm13046_vm12, %v4169_v4, %v4173_v33 }
 0x396   : > { %v12617_v58 = vpop.eup %12616  ;;  %v15077_v8 = vsel %vm12936_vm9, %v10803_v5, %v4445_v57  ;;  %v4176_v37 = vshrl.u32 %v14957_v27, 16  ;;  %v15085_v41 = vadd.f32 %v12704_v36, %v3713_v34  ;;  %v10817_v19 = vcombine.low %v15069_v14, %v15073_v6 }
 0x397   : > { %v4034_v15 = vsel %vm12846_vm6, %v3905_v54, %v4033_v47  ;;  %v4037_v44 = vsel %vm12787_vm2, %v3906_v26, %v4036_v55  ;;  %v10769_v48 = vadd.f32 -1.0, %v12617_v58  ;;  %v10859_v33 = vcombine.low %v15077_v8, %v14627_v61  ;;  %v15098_v54 = vld [vmem:[#allocation2 + $0x58] sm:$0xf]  ;;  %v15109_v58 = vld [vmem:[#allocation2 + $0x5c] sm:$0x1] }
 0x398   : > { %18479 = vst [vmem:[#allocation20_spill] sm:$0xff] %v15085_v41  ;;  %4035 = vst [vmem:[#allocation2 + $0x80] sm:$0xf] %v4034_v15  ;;  %v4178_v38 = vrot.slane %v4176_v37, 4  ;;  %v4179_v62 = vshll.u32 %v14957_v27, 16  ;;  %v11443_v4 = vpack.c.bf16 %v15085_v41, %v15085_v41  ;;  %v4190_v57 = vshrl.u32 %v15020_v49, 16  ;;  %4543 = vrot.lane.b32.xlu1 %v10817_v19, %s12731_s14  ;;  %4683 = vrot.lane.b32.xlu0 %v10817_v19, %s12730_s13 }
 0x399   : > { %4038 = vst [vmem:[#allocation2 + $0x84] sm:$0x1] %v4037_v44  ;;  %v3691_v5 = vsel %vm3611_vm7, %v14974_v39, %v10769_v48  ;;  %v15103_v26 = vrot.slane %v4210_v60, 4  ;;  %12184 = vmatmul.mubr.msk.bf16.gmra.mxu0 %vm1531_vm13, %v10859_v33  ;;  %v4185_v34 = vshll.u32 %v14959_v32, 16  ;;  %v4193_v39 = vshll.u32 %v15020_v49, 16 }
 0x39a   : > { %v3714_v61 = vmul.f32 %v12703_v35, %v3691_v5  ;;  %v4181_v27 = vrot.slane %v4179_v62, 5  ;;  %v3908_v47 = vshrl.u32 %v11443_v4, 16  ;;  %v10834_v20 = vcombine.low %v15020_v49, %v15041_v22  ;;  %v12705_v35 = vld [vmem:[%s12819_s11 + $0x78] sm:$0xff]  ;;  %v12706_v37 = vld [vmem:[#allocation2 + $0x48] sm:$0xf] }
 0x39b   : > { %v4192_v59 = vrot.slane %v4190_v57, 4  ;;  %v4199_v60 = vshll.u32 %v15026_v3, 16  ;;  %v10855_v15 = vcombine.low %v15041_v22, %v12706_v37  ;;  %v4195_v44 = vrot.slane %v4193_v39, 5  ;;  %v4042_v39 = vld [vmem:[#allocation2 + $0x8c] sm:$0x1] }
 0x39c   : > { %v15116_v55 = vadd.f32 %v12705_v35, %v3714_v61  ;;  %v4182_v32 = vor.u32 %v4181_v27, %v4178_v38  ;;  %v3910_v36 = vrot.slane %v3908_v47, 7  ;;  %v3911_v48 = vshll.u32 %v11443_v4, 16  ;;  %4585 = vrot.lane.b32.xlu1 %v10826_v31, %s12729_s12  ;;  %v4039_v4 = vld [vmem:[#allocation2 + $0x88] sm:$0xf] }
 0x39d   : > { %v10796_v33 = vrot.slane %v15098_v54, 9  ;;  %v4385_v19 = vrot.slane %v15109_v58, 5  ;;  %v4187_v62 = vrot.slane %v4185_v34, 5  ;;  %v4196_v5 = vor.u32 %v4195_v44, %v4192_v59  ;;  %4667 = vrot.lane.b32.xlu0 %v10855_v15, %s12729_s12 }
 0x39e   : > { %18480 = vst [vmem:[#allocation21_spill] sm:$0xff] %v15116_v55  ;;  %v11444_v49 = vpack.c.bf16 %v15116_v55, %v15116_v55  ;;  %v4183_v3 = vrot.slane %v4182_v32, 4  ;;  %v3913_v57 = vor.u32 %v3911_v48, %v3910_v36  ;;  %v3914_v61 = vrot.slane %v3910_v36, 4  ;;  %v15140_v32 = vld [vmem:[#allocation2 + $0x60] sm:$0xf] }
 0x39f   : > { %v4201_v38 = vrot.slane %v4199_v60, 5  ;;  %v4412_v27 = vshrl.u32 %v15041_v22, 16  ;;  %v4197_v35 = vrot.slane %v4196_v5, 4  ;;  %v10850_v37 = vcombine.low %v15047_v45, %v15077_v8  ;;  %v15148_v48 = vld [vmem:[#allocation2 + $0x64] sm:$0x1] }
 0x3a0   : > { %v3916_v47 = vshrl.u32 %v11444_v49, 16  ;;  %v15130_v31 = vsel %vm12936_vm9, %v10796_v33, %v4385_v19  ;;  %v4040_v34 = vsel %vm12846_vm6, %v3913_v57, %v4039_v4  ;;  %v4043_v59 = vsel %vm12787_vm2, %v3914_v61, %v4042_v39  ;;  %4611 = vrot.lane.b32.xlu1 %v10834_v20, %s12730_s13  ;;  %v4045_v33 = vld [vmem:[#allocation2 + $0x90] sm:$0xf] }
 0x3a1   : > { %v3919_v60 = vshll.u32 %v11444_v49, 16  ;;  %v15138_v15 = vsel %vm13046_vm12, %v4183_v3, %v4187_v62  ;;  %4041 = vst [vmem:[#allocation2 + $0x88] sm:$0xf] %v4040_v34  ;;  %4044 = vst [vmem:[#allocation2 + $0x8c] sm:$0x1] %v4043_v59  ;;  %v15145_v8 = vsel %vm13046_vm12, %v4197_v35, %v4201_v38  ;;  %v4414_v44 = vrot.slane %v4412_v27, 4  ;;  %4647 = vrot.lane.b32.xlu0 %v10850_v37, %s12731_s14 }
 0x3a2   : > { %v3918_v45 = vrot.slane %v3916_v47, 7  ;;  %v4415_v36 = vshll.u32 %v15041_v22, 16  ;;  %v10818_v19 = vcombine.low %v15138_v15, %v15145_v8  ;;  %v4421_v49 = vshll.u32 %v15043_v1, 16  ;;  %v15156_v62 = vld [vmem:[#allocation2 + $0x68] sm:$0xf] }
 0x3a3   : > { %v4218_v3 = vshrl.u32 %v15098_v54, 16  ;;  %v4221_v20 = vshll.u32 %v15098_v54, 16  ;;  %v4227_v22 = vshll.u32 %v15109_v58, 16  ;;  %v15159_v38 = vld [vmem:[#allocation2 + $0x6c] sm:$0x1]  ;;  %v10827_v4 = vcombine.low %v14631_v16, %v15130_v31 }
 0x3a4   : > { %v3921_v5 = vor.u32 %v3919_v60, %v3918_v45  ;;  %v3922_v57 = vrot.slane %v3918_v45, 4  ;;  %v4417_v61 = vrot.slane %v4415_v36, 5  ;;  %v4048_v27 = vld [vmem:[#allocation2 + $0x94] sm:$0x1]  ;;  %v10797_v1 = vrot.slane %v15140_v32, 9  ;;  %4545 = vrot.lane.b32.xlu1 %v10818_v19, %s12731_s14 }
 0x3a5   : > { %v4220_v39 = vrot.slane %v4218_v3, 4  ;;  %v4223_v47 = vrot.slane %v4221_v20, 5  ;;  %v4389_v58 = vrot.slane %v15148_v48, 5  ;;  %v15170_v59 = vld [vmem:[#allocation2 + $0x70] sm:$0xf]  ;;  %4685 = vrot.lane.b32.xlu0 %v10818_v19, %s12730_s13  ;;  %v4464_v16 = vsel %vm13046_vm12, %v14731_v29, %v14633_v23 }
 0x3a6   : > { %v4046_v35 = vsel %vm12846_vm6, %v3921_v5, %v4045_v33  ;;  %v4049_v37 = vsel %vm12787_vm2, %v3922_v57, %v4048_v27  ;;  %v4418_v34 = vor.u32 %v4417_v61, %v4414_v44  ;;  %v15172_v60 = vld [vmem:[#allocation2 + $0x74] sm:$0x1]  ;;  %v10798_v36 = vrot.slane %v15156_v62, 9 }
 0x3a7   : > { %4047 = vst [vmem:[#allocation2 + $0x90] sm:$0xf] %v4046_v35  ;;  %4050 = vst [vmem:[#allocation2 + $0x94] sm:$0x1] %v4049_v37  ;;  %v4224_v45 = vor.u32 %v4223_v47, %v4220_v39  ;;  %v4393_v44 = vrot.slane %v15159_v38, 5  ;;  %v4423_v3 = vrot.slane %v4421_v49, 5  ;;  %v4390_v5 = vsel %vm12936_vm9, %v10797_v1, %v4389_v58 }
 0x3a8   : > { %v4419_v33 = vrot.slane %v4418_v34, 4  ;;  %v4229_v20 = vrot.slane %v4227_v22, 5  ;;  %v10799_v61 = vrot.slane %v15170_v59, 9  ;;  %v4397_v23 = vrot.slane %v15172_v60, 5  ;;  %4587 = vrot.lane.b32.xlu1 %v10827_v4, %s12729_s12  ;;  %v15202_v1 = vld [vmem:[#allocation2 + $0x78] sm:$0xf] }
 0x3a9   : > { %v4225_v57 = vrot.slane %v4224_v45, 4  ;;  %v15185_v19 = vsel %vm12936_vm9, %v10798_v36, %v4393_v44  ;;  %v4232_v22 = vshrl.u32 %v15140_v32, 16  ;;  %v4235_v27 = vshll.u32 %v15140_v32, 16  ;;  %v15204_v4 = vld [vmem:[#allocation2 + $0x7c] sm:$0x1] }
 0x3aa   : > { %v15192_v29 = vsel %vm13046_vm12, %v4419_v33, %v4423_v3  ;;  %v10828_v49 = vcombine.low %v4390_v5, %v15185_v19  ;;  %v4216_v47 = vsel %vm13046_vm12, %v15103_v26, %v14637_v11  ;;  %v10835_v35 = vcombine.low %v15098_v54, %v15140_v32  ;;  %v15216_v26 = vld [vmem:[#allocation2 + $0x80] sm:$0xf]  ;;  %v15218_v45 = vld [vmem:[#allocation2 + $0x84] sm:$0x1] }
 0x3ab   : > { %v10857_v39 = vcombine.low %v15192_v29, %v4464_v16  ;;  %v15210_v37 = vsel %vm13046_vm12, %v4225_v57, %v4229_v20  ;;  %v4234_v34 = vrot.slane %v4232_v22, 4  ;;  %v4237_v58 = vrot.slane %v4235_v27, 5  ;;  %v15226_v20 = vld [vmem:[#allocation2 + $0x88] sm:$0xf]  ;;  %v15228_v57 = vld [vmem:[#allocation2 + $0x8c] sm:$0x1] }
 0x3ac   : > { %12187 = vmatprep.mubr.msk.bf16.mxu0 %vm1531_vm13, %v10828_v49  ;;  %v4246_v16 = vshrl.u32 %v15156_v62, 16  ;;  %v4249_v11 = vshll.u32 %v15156_v62, 16  ;;  %4613 = vrot.lane.b32.xlu1 %v10835_v35, %s12730_s13  ;;  %v10851_v36 = vcombine.low %v15130_v31, %v4390_v5  ;;  %v4398_v44 = vsel %vm12936_vm9, %v10799_v61, %v4397_v23  ;;  %v15232_v35 = vld [vmem:[#allocation2 + $0x98] sm:$0xf] }
 0x3ad   : > { %4687 = vrot.lane.b32.xlu0 %v10857_v39, %s12730_s13  ;;  %v10800_v33 = vrot.slane %v15202_v1, 9  ;;  %v4401_v3 = vrot.slane %v15204_v4, 5  ;;  %v10819_v22 = vcombine.low %v4216_v47, %v15210_v37  ;;  %v4241_v27 = vshll.u32 %v15148_v48, 16 }
 0x3ae   : > { %v4248_v39 = vrot.slane %v4246_v16, 4  ;;  %v4251_v43 = vrot.slane %v4249_v11, 5  ;;  %v4238_v31 = vor.u32 %v4237_v58, %v4234_v34  ;;  %v10801_v61 = vrot.slane %v15216_v26, 9  ;;  %v15276_v55 = vld [vmem:[#allocation2 + $0x94] sm:$0x1] }
 0x3af   : > { %v15236_v5 = vsel %vm12936_vm9, %v10800_v33, %v4401_v3  ;;  %v4405_v23 = vrot.slane %v15218_v45, 5  ;;  %v10802_v16 = vrot.slane %v15226_v20, 9  ;;  %v4409_v34 = vrot.slane %v15228_v57, 5 }
 0x3b0   : > { %v4252_v47 = vor.u32 %v4251_v43, %v4248_v39  ;;  %v15244_v48 = vcombine.low %v4398_v44, %v15236_v5  ;;  %4547 = vrot.lane.b32.xlu1 %v10819_v22, %s12731_s14  ;;  %v4255_v58 = vshll.u32 %v15159_v38, 16  ;;  %v4260_v11 = vshrl.u32 %v15170_v59, 16  ;;  %v15267_v22 = vld [vmem:[#allocation2 + $0x90] sm:$0xf] }
 0x3b1   : > { %4649 = vrot.lane.b32.xlu0 %v10851_v36, %s12731_s14  ;;  %v4263_v33 = vshll.u32 %v15170_v59, 16  ;;  %v10806_v3 = vrot.slane %v15232_v35, 9  ;;  %v15255_v43 = vcombine.low %v15140_v32, %v15156_v62  ;;  %v15261_v36 = vsel %vm12936_vm9, %v10801_v61, %v4405_v23 }
 0x3b2   : > { %12188 = vmatmul.mubr.msk.bf16.gmra.mxu0 %vm1531_vm13, %v15244_v48  ;;  %v15265_v38 = vsel %vm12936_vm9, %v10802_v16, %v4409_v34  ;;  %v4489_v39 = vrot.slane %v15240_v7, 5  ;;  %v10852_v18 = vcombine.low %v15185_v19, %v4398_v44  ;;  %v4274_v13 = vshrl.u32 %v15202_v1, 16 }
 0x3b3   : > { %v15273_v32 = vcombine.low %v15261_v36, %v15265_v38  ;;  %v4239_v61 = vrot.slane %v4238_v31, 4  ;;  %v4243_v23 = vrot.slane %v4241_v27, 5  ;;  %v4253_v16 = vrot.slane %v4252_v47, 4 }
 0x3b4   : > { %v4277_v34 = vshll.u32 %v15202_v1, 16  ;;  %4589 = vrot.lane.b32.xlu1 %v10828_v49, %s12729_s12  ;;  %v4257_v50 = vrot.slane %v4255_v58, 5  ;;  %v4262_v19 = vrot.slane %v4260_v11, 4  ;;  %v4265_v44 = vrot.slane %v4263_v33, 5 }
 0x3b5   : > { %4669 = vrot.lane.b32.xlu0 %v15255_v43, %s12729_s12  ;;  %12191 = vmatprep.mubr.msk.bf16.mxu0 %vm1531_vm13, %v15273_v32  ;;  %v10804_v51 = vrot.slane %v15267_v22, 9  ;;  %v4276_v41 = vrot.slane %v4274_v13, 4  ;;  %v4449_v42 = vrot.slane %v15276_v55, 5  ;;  %v4490_v27 = vsel %vm12936_vm9, %v10806_v3, %v4489_v39 }
 0x3b6   : > { %v4279_v30 = vrot.slane %v4277_v34, 5  ;;  %v10836_v31 = vcombine.low %v15156_v62, %v15170_v59  ;;  %v15292_v49 = vcombine.low %v15170_v59, %v15202_v1  ;;  %v4288_v47 = vshrl.u32 %v15216_v26, 16 }
 0x3b7   : > { %v4291_v58 = vshll.u32 %v15216_v26, 16  ;;  %v15299_v13 = vsel %vm13046_vm12, %v4239_v61, %v4243_v23  ;;  %v15303_v11 = vsel %vm13046_vm12, %v4253_v16, %v4257_v50  ;;  %v15307_v62 = vsel %vm12936_vm9, %v10804_v51, %v4449_v42 }
 0x3b8   : > { %v4302_v59 = vshrl.u32 %v15226_v20, 16  ;;  %4615 = vrot.lane.b32.xlu1 %v10836_v31, %s12730_s13  ;;  %v4266_v33 = vor.u32 %v4265_v44, %v4262_v19  ;;  %v10860_v3 = vcombine.low %v15307_v62, %v4490_v27  ;;  %v4269_v61 = vshll.u32 %v15172_v60, 16 }
 0x3b9   : > { %4651 = vrot.lane.b32.xlu0 %v10852_v18, %s12731_s14  ;;  %v4290_v18 = vrot.slane %v4288_v47, 4  ;;  %v4293_v39 = vrot.slane %v4291_v58, 5  ;;  %v4280_v23 = vor.u32 %v4279_v30, %v4276_v41  ;;  %v4305_v50 = vshll.u32 %v15226_v20, 16 }
 0x3ba   : > { %v4304_v34 = vrot.slane %v4302_v59, 4  ;;  %v10820_v16 = vcombine.low %v15299_v13, %v15303_v11  ;;  %12192 = vmatmul.mubr.msk.bf16.gmra.mxu0 %vm1531_vm13, %v10860_v3  ;;  %v4297_v51 = vshll.u32 %v15218_v45, 16  ;;  %v4283_v19 = vshll.u32 %v15204_v4, 16 }
 0x3bb   : > { %v4294_v42 = vor.u32 %v4293_v39, %v4290_v18  ;;  %v4307_v44 = vrot.slane %v4305_v50, 5  ;;  %v4426_v60 = vshrl.u32 %v15267_v22, 16  ;;  %v4267_v30 = vrot.slane %v4266_v33, 4 }
 0x3bc   : > { %4549 = vrot.lane.b32.xlu1 %v10820_v16, %s12731_s14  ;;  %v4429_v27 = vshll.u32 %v15267_v22, 16  ;;  %v4271_v31 = vrot.slane %v4269_v61, 5  ;;  %v4281_v47 = vrot.slane %v4280_v23, 4  ;;  %v4299_v3 = vrot.slane %v4297_v51, 5 }
 0x3bd   : > { %4671 = vrot.lane.b32.xlu0 %v15292_v49, %s12729_s12  ;;  %v4295_v41 = vrot.slane %v4294_v42, 4  ;;  %v4308_v58 = vor.u32 %v4307_v44, %v4304_v34  ;;  %v4428_v59 = vrot.slane %v4426_v60, 4  ;;  %v4311_v45 = vshll.u32 %v15228_v57, 16 }
 0x3be   : > { %v4431_v18 = vrot.slane %v4429_v27, 5  ;;  %v4435_v39 = vshll.u32 %v15276_v55, 16  ;;  %v4285_v4 = vrot.slane %v4283_v19, 5  ;;  %v15331_v33 = vsel %vm13046_vm12, %v4267_v30, %v4271_v31 }
 0x3bf   : > { %v15335_v61 = vsel %vm13046_vm12, %v4295_v41, %v4299_v3  ;;  %v4309_v23 = vrot.slane %v4308_v58, 4  ;;  %v10837_v57 = vcombine.low %v15202_v1, %v15216_v26  ;;  %v10853_v55 = vcombine.low %v15236_v5, %v15261_v36 }
 0x3c0   : > { %4591 = vrot.lane.b32.xlu1 %v15244_v48, %s12729_s12  ;;  %v4432_v34 = vor.u32 %v4431_v18, %v4428_v59  ;;  %v10841_v50 = vcombine.low %v15073_v6, %v15138_v15  ;;  %v10842_v48 = vcombine.low %v15145_v8, %v15192_v29  ;;  %v4313_v42 = vrot.slane %v4311_v45, 5 }
 0x3c1   : > { %4689 = vrot.lane.b32.xlu0 %v10820_v16, %s12730_s13  ;;  %v15347_v16 = vsel %vm13046_vm12, %v4281_v47, %v4285_v4  ;;  %v4437_v19 = vrot.slane %v4435_v39, 5  ;;  %v10843_v1 = vcombine.low %v15210_v37, %v15299_v13  ;;  %v10844_v5 = vcombine.low %v15303_v11, %v15331_v33 }
 0x3c2   : > { %v4433_v51 = vrot.slane %v4432_v34, 4  ;;  %v10845_v36 = vcombine.low %v15347_v16, %v15335_v61  ;;  %v15359_v44 = vsel %vm13046_vm12, %v4309_v23, %v4313_v42  ;;  %v15367_v30 = vcombine.low %v15216_v26, %v15226_v20 }
 0x3c3   : > { %v10821_v27 = vcombine.low %v15331_v33, %v15347_v16  ;;  %v4466_v31 = vshrl.u32 %v15232_v35, 16  ;;  %v4469_v47 = vshll.u32 %v15232_v35, 16  ;;  %v10854_v26 = vcombine.low %v15265_v38, %v15307_v62 }
 0x3c4   : > { %4617 = vrot.lane.b32.xlu1 %v10837_v57, %s12730_s13  ;;  %v15363_v60 = vsel %vm13046_vm12, %v4433_v51, %v4437_v19  ;;  %v10822_v3 = vcombine.low %v15335_v61, %v15359_v44  ;;  %v4475_v18 = vshll.u32 %v15240_v7, 16  ;;  %v10838_v39 = vcombine.low %v15226_v20, %v15267_v22  ;;  %v4580_v62 = vpop.permute.xlu1 %4579  ;;  %v12707_v51 = vld [vmem:[#allocation2] sm:$0xf]  ;;  %v12708_v19 = vld [vmem:[#allocation2 + $0x8] sm:$0xf] }
 0x3c5   : > { %4653 = vrot.lane.b32.xlu0 %v10853_v55, %s12731_s14  ;;  %v10846_v41 = vcombine.low %v15359_v44, %v15363_v60  ;;  %v4468_v58 = vrot.slane %v4466_v31, 4  ;;  %v4471_v59 = vrot.slane %v4469_v47, 5  ;;  %v10856_v38 = vcombine.low %v15267_v22, %v15232_v35  ;;  %v15479_v44 = vld [vmem:[%s18408_s2 + $0x2] ss:$0 sm:$0xff] }
 0x3c6   : > { %v4477_v23 = vrot.slane %v4475_v18, 5  ;;  %v10839_v47 = vcombine.low %v14712_v17, %v14908_v52  ;;  %v10840_v52 = vcombine.low %v14945_v9, %v15069_v14 }
 0x3c7   : > { %v4472_v45 = vor.u32 %v4471_v59, %v4468_v58 }
 0x3c8   : > { %4551 = vrot.lane.b32.xlu1 %v10821_v27, %s12731_s14  ;;  %v4642_v20 = vpop.permute.xlu0 %4641  ;;  %v4606_v34 = vpop.permute.xlu1 %4605 }
 0x3c9   : > { %4673 = vrot.lane.b32.xlu0 %v15367_v30, %s12729_s12  ;;  %v4473_v4 = vrot.slane %v4472_v45, 4  ;;  %v4767_v58 = vsel %vm1531_vm13, %v10839_v47, %v4642_v20 }
 0x3cc   : > { %4593 = vrot.lane.b32.xlu1 %v15273_v32, %s12729_s12  ;;  %v4478_v32 = vsel %vm13046_vm12, %v4473_v4, %v4477_v23  ;;  %v4540_v55 = vpop.permute.xlu1 %4539 }
 0x3cd   : > { %4691 = vrot.lane.b32.xlu0 %v10821_v27, %s12730_s13  ;;  %v10858_v7 = vcombine.low %v15363_v60, %v4478_v32  ;;  %v10807_v27 = vcombine.low %v12707_v51, %v12708_v19 }
 0x3cf   : > { %v4703_v22 = vsel %vm1531_vm13, %v10807_v27, %v4540_v55 }
 0x3d0   : > { %4553 = vrot.lane.b32.xlu1 %v10822_v3, %s12731_s14  ;;  %v4726_v59 = vsel %vm1556_vm14, %v4703_v22, %v4580_v62 }
 0x3d1   : > { %4655 = vrot.lane.b32.xlu0 %v10854_v26, %s12731_s14 }
 0x3d4   : > { %4619 = vrot.lane.b32.xlu1 %v10838_v39, %s12730_s13  ;;  %v4742_v39 = vsel %vm1573_vm15, %v4726_v59, %v4606_v34 }
 0x3d5   : > { %4693 = vrot.lane.b32.xlu0 %v10822_v3, %s12730_s13 }
 0x3d8   : > { %v4582_v31 = vpop.permute.xlu1 %4581 }
 0x3d9   : > { %4675 = vrot.lane.b32.xlu0 %v10856_v38, %s12729_s12 }
 0x3da   : > { %v4662_v57 = vpop.permute.xlu0 %4661 }
 0x3db   : > { %v4790_v26 = vsel %vm1556_vm14, %v4767_v58, %v4662_v57 }
 0x3dd   : > { %4695 = vrot.lane.b32.xlu0 %v10858_v7, %s12730_s13 }
 0x3de   : > { %v4608_v3 = vpop.permute.xlu1 %4607 }
 0x3e3   : > { %v4644_v42 = vpop.permute.xlu0 %4643 }
 0x3e4   : > { %v4770_v62 = vsel %vm1531_vm13, %v10840_v52, %v4644_v42 }
 0x3eb   : > { %v4664_v35 = vpop.permute.xlu0 %4663 }
 0x3ec   : > { %v4792_v55 = vsel %vm1556_vm14, %v4770_v62, %v4664_v35 }
 0x3f3   : > { %v4682_v45 = vpop.permute.xlu0 %4681  ;;  %v4542_v4 = vpop.permute.xlu1 %4541 }
 0x3f4   : > { %v4806_v18 = vsel %vm1573_vm15, %v4790_v26, %v4682_v45  ;;  %v4706_v17 = vsel %vm1531_vm13, %v14804_v25, %v4542_v4 }
 0x3f5   : > { %5038 = vmatprep.mubr.bf16.mxu1 %v4806_v18  ;;  %v4728_v57 = vsel %vm1556_vm14, %v4706_v17, %v4582_v31 }
 0x3f6   : > { %5039 = vmatmul.mubr.bf16.vlgmr.msra.gmra.mxu1 %v4742_v39  ;;  %v4745_v19 = vsel %vm1573_vm15, %v4728_v57, %v4608_v3 }
 0x3f7   : > { %v4584_v23 = vpop.permute.xlu1 %4583 }
 0x3fa   : > { %v4646_v38 = vpop.permute.xlu0 %4645 }
 0x3fb   : > { %v4610_v32 = vpop.permute.xlu1 %4609  ;;  %v4773_v42 = vsel %vm1531_vm13, %v10841_v50, %v4646_v38 }
 0x404   : > { %v4666_v7 = vpop.permute.xlu0 %4665 }
 0x405   : > { %v4794_v47 = vsel %vm1556_vm14, %v4773_v42, %v4666_v7  ;;  %v12709_v7 = vld [vmem:[#allocation2 + $0x50] sm:$0xf] }
 0x40a   : > { %v4544_v20 = vpop.permute.xlu1 %4543  ;;  %v4684_v34 = vpop.permute.xlu0 %4683 }
 0x40b   : > { %v4809_v51 = vsel %vm1573_vm15, %v4792_v55, %v4684_v34  ;;  %v4709_v9 = vsel %vm1531_vm13, %v14918_v12, %v4544_v20 }
 0x40c   : > { %5046 = vmatprep.mubr.bf16.mxu1 %v4809_v51  ;;  %v4730_v35 = vsel %vm1556_vm14, %v4709_v9, %v4584_v23 }
 0x40d   : > { %5047 = vmatmul.mubr.bf16.gmra.mxu1 %v4745_v19  ;;  %v4748_v26 = vsel %vm1573_vm15, %v4730_v35, %v4610_v32 }
 0x40e   : > { %v4586_v27 = vpop.permute.xlu1 %4585 }
 0x40f   : > { %v4668_v22 = vpop.permute.xlu0 %4667 }
 0x412   : > { %v4612_v25 = vpop.permute.xlu1 %4611 }
 0x413   : > { %v4648_v14 = vpop.permute.xlu0 %4647 }
 0x414   : > { %v4776_v12 = vsel %vm1531_vm13, %v10842_v48, %v4648_v14 }
 0x415   : > { %v4796_v50 = vsel %vm1556_vm14, %v4776_v12, %v4668_v22 }
 0x416   : > { %v4546_v31 = vpop.permute.xlu1 %4545 }
 0x417   : > { %v4686_v58 = vpop.permute.xlu0 %4685  ;;  %v4712_v6 = vsel %vm1531_vm13, %v15039_v53, %v4546_v31  ;;  %v10811_v53 = vcombine.low %v12709_v7, %v15098_v54 }
 0x418   : > { %v4812_v59 = vsel %vm1573_vm15, %v4794_v47, %v4686_v58  ;;  %v4732_v39 = vsel %vm1556_vm14, %v4712_v6, %v4586_v27 }
 0x419   : > { %5054 = vmatprep.mubr.bf16.mxu1 %v4812_v59  ;;  %v4751_v23 = vsel %vm1573_vm15, %v4732_v39, %v4612_v25 }
 0x41a   : > { %v4588_v3 = vpop.permute.xlu1 %4587  ;;  %5055 = vmatmul.mubr.bf16.gmra.mxu1 %v4748_v26 }
 0x41e   : > { %v4614_v45 = vpop.permute.xlu1 %4613 }
 0x41f   : > { %v4688_v15 = vpop.permute.xlu0 %4687 }
 0x420   : > { %v4815_v18 = vsel %vm1573_vm15, %v4796_v50, %v4688_v15 }
 0x421   : > { %5062 = vmatprep.mubr.bf16.mxu1 %v4815_v18 }
 0x422   : > { %v4548_v8 = vpop.permute.xlu1 %4547  ;;  %5063 = vmatmul.mubr.bf16.gmra.mxu1 %v4751_v23 }
 0x423   : > { %v4650_v4 = vpop.permute.xlu0 %4649  ;;  %v4715_v17 = vsel %vm1531_vm13, %v10811_v53, %v4548_v8 }
 0x424   : > { %v4779_v20 = vsel %vm1531_vm13, %v10843_v1, %v4650_v4  ;;  %v4734_v57 = vsel %vm1556_vm14, %v4715_v17, %v4588_v3 }
 0x425   : > { %v4754_v54 = vsel %vm1573_vm15, %v4734_v57, %v4614_v45 }
 0x426   : > { %v4590_v48 = vpop.permute.xlu1 %4589 }
 0x427   : > { %v4670_v29 = vpop.permute.xlu0 %4669 }
 0x428   : > { %v4798_v55 = vsel %vm1556_vm14, %v4779_v20, %v4670_v29 }
 0x42a   : > { %v4616_v32 = vpop.permute.xlu1 %4615 }
 0x42b   : > { %v4652_v38 = vpop.permute.xlu0 %4651 }
 0x42c   : > { %v4782_v1 = vsel %vm1531_vm13, %v10844_v5, %v4652_v38 }
 0x42e   : > { %v4550_v62 = vpop.permute.xlu1 %4549 }
 0x42f   : > { %v4672_v52 = vpop.permute.xlu0 %4671  ;;  %v4718_v25 = vsel %vm1531_vm13, %v15255_v43, %v4550_v62 }
 0x430   : > { %v4736_v9 = vsel %vm1556_vm14, %v4718_v25, %v4590_v48  ;;  %v4800_v14 = vsel %vm1556_vm14, %v4782_v1, %v4672_v52 }
 0x431   : > { %v4757_v35 = vsel %vm1573_vm15, %v4736_v9, %v4616_v32 }
 0x432   : > { %v4592_v51 = vpop.permute.xlu1 %4591 }
 0x433   : > { %v4690_v34 = vpop.permute.xlu0 %4689 }
 0x434   : > { %v4818_v19 = vsel %vm1573_vm15, %v4798_v55, %v4690_v34 }
 0x435   : > { %5070 = vmatprep.mubr.bf16.mxu1 %v4818_v19 }
 0x436   : > { %5071 = vmatmul.mubr.bf16.gmra.mxu1 %v4754_v54  ;;  %v4618_v22 = vpop.permute.xlu1 %4617 }
 0x437   : > { %v4654_v27 = vpop.permute.xlu0 %4653 }
 0x438   : > { %v4785_v11 = vsel %vm1531_vm13, %v10845_v36, %v4654_v27 }
 0x43a   : > { %v4552_v13 = vpop.permute.xlu1 %4551 }
 0x43b   : > { %v4674_v37 = vpop.permute.xlu0 %4673  ;;  %v4721_v43 = vsel %vm1531_vm13, %v15292_v49, %v4552_v13 }
 0x43c   : > { %v4738_v33 = vsel %vm1556_vm14, %v4721_v43, %v4592_v51  ;;  %v4802_v5 = vsel %vm1556_vm14, %v4785_v11, %v4674_v37 }
 0x43d   : > { %v4760_v3 = vsel %vm1573_vm15, %v4738_v33, %v4618_v22 }
 0x43e   : > { %v4594_v47 = vpop.permute.xlu1 %4593  ;;  %v12181_v39 = vpop.f32.mrf.mxu0 }
 0x43f   : > { %v4692_v42 = vpop.permute.xlu0 %4691 }
 0x440   : > { %v4821_v31 = vsel %vm1573_vm15, %v4800_v14, %v4692_v42 }
 0x441   : > { %5078 = vmatprep.mubr.bf16.mxu1 %v4821_v31 }
 0x442   : > { %5079 = vmatmul.mubr.bf16.gmra.mxu1 %v4757_v35  ;;  %v4554_v26 = vpop.permute.xlu1 %4553 }
 0x443   : > { %v4656_v58 = vpop.permute.xlu0 %4655  ;;  %v4724_v49 = vsel %vm1531_vm13, %v15367_v30, %v4554_v26  ;;  %v5137_v30 = vpop.f32.mrf.mxu0 }
 0x444   : > { %v4788_v61 = vsel %vm1531_vm13, %v10846_v41, %v4656_v58  ;;  %v4740_v45 = vsel %vm1556_vm14, %v4724_v49, %v4594_v47 }
 0x445   : > { %v12182_v29 = vpop.f32.mrf.mxu0 }
 0x446   : > { %v4620_v16 = vpop.permute.xlu1 %4619 }
 0x447   : > { %v4694_v59 = vpop.permute.xlu0 %4693  ;;  %v4763_v18 = vsel %vm1573_vm15, %v4740_v45, %v4620_v16  ;;  %v5140_v17 = vpop.f32.mrf.mxu0 }
 0x448   : > { %v4824_v12 = vsel %vm1573_vm15, %v4802_v5, %v4694_v59 }
 0x449   : > { %5086 = vmatprep.mubr.bf16.mxu1 %v4824_v12 }
 0x44a   : > { %5087 = vmatmul.mubr.bf16.gmra.mxu1 %v4760_v3  ;;  %v5520_v3 = vld [vmem:[#allocation2 + $0x8] sm:$0xf] }
 0x44b   : > { %v4676_v6 = vpop.permute.xlu0 %4675 }
 0x44c   : > { %v4804_v36 = vsel %vm1556_vm14, %v4788_v61, %v4676_v6  ;;  %v5523_v6 = vld [vmem:[#allocation2 + $0xc] sm:$0x1] }
 0x44f   : > { %v4696_v15 = vpop.permute.xlu0 %4695 }
 0x450   : > { %v4827_v50 = vsel %vm1573_vm15, %v4804_v36, %v4696_v15 }
 0x451   : > { %5094 = vmatprep.mubr.bf16.mxu1 %v4827_v50 }
 0x452   : > { %5095 = vmatmul.mubr.bf16.gmra.mxu1 %v4763_v18  ;;  %v5616_v18 = vld [vmem:[#allocation2] sm:$0xf] }
 0x459   : > { %v15487_v33 = vpop.f32.mrf.mxu0 }
 0x4b6   : > { %v11657_v4 = vpop.f32.mrf.mxu1 }
 0x4b8   : > { %v11658_v60 = vpop.f32.mrf.mxu1 }
 0x4b9   : > { %v11659_v41 = vadd.f32 %v11658_v60, %v11657_v4 }
 0x4ba   : > { %v11660_v23 = vpop.f32.mrf.mxu1 }
 0x4bb   : > { %v5041_v8 = vadd.f32 %v11659_v41, %v15479_v44 }
 0x4bc   : > { %v11661_v48 = vpop.f32.mrf.mxu1 }
 0x4bd   : > { %v5138_v38 = vadd.f32 %v5137_v30, %v5041_v8  ;;  %v11662_v32 = vadd.f32 %v11661_v48, %v11660_v23  ;;  %v5526_v23 = vld [vmem:[#allocation2 + $0x10] sm:$0xf]  ;;  %v5529_v8 = vld [vmem:[#allocation2 + $0x14] sm:$0x1] }
 0x4bf   : > { %v5216_v7 = vmin.f32 %v5138_v38, 0.0  ;;  %v5044_v53 = vadd.f32 %v11662_v32, %v15479_v44  ;;  %vm5200_vm8 = vcmp.gt.f32.partialorder %v5138_v38, 0.0  ;;  %v5617_v32 = vld [vmem:[#allocation2 + $0x4] sm:$0x1] }
 0x4c1   : > { %v5232_v52 = vmul.f32 1.442695, %v5216_v7  ;;  %v5141_v62 = vadd.f32 %v5140_v17, %v5044_v53  ;;  %v5657_v7 = vshrl.u32 %v5616_v18, 16  ;;  %v5660_v53 = vshll.u32 %v5616_v18, 16 }
 0x4c3   : > { %12618 = vpow2.f32 %v5232_v52  ;;  %v5217_v20 = vmin.f32 %v5141_v62, 0.0  ;;  %vm5201_vm10 = vcmp.gt.f32.partialorder %v5141_v62, 0.0 }
 0x4c5   : > { %v5234_v57 = vmul.f32 1.442695, %v5217_v20 }
 0x4c7   : > { %12620 = vpow2.f32 %v5234_v57 }
 0x4cd   : > { %v11663_v55 = vpop.f32.mrf.mxu1 }
 0x4cf   : > { %v11664_v19 = vpop.f32.mrf.mxu1 }
 0x4d0   : > { %v12619_v34 = vpop.eup %12618  ;;  %v11665_v54 = vadd.f32 %v11664_v19, %v11663_v55  ;;  %v5914_v19 = vrot.slane %v5617_v32, 5 }
 0x4d1   : > { %v10925_v51 = vadd.f32 -1.0, %v12619_v34  ;;  %v11666_v22 = vpop.f32.mrf.mxu1 }
 0x4d2   : > { %v5049_v13 = vadd.f32 %v11665_v54, %v15479_v44 }
 0x4d3   : > { %v5280_v27 = vsel %vm5200_vm8, %v5138_v38, %v10925_v51  ;;  %v11667_v9 = vpop.f32.mrf.mxu1  ;;  %v10957_v51 = vrot.slane %v5616_v18, 9 }
 0x4d4   : > { %v12621_v25 = vpop.eup %12620  ;;  %v11445_v37 = vpack.c.bf16 %v5280_v27, %v5280_v27  ;;  %v15484_v42 = vadd.f32 %v12181_v39, %v5049_v13  ;;  %v11668_v31 = vadd.f32 %v11667_v9, %v11666_v22  ;;  %v5153_v39 = vpop.f32.mrf.mxu0  ;;  %v5659_v27 = vrot.slane %v5657_v7, 4 }
 0x4d5   : > { %v10926_v1 = vadd.f32 -1.0, %v12621_v25  ;;  %v5662_v22 = vrot.slane %v5660_v53, 5 }
 0x4d6   : > { %v5361_v14 = vshrl.u32 %v11445_v37, 16  ;;  %v5364_v43 = vshll.u32 %v11445_v37, 16  ;;  %v5218_v11 = vmin.f32 %v15484_v42, 0.0  ;;  %v5052_v5 = vadd.f32 %v11668_v31, %v15479_v44  ;;  %v12186_v20 = vpop.f32.mrf.mxu0 }
 0x4d7   : > { %v5281_v35 = vsel %vm5201_vm10, %v5141_v62, %v10926_v1  ;;  %vm5202_vm11 = vcmp.gt.f32.partialorder %v15484_v42, 0.0 }
 0x4d8   : > { %v5363_v47 = vrot.slane %v5361_v14, 7  ;;  %v11446_v58 = vpack.c.bf16 %v5281_v35, %v5281_v35  ;;  %v5236_v49 = vmul.f32 1.442695, %v5218_v11  ;;  %v15490_v61 = vadd.f32 %v12182_v29, %v5052_v5  ;;  %v5156_v9 = vpop.f32.mrf.mxu0 }
 0x4d9   : > { %v5915_v11 = vsel %vm12936_vm9, %v10957_v51, %v5914_v19 }
 0x4da   : > { %v5366_v59 = vor.u32 %v5364_v43, %v5363_v47  ;;  %v5367_v26 = vrot.slane %v5363_v47, 4  ;;  %v5369_v12 = vshrl.u32 %v11446_v58, 16  ;;  %v11669_v16 = vpop.f32.mrf.mxu1  ;;  %v5372_v45 = vshll.u32 %v11446_v58, 16 }
 0x4db   : > { %12622 = vpow2.f32 %v5236_v49  ;;  %v5219_v4 = vmin.f32 %v15490_v61, 0.0  ;;  %vm5203_vm0 = vcmp.gt.f32.partialorder %v15490_v61, 0.0 }
 0x4dc   : > { %v5521_v36 = vsel %vm12846_vm6, %v5366_v59, %v5520_v3  ;;  %v5524_v15 = vsel %vm12787_vm2, %v5367_v26, %v5523_v6  ;;  %v5371_v50 = vrot.slane %v5369_v12, 7  ;;  %v11670_v30 = vpop.f32.mrf.mxu1  ;;  %v5663_v26 = vor.u32 %v5662_v22, %v5659_v27 }
 0x4dd   : > { %5522 = vst [vmem:[#allocation2 + $0x8] sm:$0xf] %v5521_v36  ;;  %5525 = vst [vmem:[#allocation2 + $0xc] sm:$0x1] %v5524_v15  ;;  %v11671_v29 = vadd.f32 %v11670_v30, %v11669_v16  ;;  %v5238_v48 = vmul.f32 1.442695, %v5219_v4 }
 0x4de   : > { %v5374_v60 = vor.u32 %v5372_v45, %v5371_v50  ;;  %v5375_v41 = vrot.slane %v5371_v50, 4  ;;  %v11672_v38 = vpop.f32.mrf.mxu1  ;;  %v5666_v12 = vshll.u32 %v5617_v32, 16 }
 0x4df   : > { %v5057_v62 = vadd.f32 %v11671_v29, %v15479_v44  ;;  %12624 = vpow2.f32 %v5238_v48 }
 0x4e0   : > { %v5527_v17 = vsel %vm12846_vm6, %v5374_v60, %v5526_v23  ;;  %v5530_v52 = vsel %vm12787_vm2, %v5375_v41, %v5529_v8  ;;  %v11673_v57 = vpop.f32.mrf.mxu1  ;;  %v15527_v8 = vrot.slane %v5663_v26, 4  ;;  %v15529_v29 = vrot.slane %v5666_v12, 5 }
 0x4e1   : > { %5528 = vst [vmem:[#allocation2 + $0x10] sm:$0xf] %v5527_v17  ;;  %5531 = vst [vmem:[#allocation2 + $0x14] sm:$0x1] %v5530_v52  ;;  %v15502_v55 = vadd.f32 %v5153_v39, %v5057_v62  ;;  %v11674_v34 = vadd.f32 %v11673_v57, %v11672_v38 }
 0x4e2   : > { %v11675_v54 = vpop.f32.mrf.mxu1 }
 0x4e3   : > { %v5220_v25 = vmin.f32 %v15502_v55, 0.0  ;;  %v5060_v37 = vadd.f32 %v11674_v34, %v15479_v44  ;;  %vm5204_vm4 = vcmp.gt.f32.partialorder %v15502_v55, 0.0 }
 0x4e4   : > { %v5618_v13 = vld [vmem:[#allocation2 + $0x8] sm:$0xf]  ;;  %v15506_v1 = vld [vmem:[#allocation2 + $0xc] sm:$0x1]  ;;  %v11676_v14 = vpop.f32.mrf.mxu1 }
 0x4e5   : > { %v10958_v31 = vrot.slane %v5618_v13, 9  ;;  %v5918_v35 = vrot.slane %v15506_v1, 5  ;;  %v5240_v47 = vmul.f32 1.442695, %v5220_v25  ;;  %v15509_v43 = vadd.f32 %v5156_v9, %v5060_v37 }
 0x4e6   : > { %v11677_v58 = vadd.f32 %v11676_v14, %v11675_v54  ;;  %v11678_v5 = vpop.f32.mrf.mxu1  ;;  %v5671_v45 = vshrl.u32 %v5618_v13, 16  ;;  %v5674_v18 = vshll.u32 %v5618_v13, 16  ;;  %v12405_v54 = vld [vmem:[%s18407_s1 + $0x228] sm:$0xff]  }
 0x4e7   : > { %v5919_v59 = vsel %vm12936_vm9, %v10958_v31, %v5918_v35  ;;  %12626 = vpow2.f32 %v5240_v47  ;;  %v5221_v3 = vmin.f32 %v15509_v43, 0.0  ;;  %v5669_v31 = vsel %vm13046_vm12, %v15527_v8, %v15529_v29  ;;  %11715 = vmatprep.subr.bf16.mxu0 %v12405_v54  ;;  %12267 = vmatprep.subr.bf16.mxu1 %v12405_v54  ;;  %v15559_v35 = vpop.f32.mrf.mxu0  ;;  %v5532_v47 = vld [vmem:[#allocation2 + $0x18] sm:$0xf]  ;;  %v5547_v29 = vld [vmem:[#allocation2 + $0x2c] sm:$0x1] }
 0x4e8   : > { %v5065_v6 = vadd.f32 %v11677_v58, %v15479_v44  ;;  %v15517_v49 = vld [vmem:[#allocation2 + $0x10] sm:$0xf]  ;;  %v15519_v16 = vld [vmem:[#allocation2 + $0x14] sm:$0x1]  ;;  %v11679_v36 = vpop.f32.mrf.mxu1  ;;  %v10993_v15 = vcombine.low %v5915_v11, %v5919_v59  ;;  %v12623_v39 = vpop.eup %12622  ;;  %v5673_v7 = vrot.slane %v5671_v45, 4  ;;  %v5676_v53 = vrot.slane %v5674_v18, 5 }
 0x4e9   : > { %v10959_v50 = vrot.slane %v15517_v49, 9  ;;  %v5242_v4 = vmul.f32 1.442695, %v5221_v3  ;;  %v11680_v60 = vadd.f32 %v11679_v36, %v11678_v5  ;;  %v5922_v41 = vrot.slane %v15519_v16, 5  ;;  %v12408_v36 = vld [vmem:[%s18407_s1 + $0x1e0] sm:$0xff]   ;;  %v12410_v54 = vld [vmem:[%s18407_s1 + $0x1d8] sm:$0xff]  }
 0x4ea   : > { %v15523_v30 = vadd.f32 %v15487_v33, %v5065_v6  ;;  %v10927_v23 = vadd.f32 -1.0, %v12623_v39  ;;  %6144 = vrot.lane.b32.xlu0 %v10993_v15, %s12729_s12  ;;  %v11001_v32 = vcombine.low %v5618_v13, %v15517_v49  ;;  %v5677_v37 = vor.u32 %v5676_v53, %v5673_v7  ;;  %v12407_v6 = vld [vmem:[%s18407_s1 + $0x220] sm:$0xff]   ;;  %v5535_v15 = vld [vmem:[#allocation2 + $0x1c] sm:$0x1] }
 0x4eb   : > { %12628 = vpow2.f32 %v5242_v4  ;;  %v5068_v38 = vadd.f32 %v11680_v60, %v15479_v44  ;;  %v15540_v34 = vsel %vm12936_vm9, %v10959_v50, %v5922_v41  ;;  %v5685_v3 = vshrl.u32 %v15517_v49, 16 }
 0x4ec   : > { %v5222_v48 = vmin.f32 %v15523_v30, 0.0  ;;  %v5282_v33 = vsel %vm5202_vm11, %v15484_v42, %v10927_v23  ;;  %v12625_v17 = vpop.eup %12624  ;;  %v15544_v42 = vld [vmem:[#allocation2 + $0x48] sm:$0xf]  ;;  %v11017_v25 = vcombine.low %v5919_v59, %v15540_v34  ;;  %v5678_v18 = vrot.slane %v5677_v37, 4 }
 0x4ed   : > { %v11447_v52 = vpack.c.bf16 %v5282_v33, %v5282_v33  ;;  %v15536_v57 = vadd.f32 %v12186_v20, %v5068_v38  ;;  %v10928_v51 = vadd.f32 -1.0, %v12625_v17  ;;  %v12406_v20 = vld [vmem:[%s18407_s1 + $0x1e8] sm:$0xff]   ;;  %v6017_v11 = vshrl.u32 %v15544_v42, 16  ;;  %v5169_v38 = vpop.f32.mrf.mxu0 }
 0x4ee   : > { %v5244_v62 = vmul.f32 1.442695, %v5222_v48  ;;  %6170 = vrot.lane.b32.xlu0 %v11001_v32, %s12730_s13  ;;  %v6020_v5 = vshll.u32 %v15544_v42, 16  ;;  %11716 = vmatpush3.bf16.msra.mxu0 %v12406_v20  ;;  %v5688_v39 = vshll.u32 %v15517_v49, 16  ;;  %v15577_v48 = vld [vmem:[#allocation2 + $0x4c] sm:$0x1] }
 0x4ef   : > { %v5377_v19 = vshrl.u32 %v11447_v52, 16  ;;  %v5283_v27 = vsel %vm5203_vm0, %v15490_v61, %v10928_v51  ;;  %v5223_v22 = vmin.f32 %v15536_v57, 0.0  ;;  %v5380_v9 = vshll.u32 %v11447_v52, 16  ;;  %12275 = vmatpush3.bf16.msra.mxu1 %v12406_v20  ;;  %11717 = vmatprep.subr.bf16.mxu0 %v12407_v6 }
 0x4f0   : > { %12630 = vpow2.f32 %v5244_v62  ;;  %v11448_v14 = vpack.c.bf16 %v5283_v27, %v5283_v27  ;;  %v5680_v61 = vshll.u32 %v15506_v1, 16  ;;  %12268 = vmatprep.subr.bf16.mxu1 %v12407_v6  ;;  %v15580_v7 = vrot.slane %v6017_v11, 4  ;;  %v5538_v27 = vld [vmem:[#allocation2 + $0x20] sm:$0xf]  ;;  %v15603_v11 = vpop.f32.mrf.mxu0 }
 0x4f1   : > { %v5379_v13 = vrot.slane %v5377_v19, 7  ;;  %v5246_v58 = vmul.f32 1.442695, %v5223_v22  ;;  %v6026_v53 = vshll.u32 %v15577_v48, 16  ;;  %v12409_v19 = vld [vmem:[%s18407_s1 + $0x218] sm:$0xff]   ;;  %vm5205_vm5 = vcmp.gt.f32.partialorder %v15509_v43, 0.0 }
 0x4f2   : > { %6206 = vrot.lane.b32.xlu0 %v11017_v25, %s12731_s14  ;;  %v5385_v12 = vshrl.u32 %v11448_v14, 16  ;;  %v5388_v50 = vshll.u32 %v11448_v14, 16  ;;  %v5682_v32 = vrot.slane %v5680_v61, 5  ;;  %11718 = vmatpush3.bf16.msra.mxu0 %v12408_v36  ;;  %v5541_v22 = vld [vmem:[#allocation2 + $0x24] sm:$0x1]  ;;  %vm5206_vm7 = vcmp.gt.f32.partialorder %v15523_v30, 0.0 }
 0x4f3   : > { %v5382_v59 = vor.u32 %v5380_v9, %v5379_v13  ;;  %v5383_v26 = vrot.slane %v5379_v13, 4  ;;  %12632 = vpow2.f32 %v5246_v58  ;;  %12276 = vmatpush3.bf16.msra.mxu1 %v12408_v36  ;;  %v15596_v9 = vrot.slane %v5688_v39, 5  ;;  %11719 = vmatprep.subr.bf16.mxu0 %v12409_v19 }
 0x4f4   : > { %v12627_v1 = vpop.eup %12626  ;;  %v5387_v41 = vrot.slane %v5385_v12, 7  ;;  %v15592_v13 = vsel %vm13046_vm12, %v5678_v18, %v5682_v32  ;;  %12269 = vmatprep.subr.bf16.mxu1 %v12409_v19  ;;  %v15607_v12 = vrot.slane %v6020_v5, 5  ;;  %vm5207_vm8 = vcmp.gt.f32.partialorder %v15536_v57, 0.0 }
 0x4f5   : > { %v5533_v4 = vsel %vm12846_vm6, %v5382_v59, %v5532_v47  ;;  %v5536_v60 = vsel %vm12787_vm2, %v5383_v26, %v5535_v15  ;;  %v10929_v23 = vadd.f32 -1.0, %v12627_v1  ;;  %v5694_v1 = vshll.u32 %v15519_v16, 16  ;;  %v12412_v15 = vld [vmem:[%s18407_s1 + $0x210] sm:$0xff]  }
 0x4f6   : > { %v11681_v45 = vpop.f32.mrf.mxu1  ;;  %5534 = vst [vmem:[#allocation2 + $0x18] sm:$0xf] %v5533_v4  ;;  %5537 = vst [vmem:[#allocation2 + $0x1c] sm:$0x1] %v5536_v60  ;;  %v5390_v17 = vor.u32 %v5388_v50, %v5387_v41  ;;  %v5391_v52 = vrot.slane %v5387_v41, 4  ;;  %11720 = vmatpush3.bf16.msra.mxu0 %v12410_v54  ;;  %v12413_v50 = vld [vmem:[%s18407_s1 + $0x1d0] sm:$0xff]  }
 0x4f7   : > { %v5284_v62 = vsel %vm5204_vm4, %v15502_v55, %v10929_v23  ;;  %v15594_v55 = vrot.slane %v5685_v3, 4  ;;  %12277 = vmatpush3.bf16.msra.mxu1 %v12410_v54  ;;  %11721 = vmatprep.subr.bf16.mxu0 %v12412_v15  ;;  %v12414_v54 = vld [vmem:[%s18407_s1 + $0x208] sm:$0xff]  }
 0x4f8   : > { %v11682_v33 = vpop.f32.mrf.mxu1  ;;  %v12629_v20 = vpop.eup %12628  ;;  %v11449_v25 = vpack.c.bf16 %v5284_v62, %v5284_v62  ;;  %v5539_v14 = vsel %vm12846_vm6, %v5390_v17, %v5538_v27  ;;  %v5542_v47 = vsel %vm12787_vm2, %v5391_v52, %v5541_v22  ;;  %12270 = vmatprep.subr.bf16.mxu1 %v12412_v15  ;;  %v5544_v17 = vld [vmem:[#allocation2 + $0x28] sm:$0xf] }
 0x4f9   : > { %v11683_v51 = vadd.f32 %v11682_v33, %v11681_v45  ;;  %v10930_v58 = vadd.f32 -1.0, %v12629_v20  ;;  %5540 = vst [vmem:[#allocation2 + $0x20] sm:$0xf] %v5539_v14  ;;  %5543 = vst [vmem:[#allocation2 + $0x24] sm:$0x1] %v5542_v47  ;;  %v5691_v23 = vor.u32 %v15596_v9, %v15594_v55  ;;  %v12415_v20 = vld [vmem:[%s18407_s1 + $0x1c8] sm:$0xff]  }
 0x4fa   : > { %v11684_v37 = vpop.f32.mrf.mxu1  ;;  %v5393_v59 = vshrl.u32 %v11449_v25, 16  ;;  %v5396_v18 = vshll.u32 %v11449_v25, 16  ;;  %11722 = vmatpush3.bf16.msra.mxu0 %v12413_v50  ;;  %v5550_v9 = vld [vmem:[#allocation2 + $0x30] sm:$0xf] }
 0x4fb   : > { %v5073_v61 = vadd.f32 %v11683_v51, %v15479_v44  ;;  %v5285_v3 = vsel %vm5205_vm5, %v15509_v43, %v10930_v58  ;;  %v15626_v43 = vcombine.low %v5669_v31, %v15592_v13  ;;  %12278 = vmatpush3.bf16.msra.mxu1 %v12413_v50  ;;  %v15659_v58 = vrot.slane %v5694_v1, 5  ;;  %11723 = vmatprep.subr.bf16.mxu0 %v12414_v54  ;;  %v12417_v1 = vld [vmem:[%s18407_s1 + $0x200] sm:$0xff]  }
 0x4fc   : > { %v11685_v26 = vpop.f32.mrf.mxu1  ;;  %v5395_v5 = vrot.slane %v5393_v59, 7  ;;  %v11450_v39 = vpack.c.bf16 %v5285_v3, %v5285_v3  ;;  %v15661_v15 = vrot.slane %v5691_v23, 4  ;;  %12271 = vmatprep.subr.bf16.mxu1 %v12414_v54 }
 0x4fd   : > { %v15610_v6 = vadd.f32 %v5169_v38, %v5073_v61  ;;  %v11686_v36 = vadd.f32 %v11685_v26, %v11684_v37  ;;  %v12631_v45 = vpop.eup %12630  ;;  %v15630_v41 = vld [vmem:[#allocation2 + $0x18] sm:$0xf]  ;;  %v5172_v38 = vpop.f32.mrf.mxu0  ;;  %v5553_v26 = vld [vmem:[#allocation2 + $0x34] sm:$0x1] }
 0x4fe   : > { %v10931_v16 = vadd.f32 -1.0, %v12631_v45  ;;  %v5398_v33 = vor.u32 %v5396_v18, %v5395_v5  ;;  %v5399_v32 = vrot.slane %v5395_v5, 4  ;;  %v5401_v52 = vshrl.u32 %v11450_v39, 16  ;;  %11724 = vmatpush3.bf16.msra.mxu0 %v12415_v20 }
 0x4ff   : > { %v5224_v4 = vmin.f32 %v15610_v6, 0.0  ;;  %v5076_v60 = vadd.f32 %v11686_v36, %v15479_v44  ;;  %v5404_v8 = vshll.u32 %v11450_v39, 16  ;;  %v15641_v19 = vcombine.low %v15517_v49, %v15630_v41  ;;  %v15653_v49 = vld [vmem:[#allocation2 + $0x1c] sm:$0x1]  ;;  %v12418_v39 = vld [vmem:[%s18407_s1 + $0x1c0] sm:$0xff]   ;;  %12279 = vmatpush3.bf16.msra.mxu1 %v12415_v20  ;;  %11725 = vmatprep.subr.bf16.mxu0 %v12417_v1 }
 0x500   : > { %v5286_v31 = vsel %vm5206_vm7, %v15523_v30, %v10931_v16  ;;  %v5545_v27 = vsel %vm12846_vm6, %v5398_v33, %v5544_v17  ;;  %v5548_v30 = vsel %vm12787_vm2, %v5399_v32, %v5547_v29  ;;  %v5403_v22 = vrot.slane %v5401_v52, 7  ;;  %v12633_v55 = vpop.eup %12632  ;;  %v15674_v33 = vld [vmem:[#allocation2 + $0x20] sm:$0xf]  ;;  %v15676_v32 = vld [vmem:[#allocation2 + $0x24] sm:$0x1]  ;;  %12272 = vmatprep.subr.bf16.mxu1 %v12417_v1 }
 0x501   : > { %v5248_v62 = vmul.f32 1.442695, %v5224_v4  ;;  %v15637_v51 = vadd.f32 %v5172_v38, %v5076_v60  ;;  %v11451_v25 = vpack.c.bf16 %v5286_v31, %v5286_v31  ;;  %5546 = vst [vmem:[#allocation2 + $0x28] sm:$0xf] %v5545_v27  ;;  %5549 = vst [vmem:[#allocation2 + $0x2c] sm:$0x1] %v5548_v30  ;;  %6226 = vrot.lane.b32.xlu0 %v15641_v19, %s12729_s12 }
 0x502   : > { %v11687_v37 = vpop.f32.mrf.mxu1  ;;  %v10960_v47 = vrot.slane %v15630_v41, 9  ;;  %v5406_v61 = vor.u32 %v5404_v8, %v5403_v22  ;;  %v5407_v59 = vrot.slane %v5403_v22, 4  ;;  %v10932_v50 = vadd.f32 -1.0, %v12633_v55  ;;  %11726 = vmatpush3.bf16.msra.mxu0 %v12418_v39  ;;  %v5556_v27 = vld [vmem:[#allocation2 + $0x38] sm:$0xf] }
 0x503   : > { %12634 = vpow2.f32 %v5248_v62  ;;  %v5225_v14 = vmin.f32 %v15637_v51, 0.0  ;;  %v5409_v3 = vshrl.u32 %v11451_v25, 16  ;;  %v5926_v18 = vrot.slane %v15653_v49, 5  ;;  %v5559_v30 = vld [vmem:[#allocation2 + $0x3c] sm:$0x1]  ;;  %12280 = vmatpush3.bf16.msra.mxu1 %v12418_v39 }
 0x504   : > { %v11688_v36 = vpop.f32.mrf.mxu1  ;;  %v5551_v16 = vsel %vm12846_vm6, %v5406_v61, %v5550_v9  ;;  %v5554_v4 = vsel %vm12787_vm2, %v5407_v59, %v5553_v26  ;;  %v5412_v23 = vshll.u32 %v11451_v25, 16  ;;  %v5287_v17 = vsel %vm5207_vm8, %v15536_v57, %v10932_v50  ;;  %v15689_v57 = vpop.f32.mrf.mxu0 }
 0x505   : > { %v5250_v45 = vmul.f32 1.442695, %v5225_v14  ;;  %v11689_v5 = vadd.f32 %v11688_v36, %v11687_v37  ;;  %v5411_v60 = vrot.slane %v5409_v3, 7  ;;  %5552 = vst [vmem:[#allocation2 + $0x30] sm:$0xf] %v5551_v16  ;;  %v5927_v8 = vsel %vm12936_vm9, %v10960_v47, %v5926_v18  ;;  %6104 = vrot.lane.b32.xlu0 %v15626_v43, %s12731_s14  ;;  %v12420_v3 = vld [vmem:[%s18407_s1 + $0x1f8] sm:$0xff]  }
 0x506   : > { %v11690_v38 = vpop.f32.mrf.mxu1  ;;  %5555 = vst [vmem:[#allocation2 + $0x34] sm:$0x1] %v5554_v4  ;;  %v11452_v62 = vpack.c.bf16 %v5287_v17, %v5287_v17  ;;  %v15687_v54 = vcombine.low %v15540_v34, %v5927_v8  ;;  %v10961_v43 = vrot.slane %v15674_v33, 9  ;;  %v5930_v37 = vrot.slane %v15676_v32, 5  ;;  %v12421_v36 = vld [vmem:[%s18407_s1 + $0x1b8] sm:$0xff]   ;;  %v5185_v39 = vpop.f32.mrf.mxu0  ;;  %11727 = vmatprep.subr.bf16.mxu0 %v12420_v3  ;;  %v12422_v17 = vld [vmem:[%s18407_s1 + $0x1f0] sm:$0xff]   ;;  %12273 = vmatprep.subr.bf16.mxu1 %v12420_v3 }
 0x507   : > { %12636 = vpow2.f32 %v5250_v45  ;;  %v5081_v52 = vadd.f32 %v11689_v5, %v15479_v44  ;;  %v5414_v29 = vor.u32 %v5412_v23, %v5411_v60  ;;  %v5415_v31 = vrot.slane %v5411_v60, 4  ;;  %v5562_v16 = vld [vmem:[#allocation2 + $0x40] sm:$0xf]  ;;  %11728 = vmatpush3.bf16.msra.mxu0 %v12421_v36  ;;  %12281 = vmatpush3.bf16.msra.mxu1 %v12421_v36 }
 0x508   : > { %18481 = vst [vmem:[#allocation22_spill] sm:$0xff] %v15687_v54  ;;  %v11691_v20 = vpop.f32.mrf.mxu1  ;;  %v5417_v9 = vshrl.u32 %v11452_v62, 16  ;;  %vm5208_vm10 = vcmp.gt.f32.partialorder %v15610_v6, 0.0  ;;  %6146 = vrot.lane.b32.xlu1 %v15687_v54, %s12729_s12  ;;  %v5420_v47 = vshll.u32 %v11452_v62, 16  ;;  %v15709_v26 = vsel %vm12936_vm9, %v10961_v43, %v5930_v37  ;;  %11729 = vmatprep.subr.bf16.mxu0 %v12422_v17 }
 0x509   : > { %v15692_v22 = vadd.f32 %v15559_v35, %v5081_v52  ;;  %v11692_v25 = vadd.f32 %v11691_v20, %v11690_v38  ;;  %v5557_v34 = vsel %vm12846_vm6, %v5414_v29, %v5556_v27  ;;  %v5560_v55 = vsel %vm12787_vm2, %v5415_v31, %v5559_v30  ;;  %v5565_v29 = vld [vmem:[#allocation2 + $0x44] sm:$0x1]  ;;  %v15731_v20 = vld [vmem:[#allocation2 + $0x28] sm:$0xf]  ;;  %v15733_v27 = vld [vmem:[#allocation2 + $0x2c] sm:$0x1]  ;;  %12274 = vmatprep.subr.bf16.mxu1 %v12422_v17 }
 0x50a   : > { %v11002_v35 = vcombine.low %v15630_v41, %v15674_v33  ;;  %v11693_v14 = vpop.f32.mrf.mxu1  ;;  %5558 = vst [vmem:[#allocation2 + $0x38] sm:$0xf] %v5557_v34  ;;  %5561 = vst [vmem:[#allocation2 + $0x3c] sm:$0x1] %v5560_v55  ;;  %v5419_v50 = vrot.slane %v5417_v9, 7  ;;  %v11018_v5 = vcombine.low %v5927_v8, %v15709_v26  ;;  %v5699_v18 = vshrl.u32 %v15630_v41, 16 }
 0x50b   : > { %v5226_v61 = vmin.f32 %v15692_v22, 0.0  ;;  %v5084_v59 = vadd.f32 %v11692_v25, %v15479_v44  ;;  %v5702_v1 = vshll.u32 %v15630_v41, 16  ;;  %v5708_v38 = vshll.u32 %v15653_v49, 16  ;;  %v12423_v30 = vld [vmem:[%s18407_s1 + $0x1b0] sm:$0xff]  }
 0x50c   : > { %v11694_v45 = vpop.f32.mrf.mxu1  ;;  %v5422_v52 = vor.u32 %v5420_v47, %v5419_v50  ;;  %v5423_v8 = vrot.slane %v5419_v50, 4  ;;  %6172 = vrot.lane.b32.xlu1 %v11002_v35, %s12730_s13  ;;  %6208 = vrot.lane.b32.xlu0 %v11018_v5, %s12731_s14  ;;  %v5701_v41 = vrot.slane %v5699_v18, 4  ;;  %v15742_v35 = vpop.f32.mrf.mxu0  ;;  %v15748_v36 = vcombine.low %v15674_v33, %v15731_v20 }
 0x50d   : > { %v5252_v4 = vmul.f32 1.442695, %v5226_v61  ;;  %v15721_v60 = vadd.f32 %v15603_v11, %v5084_v59  ;;  %v11695_v23 = vadd.f32 %v11694_v45, %v11693_v14  ;;  %v5704_v31 = vrot.slane %v5702_v1, 5  ;;  %11730 = vmatpush3.bf16.msra.mxu0 %v12423_v30  ;;  %12282 = vmatpush3.bf16.msra.mxu1 %v12423_v30 }
 0x50e   : > { %v11696_v11 = vpop.f32.mrf.mxu1  ;;  %v5563_v43 = vsel %vm12846_vm6, %v5422_v52, %v5562_v16  ;;  %v5566_v37 = vsel %vm12787_vm2, %v5423_v8, %v5565_v29  ;;  %v5710_v55 = vrot.slane %v5708_v38, 5  ;;  %18482 = vst [vmem:[#allocation23_spill] sm:$0xff] %v15748_v36  ;;  %v10962_v50 = vrot.slane %v15731_v20, 9 }
 0x50f   : > { %12638 = vpow2.f32 %v5252_v4  ;;  %v5227_v62 = vmin.f32 %v15721_v60, 0.0  ;;  %v5089_v49 = vadd.f32 %v11695_v23, %v15479_v44  ;;  %v5705_v34 = vor.u32 %v5704_v31, %v5701_v41  ;;  %5564 = vst [vmem:[#allocation2 + $0x40] sm:$0xf] %v5563_v43  ;;  %5567 = vst [vmem:[#allocation2 + $0x44] sm:$0x1] %v5566_v37 }
 0x510   : > { %v12635_v25 = vpop.eup %12634  ;;  %v11697_v9 = vpop.f32.mrf.mxu1  ;;  %v5934_v45 = vrot.slane %v15733_v27, 5  ;;  %6228 = vrot.lane.b32.xlu0 %v15748_v36, %s12729_s12  ;;  %vm5209_vm11 = vcmp.gt.f32.partialorder %v15637_v51, 0.0  ;;  %vm5210_vm0 = vcmp.gt.f32.partialorder %v15692_v22, 0.0  ;;  %v5716_v30 = vshll.u32 %v15674_v33, 16 }
 0x511   : > { %v10933_v14 = vadd.f32 -1.0, %v12635_v25  ;;  %v5254_v47 = vmul.f32 1.442695, %v5227_v62  ;;  %v15744_v61 = vadd.f32 %v5185_v39, %v5089_v49  ;;  %v11698_v59 = vadd.f32 %v11697_v9, %v11696_v11 }
 0x512   : > { %v5706_v3 = vrot.slane %v5705_v34, 4  ;;  %v11699_v5 = vpop.f32.mrf.mxu1  ;;  %v15760_v39 = vsel %vm13046_vm12, %v15661_v15, %v15659_v58  ;;  %v5188_v58 = vpop.f32.mrf.mxu0  ;;  %v5713_v49 = vshrl.u32 %v15674_v33, 16  ;;  %v5718_v9 = vrot.slane %v5716_v30, 5  ;;  %v5571_v33 = vld [vmem:[#allocation2 + $0x5c] sm:$0x1] }
 0x513   : > { %v5288_v18 = vsel %vm5208_vm10, %v15610_v6, %v10933_v14  ;;  %12640 = vpow2.f32 %v5254_v47  ;;  %v5228_v1 = vmin.f32 %v15744_v61, 0.0  ;;  %v5092_v38 = vadd.f32 %v11698_v59, %v15479_v44  ;;  %v5568_v59 = vld [vmem:[#allocation2 + $0x58] sm:$0xf] }
 0x514   : > { %v12637_v16 = vpop.eup %12636  ;;  %v11453_v4 = vpack.c.bf16 %v5288_v18, %v5288_v18  ;;  %v15764_v23 = vsel %vm13046_vm12, %v5706_v3, %v5710_v55  ;;  %v15771_v6 = vsel %vm12936_vm9, %v10962_v50, %v5934_v45  ;;  %v11700_v17 = vpop.f32.mrf.mxu1  ;;  %v5715_v55 = vrot.slane %v5713_v49, 4 }
 0x515   : > { %18483 = vst [vmem:[#allocation24_spill] sm:$0xff] %v15764_v23  ;;  %v10934_v15 = vadd.f32 -1.0, %v12637_v16  ;;  %v5256_v52 = vmul.f32 1.442695, %v5228_v1  ;;  %v10986_v8 = vcombine.low %v15760_v39, %v15764_v23  ;;  %v15777_v41 = vadd.f32 %v5188_v58, %v5092_v38  ;;  %v5574_v58 = vld [vmem:[#allocation2 + $0x60] sm:$0xf] }
 0x516   : > { %v5425_v29 = vshrl.u32 %v11453_v4, 16  ;;  %v15781_v31 = vcombine.low %v15709_v26, %v15771_v6  ;;  %v11701_v11 = vadd.f32 %v11700_v17, %v11699_v5  ;;  %v5428_v43 = vshll.u32 %v11453_v4, 16  ;;  %v11702_v18 = vpop.f32.mrf.mxu1 }
 0x517   : > { %v5289_v62 = vsel %vm5209_vm11, %v15637_v51, %v10934_v15  ;;  %12642 = vpow2.f32 %v5256_v52  ;;  %6106 = vrot.lane.b32.xlu1 %v10986_v8, %s12731_s14  ;;  %v5229_v34 = vmin.f32 %v15777_v41, 0.0  ;;  %6246 = vrot.lane.b32.xlu0 %v10986_v8, %s12730_s13  ;;  %v5722_v51 = vshll.u32 %v15676_v32, 16 }
 0x518   : > { %18484 = vst [vmem:[#allocation25_spill] sm:$0xff] %v15781_v31  ;;  %v5427_v25 = vrot.slane %v5425_v29, 7  ;;  %v11454_v37 = vpack.c.bf16 %v5289_v62, %v5289_v62  ;;  %v5097_v26 = vadd.f32 %v11701_v11, %v15479_v44  ;;  %vm5211_vm4 = vcmp.gt.f32.partialorder %v15721_v60, 0.0  ;;  %v5577_v11 = vld [vmem:[#allocation2 + $0x64] sm:$0x1] }
 0x519   : > { %v5258_v45 = vmul.f32 1.442695, %v5229_v34  ;;  %v5719_v1 = vor.u32 %v5718_v9, %v5715_v55  ;;  %v5727_v17 = vshrl.u32 %v15731_v20, 16  ;;  %v5724_v52 = vrot.slane %v5722_v51, 5  ;;  %v11703_v34 = vpop.f32.mrf.mxu1 }
 0x51a   : > { %v5430_v14 = vor.u32 %v5428_v43, %v5427_v25  ;;  %v5431_v47 = vrot.slane %v5427_v25, 4  ;;  %v5433_v3 = vshrl.u32 %v11454_v37, 16  ;;  %v5436_v50 = vshll.u32 %v11454_v37, 16 }
 0x51b   : > { %6148 = vrot.lane.b32.xlu1 %v15781_v31, %s12729_s12  ;;  %v15795_v5 = vadd.f32 %v15689_v57, %v5097_v26  ;;  %12644 = vpow2.f32 %v5258_v45  ;;  %v5720_v62 = vrot.slane %v5719_v1, 4  ;;  %v5729_v49 = vrot.slane %v5727_v17, 4  ;;  %v15808_v26 = vld [vmem:[#allocation2 + $0x30] sm:$0xf] }
 0x51c   : > { %v12639_v16 = vpop.eup %12638  ;;  %v5569_v32 = vsel %vm12846_vm6, %v5430_v14, %v5568_v59  ;;  %v5572_v4 = vsel %vm12787_vm2, %v5431_v47, %v5571_v33  ;;  %v5435_v38 = vrot.slane %v5433_v3, 7  ;;  %v5730_v43 = vshll.u32 %v15731_v20, 16  ;;  %v15815_v47 = vld [vmem:[#allocation2 + $0x34] sm:$0x1] }
 0x51d   : > { %5570 = vst [vmem:[#allocation2 + $0x58] sm:$0xf] %v5569_v32  ;;  %5573 = vst [vmem:[#allocation2 + $0x5c] sm:$0x1] %v5572_v4  ;;  %v10935_v15 = vadd.f32 -1.0, %v12639_v16  ;;  %v5230_v57 = vmin.f32 %v15795_v5, 0.0 }
 0x51e   : > { %v5438_v8 = vor.u32 %v5436_v50, %v5435_v38  ;;  %v5439_v29 = vrot.slane %v5435_v38, 4  ;;  %v5736_v37 = vshll.u32 %v15733_v27, 16  ;;  %vm5212_vm5 = vcmp.gt.f32.partialorder %v15744_v61, 0.0 }
 0x51f   : > { %v5290_v30 = vsel %vm5210_vm0, %v15692_v22, %v10935_v15  ;;  %v5260_v25 = vmul.f32 1.442695, %v5230_v57  ;;  %v15819_v27 = vsel %vm13046_vm12, %v5720_v62, %v5724_v52  ;;  %v5732_v59 = vrot.slane %v5730_v43, 5 }
 0x520   : > { %v12641_v55 = vpop.eup %12640  ;;  %v5575_v9 = vsel %vm12846_vm6, %v5438_v8, %v5574_v58  ;;  %v5578_v51 = vsel %vm12787_vm2, %v5439_v29, %v5577_v11  ;;  %v11455_v14 = vpack.c.bf16 %v5290_v30, %v5290_v30  ;;  %18485 = vst [vmem:[#allocation26_spill] sm:$0xff] %v15819_v27  ;;  %v5738_v33 = vrot.slane %v5736_v37, 5  ;;  %v5580_v30 = vld [vmem:[#allocation2 + $0x68] sm:$0xf] }
 0x521   : > { %5576 = vst [vmem:[#allocation2 + $0x60] sm:$0xf] %v5575_v9  ;;  %5579 = vst [vmem:[#allocation2 + $0x64] sm:$0x1] %v5578_v51  ;;  %v10936_v22 = vadd.f32 -1.0, %v12641_v55  ;;  %12646 = vpow2.f32 %v5260_v25  ;;  %v11704_v50 = vadd.f32 %v11703_v34, %v11702_v18  ;;  %v10963_v45 = vrot.slane %v15808_v26, 9 }
 0x522   : > { %v5441_v3 = vshrl.u32 %v11455_v14, 16  ;;  %v5444_v1 = vshll.u32 %v11455_v14, 16  ;;  %v5733_v32 = vor.u32 %v5732_v59, %v5729_v49  ;;  %v5938_v4 = vrot.slane %v15815_v47, 5  ;;  %v5583_v25 = vld [vmem:[#allocation2 + $0x6c] sm:$0x1] }
 0x523   : > { %v5291_v16 = vsel %vm5211_vm4, %v15721_v60, %v10936_v22  ;;  %v5100_v15 = vadd.f32 %v11704_v50, %v15479_v44  ;;  %v5741_v57 = vshrl.u32 %v15808_v26, 16  ;;  %v5744_v29 = vshll.u32 %v15808_v26, 16  ;;  %v15845_v55 = vld [vmem:[#allocation2 + $0x38] sm:$0xf]  ;;  %v5586_v50 = vld [vmem:[#allocation2 + $0x70] sm:$0xf] }
 0x524   : > { %v12643_v38 = vpop.eup %12642  ;;  %v5443_v17 = vrot.slane %v5441_v3, 7  ;;  %v11456_v58 = vpack.c.bf16 %v5291_v16, %v5291_v16  ;;  %v5734_v8 = vrot.slane %v5733_v32, 4  ;;  %v15830_v18 = vsel %vm12936_vm9, %v10963_v45, %v5938_v4  ;;  %v5589_v45 = vld [vmem:[#allocation2 + $0x74] sm:$0x1] }
 0x525   : > { %v10937_v52 = vadd.f32 -1.0, %v12643_v38  ;;  %v15841_v37 = vadd.f32 %v15742_v35, %v5100_v15  ;;  %v11019_v34 = vcombine.low %v15771_v6, %v15830_v18  ;;  %vm5213_vm7 = vcmp.gt.f32.partialorder %v15777_v41, 0.0 }
 0x526   : > { %v5446_v11 = vor.u32 %v5444_v1, %v5443_v17  ;;  %v5447_v60 = vrot.slane %v5443_v17, 4  ;;  %v5449_v62 = vshrl.u32 %v11456_v58, 16  ;;  %v5452_v49 = vshll.u32 %v11456_v58, 16 }
 0x527   : > { %v5292_v44 = vsel %vm5212_vm5, %v15744_v61, %v10937_v52  ;;  %v15838_v43 = vsel %vm13046_vm12, %v5734_v8, %v5738_v33  ;;  %v5231_v22 = vmin.f32 %v15841_v37, 0.0  ;;  %6210 = vrot.lane.b32.xlu0 %v11019_v34, %s12731_s14  ;;  %v5743_v6 = vrot.slane %v5741_v57, 4  ;;  %v15865_v52 = vld [vmem:[#allocation2 + $0x3c] sm:$0x1] }
 0x528   : > { %v5581_v9 = vsel %vm12846_vm6, %v5446_v11, %v5580_v30  ;;  %v5584_v51 = vsel %vm12787_vm2, %v5447_v60, %v5583_v25  ;;  %v5451_v14 = vrot.slane %v5449_v62, 7  ;;  %v11457_v61 = vpack.c.bf16 %v5292_v44, %v5292_v44  ;;  %v12645_v59 = vpop.eup %12644  ;;  %v5592_v25 = vld [vmem:[#allocation2 + $0x78] sm:$0xf] }
 0x529   : > { %5582 = vst [vmem:[#allocation2 + $0x68] sm:$0xf] %v5581_v9  ;;  %5585 = vst [vmem:[#allocation2 + $0x6c] sm:$0x1] %v5584_v51  ;;  %v10987_v35 = vcombine.low %v15819_v27, %v15838_v43  ;;  %v15858_v16 = vcombine.low %v15808_v26, %v15845_v55  ;;  %v10938_v4 = vadd.f32 -1.0, %v12645_v59  ;;  %v5746_v17 = vrot.slane %v5744_v29, 5 }
 0x52a   : > { %v5454_v3 = vor.u32 %v5452_v49, %v5451_v14  ;;  %v5455_v33 = vrot.slane %v5451_v14, 4  ;;  %v5457_v1 = vshrl.u32 %v11457_v61, 16  ;;  %v5460_v32 = vshll.u32 %v11457_v61, 16  ;;  %v15874_v9 = vld [vmem:[#allocation2 + $0x98] sm:$0xf] }
 0x52b   : > { %18486 = vst [vmem:[#allocation27_spill] sm:$0xff] %v15858_v16  ;;  %6108 = vrot.lane.b32.xlu1 %v10987_v35, %s12731_s14  ;;  %v5262_v38 = vmul.f32 1.442695, %v5231_v22  ;;  %v5755_v8 = vshrl.u32 %v15845_v55, 16  ;;  %v5293_v11 = vsel %vm5213_vm7, %v15777_v41, %v10938_v4  ;;  %6230 = vrot.lane.b32.xlu0 %v15858_v16, %s12729_s12  ;;  %v5747_v29 = vor.u32 %v5746_v17, %v5743_v6  ;;  %v5595_v51 = vld [vmem:[#allocation2 + $0x7c] sm:$0x1] }
 0x52c   : > { %v5587_v58 = vsel %vm12846_vm6, %v5454_v3, %v5586_v50  ;;  %v5590_v15 = vsel %vm12787_vm2, %v5455_v33, %v5589_v45  ;;  %v5459_v57 = vrot.slane %v5457_v1, 7  ;;  %v5750_v60 = vshll.u32 %v15815_v47, 16  ;;  %18487 = vst [vmem:[#allocation28_spill] sm:$0xff] %v15874_v9  ;;  %v15888_v17 = vld [vmem:[#allocation2 + $0x44] sm:$0x1] }
 0x52d   : > { %5588 = vst [vmem:[#allocation2 + $0x70] sm:$0xf] %v5587_v58  ;;  %5591 = vst [vmem:[#allocation2 + $0x74] sm:$0x1] %v5590_v15  ;;  %12648 = vpow2.f32 %v5262_v38  ;;  %v11458_v44 = vpack.c.bf16 %v5293_v11, %v5293_v11  ;;  %v5757_v34 = vrot.slane %v5755_v8, 4  ;;  %v5748_v61 = vrot.slane %v5747_v29, 4 }
 0x52e   : > { %v12647_v62 = vpop.eup %12646  ;;  %v5462_v49 = vor.u32 %v5460_v32, %v5459_v57  ;;  %v5463_v30 = vrot.slane %v5459_v57, 4  ;;  %v5758_v41 = vshll.u32 %v15845_v55, 16  ;;  %v5764_v22 = vshll.u32 %v15865_v52, 16  ;;  %v15886_v38 = vld [vmem:[#allocation2 + $0x40] sm:$0xf] }
 0x52f   : > { %v10939_v14 = vadd.f32 -1.0, %v12647_v62  ;;  %v5465_v59 = vshrl.u32 %v11458_v44, 16  ;;  %vm5214_vm8 = vcmp.gt.f32.partialorder %v15795_v5, 0.0  ;;  %6248 = vrot.lane.b32.xlu0 %v10987_v35, %s12730_s13  ;;  %v5752_v33 = vrot.slane %v5750_v60, 5  ;;  %v5598_v29 = vld [vmem:[#allocation2 + $0x80] sm:$0xf] }
 0x530   : > { %v5593_v6 = vsel %vm12846_vm6, %v5462_v49, %v5592_v25  ;;  %v5596_v47 = vsel %vm12787_vm2, %v5463_v30, %v5595_v51  ;;  %v5760_v50 = vrot.slane %v5758_v41, 5  ;;  %v6031_v45 = vshrl.u32 %v15874_v9, 16  ;;  %v5601_v49 = vld [vmem:[#allocation2 + $0x84] sm:$0x1] }
 0x531   : > { %5594 = vst [vmem:[#allocation2 + $0x78] sm:$0xf] %v5593_v6  ;;  %5597 = vst [vmem:[#allocation2 + $0x7c] sm:$0x1] %v5596_v47  ;;  %v5294_v3 = vsel %vm5214_vm8, %v15795_v5, %v10939_v14  ;;  %v5467_v1 = vrot.slane %v5465_v59, 7  ;;  %v5468_v32 = vshll.u32 %v11458_v44, 16  ;;  %v6023_v58 = vor.u32 %v15607_v12, %v15580_v7 }
 0x532   : > { %v11459_v4 = vpack.c.bf16 %v5294_v3, %v5294_v3  ;;  %v15894_v15 = vsel %vm13046_vm12, %v5748_v61, %v5752_v33  ;;  %v5761_v5 = vor.u32 %v5760_v50, %v5757_v34  ;;  %v5766_v35 = vrot.slane %v5764_v22, 5  ;;  %v5604_v3 = vld [vmem:[#allocation2 + $0x88] sm:$0xf]  ;;  %v5607_v33 = vld [vmem:[#allocation2 + $0x8c] sm:$0x1] }
 0x533   : > { %v6034_v57 = vshll.u32 %v15874_v9, 16  ;;  %v5470_v8 = vor.u32 %v5468_v32, %v5467_v1  ;;  %v5471_v11 = vrot.slane %v5467_v1, 4  ;;  %v10964_v62 = vrot.slane %v15845_v55, 9 }
 0x534   : > { %v5473_v60 = vshrl.u32 %v11459_v4, 16  ;;  %v5762_v30 = vrot.slane %v5761_v5, 4  ;;  %v10973_v25 = vrot.slane %v15886_v38, 9  ;;  %v6010_v7 = vrot.slane %v15888_v17, 5  ;;  %v15923_v5 = vld [vmem:[#allocation2 + $0x68] sm:$0xf] }
 0x535   : > { %v5977_v12 = vshrl.u32 %v15886_v38, 16  ;;  %v5599_v44 = vsel %vm12846_vm6, %v5470_v8, %v5598_v29  ;;  %v5602_v34 = vsel %vm12787_vm2, %v5471_v11, %v5601_v49  ;;  %v5476_v14 = vshll.u32 %v11459_v4, 16  ;;  %v15931_v29 = vld [vmem:[#allocation2 + $0x60] sm:$0xf] }
 0x536   : > { %v5475_v51 = vrot.slane %v5473_v60, 7  ;;  %5600 = vst [vmem:[#allocation2 + $0x80] sm:$0xf] %v5599_v44  ;;  %5603 = vst [vmem:[#allocation2 + $0x84] sm:$0x1] %v5602_v34  ;;  %v15907_v61 = vsel %vm13046_vm12, %v5762_v30, %v5766_v35  ;;  %v5942_v41 = vrot.slane %v15865_v52, 5  ;;  %v15917_v1 = vsel %vm12936_vm9, %v10973_v25, %v6010_v7 }
 0x537   : > { %v5979_v22 = vrot.slane %v5977_v12, 4  ;;  %v5980_v6 = vshll.u32 %v15886_v38, 16  ;;  %v15913_v50 = vcombine.low %v15894_v15, %v15907_v61  ;;  %18488 = vst [vmem:[#allocation29_spill] sm:$0xff] %v15917_v1  ;;  %v15919_v4 = vrot.slane %v6023_v58, 4  ;;  %v15933_v60 = vld [vmem:[#allocation2 + $0x9c] sm:$0x1] }
 0x538   : > { %v5478_v47 = vor.u32 %v5476_v14, %v5475_v51  ;;  %v5479_v59 = vrot.slane %v5475_v51, 4  ;;  %v6028_v52 = vrot.slane %v6026_v53, 5  ;;  %18489 = vst [vmem:[#allocation30_spill] sm:$0xff] %v15933_v60  ;;  %v15935_v58 = vrot.slane %v6031_v45, 4  ;;  %v15944_v7 = vld [vmem:[#allocation2 + $0x58] sm:$0xf] }
 0x539   : > { %v5982_v32 = vrot.slane %v5980_v6, 5  ;;  %6250 = vrot.lane.b32.xlu0 %v15913_v50, %s12730_s13  ;;  %v15937_v48 = vrot.slane %v6034_v57, 5  ;;  %v15941_v49 = vsel %vm12936_vm9, %v10964_v62, %v5942_v41  ;;  %v5986_v25 = vshll.u32 %v15888_v17, 16  ;;  %v15946_v12 = vld [vmem:[#allocation2 + $0x64] sm:$0x1] }
 0x53a   : > { %v12649_v35 = vpop.eup %12648  ;;  %v5605_v8 = vsel %vm12846_vm6, %v5478_v47, %v5604_v3  ;;  %v5608_v11 = vsel %vm12787_vm2, %v5479_v59, %v5607_v33  ;;  %vm5215_vm10 = vcmp.gt.f32.partialorder %v15841_v37, 0.0  ;;  %v11020_v45 = vcombine.low %v15941_v49, %v15917_v1  ;;  %v15951_v57 = vld [vmem:[#allocation2 + $0x5c] sm:$0x1] }
 0x53b   : > { %5606 = vst [vmem:[#allocation2 + $0x88] sm:$0xf] %v5605_v8  ;;  %5609 = vst [vmem:[#allocation2 + $0x8c] sm:$0x1] %v5608_v11  ;;  %v10940_v53 = vadd.f32 -1.0, %v12649_v35  ;;  %v5983_v30 = vor.u32 %v5982_v32, %v5979_v22  ;;  %v5811_v44 = vshrl.u32 %v15923_v5, 16  ;;  %v11025_v35 = vcombine.low %v15886_v38, %v15544_v42 }
 0x53c   : > { %v6040_v34 = vshll.u32 %v15933_v60, 16  ;;  %v5797_v17 = vshrl.u32 %v15931_v29, 16  ;;  %v5800_v14 = vshll.u32 %v15931_v29, 16  ;;  %v10966_v22 = vrot.slane %v15944_v7, 9 }
 0x53d   : > { %v5295_v62 = vsel %vm5215_vm10, %v15841_v37, %v10940_v53  ;;  %v5984_v51 = vrot.slane %v5983_v30, 4  ;;  %6212 = vrot.lane.b32.xlu0 %v11020_v45, %s12731_s14  ;;  %v10967_v6 = vrot.slane %v15931_v29, 9  ;;  %v5954_v47 = vrot.slane %v15946_v12, 5  ;;  %v15969_v11 = vld [vmem:[#allocation2 + $0x80] sm:$0xf] }
 0x53e   : > { %v11460_v41 = vpack.c.bf16 %v5295_v62, %v5295_v62  ;;  %v5988_v59 = vrot.slane %v5986_v25, 5  ;;  %v5950_v3 = vrot.slane %v15951_v57, 5  ;;  %v5813_v33 = vrot.slane %v5811_v44, 4  ;;  %v15971_v53 = vld [vmem:[#allocation2 + $0x84] sm:$0x1] }
 0x53f   : > { %v5814_v37 = vshll.u32 %v15923_v5, 16  ;;  %v6029_v8 = vsel %vm13046_vm12, %v15919_v4, %v6028_v52  ;;  %v15973_v30 = vrot.slane %v6040_v34, 5  ;;  %v5799_v45 = vrot.slane %v5797_v17, 4  ;;  %v5643_v4 = vld [vmem:[#allocation2 + $0x6c] sm:$0x1] }
 0x540   : > { %v5481_v32 = vshrl.u32 %v11460_v41, 16  ;;  %v15977_v25 = vsel %vm13046_vm12, %v5984_v51, %v5988_v59  ;;  %v5802_v44 = vrot.slane %v5800_v14, 5  ;;  %v5484_v21 = vshll.u32 %v11460_v41, 16  ;;  %v15992_v14 = vld [vmem:[#allocation2 + $0x70] sm:$0xf] }
 0x541   : > { %v5816_v62 = vrot.slane %v5814_v37, 5  ;;  %6232 = vrot.lane.b32.xlu0 %v11025_v35, %s12729_s12  ;;  %v15982_v42 = vsel %vm12936_vm9, %v10967_v6, %v5954_v47  ;;  %v6037_v34 = vor.u32 %v15937_v48, %v15935_v58  ;;  %v15990_v51 = vsel %vm12936_vm9, %v10966_v22, %v5950_v3  ;;  %v5645_v58 = vld [vmem:[#allocation2 + $0x74] sm:$0x1]  ;;  %v16000_v48 = vld [vmem:[#allocation2 + $0x78] sm:$0xf] }
 0x542   : > { %v5483_v56 = vrot.slane %v5481_v32, 7  ;;  %v15984_v52 = vld [vmem:[#allocation2 + $0x88] sm:$0xf]  ;;  %v15994_v41 = vld [vmem:[#allocation2 + $0x8c] sm:$0x1]  ;;  %v10971_v59 = vrot.slane %v15969_v11, 9  ;;  %v11027_v32 = vcombine.low %v15977_v25, %v6029_v8 }
 0x543   : > { %v5817_v17 = vor.u32 %v5816_v62, %v5813_v33  ;;  %v5970_v6 = vrot.slane %v15971_v53, 5  ;;  %v5806_v35 = vshll.u32 %v15946_v12, 16  ;;  %v5610_v22 = vld [vmem:[#allocation2 + $0x90] sm:$0xf]  ;;  %v5613_v3 = vld [vmem:[#allocation2 + $0x94] sm:$0x1]  ;;  %v11021_v33 = vcombine.low %v15990_v51, %v15982_v42 }
 0x544   : > { %v5486_v47 = vor.u32 %v5484_v21, %v5483_v56  ;;  %v5487_v37 = vrot.slane %v5483_v56, 4  ;;  %v5803_v62 = vor.u32 %v5802_v44, %v5799_v45  ;;  %v5820_v24 = vshll.u32 %v5643_v4, 16 }
 0x545   : > { %v10972_v10 = vrot.slane %v15984_v52, 9  ;;  %6252 = vrot.lane.b32.xlu0 %v11027_v32, %s12730_s13  ;;  %v10969_v12 = vrot.slane %v15992_v14, 9  ;;  %v5974_v8 = vrot.slane %v15994_v41, 5  ;;  %v5818_v2 = vrot.slane %v5817_v17, 4 }
 0x546   : > { %v5611_v21 = vsel %vm12846_vm6, %v5486_v47, %v5610_v22  ;;  %v5614_v56 = vsel %vm12787_vm2, %v5487_v37, %v5613_v3  ;;  %v5962_v40 = vrot.slane %v5645_v58, 5  ;;  %v16014_v45 = vsel %vm12936_vm9, %v10971_v59, %v5970_v6 }
 0x547   : > { %5612 = vst [vmem:[#allocation2 + $0x90] sm:$0xf] %v5611_v21  ;;  %5615 = vst [vmem:[#allocation2 + $0x94] sm:$0x1] %v5614_v56  ;;  %v5839_v44 = vshrl.u32 %v16000_v48, 16  ;;  %v16019_v47 = vsel %vm12936_vm9, %v10972_v10, %v5974_v8  ;;  %v5825_v37 = vshrl.u32 %v15992_v14, 16  ;;  %v16026_v17 = vcombine.low %v15931_v29, %v15923_v5 }
 0x548   : > { %v5828_v32 = vshll.u32 %v15992_v14, 16  ;;  %v5842_v22 = vshll.u32 %v16000_v48, 16  ;;  %v10968_v3 = vrot.slane %v15923_v5, 9  ;;  %v5958_v59 = vrot.slane %v5643_v4, 5  ;;  %v16034_v56 = vld [vmem:[#allocation2 + $0x7c] sm:$0x1] }
 0x549   : > { %18490 = vst [vmem:[#allocation31_spill] sm:$0xff] %v16026_v17  ;;  %v16031_v6 = vcombine.low %v16014_v45, %v16019_v47  ;;  %6214 = vrot.lane.b32.xlu0 %v11021_v33, %s12731_s14  ;;  %v5804_v10 = vrot.slane %v5803_v62, 4  ;;  %v5822_v21 = vrot.slane %v5820_v24, 5  ;;  %v5841_v8 = vrot.slane %v5839_v44, 4 }
 0x54a   : > { %v5844_v0 = vrot.slane %v5842_v22, 5  ;;  %v16038_v46 = vsel %vm12936_vm9, %v10969_v12, %v5962_v40  ;;  %v5834_v4 = vshll.u32 %v5645_v58, 16  ;;  %v5853_v60 = vshrl.u32 %v15969_v11, 16 }
 0x54b   : > { %18491 = vst [vmem:[#allocation32_spill] sm:$0xff] %v16031_v6  ;;  %6158 = vrot.lane.b32.xlu1 %v16031_v6, %s12729_s12  ;;  %v5856_v1 = vshll.u32 %v15969_v11, 16  ;;  %v5808_v16 = vrot.slane %v5806_v35, 5  ;;  %v16046_v24 = vsel %vm13046_vm12, %v5818_v2, %v5822_v21  ;;  %v5827_v33 = vrot.slane %v5825_v37, 4 }
 0x54c   : > { %v5830_v62 = vrot.slane %v5828_v32, 5  ;;  %v16050_v44 = vsel %vm12936_vm9, %v10968_v3, %v5958_v59  ;;  %v5848_v40 = vshll.u32 %v16034_v56, 16  ;;  %v5855_v12 = vrot.slane %v5853_v60, 4 }
 0x54d   : > { %v5858_v22 = vrot.slane %v5856_v1, 5  ;;  %6234 = vrot.lane.b32.xlu0 %v16026_v17, %s12729_s12  ;;  %v16057_v35 = vsel %vm13046_vm12, %v5804_v10, %v5808_v16  ;;  %v11022_v2 = vcombine.low %v16050_v44, %v16038_v46  ;;  %v5845_v58 = vor.u32 %v5844_v0, %v5841_v8 }
 0x54e   : > { %v5652_v37 = vld [vmem:[#allocation2 + $0x90] sm:$0xf]  ;;  %v5653_v32 = vld [vmem:[#allocation2 + $0x94] sm:$0x1]  ;;  %v16061_v21 = vrot.slane %v6037_v34, 4  ;;  %v16065_v3 = vcombine.low %v16057_v35, %v16046_v24  ;;  %v5836_v1 = vrot.slane %v5834_v4, 5  ;;  %v5831_v17 = vor.u32 %v5830_v62, %v5827_v33 }
 0x54f   : > { %v11026_v60 = vcombine.low %v5652_v37, %v15874_v9  ;;  %v10974_v59 = vrot.slane %v5652_v37, 9  ;;  %v6014_v6 = vrot.slane %v5653_v32, 5  ;;  %v5862_v16 = vshll.u32 %v15971_v53, 16 }
 0x550   : > { %v5867_v10 = vshrl.u32 %v15984_v52, 16  ;;  %v5850_v31 = vrot.slane %v5848_v40, 5  ;;  %v5859_v0 = vor.u32 %v5858_v22, %v5855_v12  ;;  %v5870_v34 = vshll.u32 %v15984_v52, 16 }
 0x551   : > { %6240 = vrot.lane.b32.xlu1 %v11026_v60, %s12729_s12  ;;  %v5991_v8 = vshrl.u32 %v5652_v37, 16  ;;  %6254 = vrot.lane.b32.xlu0 %v16065_v3, %s12730_s13  ;;  %v5846_v4 = vrot.slane %v5845_v58, 4  ;;  %v5876_v9 = vshll.u32 %v15994_v41, 16  ;;  %v5994_v33 = vshll.u32 %v5652_v37, 16 }
 0x552   : > { %v5869_v54 = vrot.slane %v5867_v10, 4  ;;  %v11008_v62 = vcombine.low %v15984_v52, %v5652_v37  ;;  %v16078_v53 = vsel %vm12936_vm9, %v10974_v59, %v6014_v6  ;;  %v5872_v40 = vrot.slane %v5870_v34, 5 }
 0x553   : > { %v5993_v60 = vrot.slane %v5991_v8, 4  ;;  %v5832_v12 = vrot.slane %v5831_v17, 4  ;;  %v5864_v22 = vrot.slane %v5862_v16, 5  ;;  %v5996_v36 = vrot.slane %v5994_v33, 5 }
 0x554   : > { %v6000_v23 = vshll.u32 %v5653_v32, 16  ;;  %v5860_v27 = vrot.slane %v5859_v0, 4  ;;  %v5873_v58 = vor.u32 %v5872_v40, %v5869_v54  ;;  %v5783_v10 = vshrl.u32 %v15944_v7, 16 }
 0x555   : > { %6184 = vrot.lane.b32.xlu1 %v11008_v62, %s12730_s13  ;;  %v5786_v41 = vshll.u32 %v15944_v7, 16  ;;  %6216 = vrot.lane.b32.xlu0 %v11022_v2, %s12731_s14  ;;  %v16086_v6 = vsel %vm13046_vm12, %v5846_v4, %v5850_v31  ;;  %v11024_v17 = vcombine.low %v16019_v47, %v16078_v53  ;;  %v5878_v37 = vrot.slane %v5876_v9, 5 }
 0x556   : > { %v5997_v59 = vor.u32 %v5996_v36, %v5993_v60  ;;  %v5874_v32 = vrot.slane %v5873_v58, 4  ;;  %v5785_v16 = vrot.slane %v5783_v10, 4  ;;  %v5792_v54 = vshll.u32 %v15951_v57, 16  ;;  %v16142_v58 = vld [vmem:[#allocation2 + $0x50] sm:$0xf] }
 0x557   : > { %v5788_v34 = vrot.slane %v5786_v41, 5  ;;  %v16093_v0 = vcombine.low %v15992_v14, %v16000_v48  ;;  %v6002_v2 = vrot.slane %v6000_v23, 5  ;;  %v6043_v31 = vsel %vm13046_vm12, %v16061_v21, %v15973_v30 }
 0x558   : > { %v5998_v8 = vrot.slane %v5997_v59, 4  ;;  %v16101_v9 = vsel %vm13046_vm12, %v5832_v12, %v5836_v1  ;;  %v16106_v36 = vsel %vm13046_vm12, %v5860_v27, %v5864_v22  ;;  %v16110_v57 = vsel %vm13046_vm12, %v5874_v32, %v5878_v37  ;;  %v16139_v22 = vld [vmem:[%s18407_s1 + $0x238] sm:$0xff]  }
 0x559   : > { %6220 = vrot.lane.b32.xlu1 %v11024_v17, %s12731_s14  ;;  %v5789_v23 = vor.u32 %v5788_v34, %v5785_v16  ;;  %6236 = vrot.lane.b32.xlu0 %v16093_v0, %s12729_s12  ;;  %v16116_v30 = vcombine.low %v16101_v9, %v16086_v6  ;;  %v10970_v47 = vrot.slane %v16000_v48, 9  ;;  %v5966_v21 = vrot.slane %v16034_v56, 5 }
 0x55a   : > { %v16122_v27 = vsel %vm13046_vm12, %v5998_v8, %v6002_v2  ;;  %v10992_v1 = vcombine.low %v16106_v36, %v16110_v57  ;;  %v5794_v33 = vrot.slane %v5792_v54, 5  ;;  %v11011_v62 = vcombine.low %v15838_v43, %v15894_v15  ;;  %12195 = vmatprep.subr.bf16.mxu1 %v16139_v22 }
 0x55b   : > { %v5790_v4 = vrot.slane %v5789_v23, 4  ;;  %v11012_v40 = vcombine.low %v15907_v61, %v15977_v25  ;;  %v11014_v60 = vcombine.low %v16046_v24, %v16101_v9  ;;  %v11015_v56 = vcombine.low %v16086_v6, %v16106_v36 }
 0x55c   : > { %v11016_v12 = vcombine.low %v16110_v57, %v16122_v27  ;;  %v5967_v17 = vsel %vm12936_vm9, %v10970_v47, %v5966_v21  ;;  %v11028_v37 = vcombine.low %v16122_v27, %v6043_v31  ;;  %v5769_v32 = vshrl.u32 %v16142_v58, 16  ;;  %v6145_v54 = vpop.permute.xlu0 %6144 }
 0x55d   : > { %6118 = vrot.lane.b32.xlu1 %v10992_v1, %s12731_s14  ;;  %v16146_v10 = vsel %vm13046_vm12, %v5790_v4, %v5794_v33  ;;  %6256 = vrot.lane.b32.xlu0 %v16116_v30, %s12730_s13  ;;  %v11023_v59 = vcombine.low %v5967_v17, %v16014_v45  ;;  %v5772_v16 = vshll.u32 %v16142_v58, 16  ;;  %v11003_v34 = vcombine.low %v15731_v20, %v15808_v26  ;;  %v5637_v45 = vld [vmem:[#allocation2 + $0x54] sm:$0x1] }
 0x55e   : > { %v11013_v41 = vcombine.low %v16146_v10, %v16057_v35  ;;  %v16165_v8 = vcombine.low %v15969_v11, %v15984_v52  ;;  %v5771_v2 = vrot.slane %v5769_v32, 4  ;;  %v5778_v47 = vshll.u32 %v5637_v45, 16 }
 0x55f   : > { %v5774_v31 = vrot.slane %v5772_v16, 5  ;;  %v16175_v20 = vcombine.low %v15830_v18, %v15941_v49  ;;  %v11004_v4 = vcombine.low %v15845_v55, %v15886_v38  ;;  %v11005_v38 = vcombine.low %v15944_v7, %v15931_v29 }
 0x560   : > { %v6171_v21 = vpop.permute.xlu0 %6170  ;;  %v5780_v52 = vrot.slane %v5778_v47, 5  ;;  %v11009_v29 = vcombine.low %v15592_v13, %v15760_v39  ;;  %v11006_v47 = vcombine.low %v15923_v5, %v15992_v14  ;;  %v16216_v13 = vcombine.low %v16038_v46, %v5967_v17 }
 0x561   : > { %6260 = vrot.lane.b32.xlu1 %v11028_v37, %s12730_s13  ;;  %6218 = vrot.lane.b32.xlu0 %v11023_v59, %s12731_s14  ;;  %v5775_v23 = vor.u32 %v5774_v31, %v5771_v2  ;;  %v5946_v59 = vrot.slane %v5637_v45, 5  ;;  %v12710_v2 = vld [vmem:[#allocation2] sm:$0xf]  ;;  %v12711_v31 = vld [vmem:[#allocation2 + $0x8] sm:$0xf]  ;;  %v11007_v5 = vcombine.low %v16000_v48, %v15969_v11 }
 0x562   : > { %v10977_v45 = vcombine.low %v12710_v2, %v12711_v31 }
 0x563   : > { %v5776_v26 = vrot.slane %v5775_v23, 4 }
 0x564   : > { %v6207_v33 = vpop.permute.xlu0 %6206 }
 0x565   : > { %6174 = vrot.lane.b32.xlu1 %v11003_v34, %s12730_s13  ;;  %6238 = vrot.lane.b32.xlu0 %v16165_v8, %s12729_s12  ;;  %v5781_v37 = vsel %vm13046_vm12, %v5776_v26, %v5780_v52  ;;  %v16198_v34 = vcombine.low %v15982_v42, %v16050_v44 }
 0x566   : > { %v10989_v18 = vcombine.low %v5781_v37, %v16146_v10  ;;  %v18492_v37 = vld [vmem:[#allocation26_spill] sm:$0xff] }
 0x569   : > { %6110 = vrot.lane.b32.xlu1 %v15913_v50, %s12731_s14  ;;  %6258 = vrot.lane.b32.xlu0 %v10992_v1, %s12730_s13  ;;  %v10965_v50 = vrot.slane %v16142_v58, 9 }
 0x56b   : > { %v5947_v49 = vsel %vm12936_vm9, %v10965_v50, %v5946_v59  ;;  %v18493_v50 = vld [vmem:[#allocation24_spill] sm:$0xff] }
 0x56c   : > { %v10997_v32 = vcombine.low %v5947_v49, %v15990_v51  ;;  %v11010_v46 = vcombine.low %v18493_v50, %v18492_v37  ;;  %v12713_v50 = vld [vmem:[#allocation2 + $0x4c] sm:$0x1] }
 0x56d   : > { %6150 = vrot.lane.b32.xlu1 %v16175_v20, %s12729_s12 }
 0x571   : > { %6176 = vrot.lane.b32.xlu1 %v11004_v4, %s12730_s13 }
 0x573   : > { %v6227_v1 = vpop.permute.xlu0 %6226 }
 0x575   : > { %6112 = vrot.lane.b32.xlu1 %v10989_v18, %s12731_s14 }
 0x577   : > { %v6105_v55 = vpop.permute.xlu0 %6104 }
 0x578   : > { %v6268_v51 = vsel %vm1531_vm13, %v10977_v45, %v6105_v55 }
 0x579   : > { %6152 = vrot.lane.b32.xlu1 %v10997_v32, %s12729_s12  ;;  %v6291_v42 = vsel %vm1556_vm14, %v6268_v51, %v6145_v54 }
 0x57a   : > { %v6307_v4 = vsel %vm1573_vm15, %v6291_v42, %v6171_v21  ;;  %v6147_v39 = vpop.permute.xlu1 %6146 }
 0x57d   : > { %6178 = vrot.lane.b32.xlu1 %v11005_v38, %s12730_s13 }
 0x57e   : > { %v6209_v16 = vpop.permute.xlu0 %6208  ;;  %v6173_v14 = vpop.permute.xlu1 %6172 }
 0x57f   : > { %v6335_v17 = vsel %vm1531_vm13, %v11010_v46, %v6209_v16  ;;  %v6050_v46 = vrot.slane %v12713_v50, 5 }
 0x581   : > { %6114 = vrot.lane.b32.xlu1 %v16065_v3, %s12731_s14  ;;  %v6332_v3 = vsel %vm1531_vm13, %v11009_v29, %v6207_v33 }
 0x582   : > { %v6229_v23 = vpop.permute.xlu0 %6228  ;;  %v6355_v44 = vsel %vm1556_vm14, %v6332_v3, %v6227_v1 }
 0x583   : > { %v6357_v18 = vsel %vm1556_vm14, %v6335_v17, %v6229_v23  ;;  %v18496_v17 = vld [vmem:[#allocation25_spill] sm:$0xff] }
 0x585   : > { %6154 = vrot.lane.b32.xlu1 %v16198_v34, %s12729_s12 }
 0x589   : > { %6180 = vrot.lane.b32.xlu1 %v11006_v47, %s12730_s13  ;;  %v6247_v26 = vpop.permute.xlu0 %6246  ;;  %v6107_v33 = vpop.permute.xlu1 %6106 }
 0x58a   : > { %v6371_v52 = vsel %vm1573_vm15, %v6355_v44, %v6247_v26  ;;  %v6271_v21 = vsel %vm1531_vm13, %v15641_v19, %v6107_v33 }
 0x58b   : > { %6603 = vmatprep.mubr.bf16.mxu0 %v6371_v52  ;;  %v6293_v59 = vsel %vm1556_vm14, %v6271_v21, %v6147_v39 }
 0x58c   : > { %6604 = vmatmul.mubr.bf16.vlgmr.msra.gmra.mxu0 %v6307_v4  ;;  %v6310_v48 = vsel %vm1573_vm15, %v6293_v59, %v6173_v14  ;;  %v18494_v4 = vld [vmem:[#allocation23_spill] sm:$0xff]  ;;  %v12426_v14 = vld [vmem:[%s18407_s1 + $0x230] sm:$0xff]  }
 0x58d   : > { %6116 = vrot.lane.b32.xlu1 %v16116_v30, %s12731_s14  ;;  %v6149_v38 = vpop.permute.xlu1 %6148 }
 0x591   : > { %6156 = vrot.lane.b32.xlu1 %v16216_v13, %s12729_s12 }
 0x595   : > { %6182 = vrot.lane.b32.xlu1 %v11007_v5, %s12730_s13 }
 0x599   : > { %v6211_v54 = vpop.permute.xlu0 %6210 }
 0x59a   : > { %v6338_v19 = vsel %vm1531_vm13, %v11011_v62, %v6211_v54 }
 0x59d   : > { %v6231_v30 = vpop.permute.xlu0 %6230  ;;  %v6109_v2 = vpop.permute.xlu1 %6108 }
 0x59e   : > { %v6359_v1 = vsel %vm1556_vm14, %v6338_v19, %v6231_v30  ;;  %v6274_v39 = vsel %vm1531_vm13, %v18494_v4, %v6109_v2 }
 0x59f   : > { %v6295_v33 = vsel %vm1556_vm14, %v6274_v39, %v6149_v38  ;;  %v18498_v38 = vld [vmem:[#allocation29_spill] sm:$0xff] }
 0x5a1   : > { %v6249_v49 = vpop.permute.xlu0 %6248 }
 0x5a2   : > { %v6374_v11 = vsel %vm1573_vm15, %v6357_v18, %v6249_v49 }
 0x5a3   : > { %6611 = vmatprep.mubr.bf16.mxu0 %v6374_v11  ;;  %v18497_v11 = vld [vmem:[#allocation27_spill] sm:$0xff] }
 0x5a4   : > { %6612 = vmatmul.mubr.bf16.gmra.mxu0 %v6310_v48 }
 0x5ab   : > { %v6251_v32 = vpop.permute.xlu0 %6250 }
 0x5ac   : > { %v6377_v55 = vsel %vm1573_vm15, %v6359_v1, %v6251_v32 }
 0x5ad   : > { %6619 = vmatprep.mubr.bf16.mxu0 %v6377_v55 }
 0x5af   : > { %v6213_v16 = vpop.permute.xlu0 %6212 }
 0x5b3   : > { %v6233_v45 = vpop.permute.xlu0 %6232 }
 0x5b7   : > { %v6253_v23 = vpop.permute.xlu0 %6252 }
 0x5bb   : > { %v6215_v47 = vpop.permute.xlu0 %6214 }
 0x5bc   : > { %v6344_v19 = vsel %vm1531_vm13, %v11013_v41, %v6215_v47 }
 0x5bd   : > { %v6159_v31 = vpop.permute.xlu1 %6158 }
 0x5bf   : > { %v6235_v43 = vpop.permute.xlu0 %6234 }
 0x5c0   : > { %v6363_v55 = vsel %vm1556_vm14, %v6344_v19, %v6235_v43  ;;  %v18501_v43 = vld [vmem:[#allocation32_spill] sm:$0xff] }
 0x5c3   : > { %v6241_v51 = vpop.permute.xlu1 %6240  ;;  %v6255_v27 = vpop.permute.xlu0 %6254 }
 0x5c4   : > { %v6383_v2 = vsel %vm1573_vm15, %v6363_v55, %v6255_v27 }
 0x5c7   : > { %v6185_v29 = vpop.permute.xlu1 %6184  ;;  %v6217_v25 = vpop.permute.xlu0 %6216 }
 0x5cb   : > { %v6221_v3 = vpop.permute.xlu1 %6220  ;;  %v6237_v49 = vpop.permute.xlu0 %6236 }
 0x5cc   : > { %v6353_v15 = vsel %vm1531_vm13, %v11016_v12, %v6221_v3  ;;  %v6341_v12 = vsel %vm1531_vm13, %v11012_v40, %v6213_v16  ;;  %v12712_v40 = vld [vmem:[#allocation2 + $0x48] sm:$0xf] }
 0x5cd   : > { %v6369_v52 = vsel %vm1556_vm14, %v6353_v15, %v6241_v51  ;;  %v6361_v21 = vsel %vm1556_vm14, %v6341_v12, %v6233_v45  ;;  %v18499_v45 = vld [vmem:[#allocation28_spill] sm:$0xff] }
 0x5ce   : > { %v6380_v37 = vsel %vm1573_vm15, %v6361_v21, %v6253_v23  ;;  %v10976_v51 = vrot.slane %v18499_v45, 9  ;;  %v18500_v23 = vld [vmem:[#allocation30_spill] sm:$0xff] }
 0x5cf   : > { %v6119_v42 = vpop.permute.xlu1 %6118  ;;  %v6257_v10 = vpop.permute.xlu0 %6256 }
 0x5d0   : > { %v6289_v62 = vsel %vm1531_vm13, %v16165_v8, %v6119_v42  ;;  %v18495_v8 = vld [vmem:[#allocation22_spill] sm:$0xff] }
 0x5d1   : > { %v6305_v44 = vsel %vm1556_vm14, %v6289_v62, %v6159_v31  ;;  %v10981_v31 = vcombine.low %v16142_v58, %v15944_v7 }
 0x5d2   : > { %v6328_v57 = vsel %vm1573_vm15, %v6305_v44, %v6185_v29  ;;  %v6054_v29 = vrot.slane %v18500_v23, 5 }
 0x5d3   : > { %v6261_v26 = vpop.permute.xlu1 %6260  ;;  %v6219_v47 = vpop.permute.xlu0 %6218 }
 0x5d4   : > { %v6392_v5 = vsel %vm1573_vm15, %v6369_v52, %v6261_v26  ;;  %v18502_v52 = vld [vmem:[#allocation31_spill] sm:$0xff]  ;;  %v6350_v39 = vsel %vm1531_vm13, %v11015_v56, %v6219_v47 }
 0x5d5   : > { %6659 = vmatprep.mubr.bf16.mxu1 %v6392_v5 }
 0x5d6   : > { %6660 = vmatmul.mubr.bf16.vlgmr.msra.gmra.mxu1 %v6328_v57 }
 0x5d7   : > { %12196 = vmatpush3.bf16.msra.mxu1 %v16139_v22  ;;  %12199 = vmatprep.mubr.msk.bf16.mxu1 %vm1531_vm13, %v18495_v8  ;;  %v6175_v54 = vpop.permute.xlu1 %6174  ;;  %v10975_v22 = vrot.slane %v12712_v40, 9  ;;  %v6239_v9 = vpop.permute.xlu0 %6238  ;;  %v12431_v40 = vld [vmem:[%s18410_s4 + $0x80] sm:$0xff]  }
 0x5d8   : > { %v6313_v30 = vsel %vm1573_vm15, %v6295_v33, %v6175_v54  ;;  %12197 = vmatprep.subr.bf16.mxu1 %v12426_v14  ;;  %v6367_v57 = vsel %vm1556_vm14, %v6350_v39, %v6239_v9 }
 0x5d9   : > { %6620 = vmatmul.mubr.bf16.gmra.mxu0 %v6313_v30  ;;  %v6051_v18 = vsel %vm12936_vm9, %v10975_v22, %v6050_v46 }
 0x5da   : > { %6627 = vmatprep.mubr.bf16.mxu0 %v6380_v37  ;;  %v11029_v16 = vcombine.low %v18498_v38, %v6051_v18  ;;  %v16339_v38 = vld [vmem:[#allocation2] sm:$0xf] }
 0x5db   : > { %12198 = vmatpush3.bf16.msra.mxu1 %v12426_v14  ;;  %v6111_v61 = vpop.permute.xlu1 %6110  ;;  %v6259_v26 = vpop.permute.xlu0 %6258 }
 0x5dc   : > { %v6277_v48 = vsel %vm1531_vm13, %v18497_v11, %v6111_v61 }
 0x5de   : > { %12200 = vmatmul.mubr.msk.bf16.vlgmr.msra.gmra.mxu1 %vm1531_vm13, %v18496_v17 }
 0x5df   : > { %12203 = vmatprep.mubr.msk.bf16.mxu1 %vm1531_vm13, %v16175_v20  ;;  %v6151_v59 = vpop.permute.xlu1 %6150 }
 0x5e0   : > { %v6297_v1 = vsel %vm1556_vm14, %v6277_v48, %v6151_v59 }
 0x5e3   : > { %v6177_v32 = vpop.permute.xlu1 %6176 }
 0x5e4   : > { %v6316_v20 = vsel %vm1573_vm15, %v6297_v1, %v6177_v32  ;;  %v16336_v1 = vld [vmem:[%s18408_s2 + $0x3] ss:$0 sm:$0xff] }
 0x5e5   : > { %6628 = vmatmul.mubr.bf16.gmra.mxu0 %v6316_v20 }
 0x5e6   : > { %6635 = vmatprep.mubr.bf16.mxu0 %v6383_v2  ;;  %12204 = vmatmul.mubr.msk.bf16.gmra.mxu1 %vm1531_vm13, %v11029_v16 }
 0x5e7   : > { %12207 = vmatprep.mubr.msk.bf16.mxu1 %vm1531_vm13, %v16198_v34  ;;  %v6113_v35 = vpop.permute.xlu1 %6112  ;;  %v6347_v34 = vsel %vm1531_vm13, %v11014_v60, %v6217_v25  ;;  %v12429_v25 = vld [vmem:[%s18410_s4 + $0x88] sm:$0xff]  }
 0x5e8   : > { %v6280_v3 = vsel %vm1531_vm13, %v10981_v31, %v6113_v35  ;;  %v6365_v58 = vsel %vm1556_vm14, %v6347_v34, %v6237_v49  ;;  %12215 = vmatprep.subr.bf16.mxu0 %v12429_v25 }
 0x5e9   : > { %v6386_v62 = vsel %vm1573_vm15, %v6365_v58, %v6257_v10  ;;  %12216 = vmatpush3.bf16.msra.mxu0 %v12429_v25  ;;  %v16344_v10 = vld [vmem:[#allocation2 + $0x48] sm:$0xf] }
 0x5ea   : > { %12217 = vmatprep.subr.bf16.mxu0 %v12431_v40  ;;  %v7638_v34 = vshrl.u32 %v16344_v10, 16 }
 0x5eb   : > { %v6153_v41 = vpop.permute.xlu1 %6152 }
 0x5ec   : > { %v6299_v42 = vsel %vm1556_vm14, %v6280_v3, %v6153_v41  ;;  %v7281_v3 = vshll.u32 %v16339_v38, 16 }
 0x5ed   : > { %12218 = vmatpush3.bf16.msra.mxu0 %v12431_v40 }
 0x5ee   : > { %12208 = vmatmul.mubr.msk.bf16.gmra.mxu1 %vm1531_vm13, %v16216_v13  ;;  %v6055_v13 = vsel %vm12936_vm9, %v10976_v51, %v6054_v29  ;;  %v7278_v29 = vshrl.u32 %v16339_v38, 16  ;;  %v7283_v39 = vrot.slane %v7281_v3, 5 }
 0x5ef   : > { %12211 = vmatprep.mubr.msk.bf16.mxu1 %vm1531_vm13, %v18501_v43  ;;  %v6179_v7 = vpop.permute.xlu1 %6178  ;;  %v11030_v60 = vcombine.low %v16078_v53, %v6055_v13  ;;  %v6389_v53 = vsel %vm1573_vm15, %v6367_v57, %v6259_v26 }
 0x5f0   : > { %v6319_v15 = vsel %vm1573_vm15, %v6299_v42, %v6179_v7  ;;  %v7641_v42 = vshll.u32 %v16344_v10, 16  ;;  %v7280_v26 = vrot.slane %v7278_v29, 4 }
 0x5f1   : > { %6636 = vmatmul.mubr.bf16.gmra.mxu0 %v6319_v15 }
 0x5f2   : > { %6643 = vmatprep.mubr.bf16.mxu0 %v6386_v62 }
 0x5f3   : > { %v6115_v24 = vpop.permute.xlu1 %6114 }
 0x5f4   : > { %v6283_v4 = vsel %vm1531_vm13, %v18502_v52, %v6115_v24 }
 0x5f6   : > { %12212 = vmatmul.mubr.msk.bf16.gmra.mxu1 %vm1531_vm13, %v11030_v60 }
 0x5f7   : > { %v6155_v44 = vpop.permute.xlu1 %6154 }
 0x5f8   : > { %v6301_v5 = vsel %vm1556_vm14, %v6283_v4, %v6155_v44 }
 0x5fb   : > { %v6181_v14 = vpop.permute.xlu1 %6180 }
 0x5fc   : > { %v6322_v27 = vsel %vm1573_vm15, %v6301_v5, %v6181_v14  ;;  %v7640_v5 = vrot.slane %v7638_v34, 4  ;;  %v7643_v14 = vrot.slane %v7641_v42, 5 }
 0x5fd   : > { %6644 = vmatmul.mubr.bf16.gmra.mxu0 %v6322_v27 }
 0x5fe   : > { %6651 = vmatprep.mubr.bf16.mxu0 %v6389_v53 }
 0x5ff   : > { %v6117_v12 = vpop.permute.xlu1 %6116 }
 0x600   : > { %v6286_v54 = vsel %vm1531_vm13, %v16093_v0, %v6117_v12 }
 0x603   : > { %v6157_v8 = vpop.permute.xlu1 %6156 }
 0x604   : > { %v6303_v6 = vsel %vm1556_vm14, %v6286_v54, %v6157_v8 }
 0x607   : > { %v6183_v36 = vpop.permute.xlu1 %6182 }
 0x608   : > { %v6325_v56 = vsel %vm1573_vm15, %v6303_v6, %v6183_v36  ;;  %v7238_v36 = vld [vmem:[#allocation2 + $0x4] sm:$0x1] }
 0x609   : > { %6652 = vmatmul.mubr.bf16.gmra.mxu0 %v6325_v56 }
 0x64c   : > { %v11731_v33 = vpop.f32.mrf.mxu0 }
 0x64e   : > { %v11732_v21 = vpop.f32.mrf.mxu0 }
 0x64f   : > { %v11733_v11 = vadd.f32 %v11732_v21, %v11731_v33  ;;  %v11129_v21 = vrot.slane %v16339_v38, 9  ;;  %v11147_v38 = vrot.slane %v16344_v10, 9 }
 0x650   : > { %v11734_v30 = vpop.f32.mrf.mxu0 }
 0x651   : > { %v6606_v35 = vadd.f32 %v11733_v11, %v16336_v1  ;;  %v7535_v11 = vrot.slane %v7238_v36, 5 }
 0x652   : > { %v11735_v37 = vpop.f32.mrf.mxu0 }
 0x653   : > { %v11736_v41 = vadd.f32 %v11735_v37, %v11734_v30  ;;  %v7287_v30 = vshll.u32 %v7238_v36, 16  ;;  %v7256_v37 = vld [vmem:[#allocation2 + $0x4c] sm:$0x1] }
 0x655   : > { %v6609_v13 = vadd.f32 %v11736_v41, %v16336_v1  ;;  %v16374_v41 = vrot.slane %v7287_v30, 5 }
 0x664   : > { %v11737_v61 = vpop.f32.mrf.mxu0 }
 0x666   : > { %v11738_v0 = vpop.f32.mrf.mxu0 }
 0x667   : > { %v11739_v59 = vadd.f32 %v11738_v0, %v11737_v61  ;;  %v7284_v0 = vor.u32 %v7283_v39, %v7280_v26 }
 0x668   : > { %v11740_v22 = vpop.f32.mrf.mxu0 }
 0x669   : > { %v6614_v55 = vadd.f32 %v11739_v59, %v16336_v1 }
 0x66a   : > { %v11741_v46 = vpop.f32.mrf.mxu0 }
 0x66b   : > { %v11742_v32 = vadd.f32 %v11741_v46, %v11740_v22  ;;  %v7647_v22 = vshll.u32 %v7256_v37, 16 }
 0x66d   : > { %v6617_v23 = vadd.f32 %v11742_v32, %v16336_v1  ;;  %v16382_v3 = vrot.slane %v7647_v22, 5 }
 0x696   : > { %v16325_v50 = vpop.f32.mrf.mxu1 }
 0x698   : > { %v16327_v17 = vpop.f32.mrf.mxu1 }
 0x699   : > { %v11743_v18 = vpop.f32.mrf.mxu0  ;;  %v11775_v34 = vadd.f32 %v16327_v17, %v16325_v50 }
 0x69a   : > { %v16329_v49 = vpop.f32.mrf.mxu1 }
 0x69b   : > { %v11744_v48 = vpop.f32.mrf.mxu0 }
 0x69c   : > { %v16331_v19 = vpop.f32.mrf.mxu1  ;;  %v11745_v43 = vadd.f32 %v11744_v48, %v11743_v18  ;;  %v7644_v48 = vor.u32 %v7643_v14, %v7640_v5  ;;  %v16415_v5 = vld [vmem:[%s18409_s3 + $0x1] ss:$0 sm:$0xff] }
 0x69d   : > { %v11746_v16 = vpop.f32.mrf.mxu0 }
 0x69e   : > { %v12201_v20 = vpop.f32.mrf.mxu1  ;;  %v6622_v12 = vadd.f32 %v11745_v43, %v16336_v1  ;;  %v16387_v43 = vrot.slane %v7644_v48, 4 }
 0x69f   : > { %v16341_v2 = vadd.f32 %v12201_v20, %v6614_v55  ;;  %v11747_v58 = vpop.f32.mrf.mxu0 }
 0x6a0   : > { %v6702_v31 = vpop.f32.mrf.mxu1  ;;  %v11748_v57 = vadd.f32 %v11747_v58, %v11746_v16 }
 0x6a1   : > { %v6783_v45 = vmin.f32 %v16341_v2, 0.0  ;;  %v16347_v51 = vadd.f32 %v6702_v31, %v6606_v35  ;;  %v7671_v31 = vrot.slane %v7256_v37, 5  ;;  %vm6767_vm11 = vcmp.gt.f32.partialorder %v16341_v2, 0.0 }
 0x6a2   : > { %v12202_v47 = vpop.f32.mrf.mxu1  ;;  %v6625_v18 = vadd.f32 %v11748_v57, %v16336_v1  ;;  %v6662_v57 = vadd.f32 %v11775_v34, %v16336_v1  ;;  %v18504_v34 = vld [vmem:[#allocation6_spill] sm:$0xff] }
 0x6a3   : > { %v6801_v7 = vmul.f32 1.442695, %v6783_v45  ;;  %v6781_v15 = vmin.f32 %v16347_v51, 0.0  ;;  %v16355_v62 = vadd.f32 %v12202_v47, %v6617_v23  ;;  %v16380_v47 = vrot.slane %v7284_v0, 4 }
 0x6a4   : > { %v6705_v24 = vpop.f32.mrf.mxu1  ;;  %vm6765_vm0 = vcmp.gt.f32.partialorder %v16347_v51, 0.0 }
 0x6a5   : > { %12650 = vpow2.f32 %v6801_v7  ;;  %v6797_v9 = vmul.f32 1.442695, %v6781_v15  ;;  %v6784_v60 = vmin.f32 %v16355_v62, 0.0  ;;  %v11749_v44 = vpop.f32.mrf.mxu0  ;;  %v16359_v52 = vadd.f32 %v6705_v24, %v6609_v13 }
 0x6a6   : > { %v12205_v4 = vpop.f32.mrf.mxu1  ;;  %v11778_v13 = vadd.f32 %v16331_v19, %v16329_v49  ;;  %v16408_v49 = vsel %vm12936_vm9, %v11147_v38, %v7671_v31  ;;  %v16410_v19 = vld [vmem:[#allocation2 + $0x54] sm:$0x1]  ;;  %vm6768_vm4 = vcmp.gt.f32.partialorder %v16355_v62, 0.0 }
 0x6a7   : > { %12652 = vpow2.f32 %v6797_v9  ;;  %v6803_v27 = vmul.f32 1.442695, %v6784_v60  ;;  %v11750_v53 = vpop.f32.mrf.mxu0  ;;  %v6782_v8 = vmin.f32 %v16359_v52, 0.0  ;;  %v16395_v60 = vsel %vm12936_vm9, %v11129_v21, %v7535_v11  ;;  %v18503_v11 = vld [vmem:[#allocation8_spill] sm:$0xff] }
 0x6a8   : > { %v11751_v54 = vadd.f32 %v11750_v53, %v11749_v44  ;;  %v6718_v6 = vpop.f32.mrf.mxu1  ;;  %v16397_v44 = vld [vmem:[#allocation2 + $0x50] sm:$0xf]  ;;  %v16428_v30 = vadd.f32 %v11778_v13, %v16336_v1  ;;  %v7567_v37 = vrot.slane %v16410_v19, 5  ;;  %vm6766_vm5 = vcmp.gt.f32.partialorder %v16359_v52, 0.0  ;;  %v12453_v19 = vld [vmem:[%s18410_s4 + $0x20] sm:$0xff]  }
 0x6a9   : > { %12654 = vpow2.f32 %v6803_v27  ;;  %v16363_v56 = vadd.f32 %v6718_v6, %v6622_v12  ;;  %v11752_v33 = vpop.f32.mrf.mxu0  ;;  %v6799_v61 = vmul.f32 1.442695, %v6782_v8  ;;  %v7650_v27 = vsel %vm13046_vm12, %v16387_v43, %v16382_v3 }
 0x6aa   : > { %v6630_v25 = vadd.f32 %v11751_v54, %v16336_v1  ;;  %v12206_v40 = vpop.f32.mrf.mxu1  ;;  %v11137_v6 = vrot.slane %v16397_v44, 9 }
 0x6ab   : > { %v6785_v46 = vmin.f32 %v16363_v56, 0.0  ;;  %v11753_v59 = vpop.f32.mrf.mxu0  ;;  %12656 = vpow2.f32 %v6799_v61  ;;  %v16431_v61 = vld [vmem:[#allocation2 + $0x98] sm:$0xf]  ;;  %vm6769_vm8 = vcmp.gt.f32.partialorder %v16363_v56, 0.0 }
 0x6ac   : > { %v16369_v32 = vadd.f32 %v12205_v4, %v6630_v25  ;;  %v11754_v55 = vadd.f32 %v11753_v59, %v11752_v33  ;;  %v6721_v20 = vpop.f32.mrf.mxu1  ;;  %v7290_v4 = vsel %vm13046_vm12, %v16380_v47, %v16374_v41  ;;  %v11148_v38 = vrot.slane %v16431_v61, 9 }
 0x6ad   : > { %v6805_v16 = vmul.f32 1.442695, %v6785_v46  ;;  %v16372_v35 = vadd.f32 %v6721_v20, %v6625_v18 }
 0x6ae   : > { %v6787_v45 = vmin.f32 %v16369_v32, 0.0  ;;  %v6633_v23 = vadd.f32 %v11754_v55, %v16336_v1  ;;  %v16378_v29 = vpop.f32.mrf.mxu1  ;;  %vm6771_vm7 = vcmp.gt.f32.partialorder %v16369_v32, 0.0 }
 0x6af   : > { %12658 = vpow2.f32 %v6805_v16  ;;  %v6786_v42 = vmin.f32 %v16372_v35, 0.0 }
 0x6b0   : > { %v6809_v7 = vmul.f32 1.442695, %v6787_v45  ;;  %v16389_v58 = vadd.f32 %v12206_v40, %v6633_v23  ;;  %v6734_v15 = vpop.f32.mrf.mxu1 }
 0x6b1   : > { %v6807_v24 = vmul.f32 1.442695, %v6786_v42  ;;  %v11755_v9 = vpop.f32.mrf.mxu0 }
 0x6b2   : > { %v12651_v50 = vpop.eup %12650  ;;  %12660 = vpow2.f32 %v6809_v7  ;;  %v6788_v17 = vmin.f32 %v16389_v58, 0.0  ;;  %v16400_v26 = vpop.f32.mrf.mxu1  ;;  %vm6772_vm10 = vcmp.gt.f32.partialorder %v16389_v58, 0.0 }
 0x6b3   : > { %v11097_v39 = vadd.f32 -1.0, %v12651_v50  ;;  %12662 = vpow2.f32 %v6807_v24  ;;  %v11756_v14 = vpop.f32.mrf.mxu0 }
 0x6b4   : > { %v12653_v53 = vpop.eup %12652  ;;  %v6811_v12 = vmul.f32 1.442695, %v6788_v17  ;;  %v11757_v8 = vadd.f32 %v11756_v14, %v11755_v9  ;;  %v16423_v54 = vpop.f32.mrf.mxu1  ;;  %v18505_v17 = vld [vmem:[#allocation9_spill] sm:$0xff] }
 0x6b5   : > { %v6847_v36 = vsel %vm6767_vm11, %v16341_v2, %v11097_v39  ;;  %v11095_v33 = vadd.f32 -1.0, %v12653_v53  ;;  %v11758_v21 = vpop.f32.mrf.mxu0  ;;  %vm6770_vm11 = vcmp.gt.f32.partialorder %v16372_v35, 0.0 }
 0x6b6   : > { %v12655_v25 = vpop.eup %12654  ;;  %v6871_v40 = vmul.f32 %v16415_v5, %v6847_v36  ;;  %12664 = vpow2.f32 %v6811_v12  ;;  %v6638_v0 = vadd.f32 %v11757_v8, %v16336_v1  ;;  %v12213_v22 = vpop.f32.mrf.mxu1 }
 0x6b7   : > { %v6845_v2 = vsel %vm6765_vm0, %v16347_v51, %v11095_v33  ;;  %v11098_v46 = vadd.f32 -1.0, %v12655_v25  ;;  %v16438_v59 = vadd.f32 %v12213_v22, %v6662_v57  ;;  %v11759_v18 = vpop.f32.mrf.mxu0  ;;  %v18506_v22 = vld [vmem:[#allocation7_spill] sm:$0xff] }
 0x6b8   : > { %v6887_v48 = vadd.f32 %v6871_v40, %v18503_v11  ;;  %v6869_v55 = vmul.f32 %v16415_v5, %v6845_v2  ;;  %v16442_v20 = vadd.f32 %v6734_v15, %v6638_v0  ;;  %v12657_v16 = vpop.eup %12656  ;;  %v11760_v45 = vadd.f32 %v11759_v18, %v11758_v21 }
 0x6b9   : > { %v6848_v31 = vsel %vm6768_vm4, %v16355_v62, %v11098_v46  ;;  %v6795_v51 = vmin.f32 %v16438_v59, 0.0  ;;  %v11096_v13 = vadd.f32 -1.0, %v12657_v16  ;;  %vm6779_vm0 = vcmp.gt.f32.partialorder %v16438_v59, 0.0 }
 0x6ba   : > { %v6903_v23 = vmax.f32 %v6887_v48, 0.0  ;;  %v6885_v42 = vadd.f32 %v6869_v55, %v18504_v34  ;;  %v6872_v7 = vmul.f32 %v16415_v5, %v6848_v31  ;;  %v6789_v15 = vmin.f32 %v16442_v20, 0.0 }
 0x6bb   : > { %v6825_v24 = vmul.f32 1.442695, %v6795_v51  ;;  %v6846_v14 = vsel %vm6766_vm5, %v16359_v52, %v11096_v13  ;;  %v6641_v21 = vadd.f32 %v11760_v45, %v16336_v1  ;;  %vm6773_vm4 = vcmp.gt.f32.partialorder %v16442_v20, 0.0 }
 0x6bc   : > { %v12659_v9 = vpop.eup %12658  ;;  %v11463_v62 = vpack.c.bf16 %v6903_v23, %v6903_v23  ;;  %v6901_v50 = vmax.f32 %v6885_v42, 0.0  ;;  %v6888_v39 = vadd.f32 %v6872_v7, %v18505_v17  ;;  %v6870_v57 = vmul.f32 %v16415_v5, %v6846_v14  ;;  %v18507_v17 = vld [vmem:[#allocation10_spill] sm:$0xff] }
 0x6bd   : > { %v11099_v53 = vadd.f32 -1.0, %v12659_v9  ;;  %v6813_v12 = vmul.f32 1.442695, %v6789_v15  ;;  %12666 = vpow2.f32 %v6825_v24  ;;  %v16457_v25 = vpop.f32.mrf.mxu0  ;;  %v7153_v15 = vld [vmem:[#allocation2 + $0x18] sm:$0xf] }
 0x6be   : > { %v6998_v8 = vshrl.u32 %v11463_v62, 16  ;;  %v11461_v36 = vpack.c.bf16 %v6901_v50, %v6901_v50  ;;  %v6904_v33 = vmax.f32 %v6888_v39, 0.0  ;;  %v7001_v0 = vshll.u32 %v11463_v62, 16  ;;  %v7156_v24 = vld [vmem:[#allocation2 + $0x1c] sm:$0x1] }
 0x6bf   : > { %v12661_v40 = vpop.eup %12660  ;;  %v6886_v2 = vadd.f32 %v6870_v57, %v18506_v22  ;;  %v6849_v52 = vsel %vm6769_vm8, %v16363_v56, %v11099_v53  ;;  %12668 = vpow2.f32 %v6813_v12  ;;  %v16466_v56 = vpop.f32.mrf.mxu0 }
 0x6c0   : > { %v12663_v46 = vpop.eup %12662  ;;  %v7000_v18 = vrot.slane %v6998_v8, 7  ;;  %v6982_v11 = vshrl.u32 %v11461_v36, 16  ;;  %v6985_v48 = vshll.u32 %v11461_v36, 16  ;;  %v11464_v55 = vpack.c.bf16 %v6904_v33, %v6904_v33  ;;  %v7141_v33 = vld [vmem:[#allocation2 + $0x8] sm:$0xf] }
 0x6c1   : > { %v6902_v16 = vmax.f32 %v6886_v2, 0.0  ;;  %v11101_v31 = vadd.f32 -1.0, %v12661_v40  ;;  %v6873_v51 = vmul.f32 %v16415_v5, %v6849_v52  ;;  %v11100_v45 = vadd.f32 -1.0, %v12663_v46  ;;  %v7144_v40 = vld [vmem:[#allocation2 + $0xc] sm:$0x1] }
 0x6c2   : > { %v7003_v23 = vor.u32 %v7001_v0, %v7000_v18  ;;  %v7004_v34 = vrot.slane %v7000_v18, 4  ;;  %v6984_v42 = vrot.slane %v6982_v11, 7  ;;  %v7006_v7 = vshrl.u32 %v11464_v55, 16 }
 0x6c3   : > { %v12665_v13 = vpop.eup %12664  ;;  %v7009_v9 = vshll.u32 %v11464_v55, 16  ;;  %v11462_v62 = vpack.c.bf16 %v6902_v16, %v6902_v16  ;;  %v6851_v50 = vsel %vm6771_vm7, %v16369_v32, %v11101_v31  ;;  %v6889_v39 = vadd.f32 %v6873_v51, %v18507_v17  ;;  %v16485_v55 = vpop.f32.mrf.mxu0 }
 0x6c4   : > { %v7154_v57 = vsel %vm12846_vm6, %v7003_v23, %v7153_v15  ;;  %v7157_v12 = vsel %vm12787_vm2, %v7004_v34, %v7156_v24  ;;  %v6987_v8 = vor.u32 %v6985_v48, %v6984_v42  ;;  %v6988_v36 = vrot.slane %v6984_v42, 4  ;;  %v16483_v48 = vpop.f32.mrf.mxu1  ;;  %v18510_v23 = vld [vmem:[#allocation12_spill] sm:$0xff] }
 0x6c5   : > { %7155 = vst [vmem:[#allocation2 + $0x18] sm:$0xf] %v7154_v57  ;;  %7158 = vst [vmem:[#allocation2 + $0x1c] sm:$0x1] %v7157_v12  ;;  %v7008_v0 = vrot.slane %v7006_v7, 7  ;;  %v6990_v22 = vshrl.u32 %v11462_v62, 16  ;;  %v6875_v32 = vmul.f32 %v16415_v5, %v6851_v50  ;;  %v6850_v24 = vsel %vm6770_vm11, %v16372_v35, %v11100_v45 }
 0x6c6   : > { %v6993_v2 = vshll.u32 %v11462_v62, 16  ;;  %v7142_v52 = vsel %vm12846_vm6, %v6987_v8, %v7141_v33  ;;  %v7145_v46 = vsel %vm12787_vm2, %v6988_v36, %v7144_v40  ;;  %v6905_v18 = vmax.f32 %v6889_v39, 0.0  ;;  %v7159_v42 = vld [vmem:[#allocation2 + $0x20] sm:$0xf]  ;;  %v7162_v7 = vld [vmem:[#allocation2 + $0x24] sm:$0x1] }
 0x6c7   : > { %v11102_v11 = vadd.f32 -1.0, %v12665_v13  ;;  %7143 = vst [vmem:[#allocation2 + $0x8] sm:$0xf] %v7142_v52  ;;  %7146 = vst [vmem:[#allocation2 + $0xc] sm:$0x1] %v7145_v46  ;;  %v7011_v16 = vor.u32 %v7009_v9, %v7008_v0  ;;  %v7012_v31 = vrot.slane %v7008_v0, 4  ;;  %v6891_v34 = vadd.f32 %v6875_v32, %v18510_v23 }
 0x6c8   : > { %v6992_v51 = vrot.slane %v6990_v22, 7  ;;  %v11465_v15 = vpack.c.bf16 %v6905_v18, %v6905_v18  ;;  %v16495_v62 = vadd.f32 %v16423_v54, %v6641_v21  ;;  %v7147_v57 = vld [vmem:[#allocation2 + $0x10] sm:$0xf]  ;;  %v12214_v54 = vpop.f32.mrf.mxu1  ;;  %v16502_v21 = vpop.f32.mrf.mxu0  ;;  %v6874_v0 = vmul.f32 %v16415_v5, %v6850_v24  ;;  %v18511_v46 = vld [vmem:[#allocation13_spill] sm:$0xff] }
 0x6c9   : > { %v6852_v13 = vsel %vm6772_vm10, %v16389_v58, %v11102_v11  ;;  %v7160_v9 = vsel %vm12846_vm6, %v7011_v16, %v7159_v42  ;;  %v7163_v50 = vsel %vm12787_vm2, %v7012_v31, %v7162_v7  ;;  %v7150_v58 = vld [vmem:[#allocation2 + $0x14] sm:$0x1]  ;;  %v6907_v8 = vmax.f32 %v6891_v34, 0.0  ;;  %v7165_v31 = vld [vmem:[#allocation2 + $0x28] sm:$0xf] }
 0x6ca   : > { %v6995_v17 = vor.u32 %v6993_v2, %v6992_v51  ;;  %v6996_v39 = vrot.slane %v6992_v51, 4  ;;  %v12667_v12 = vpop.eup %12666  ;;  %7161 = vst [vmem:[#allocation2 + $0x20] sm:$0xf] %v7160_v9  ;;  %7164 = vst [vmem:[#allocation2 + $0x24] sm:$0x1] %v7163_v50  ;;  %v7014_v36 = vshrl.u32 %v11465_v15, 16  ;;  %v6876_v35 = vmul.f32 %v16415_v5, %v6852_v13  ;;  %v16511_v16 = vpop.f32.mrf.mxu0 }
 0x6cb   : > { %v7017_v33 = vshll.u32 %v11465_v15, 16  ;;  %v11109_v22 = vadd.f32 -1.0, %v12667_v12  ;;  %v11467_v32 = vpack.c.bf16 %v6907_v8, %v6907_v8  ;;  %v6790_v11 = vmin.f32 %v16495_v62, 0.0  ;;  %v18512_v51 = vld [vmem:[#allocation11_spill] sm:$0xff]  ;;  %v12448_v8 = vld [vmem:[%s18410_s4 + $0x70] sm:$0xff]  }
 0x6cc   : > { %v7148_v45 = vsel %vm12846_vm6, %v6995_v17, %v7147_v57  ;;  %v7151_v40 = vsel %vm12787_vm2, %v6996_v39, %v7150_v58  ;;  %v12669_v2 = vpop.eup %12668  ;;  %v7016_v52 = vrot.slane %v7014_v36, 7  ;;  %v6892_v18 = vadd.f32 %v6876_v35, %v18511_v46  ;;  %v12446_v15 = vld [vmem:[%s18410_s4 + $0x78] sm:$0xff]   ;;  %v7168_v39 = vld [vmem:[#allocation2 + $0x2c] sm:$0x1] }
 0x6cd   : > { %7149 = vst [vmem:[#allocation2 + $0x10] sm:$0xf] %v7148_v45  ;;  %7152 = vst [vmem:[#allocation2 + $0x14] sm:$0x1] %v7151_v40  ;;  %v6890_v23 = vadd.f32 %v6874_v0, %v18512_v51  ;;  %v11103_v34 = vadd.f32 -1.0, %v12669_v2  ;;  %v6859_v42 = vsel %vm6779_vm0, %v16438_v59, %v11109_v22  ;;  %v16518_v7 = vadd.f32 %v12214_v54, %v16428_v30  ;;  %v12447_v13 = vld [vmem:[%s18410_s4 + $0x38] sm:$0xff]   ;;  %v16540_v45 = vpop.f32.mrf.mxu0 }
 0x6ce   : > { %v7030_v24 = vshrl.u32 %v11467_v32, 16  ;;  %v7033_v9 = vshll.u32 %v11467_v32, 16  ;;  %v7019_v50 = vor.u32 %v7017_v33, %v7016_v52  ;;  %v7020_v17 = vrot.slane %v7016_v52, 4  ;;  %v16530_v58 = vld [vmem:[#allocation2 + $0x9c] sm:$0x1]  ;;  %11789 = vmatprep.subr.bf16.mxu1 %v12446_v15  ;;  %v18513_v22 = vld [vmem:[#allocation20_spill] sm:$0xff] }
 0x6cf   : > { %v6908_v57 = vmax.f32 %v6892_v18, 0.0  ;;  %v6906_v12 = vmax.f32 %v6890_v23, 0.0  ;;  %v6853_v30 = vsel %vm6773_vm4, %v16442_v20, %v11103_v34  ;;  %v6883_v59 = vmul.f32 %v16415_v5, %v6859_v42  ;;  %11790 = vmatpush3.bf16.msra.mxu1 %v12447_v13  ;;  %v12449_v20 = vld [vmem:[%s18410_s4 + $0x30] sm:$0xff]   ;;  %v7177_v18 = vld [vmem:[#allocation2 + $0x38] sm:$0xf] }
 0x6d0   : > { %v7032_v36 = vrot.slane %v7030_v24, 7  ;;  %v7166_v33 = vsel %vm12846_vm6, %v7019_v50, %v7165_v31  ;;  %v7169_v35 = vsel %vm12787_vm2, %v7020_v17, %v7168_v39  ;;  %v6877_v54 = vmul.f32 %v16415_v5, %v6853_v30  ;;  %11791 = vmatprep.subr.bf16.mxu1 %v12448_v8  ;;  %v18514_v31 = vld [vmem:[#allocation14_spill] sm:$0xff]  ;;  %v7180_v34 = vld [vmem:[#allocation2 + $0x3c] sm:$0x1] }
 0x6d1   : > { %7167 = vst [vmem:[#allocation2 + $0x28] sm:$0xf] %v7166_v33  ;;  %7170 = vst [vmem:[#allocation2 + $0x2c] sm:$0x1] %v7169_v35  ;;  %v11468_v40 = vpack.c.bf16 %v6908_v57, %v6908_v57  ;;  %v11466_v0 = vpack.c.bf16 %v6906_v12, %v6906_v12  ;;  %v6899_v2 = vadd.f32 %v6883_v59, %v18513_v22  ;;  %v6815_v32 = vmul.f32 1.442695, %v6790_v11 }
 0x6d2   : > { %v7035_v52 = vor.u32 %v7033_v9, %v7032_v36  ;;  %v7036_v46 = vrot.slane %v7032_v36, 4  ;;  %v6893_v51 = vadd.f32 %v6877_v54, %v18514_v31  ;;  %v7675_v23 = vrot.slane %v16530_v58, 5  ;;  %v11770_v9 = vpop.f32.mrf.mxu0  ;;  %v7171_v59 = vld [vmem:[#allocation2 + $0x30] sm:$0xf]  ;;  %v7174_v8 = vld [vmem:[#allocation2 + $0x34] sm:$0x1] }
 0x6d3   : > { %v7038_v42 = vshrl.u32 %v11468_v40, 16  ;;  %v7041_v15 = vshll.u32 %v11468_v40, 16  ;;  %v7022_v13 = vshrl.u32 %v11466_v0, 16  ;;  %v7025_v24 = vshll.u32 %v11466_v0, 16  ;;  %11792 = vmatpush3.bf16.msra.mxu1 %v12449_v20  ;;  %v7183_v20 = vld [vmem:[#allocation2 + $0x40] sm:$0xf] }
 0x6d4   : > { %v7178_v50 = vsel %vm12846_vm6, %v7035_v52, %v7177_v18  ;;  %v7181_v17 = vsel %vm12787_vm2, %v7036_v46, %v7180_v34  ;;  %v6909_v11 = vmax.f32 %v6893_v51, 0.0  ;;  %v6915_v39 = vmax.f32 %v6899_v2, 0.0  ;;  %v7186_v22 = vld [vmem:[#allocation2 + $0x44] sm:$0x1]  ;;  %v11771_v51 = vpop.f32.mrf.mxu0  ;;  %v16557_v34 = vld [vmem:[#allocation2 + $0x20] sm:$0xf] }
 0x6d5   : > { %7179 = vst [vmem:[#allocation2 + $0x38] sm:$0xf] %v7178_v50  ;;  %7182 = vst [vmem:[#allocation2 + $0x3c] sm:$0x1] %v7181_v17  ;;  %v7040_v57 = vrot.slane %v7038_v42, 7  ;;  %v7024_v12 = vrot.slane %v7022_v13, 7  ;;  %12670 = vpow2.f32 %v6815_v32  ;;  %v11763_v35 = vadd.f32 %v16466_v56, %v16457_v25 }
 0x6d6   : > { %v6796_v30 = vmin.f32 %v16518_v7, 0.0  ;;  %v11469_v36 = vpack.c.bf16 %v6909_v11, %v6909_v11  ;;  %v11475_v33 = vpack.c.bf16 %v6915_v39, %v6915_v39  ;;  %v11766_v54 = vadd.f32 %v16502_v21, %v16485_v55  ;;  %v12450_v21 = vld [vmem:[%s18410_s4 + $0x68] sm:$0xff]   ;;  %v16574_v11 = vld [vmem:[#allocation2 + $0x18] sm:$0xf] }
 0x6d7   : > { %v7043_v40 = vor.u32 %v7041_v15, %v7040_v57  ;;  %v7044_v0 = vrot.slane %v7040_v57, 4  ;;  %v7027_v2 = vor.u32 %v7025_v24, %v7024_v12  ;;  %v7028_v52 = vrot.slane %v7024_v12, 4  ;;  %v12451_v15 = vld [vmem:[%s18410_s4 + $0x28] sm:$0xff]   ;;  %v7189_v39 = vld [vmem:[#allocation2 + $0x58] sm:$0xf]  ;;  %11793 = vmatprep.subr.bf16.mxu1 %v12450_v21 }
 0x6d8   : > { %v7046_v46 = vshrl.u32 %v11469_v36, 16  ;;  %v7049_v32 = vshll.u32 %v11469_v36, 16  ;;  %v7094_v18 = vshrl.u32 %v11475_v33, 16  ;;  %v7097_v31 = vshll.u32 %v11475_v33, 16  ;;  %11794 = vmatpush3.bf16.msra.mxu1 %v12451_v15 }
 0x6d9   : > { %v7184_v42 = vsel %vm12846_vm6, %v7043_v40, %v7183_v20  ;;  %v7187_v25 = vsel %vm12787_vm2, %v7044_v0, %v7186_v22  ;;  %v7172_v56 = vsel %vm12846_vm6, %v7027_v2, %v7171_v59  ;;  %v7175_v55 = vsel %vm12787_vm2, %v7028_v52, %v7174_v8  ;;  %v7192_v40 = vld [vmem:[#allocation2 + $0x5c] sm:$0x1]  ;;  %v7225_v20 = vld [vmem:[#allocation2 + $0x88] sm:$0xf] }
 0x6da   : > { %7185 = vst [vmem:[#allocation2 + $0x40] sm:$0xf] %v7184_v42  ;;  %7188 = vst [vmem:[#allocation2 + $0x44] sm:$0x1] %v7187_v25  ;;  %v7048_v13 = vrot.slane %v7046_v46, 7  ;;  %v7096_v24 = vrot.slane %v7094_v18, 7  ;;  %v6646_v17 = vadd.f32 %v11763_v35, %v16336_v1  ;;  %v6649_v57 = vadd.f32 %v11766_v54, %v16336_v1 }
 0x6db   : > { %7173 = vst [vmem:[#allocation2 + $0x30] sm:$0xf] %v7172_v56  ;;  %7176 = vst [vmem:[#allocation2 + $0x34] sm:$0x1] %v7175_v55  ;;  %v6827_v50 = vmul.f32 1.442695, %v6796_v30  ;;  %v11769_v12 = vadd.f32 %v16540_v45, %v16511_v16  ;;  %v11772_v59 = vadd.f32 %v11771_v51, %v11770_v9  ;;  %v11174_v8 = vcombine.low %v16574_v11, %v16557_v34 }
 0x6dc   : > { %v7051_v36 = vor.u32 %v7049_v32, %v7048_v13  ;;  %v7052_v33 = vrot.slane %v7048_v13, 4  ;;  %v7099_v0 = vor.u32 %v7097_v31, %v7096_v24  ;;  %v7100_v30 = vrot.slane %v7096_v24, 4  ;;  %v7228_v35 = vld [vmem:[#allocation2 + $0x8c] sm:$0x1]  ;;  %v16589_v45 = vld [vmem:[#allocation2 + $0x10] sm:$0xf] }
 0x6dd   : > { %12672 = vpow2.f32 %v6827_v50  ;;  %v16582_v22 = vadd.f32 %v16378_v29, %v6646_v17  ;;  %v16585_v54 = vadd.f32 %v16400_v26, %v6649_v57  ;;  %v6654_v16 = vadd.f32 %v11769_v12, %v16336_v1  ;;  %7793 = vrot.lane.b32.xlu1 %v11174_v8, %s12730_s13  ;;  %v16591_v9 = vld [vmem:[#allocation2 + $0x8] sm:$0xf]  ;;  %v16601_v46 = vld [vmem:[#allocation2 + $0xc] sm:$0x1]  ;;  %v16605_v31 = vld [vmem:[#allocation2 + $0x14] sm:$0x1] }
 0x6de   : > { %v7190_v2 = vsel %vm12846_vm6, %v7051_v36, %v7189_v39  ;;  %v7193_v52 = vsel %vm12787_vm2, %v7052_v33, %v7192_v40  ;;  %v7226_v29 = vsel %vm12846_vm6, %v7099_v0, %v7225_v20  ;;  %v7229_v26 = vsel %vm12787_vm2, %v7100_v30, %v7228_v35  ;;  %v12452_v25 = vld [vmem:[%s18410_s4 + $0x60] sm:$0xff]   ;;  %v16660_v33 = vld [vmem:[#allocation2 + $0x2c] sm:$0x1]  ;;  %v12454_v35 = vld [vmem:[%s18410_s4 + $0x58] sm:$0xff]  }
 0x6df   : > { %7191 = vst [vmem:[#allocation2 + $0x58] sm:$0xf] %v7190_v2  ;;  %7194 = vst [vmem:[#allocation2 + $0x5c] sm:$0x1] %v7193_v52  ;;  %v6791_v32 = vmin.f32 %v16582_v22, 0.0  ;;  %v6792_v18 = vmin.f32 %v16585_v54, 0.0  ;;  %v16613_v51 = vsel %vm12936_vm9, %v11137_v6, %v7567_v37  ;;  %v16621_v42 = vsel %vm12936_vm9, %v11148_v38, %v7675_v23  ;;  %v6753_v38 = vpop.f32.mrf.mxu1  ;;  %11795 = vmatprep.subr.bf16.mxu1 %v12452_v25 }
 0x6e0   : > { %7227 = vst [vmem:[#allocation2 + $0x88] sm:$0xf] %v7226_v29  ;;  %7230 = vst [vmem:[#allocation2 + $0x8c] sm:$0x1] %v7229_v26  ;;  %v16630_v56 = vadd.f32 %v16483_v48, %v6654_v16  ;;  %v6657_v6 = vadd.f32 %v11772_v59, %v16336_v1  ;;  %v16635_v37 = vcombine.low %v16589_v45, %v16574_v11  ;;  %v11130_v61 = vrot.slane %v16591_v9, 9  ;;  %v12455_v16 = vld [vmem:[%s18410_s4 + $0x18] sm:$0xff]  }
 0x6e1   : > { %v6817_v58 = vmul.f32 1.442695, %v6791_v32  ;;  %v6819_v23 = vmul.f32 1.442695, %v6792_v18  ;;  %v7539_v55 = vrot.slane %v16601_v46, 5  ;;  %v11131_v21 = vrot.slane %v16589_v45, 9  ;;  %11796 = vmatpush3.bf16.msra.mxu1 %v12453_v19 }
 0x6e2   : > { %v12671_v15 = vpop.eup %12670  ;;  %v6793_v48 = vmin.f32 %v16630_v56, 0.0  ;;  %v16641_v13 = vadd.f32 %v6753_v38, %v6657_v6  ;;  %7847 = vrot.lane.b32.xlu0 %v16635_v37, %s12729_s12  ;;  %v16645_v1 = vld [vmem:[#allocation2 + $0x1c] sm:$0x1]  ;;  %v7543_v24 = vrot.slane %v16605_v31, 5  ;;  %v7390_v50 = vshrl.u32 %v16397_v44, 16  ;;  %11797 = vmatprep.subr.bf16.mxu1 %v12454_v35 }
 0x6e3   : > { %v11104_v17 = vadd.f32 -1.0, %v12671_v15  ;;  %12674 = vpow2.f32 %v6817_v58  ;;  %v16651_v39 = vsel %vm12936_vm9, %v11130_v61, %v7539_v55  ;;  %v11132_v57 = vrot.slane %v16574_v11, 9  ;;  %v16654_v12 = vld [vmem:[#allocation2 + $0x24] sm:$0x1]  ;;  %v16656_v59 = vld [vmem:[#allocation2 + $0x28] sm:$0xf] }
 0x6e4   : > { %vm6774_vm5 = vcmp.gt.f32.partialorder %v16495_v62, 0.0  ;;  %12676 = vpow2.f32 %v6819_v23  ;;  %v6821_v8 = vmul.f32 1.442695, %v6793_v48  ;;  %v6794_v36 = vmin.f32 %v16641_v13, 0.0  ;;  %v16678_v52 = vld [vmem:[#allocation2 + $0x30] sm:$0xf] }
 0x6e5   : > { %v6854_v40 = vsel %vm6774_vm5, %v16495_v62, %v11104_v17  ;;  %v11165_v0 = vcombine.low %v16395_v60, %v16651_v39  ;;  %v16667_v30 = vsel %vm12936_vm9, %v11131_v21, %v7543_v24  ;;  %v7547_v20 = vrot.slane %v16645_v1, 5  ;;  %v16686_v25 = vld [vmem:[#allocation2 + $0x34] sm:$0x1]  ;;  %v18515_v19 = vld [vmem:[#allocation15_spill] sm:$0xff]  ;;  %11798 = vmatpush3.bf16.msra.mxu1 %v12455_v16 }
 0x6e6   : > { %v6878_v2 = vmul.f32 %v16415_v5, %v6854_v40  ;;  %12678 = vpow2.f32 %v6821_v8  ;;  %v6823_v62 = vmul.f32 1.442695, %v6794_v36  ;;  %v11133_v60 = vrot.slane %v16557_v34, 9  ;;  %v16691_v38 = vld [vmem:[#allocation2 + $0x38] sm:$0xf] }
 0x6e7   : > { %7765 = vrot.lane.b32.xlu1 %v11165_v0, %s12729_s12  ;;  %v7548_v29 = vsel %vm12936_vm9, %v11132_v57, %v7547_v20  ;;  %v7551_v26 = vrot.slane %v16654_v12, 5  ;;  %v11134_v32 = vrot.slane %v16656_v59, 9  ;;  %v7555_v18 = vrot.slane %v16660_v33, 5  ;;  %v16693_v58 = vld [vmem:[#allocation2 + $0x3c] sm:$0x1] }
 0x6e8   : > { %v6894_v6 = vadd.f32 %v6878_v2, %v18515_v19  ;;  %vm6780_vm7 = vcmp.gt.f32.partialorder %v16518_v7, 0.0  ;;  %12680 = vpow2.f32 %v6823_v62  ;;  %v11166_v61 = vcombine.low %v16667_v30, %v7548_v29  ;;  %v16710_v36 = vld [vmem:[#allocation2 + $0x40] sm:$0xf] }
 0x6e9   : > { %v7552_v23 = vsel %vm12936_vm9, %v11133_v60, %v7551_v26  ;;  %v16699_v55 = vsel %vm12936_vm9, %v11134_v32, %v7555_v18  ;;  %v11173_v21 = vcombine.low %v16591_v9, %v16589_v45  ;;  %v11135_v15 = vrot.slane %v16678_v52, 9  ;;  %v12457_v18 = vld [vmem:[%s18410_s4 + $0x50] sm:$0xff]  }
 0x6ea   : > { %v12673_v48 = vpop.eup %12672  ;;  %v6910_v24 = vmax.f32 %v6894_v6, 0.0  ;;  %vm6775_vm8 = vcmp.gt.f32.partialorder %v16582_v22, 0.0  ;;  %12219 = vmatprep.mubr.msk.bf16.mxu0 %vm1531_vm13, %v11166_v61  ;;  %v11190_v17 = vcombine.low %v7548_v29, %v7552_v23  ;;  %v16707_v57 = vcombine.low %v7552_v23, %v16699_v55  ;;  %11799 = vmatprep.subr.bf16.mxu1 %v12457_v18 }
 0x6eb   : > { %v7559_v8 = vrot.slane %v16686_v25, 5  ;;  %v11110_v40 = vadd.f32 -1.0, %v12673_v48  ;;  %7791 = vrot.lane.b32.xlu1 %v11173_v21, %s12730_s13  ;;  %v11189_v0 = vcombine.low %v16651_v39, %v16667_v30  ;;  %v11136_v20 = vrot.slane %v16691_v38, 9  ;;  %v16727_v30 = vld [vmem:[#allocation2 + $0x44] sm:$0x1] }
 0x6ec   : > { %v7563_v35 = vrot.slane %v16693_v58, 5  ;;  %v11470_v16 = vpack.c.bf16 %v6910_v24, %v6910_v24  ;;  %vm6776_vm10 = vcmp.gt.f32.partialorder %v16585_v54, 0.0  ;;  %7829 = vrot.lane.b32.xlu0 %v11190_v17, %s12731_s14  ;;  %12220 = vmatmul.mubr.msk.bf16.vlgmr.msra.gmra.mxu0 %vm1531_vm13, %v16707_v57  ;;  %v7292_v62 = vshrl.u32 %v16591_v9, 16  ;;  %v12459_v24 = vld [vmem:[%s18410_s4 + $0x48] sm:$0xff]  }
 0x6ed   : > { %v16723_v2 = vsel %vm12936_vm9, %v11135_v15, %v7559_v8  ;;  %v7295_v39 = vshll.u32 %v16591_v9, 16  ;;  %v6860_v60 = vsel %vm6780_vm7, %v16518_v7, %v11110_v40  ;;  %v7301_v26 = vshll.u32 %v16601_v46, 16  ;;  %v12458_v9 = vld [vmem:[%s18410_s4 + $0x10] sm:$0xff]   ;;  %v18516_v40 = vld [vmem:[#allocation21_spill] sm:$0xff] }
 0x6ee   : > { %v16734_v29 = vsel %vm12936_vm9, %v11136_v20, %v7563_v35  ;;  %v11145_v32 = vrot.slane %v16710_v36, 9  ;;  %v7054_v19 = vshrl.u32 %v11470_v16, 16  ;;  %v6884_v6 = vmul.f32 %v16415_v5, %v6860_v60  ;;  %11800 = vmatpush3.bf16.msra.mxu1 %v12458_v9 }
 0x6ef   : > { %vm6777_vm11 = vcmp.gt.f32.partialorder %v16630_v56, 0.0  ;;  %v16748_v7 = vcombine.low %v16723_v2, %v16734_v29  ;;  %v16752_v46 = vcombine.low %v16557_v34, %v16656_v59  ;;  %v7057_v23 = vshll.u32 %v11470_v16, 16  ;;  %7767 = vrot.lane.b32.xlu1 %v11166_v61, %s12729_s12  ;;  %11801 = vmatprep.subr.bf16.mxu1 %v12459_v24 }
 0x6f0   : > { %v7294_v21 = vrot.slane %v7292_v62, 4  ;;  %v7297_v15 = vrot.slane %v7295_v39, 5  ;;  %v7631_v48 = vrot.slane %v16727_v30, 5  ;;  %v12675_v17 = vpop.eup %12674  ;;  %v7056_v8 = vrot.slane %v7054_v19, 7  ;;  %7827 = vrot.lane.b32.xlu0 %v11189_v0, %s12731_s14  ;;  %v12460_v0 = vld [vmem:[%s18410_s4 + $0x8] sm:$0xff]  }
 0x6f1   : > { %v6900_v20 = vadd.f32 %v6884_v6, %v18516_v40  ;;  %vm6778_vm0 = vcmp.gt.f32.partialorder %v16641_v13, 0.0  ;;  %12223 = vmatprep.mubr.msk.bf16.mxu0 %vm1531_vm13, %v16748_v7  ;;  %v7303_v61 = vrot.slane %v7301_v26, 5  ;;  %v11197_v35 = vcombine.low %v16710_v36, %v16344_v10  ;;  %v12677_v16 = vpop.eup %12676  ;;  %v7195_v6 = vld [vmem:[#allocation2 + $0x60] sm:$0xf] }
 0x6f2   : > { %v11105_v62 = vadd.f32 -1.0, %v12675_v17  ;;  %v7298_v39 = vor.u32 %v7297_v15, %v7294_v21  ;;  %v16768_v60 = vsel %vm12936_vm9, %v11145_v32, %v7631_v48  ;;  %v16772_v18 = vcombine.low %v16678_v52, %v16691_v38  ;;  %v7198_v15 = vld [vmem:[#allocation2 + $0x64] sm:$0x1]  ;;  %11802 = vmatpush3.bf16.msra.mxu1 %v12460_v0 }
 0x6f3   : > { %v7059_v26 = vor.u32 %v7057_v23, %v7056_v8  ;;  %v7060_v19 = vrot.slane %v7056_v8, 4  ;;  %v6916_v10 = vmax.f32 %v6900_v20, 0.0  ;;  %v11106_v40 = vadd.f32 -1.0, %v12677_v16  ;;  %v12679_v21 = vpop.eup %12678  ;;  %v12461_v23 = vld [vmem:[%s18410_s4 + $0x40] sm:$0xff]  }
 0x6f4   : > { %v6855_v32 = vsel %vm6775_vm8, %v16582_v22, %v11105_v62  ;;  %v7299_v48 = vrot.slane %v7298_v39, 4  ;;  %v11201_v9 = vcombine.low %v16768_v60, %v16408_v49  ;;  %v7306_v17 = vshrl.u32 %v16589_v45, 16  ;;  %7849 = vrot.lane.b32.xlu0 %v16752_v46, %s12729_s12  ;;  %11803 = vmatprep.subr.bf16.mxu1 %v12461_v23 }
 0x6f5   : > { %v7196_v8 = vsel %vm12846_vm6, %v7059_v26, %v7195_v6  ;;  %v7199_v24 = vsel %vm12787_vm2, %v7060_v19, %v7198_v15  ;;  %v11476_v20 = vpack.c.bf16 %v6916_v10, %v6916_v10  ;;  %v6879_v16 = vmul.f32 %v16415_v5, %v6855_v32  ;;  %v12681_v22 = vpop.eup %12680  ;;  %v12462_v19 = vld [vmem:[%s18410_s4] sm:$0xff]  }
 0x6f6   : > { %7197 = vst [vmem:[#allocation2 + $0x60] sm:$0xf] %v7196_v8  ;;  %7200 = vst [vmem:[#allocation2 + $0x64] sm:$0x1] %v7199_v24  ;;  %v6856_v49 = vsel %vm6776_vm10, %v16585_v54, %v11106_v40  ;;  %v11107_v62 = vadd.f32 -1.0, %v12679_v21  ;;  %v16798_v39 = vsel %vm13046_vm12, %v7299_v48, %v7303_v61  ;;  %12224 = vmatmul.mubr.msk.bf16.gmra.mxu0 %vm1531_vm13, %v11201_v9  ;;  %v7308_v26 = vrot.slane %v7306_v17, 4 }
 0x6f7   : > { %v7102_v6 = vshrl.u32 %v11476_v20, 16  ;;  %v7105_v10 = vshll.u32 %v11476_v20, 16  ;;  %v18517_v15 = vld [vmem:[#allocation16_spill] sm:$0xff]  ;;  %v6880_v8 = vmul.f32 %v16415_v5, %v6856_v49  ;;  %v11108_v61 = vadd.f32 -1.0, %v12681_v22  ;;  %v18518_v9 = vld [vmem:[#allocation17_spill] sm:$0xff]  ;;  %11804 = vmatpush3.bf16.msra.mxu1 %v12462_v19 }
 0x6f8   : > { %v6895_v32 = vadd.f32 %v6879_v16, %v18517_v15  ;;  %v6857_v54 = vsel %vm6777_vm11, %v16630_v56, %v11107_v62  ;;  %v11157_v0 = vcombine.low %v7290_v4, %v16798_v39  ;;  %v7309_v40 = vshll.u32 %v16589_v45, 16  ;;  %7853 = vrot.lane.b32.xlu0 %v11197_v35, %s12729_s12  ;;  %v7231_v22 = vld [vmem:[#allocation2 + $0x90] sm:$0xf]  ;;  %v7234_v49 = vld [vmem:[#allocation2 + $0x94] sm:$0x1] }
 0x6f9   : > { %v7104_v21 = vrot.slane %v7102_v6, 7  ;;  %v6896_v17 = vadd.f32 %v6880_v8, %v18518_v9  ;;  %v6881_v23 = vmul.f32 %v16415_v5, %v6857_v54  ;;  %v6858_v56 = vsel %vm6778_vm0, %v16641_v13, %v11108_v61  ;;  %v18519_v62 = vld [vmem:[#allocation18_spill] sm:$0xff]  ;;  %v18520_v54 = vld [vmem:[#allocation19_spill] sm:$0xff] }
 0x6fa   : > { %v6911_v48 = vmax.f32 %v6895_v32, 0.0  ;;  %7725 = vrot.lane.b32.xlu1 %v11157_v0, %s12731_s14  ;;  %v7311_v24 = vrot.slane %v7309_v40, 5  ;;  %v7315_v41 = vshll.u32 %v16605_v31, 16  ;;  %v7320_v47 = vshrl.u32 %v16574_v11, 16 }
 0x6fb   : > { %v7107_v4 = vor.u32 %v7105_v10, %v7104_v21  ;;  %v7108_v45 = vrot.slane %v7104_v21, 4  ;;  %v6912_v16 = vmax.f32 %v6896_v17, 0.0  ;;  %v6897_v35 = vadd.f32 %v6881_v23, %v18519_v62 }
 0x6fc   : > { %v11471_v20 = vpack.c.bf16 %v6911_v48, %v6911_v48  ;;  %v6882_v6 = vmul.f32 %v16415_v5, %v6858_v56  ;;  %v11176_v13 = vcombine.low %v16691_v38, %v16710_v36  ;;  %v7312_v15 = vor.u32 %v7311_v24, %v7308_v26  ;;  %7851 = vrot.lane.b32.xlu0 %v16772_v18, %s12729_s12 }
 0x6fd   : > { %v7232_v31 = vsel %vm12846_vm6, %v7107_v4, %v7231_v22  ;;  %v7235_v19 = vsel %vm12787_vm2, %v7108_v45, %v7234_v49  ;;  %v7393_v32 = vshll.u32 %v16397_v44, 16  ;;  %v11472_v8 = vpack.c.bf16 %v6912_v16, %v6912_v16  ;;  %v7201_v45 = vld [vmem:[#allocation2 + $0x68] sm:$0xf]  ;;  %v7204_v49 = vld [vmem:[#allocation2 + $0x6c] sm:$0x1] }
 0x6fe   : > { %v7062_v10 = vshrl.u32 %v11471_v20, 16  ;;  %7233 = vst [vmem:[#allocation2 + $0x90] sm:$0xf] %v7232_v31  ;;  %7236 = vst [vmem:[#allocation2 + $0x94] sm:$0x1] %v7235_v19  ;;  %v6913_v5 = vmax.f32 %v6897_v35, 0.0  ;;  %v6898_v61 = vadd.f32 %v6882_v6, %v18520_v54  ;;  %7797 = vrot.lane.b32.xlu1 %v11176_v13, %s12730_s13 }
 0x6ff   : > { %v7317_v26 = vrot.slane %v7315_v41, 5  ;;  %v7065_v40 = vshll.u32 %v11471_v20, 16  ;;  %v7322_v21 = vrot.slane %v7320_v47, 4  ;;  %v7323_v48 = vshll.u32 %v16574_v11, 16  ;;  %v7207_v31 = vld [vmem:[#allocation2 + $0x70] sm:$0xf] }
 0x700   : > { %v7064_v0 = vrot.slane %v7062_v10, 7  ;;  %v7070_v9 = vshrl.u32 %v11472_v8, 16  ;;  %v11473_v17 = vpack.c.bf16 %v6913_v5, %v6913_v5  ;;  %v6914_v23 = vmax.f32 %v6898_v61, 0.0 }
 0x701   : > { %v7313_v56 = vrot.slane %v7312_v15, 4  ;;  %v7325_v22 = vrot.slane %v7323_v48, 5  ;;  %v7329_v16 = vshll.u32 %v16645_v1, 16  ;;  %v7073_v35 = vshll.u32 %v11472_v8, 16  ;;  %v7210_v8 = vld [vmem:[#allocation2 + $0x74] sm:$0x1] }
 0x702   : > { %v7067_v24 = vor.u32 %v7065_v40, %v7064_v0  ;;  %v7068_v4 = vrot.slane %v7064_v0, 4  ;;  %v7072_v62 = vrot.slane %v7070_v9, 7  ;;  %v7078_v6 = vshrl.u32 %v11473_v17, 16  ;;  %7769 = vrot.lane.b32.xlu1 %v16707_v57, %s12729_s12  ;;  %v16852_v0 = vld [vmem:[#allocation2 + $0x60] sm:$0xf] }
 0x703   : > { %v11474_v41 = vpack.c.bf16 %v6914_v23, %v6914_v23  ;;  %v7081_v20 = vshll.u32 %v11473_v17, 16  ;;  %v7326_v13 = vor.u32 %v7325_v22, %v7322_v21  ;;  %v16848_v5 = vsel %vm13046_vm12, %v7313_v56, %v7317_v26  ;;  %v7213_v17 = vld [vmem:[#allocation2 + $0x78] sm:$0xf]  ;;  %v7216_v23 = vld [vmem:[#allocation2 + $0x7c] sm:$0x1] }
 0x704   : > { %v7202_v11 = vsel %vm12846_vm6, %v7067_v24, %v7201_v45  ;;  %v7205_v47 = vsel %vm12787_vm2, %v7068_v4, %v7204_v49  ;;  %v7075_v15 = vor.u32 %v7073_v35, %v7072_v62  ;;  %v7076_v1 = vrot.slane %v7072_v62, 4  ;;  %v16863_v4 = vld [vmem:[#allocation2 + $0x64] sm:$0x1] }
 0x705   : > { %7203 = vst [vmem:[#allocation2 + $0x68] sm:$0xf] %v7202_v11  ;;  %7206 = vst [vmem:[#allocation2 + $0x6c] sm:$0x1] %v7205_v47  ;;  %v7080_v19 = vrot.slane %v7078_v6, 7  ;;  %v7086_v10 = vshrl.u32 %v11474_v41, 16  ;;  %v11175_v61 = vcombine.low %v16656_v59, %v16678_v52 }
 0x706   : > { %v7327_v57 = vrot.slane %v7326_v13, 4  ;;  %v7331_v54 = vrot.slane %v7329_v16, 5  ;;  %v7208_v40 = vsel %vm12846_vm6, %v7075_v15, %v7207_v31  ;;  %v7211_v21 = vsel %vm12787_vm2, %v7076_v1, %v7210_v8  ;;  %v7222_v47 = vld [vmem:[#allocation2 + $0x84] sm:$0x1] }
 0x707   : > { %v7083_v48 = vor.u32 %v7081_v20, %v7080_v19  ;;  %v7084_v9 = vrot.slane %v7080_v19, 4  ;;  %7209 = vst [vmem:[#allocation2 + $0x70] sm:$0xf] %v7208_v40  ;;  %7212 = vst [vmem:[#allocation2 + $0x74] sm:$0x1] %v7211_v21  ;;  %v7088_v26 = vrot.slane %v7086_v10, 7  ;;  %7795 = vrot.lane.b32.xlu1 %v11175_v61, %s12730_s13 }
 0x708   : > { %v7089_v56 = vshll.u32 %v11474_v41, 16  ;;  %v16860_v24 = vsel %vm13046_vm12, %v7327_v57, %v7331_v54  ;;  %v16867_v45 = vrot.slane %v7390_v50, 4  ;;  %v11139_v62 = vrot.slane %v16852_v0, 9  ;;  %v7219_v41 = vld [vmem:[#allocation2 + $0x80] sm:$0xf] }
 0x709   : > { %v7214_v22 = vsel %vm12846_vm6, %v7083_v48, %v7213_v17  ;;  %v7217_v16 = vsel %vm12787_vm2, %v7084_v9, %v7216_v23  ;;  %v11158_v49 = vcombine.low %v16848_v5, %v16860_v24  ;;  %v7092_v6 = vrot.slane %v7088_v26, 4  ;;  %v16908_v9 = vld [vmem:[#allocation2 + $0x58] sm:$0xf]  ;;  %v16910_v17 = vld [vmem:[#allocation2 + $0x5c] sm:$0x1] }
 0x70a   : > { %7215 = vst [vmem:[#allocation2 + $0x78] sm:$0xf] %v7214_v22  ;;  %7218 = vst [vmem:[#allocation2 + $0x7c] sm:$0x1] %v7217_v16  ;;  %v7091_v35 = vor.u32 %v7089_v56, %v7088_v26  ;;  %v7334_v11 = vshrl.u32 %v16557_v34, 16  ;;  %v7337_v50 = vshll.u32 %v16557_v34, 16 }
 0x70b   : > { %7867 = vrot.lane.b32.xlu0 %v11158_v49, %s12730_s13  ;;  %v7575_v20 = vrot.slane %v16863_v4, 5  ;;  %v7343_v13 = vshll.u32 %v16654_v12, 16  ;;  %v7348_v15 = vshrl.u32 %v16656_v59, 16  ;;  %v7351_v1 = vshll.u32 %v16656_v59, 16  ;;  %7727 = vrot.lane.b32.xlu1 %v11158_v49, %s12731_s14 }
 0x70c   : > { %v7220_v31 = vsel %vm12846_vm6, %v7091_v35, %v7219_v41  ;;  %v7223_v19 = vsel %vm12787_vm2, %v7092_v6, %v7222_v47  ;;  %v16888_v34 = vld [vmem:[#allocation2 + $0x68] sm:$0xf]  ;;  %v16890_v10 = vld [vmem:[#allocation2 + $0x6c] sm:$0x1]  ;;  %v7336_v8 = vrot.slane %v7334_v11, 4  ;;  %v7339_v57 = vrot.slane %v7337_v50, 5 }
 0x70d   : > { %7221 = vst [vmem:[#allocation2 + $0x80] sm:$0xf] %v7220_v31  ;;  %7224 = vst [vmem:[#allocation2 + $0x84] sm:$0x1] %v7223_v19  ;;  %v11192_v12 = vcombine.low %v16734_v29, %v16768_v60  ;;  %v11140_v59 = vrot.slane %v16888_v34, 9  ;;  %v7579_v14 = vrot.slane %v16890_v10, 5  ;;  %v16901_v48 = vsel %vm12936_vm9, %v11139_v62, %v7575_v20 }
 0x70e   : > { %v7350_v54 = vrot.slane %v7348_v15, 4  ;;  %v7340_v53 = vor.u32 %v7339_v57, %v7336_v8  ;;  %v7353_v61 = vrot.slane %v7351_v1, 5  ;;  %v7357_v40 = vshll.u32 %v16660_v33, 16  ;;  %v16922_v16 = vld [vmem:[#allocation2 + $0x70] sm:$0xf] }
 0x70f   : > { %v7598_v21 = vshrl.u32 %v16710_v36, 16  ;;  %7833 = vrot.lane.b32.xlu0 %v11192_v12, %s12731_s14  ;;  %v16905_v29 = vsel %vm12936_vm9, %v11140_v59, %v7579_v14  ;;  %v7601_v60 = vshll.u32 %v16710_v36, 16  ;;  %v16914_v33 = vrot.slane %v7393_v32, 5  ;;  %7771 = vrot.lane.b32.xlu1 %v16748_v7, %s12729_s12  ;;  %v16924_v36 = vld [vmem:[#allocation2 + $0x74] sm:$0x1] }
 0x710   : > { %v16920_v23 = vcombine.low %v16901_v48, %v16905_v29  ;;  %v7341_v26 = vrot.slane %v7340_v53, 4  ;;  %v7345_v56 = vrot.slane %v7343_v13, 5  ;;  %v7354_v22 = vor.u32 %v7353_v61, %v7350_v54 }
 0x711   : > { %v11191_v49 = vcombine.low %v16699_v55, %v16723_v2  ;;  %v7600_v44 = vrot.slane %v7598_v21, 4  ;;  %v7603_v32 = vrot.slane %v7601_v60, 5  ;;  %v7607_v62 = vshll.u32 %v16727_v30, 16  ;;  %v16929_v35 = vld [vmem:[#allocation2 + $0x78] sm:$0xf] }
 0x712   : > { %12227 = vmatprep.mubr.msk.bf16.mxu0 %vm1531_vm13, %v16920_v23  ;;  %v16935_v7 = vsel %vm13046_vm12, %v7341_v26, %v7345_v56  ;;  %v7355_v6 = vrot.slane %v7354_v22, 4  ;;  %v7359_v41 = vrot.slane %v7357_v40, 5  ;;  %v11138_v11 = vrot.slane %v16908_v9, 9  ;;  %v16938_v50 = vld [vmem:[#allocation2 + $0x7c] sm:$0x1] }
 0x713   : > { %7831 = vrot.lane.b32.xlu0 %v11191_v49, %s12731_s14  ;;  %v7604_v55 = vor.u32 %v7603_v32, %v7600_v44  ;;  %v11141_v2 = vrot.slane %v16922_v16, 9  ;;  %v7583_v30 = vrot.slane %v16924_v36, 5  ;;  %v11142_v47 = vrot.slane %v16929_v35, 9  ;;  %v16993_v32 = vld [vmem:[#allocation2 + $0x8c] sm:$0x1] }
 0x714   : > { %v16946_v20 = vsel %vm13046_vm12, %v7355_v6, %v7359_v41  ;;  %v7571_v13 = vrot.slane %v16910_v17, 5  ;;  %v7587_v15 = vrot.slane %v16938_v50, 5  ;;  %v7362_v1 = vshrl.u32 %v16678_v52, 16  ;;  %v16964_v53 = vld [vmem:[#allocation2 + $0x80] sm:$0xf] }
 0x715   : > { %v11159_v31 = vcombine.low %v16935_v7, %v16946_v20  ;;  %v7605_v19 = vrot.slane %v7604_v55, 4  ;;  %v7609_v8 = vrot.slane %v7607_v62, 5  ;;  %v11178_v57 = vcombine.low %v16888_v34, %v16922_v16  ;;  %v16978_v26 = vld [vmem:[#allocation2 + $0x84] sm:$0x1] }
 0x716   : > { %v16957_v12 = vsel %vm12936_vm9, %v11141_v2, %v7583_v30  ;;  %v16961_v59 = vsel %vm12936_vm9, %v11142_v47, %v7587_v15  ;;  %v7364_v14 = vrot.slane %v7362_v1, 4  ;;  %v7365_v54 = vshll.u32 %v16678_v52, 16  ;;  %v16980_v52 = vld [vmem:[#allocation2 + $0x88] sm:$0xf] }
 0x717   : > { %7869 = vrot.lane.b32.xlu0 %v11159_v31, %s12730_s13  ;;  %7729 = vrot.lane.b32.xlu1 %v11159_v31, %s12731_s14  ;;  %v16970_v61 = vsel %vm13046_vm12, %v7605_v19, %v7609_v8  ;;  %v16974_v40 = vcombine.low %v16957_v12, %v16961_v59  ;;  %v7376_v21 = vshrl.u32 %v16691_v38, 16  ;;  %v7379_v60 = vshll.u32 %v16691_v38, 16  ;;  %v16995_v38 = vld [vmem:[#allocation2 + $0x90] sm:$0xf] }
 0x718   : > { %v11199_v56 = vcombine.low %v16970_v61, %v7650_v27  ;;  %v16990_v22 = vsel %vm12936_vm9, %v11138_v11, %v7571_v13  ;;  %v7367_v49 = vrot.slane %v7365_v54, 5  ;;  %v7371_v44 = vshll.u32 %v16686_v25, 16  ;;  %v17001_v27 = vld [vmem:[#allocation2 + $0x94] sm:$0x1] }
 0x719   : > { %12228 = vmatmul.mubr.msk.bf16.gmra.mxu0 %vm1531_vm13, %v16974_v40  ;;  %v7378_v62 = vrot.slane %v7376_v21, 4  ;;  %v7381_v6 = vrot.slane %v7379_v60, 5  ;;  %v7385_v3 = vshll.u32 %v16693_v58, 16  ;;  %v11143_v43 = vrot.slane %v16964_v53, 9 }
 0x71a   : > { %v17005_v41 = vcombine.low %v16852_v0, %v16888_v34  ;;  %v7368_v25 = vor.u32 %v7367_v49, %v7364_v14  ;;  %v7591_v11 = vrot.slane %v16978_v26, 5  ;;  %v11144_v55 = vrot.slane %v16980_v52, 9 }
 0x71b   : > { %7873 = vrot.lane.b32.xlu0 %v11199_v56, %s12730_s13  ;;  %7801 = vrot.lane.b32.xlu1 %v11178_v57, %s12730_s13  ;;  %v11169_v58 = vcombine.low %v16613_v51, %v16990_v22  ;;  %v7382_v2 = vor.u32 %v7381_v6, %v7378_v62  ;;  %v7595_v30 = vrot.slane %v16993_v32, 5  ;;  %v11146_v47 = vrot.slane %v16995_v38, 9 }
 0x71c   : > { %v7369_v13 = vrot.slane %v7368_v25, 4  ;;  %v7373_v15 = vrot.slane %v7371_v44, 5  ;;  %v17017_v1 = vsel %vm12936_vm9, %v11143_v43, %v7591_v11  ;;  %v7635_v31 = vrot.slane %v17001_v27, 5  ;;  %v12714_v44 = vld [vmem:[#allocation2 + $0x54] sm:$0x1] }
 0x71d   : > { %v7383_v19 = vrot.slane %v7382_v2, 4  ;;  %v7387_v8 = vrot.slane %v7385_v3, 5  ;;  %v17022_v57 = vsel %vm12936_vm9, %v11144_v55, %v7595_v30  ;;  %v7404_v51 = vshrl.u32 %v16908_v9, 16 }
 0x71e   : > { %v17027_v14 = vsel %vm13046_vm12, %v7369_v13, %v7373_v15  ;;  %v17031_v54 = vcombine.low %v17017_v1, %v17022_v57  ;;  %v17035_v21 = vsel %vm12936_vm9, %v11146_v47, %v7635_v31  ;;  %v7407_v60 = vshll.u32 %v16908_v9, 16 }
 0x71f   : > { %7855 = vrot.lane.b32.xlu0 %v17005_v41, %s12729_s12  ;;  %7773 = vrot.lane.b32.xlu1 %v11169_v58, %s12729_s12  ;;  %v17043_v56 = vsel %vm13046_vm12, %v7383_v19, %v7387_v8  ;;  %v11202_v49 = vcombine.low %v17035_v21, %v16621_v42  ;;  %v7399_v62 = vshll.u32 %v12714_v44, 16  ;;  %v7406_v6 = vrot.slane %v7404_v51, 4 }
 0x720   : > { %12231 = vmatprep.mubr.msk.bf16.mxu0 %vm1531_vm13, %v17031_v54  ;;  %v7396_v3 = vor.u32 %v16914_v33, %v16867_v45  ;;  %v7409_v43 = vrot.slane %v7407_v60, 5  ;;  %v11160_v25 = vcombine.low %v17027_v14, %v17043_v56  ;;  %v11177_v11 = vcombine.low %v16908_v9, %v16852_v0 }
 0x721   : > { %12232 = vmatmul.mubr.msk.bf16.gmra.mxu0 %vm1531_vm13, %v11202_v49  ;;  %v7432_v42 = vshrl.u32 %v16888_v34, 16  ;;  %v7413_v58 = vshll.u32 %v16910_v17, 16  ;;  %v7435_v2 = vshll.u32 %v16888_v34, 16  ;;  %v7401_v45 = vrot.slane %v7399_v62, 5 }
 0x722   : > { %v7410_v55 = vor.u32 %v7409_v43, %v7406_v6  ;;  %v7418_v33 = vshrl.u32 %v16852_v0, 16  ;;  %v7421_v30 = vshll.u32 %v16852_v0, 16  ;;  %v7397_v47 = vrot.slane %v7396_v3, 4 }
 0x723   : > { %7871 = vrot.lane.b32.xlu0 %v11160_v25, %s12730_s13  ;;  %7799 = vrot.lane.b32.xlu1 %v11177_v11, %s12730_s13  ;;  %v7434_v15 = vrot.slane %v7432_v42, 4  ;;  %v7437_v31 = vrot.slane %v7435_v2, 5  ;;  %v11194_v19 = vcombine.low %v16905_v29, %v16957_v12  ;;  %v7446_v17 = vshrl.u32 %v16922_v16, 16 }
 0x724   : > { %v7411_v13 = vrot.slane %v7410_v55, 4  ;;  %v7449_v34 = vshll.u32 %v16922_v16, 16  ;;  %v7415_v8 = vrot.slane %v7413_v58, 5  ;;  %v7460_v51 = vshrl.u32 %v16929_v35, 16 }
 0x725   : > { %v7463_v60 = vshll.u32 %v16929_v35, 16  ;;  %v7420_v0 = vrot.slane %v7418_v33, 4  ;;  %v7423_v49 = vrot.slane %v7421_v30, 5  ;;  %v7448_v44 = vrot.slane %v7446_v17, 4 }
 0x726   : > { %v7451_v62 = vrot.slane %v7449_v34, 5  ;;  %v11193_v29 = vcombine.low %v16990_v22, %v16901_v48  ;;  %v7402_v12 = vsel %vm13046_vm12, %v7397_v47, %v7401_v45  ;;  %v17077_v6 = vsel %vm13046_vm12, %v7411_v13, %v7415_v8 }
 0x727   : > { %7837 = vrot.lane.b32.xlu0 %v11194_v19, %s12731_s14  ;;  %7731 = vrot.lane.b32.xlu1 %v11160_v25, %s12731_s14  ;;  %v7438_v3 = vor.u32 %v7437_v31, %v7434_v15  ;;  %v17081_v43 = vcombine.low %v16922_v16, %v16929_v35  ;;  %v7462_v11 = vrot.slane %v7460_v51, 4  ;;  %v7465_v42 = vrot.slane %v7463_v60, 5 }
 0x728   : > { %v7452_v25 = vor.u32 %v7451_v62, %v7448_v44  ;;  %v7427_v55 = vshll.u32 %v16863_v4, 16  ;;  %v7441_v58 = vshll.u32 %v16890_v10, 16  ;;  %v7474_v48 = vshrl.u32 %v16964_v53, 16 }
 0x729   : > { %v7477_v22 = vshll.u32 %v16964_v53, 16  ;;  %v11161_v2 = vcombine.low %v7402_v12, %v17077_v6  ;;  %v17093_v16 = vcombine.low %v16964_v53, %v16980_v52  ;;  %v7424_v45 = vor.u32 %v7423_v49, %v7420_v0 }
 0x72a   : > { %v7455_v4 = vshll.u32 %v16924_v36, 16  ;;  %v7439_v33 = vrot.slane %v7438_v3, 4  ;;  %v7476_v10 = vrot.slane %v7474_v48, 4  ;;  %v7488_v47 = vshrl.u32 %v16980_v52, 16 }
 0x72b   : > { %7835 = vrot.lane.b32.xlu0 %v11193_v29, %s12731_s14  ;;  %7775 = vrot.lane.b32.xlu1 %v16920_v23, %s12729_s12  ;;  %v7479_v30 = vrot.slane %v7477_v22, 5  ;;  %v7453_v13 = vrot.slane %v7452_v25, 4  ;;  %v7466_v15 = vor.u32 %v7465_v42, %v7462_v11  ;;  %v7483_v31 = vshll.u32 %v16978_v26, 16 }
 0x72c   : > { %v7491_v23 = vshll.u32 %v16980_v52, 16  ;;  %v7429_v19 = vrot.slane %v7427_v55, 5  ;;  %v7443_v17 = vrot.slane %v7441_v58, 5  ;;  %v7490_v8 = vrot.slane %v7488_v47, 4 }
 0x72d   : > { %v7480_v34 = vor.u32 %v7479_v30, %v7476_v10  ;;  %v7425_v36 = vrot.slane %v7424_v45, 4  ;;  %v7457_v51 = vrot.slane %v7455_v4, 5  ;;  %v7469_v60 = vshll.u32 %v16938_v50, 16 }
 0x72e   : > { %v7493_v0 = vrot.slane %v7491_v23, 5  ;;  %v17105_v49 = vsel %vm13046_vm12, %v7439_v33, %v7443_v17  ;;  %v7612_v44 = vshrl.u32 %v16995_v38, 16  ;;  %v7615_v62 = vshll.u32 %v16995_v38, 16 }
 0x72f   : > { %7857 = vrot.lane.b32.xlu0 %v17081_v43, %s12729_s12  ;;  %7733 = vrot.lane.b32.xlu1 %v11161_v2, %s12731_s14  ;;  %v7481_v26 = vrot.slane %v7480_v34, 4  ;;  %v17111_v29 = vsel %vm13046_vm12, %v7453_v13, %v7457_v51  ;;  %v7467_v12 = vrot.slane %v7466_v15, 4  ;;  %v7485_v3 = vrot.slane %v7483_v31, 5  ;;  %v12715_v51 = vld [vmem:[#allocation2 + $0x98] sm:$0xf] }
 0x730   : > { %v7494_v25 = vor.u32 %v7493_v0, %v7490_v8  ;;  %v7497_v11 = vshll.u32 %v16993_v32, 16  ;;  %v7614_v50 = vrot.slane %v7612_v44, 4  ;;  %v7617_v42 = vrot.slane %v7615_v62, 5 }
 0x731   : > { %v7621_v55 = vshll.u32 %v17001_v27, 16  ;;  %v17121_v58 = vsel %vm13046_vm12, %v7425_v36, %v7429_v19  ;;  %v7471_v48 = vrot.slane %v7469_v60, 5  ;;  %v17125_v22 = vsel %vm13046_vm12, %v7481_v26, %v7485_v3 }
 0x732   : > { %v11182_v32 = vcombine.low %v16860_v24, %v16935_v7  ;;  %v7495_v2 = vrot.slane %v7494_v25, 4  ;;  %v7618_v27 = vor.u32 %v7617_v42, %v7614_v50  ;;  %v11181_v45 = vcombine.low %v16798_v39, %v16848_v5 }
 0x733   : > { %7859 = vrot.lane.b32.xlu0 %v17093_v16, %s12729_s12  ;;  %7777 = vrot.lane.b32.xlu1 %v16974_v40, %s12729_s12  ;;  %v11184_v40 = vcombine.low %v17043_v56, %v16970_v61  ;;  %v11162_v4 = vcombine.low %v17121_v58, %v17105_v49  ;;  %v17137_v33 = vsel %vm13046_vm12, %v7467_v12, %v7471_v48  ;;  %v7499_v47 = vrot.slane %v7497_v11, 5 }
 0x734   : > { %v11183_v10 = vcombine.low %v16946_v20, %v17027_v14  ;;  %v11186_v30 = vcombine.low %v17105_v49, %v17111_v29  ;;  %v7619_v13 = vrot.slane %v7618_v27, 4  ;;  %v7623_v15 = vrot.slane %v7621_v55, 5 }
 0x735   : > { %v11185_v31 = vcombine.low %v17077_v6, %v17121_v58  ;;  %v11187_v23 = vcombine.low %v17137_v33, %v17125_v22  ;;  %v17151_v19 = vsel %vm13046_vm12, %v7495_v2, %v7499_v47  ;;  %v11195_v34 = vcombine.low %v16961_v59, %v17017_v1 }
 0x736   : > { %v17155_v17 = vsel %vm13046_vm12, %v7619_v13, %v7623_v15  ;;  %v11179_v8 = vcombine.low %v16929_v35, %v16964_v53  ;;  %v7652_v60 = vshrl.u32 %v12715_v51, 16  ;;  %v7655_v0 = vshll.u32 %v12715_v51, 16  ;;  %v12716_v53 = vld [vmem:[#allocation2 + $0x9c] sm:$0x1] }
 0x737   : > { %7875 = vrot.lane.b32.xlu0 %v11162_v4, %s12730_s13  ;;  %7735 = vrot.lane.b32.xlu1 %v11162_v4, %s12731_s14  ;;  %v11188_v36 = vcombine.low %v17151_v19, %v17155_v17  ;;  %v11163_v26 = vcombine.low %v17111_v29, %v17137_v33  ;;  %v11196_v35 = vcombine.low %v17022_v57, %v17035_v21  ;;  %v7661_v1 = vshll.u32 %v12716_v53, 16 }
 0x738   : > { %v7654_v44 = vrot.slane %v7652_v60, 4  ;;  %v7657_v62 = vrot.slane %v7655_v0, 5  ;;  %v11164_v12 = vcombine.low %v17125_v22, %v17151_v19  ;;  %v11198_v11 = vcombine.low %v16995_v38, %v12715_v51 }
 0x739   : > { %v7663_v25 = vrot.slane %v7661_v1, 5  ;;  %v11180_v57 = vcombine.low %v16980_v52, %v16995_v38  ;;  %vm438_vm2 = vcmask 1040384  }
 0x73a   : > { %v7658_v59 = vor.u32 %v7657_v62, %v7654_v44  ;;  %vm17267_vm6 = vmand %vm438_vm2, %vm328_vm1  ;;  %vm8608_vm1 = vcmask 1043456  }
 0x73b   : > { %7839 = vrot.lane.b32.xlu0 %v11195_v34, %s12731_s14  ;;  %7803 = vrot.lane.b32.xlu1 %v11179_v8, %s12730_s13  ;;  %v12717_v34 = vld [vmem:[#allocation2] sm:$0xf]  ;;  %v12718_v8 = vld [vmem:[#allocation2 + $0x8] sm:$0xf] }
 0x73c   : > { %v7659_v3 = vrot.slane %v7658_v59, 4  ;;  %v11149_v51 = vcombine.low %v12717_v34, %v12718_v8 }
 0x73e   : > { %v7664_v21 = vsel %vm13046_vm12, %v7659_v3, %v7663_v25 }
 0x73f   : > { %7877 = vrot.lane.b32.xlu0 %v11163_v26, %s12730_s13  ;;  %7737 = vrot.lane.b32.xlu1 %v11163_v26, %s12731_s14 }
 0x743   : > { %7841 = vrot.lane.b32.xlu0 %v11196_v35, %s12731_s14  ;;  %7779 = vrot.lane.b32.xlu1 %v17031_v54, %s12729_s12  ;;  %v11200_v54 = vcombine.low %v17155_v17, %v7664_v21 }
 0x747   : > { %7879 = vrot.lane.b32.xlu0 %v11164_v12, %s12730_s13  ;;  %7739 = vrot.lane.b32.xlu1 %v11164_v12, %s12731_s14 }
 0x74b   : > { %7861 = vrot.lane.b32.xlu0 %v11198_v11, %s12729_s12  ;;  %7805 = vrot.lane.b32.xlu1 %v11180_v57, %s12730_s13 }
 0x74f   : > { %7881 = vrot.lane.b32.xlu0 %v11200_v54, %s12730_s13  ;;  %v7794_v50 = vpop.permute.xlu1 %7793 }
 0x754   : > { %v7848_v42 = vpop.permute.xlu0 %7847 }
 0x759   : > { %v7766_v55 = vpop.permute.xlu1 %7765 }
 0x75d   : > { %v7792_v2 = vpop.permute.xlu1 %7791 }
 0x75e   : > { %v7830_v48 = vpop.permute.xlu0 %7829 }
 0x761   : > { %v7768_v4 = vpop.permute.xlu1 %7767 }
 0x762   : > { %v7828_v27 = vpop.permute.xlu0 %7827 }
 0x763   : > { %v7953_v26 = vsel %vm1531_vm13, %v11181_v45, %v7828_v27  ;;  %v7956_v45 = vsel %vm1531_vm13, %v11182_v32, %v7830_v48 }
 0x764   : > { %v7976_v59 = vsel %vm1556_vm14, %v7953_v26, %v7848_v42  ;;  %v12719_v26 = vld [vmem:[#allocation2 + $0x50] sm:$0xf] }
 0x766   : > { %v7850_v47 = vpop.permute.xlu0 %7849 }
 0x767   : > { %v7978_v57 = vsel %vm1556_vm14, %v7956_v45, %v7850_v47 }
 0x76a   : > { %v7854_v38 = vpop.permute.xlu0 %7853 }
 0x76c   : > { %v7726_v52 = vpop.permute.xlu1 %7725 }
 0x76d   : > { %v7889_v0 = vsel %vm1531_vm13, %v11149_v51, %v7726_v52 }
 0x76e   : > { %v7852_v60 = vpop.permute.xlu0 %7851  ;;  %v7912_v62 = vsel %vm1556_vm14, %v7889_v0, %v7766_v55 }
 0x76f   : > { %v7928_v12 = vsel %vm1573_vm15, %v7912_v62, %v7792_v2 }
 0x770   : > { %v7798_v13 = vpop.permute.xlu1 %7797 }
 0x774   : > { %v7770_v15 = vpop.permute.xlu1 %7769 }
 0x779   : > { %v7796_v44 = vpop.permute.xlu1 %7795 }
 0x77d   : > { %v7868_v35 = vpop.permute.xlu0 %7867  ;;  %v7728_v1 = vpop.permute.xlu1 %7727 }
 0x77e   : > { %v7992_v53 = vsel %vm1573_vm15, %v7976_v59, %v7868_v35  ;;  %v7892_v39 = vsel %vm1531_vm13, %v16635_v37, %v7728_v1 }
 0x77f   : > { %8222 = vmatprep.mubr.bf16.mxu1 %v7992_v53  ;;  %v7914_v11 = vsel %vm1556_vm14, %v7892_v39, %v7768_v4 }
 0x780   : > { %8223 = vmatmul.mubr.bf16.vlgmr.msra.gmra.mxu1 %v7928_v12  ;;  %v7931_v55 = vsel %vm1573_vm15, %v7914_v11, %v7794_v50 }
 0x781   : > { %v7834_v3 = vpop.permute.xlu0 %7833  ;;  %v7772_v25 = vpop.permute.xlu1 %7771 }
 0x782   : > { %v7962_v48 = vsel %vm1531_vm13, %v11184_v40, %v7834_v3 }
 0x783   : > { %v7982_v20 = vsel %vm1556_vm14, %v7962_v48, %v7854_v38  ;;  %v11153_v38 = vcombine.low %v12719_v26, %v16908_v9  ;;  %v12474_v26 = vld [vmem:[%s18412_s6 + $0xe0] sm:$0xff]  }
 0x785   : > { %v7832_v5 = vpop.permute.xlu0 %7831 }
 0x786   : > { %v7959_v32 = vsel %vm1531_vm13, %v11183_v10, %v7832_v5 }
 0x787   : > { %v7980_v52 = vsel %vm1556_vm14, %v7959_v32, %v7852_v60 }
 0x789   : > { %v7870_v21 = vpop.permute.xlu0 %7869  ;;  %v7730_v54 = vpop.permute.xlu1 %7729 }
 0x78a   : > { %v7995_v42 = vsel %vm1573_vm15, %v7978_v57, %v7870_v21  ;;  %v7895_v27 = vsel %vm1531_vm13, %v16752_v46, %v7730_v54 }
 0x78b   : > { %8230 = vmatprep.mubr.bf16.mxu1 %v7995_v42  ;;  %v7916_v50 = vsel %vm1556_vm14, %v7895_v27, %v7770_v15 }
 0x78c   : > { %8231 = vmatmul.mubr.bf16.gmra.mxu1 %v7931_v55  ;;  %v7934_v34 = vsel %vm1573_vm15, %v7916_v50, %v7796_v44 }
 0x78d   : > { %v7874_v2 = vpop.permute.xlu0 %7873  ;;  %v7802_v37 = vpop.permute.xlu1 %7801 }
 0x78e   : > { %v8001_v14 = vsel %vm1573_vm15, %v7982_v20, %v7874_v2  ;;  %v492_v20 = vld [vmem:[#allocation3 + $0x14] sm:$0x1] }
 0x791   : > { %v7856_v24 = vpop.permute.xlu0 %7855  ;;  %v7774_v7 = vpop.permute.xlu1 %7773 }
 0x795   : > { %v7872_v4 = vpop.permute.xlu0 %7871  ;;  %v7800_v47 = vpop.permute.xlu1 %7799 }
 0x796   : > { %v7998_v46 = vsel %vm1573_vm15, %v7980_v52, %v7872_v4  ;;  %v12465_v52 = vld [vmem:[%s18412_s6 + $0xb8] sm:$0xff]  }
 0x797   : > { %8238 = vmatprep.mubr.bf16.mxu1 %v7998_v46  ;;  %v12466_v46 = vld [vmem:[%s18412_s6 + $0xf0] sm:$0xff]  }
 0x798   : > { %8239 = vmatmul.mubr.bf16.gmra.mxu1 %v7934_v34  ;;  %v443_v34 = vld [vmem:[#allocation3 + $0x10] sm:$0x1] }
 0x799   : > { %8246 = vmatprep.mubr.bf16.mxu1 %v8001_v14  ;;  %v7838_v61 = vpop.permute.xlu0 %7837  ;;  %v7732_v56 = vpop.permute.xlu1 %7731  ;;  %v444_v14 = vsel %vm17267_vm6, 0, %v443_v34 }
 0x79a   : > { %v7898_v40 = vsel %vm1531_vm13, %v16772_v18, %v7732_v56  ;;  %v7968_v6 = vsel %vm1531_vm13, %v11186_v30, %v7838_v61  ;;  %445 = vst [vmem:[#allocation3 + $0x10] sm:$0x1] %v444_v14  ;;  %v12467_v56 = vld [vmem:[%s18412_s6 + $0x78] sm:$0xff]   ;;  %v467_v14 = vld [vmem:[#allocation3 + $0x60] sm:$0x1] }
 0x79b   : > { %v7918_v10 = vsel %vm1556_vm14, %v7898_v40, %v7772_v25  ;;  %v12468_v40 = vld [vmem:[%s18412_s6 + $0xb0] sm:$0xff]   ;;  %11863 = vmatprep.subr.bf16.mxu0 %v12467_v56  ;;  %v516_v56 = vld [vmem:[#allocation3 + $0x64] sm:$0x1] }
 0x79c   : > { %v7937_v51 = vsel %vm1573_vm15, %v7918_v10, %v7798_v13  ;;  %v12469_v10 = vld [vmem:[%s18412_s6 + $0x38] sm:$0xff]  }
 0x79d   : > { %v7836_v15 = vpop.permute.xlu0 %7835  ;;  %v7776_v8 = vpop.permute.xlu1 %7775  ;;  %11864 = vmatpush3.bf16.msra.mxu0 %v12469_v10  ;;  %v470_v10 = vld [vmem:[#allocation3 + $0x68] sm:$0x1] }
 0x79e   : > { %v7965_v18 = vsel %vm1531_vm13, %v11185_v31, %v7836_v15  ;;  %v12470_v15 = vld [vmem:[%s18412_s6 + $0xe8] sm:$0xff]  }
 0x79f   : > { %v7984_v13 = vsel %vm1556_vm14, %v7965_v18, %v7856_v24  ;;  %v440_v24 = vld [vmem:[#allocation3 + $0x8] sm:$0x1]  ;;  %v12476_v18 = vld [vmem:[%s18412_s6 + $0xa0] sm:$0xff]  }
 0x7a0   : > { %8247 = vmatmul.mubr.bf16.gmra.mxu1 %v7937_v51  ;;  %v441_v17 = vsel %vm17267_vm6, 0, %v440_v24  ;;  %v12472_v51 = vld [vmem:[%s18412_s6 + $0xa8] sm:$0xff]   ;;  %v507_v24 = vld [vmem:[#allocation3 + $0x3c] sm:$0x1] }
 0x7a1   : > { %v7858_v60 = vpop.permute.xlu0 %7857  ;;  %v7734_v0 = vpop.permute.xlu1 %7733  ;;  %442 = vst [vmem:[#allocation3 + $0x8] sm:$0x1] %v441_v17  ;;  %v510_v17 = vld [vmem:[#allocation3 + $0x44] sm:$0x1] }
 0x7a2   : > { %v7901_v44 = vsel %vm1531_vm13, %v11153_v38, %v7734_v0  ;;  %v7986_v31 = vsel %vm1556_vm14, %v7968_v6, %v7858_v60  ;;  %v446_v60 = vld [vmem:[#allocation3 + $0x18] sm:$0x1]  ;;  %v12473_v0 = vld [vmem:[%s18412_s6 + $0x30] sm:$0xff]  }
 0x7a3   : > { %v7920_v59 = vsel %vm1556_vm14, %v7901_v44, %v7774_v7  ;;  %v489_v7 = vld [vmem:[#allocation3 + $0xc] sm:$0x1]  ;;  %v447_v38 = vsel %vm17267_vm6, 0, %v446_v60  ;;  %v495_v44 = vld [vmem:[#allocation3 + $0x1c] sm:$0x1]  ;;  %v12482_v6 = vld [vmem:[%s18412_s6 + $0xd0] sm:$0xff]  }
 0x7a4   : > { %v7940_v9 = vsel %vm1573_vm15, %v7920_v59, %v7800_v47  ;;  %448 = vst [vmem:[#allocation3 + $0x18] sm:$0x1] %v447_v38  ;;  %v12477_v59 = vld [vmem:[%s18412_s6 + $0x28] sm:$0xff]   ;;  %v473_v60 = vld [vmem:[#allocation3 + $0x70] sm:$0x1] }
 0x7a5   : > { %v7860_v62 = vpop.permute.xlu0 %7859  ;;  %v7778_v35 = vpop.permute.xlu1 %7777 }
 0x7a9   : > { %v7876_v53 = vpop.permute.xlu0 %7875  ;;  %v7736_v1 = vpop.permute.xlu1 %7735 }
 0x7aa   : > { %v8004_v12 = vsel %vm1573_vm15, %v7984_v13, %v7876_v53  ;;  %v7904_v3 = vsel %vm1531_vm13, %v17005_v41, %v7736_v1  ;;  %v12478_v53 = vld [vmem:[%s18412_s6 + $0xd8] sm:$0xff]   ;;  %v449_v1 = vld [vmem:[#allocation3 + $0x20] sm:$0x1]  ;;  %v498_v13 = vld [vmem:[#allocation3 + $0x24] sm:$0x1] }
 0x7ab   : > { %8254 = vmatprep.mubr.bf16.mxu1 %v8004_v12  ;;  %v7922_v58 = vsel %vm1556_vm14, %v7904_v3, %v7776_v8  ;;  %v12471_v8 = vld [vmem:[%s18412_s6 + $0x70] sm:$0xff]   ;;  %v450_v12 = vsel %vm17267_vm6, 0, %v449_v1  ;;  %v12479_v3 = vld [vmem:[%s18412_s6 + $0x60] sm:$0xff]  }
 0x7ac   : > { %8255 = vmatmul.mubr.bf16.gmra.mxu1 %v7940_v9  ;;  %v7943_v57 = vsel %vm1573_vm15, %v7922_v58, %v7802_v37  ;;  %11865 = vmatprep.subr.bf16.mxu0 %v12471_v8  ;;  %451 = vst [vmem:[#allocation3 + $0x20] sm:$0x1] %v450_v12  ;;  %v12483_v58 = vld [vmem:[%s18412_s6 + $0x58] sm:$0xff]   ;;  %v471_v8 = vsel %vm17267_vm6, 0, %v470_v10  ;;  %v528_v1 = vld [vmem:[#allocation3 + $0x84] sm:$0x1] }
 0x7ad   : > { %v7840_v25 = vpop.permute.xlu0 %7839  ;;  %v7804_v39 = vpop.permute.xlu1 %7803  ;;  %11866 = vmatpush3.bf16.msra.mxu0 %v12473_v0  ;;  %472 = vst [vmem:[#allocation3 + $0x68] sm:$0x1] %v471_v8  ;;  %v474_v0 = vsel %vm17267_vm6, 0, %v473_v60  ;;  %v482_v12 = vld [vmem:[#allocation3 + $0x88] sm:$0x1] }
 0x7ae   : > { %v7971_v49 = vsel %vm1531_vm13, %v11187_v23, %v7840_v25  ;;  %v12464_v23 = vld [vmem:[%s18412_s6 + $0xf8] sm:$0xff]   ;;  %475 = vst [vmem:[#allocation3 + $0x70] sm:$0x1] %v474_v0  ;;  %v8616_v10 = vld [vmem:[#allocation3 + $0x10] sm:$0xf] }
 0x7af   : > { %v7988_v42 = vsel %vm1556_vm14, %v7971_v49, %v7860_v62  ;;  %11927 = vmatprep.subr.bf16.mxu1 %v12464_v23  ;;  %v12480_v25 = vld [vmem:[%s18412_s6 + $0x98] sm:$0xff]   ;;  %v12488_v49 = vld [vmem:[%s18412_s6 + $0x88] sm:$0xff]  }
 0x7b0   : > { %11928 = vmatpush3.bf16.msra.mxu1 %v12465_v52  ;;  %v513_v52 = vld [vmem:[#allocation3 + $0x5c] sm:$0x1] }
 0x7b1   : > { %v7878_v5 = vpop.permute.xlu0 %7877  ;;  %v7738_v45 = vpop.permute.xlu1 %7737  ;;  %11929 = vmatprep.subr.bf16.mxu1 %v12466_v46 }
 0x7b2   : > { %v8007_v11 = vsel %vm1573_vm15, %v7986_v31, %v7878_v5  ;;  %v7907_v41 = vsel %vm1531_vm13, %v17081_v43, %v7738_v45  ;;  %v12484_v31 = vld [vmem:[%s18412_s6 + $0x90] sm:$0xff]   ;;  %v452_v5 = vld [vmem:[#allocation3 + $0x28] sm:$0x1]  ;;  %v501_v45 = vld [vmem:[#allocation3 + $0x2c] sm:$0x1] }
 0x7b3   : > { %8262 = vmatprep.mubr.bf16.mxu1 %v8007_v11  ;;  %v7924_v29 = vsel %vm1556_vm14, %v7907_v41, %v7778_v35  ;;  %v12475_v35 = vld [vmem:[%s18412_s6 + $0x68] sm:$0xff]   ;;  %v12485_v11 = vld [vmem:[%s18412_s6 + $0x18] sm:$0xff]   ;;  %v453_v41 = vsel %vm17267_vm6, 0, %v452_v5 }
 0x7b4   : > { %8263 = vmatmul.mubr.bf16.gmra.mxu1 %v7943_v57  ;;  %v7946_v37 = vsel %vm1573_vm15, %v7924_v29, %v7804_v39  ;;  %11867 = vmatprep.subr.bf16.mxu0 %v12475_v35  ;;  %v12481_v39 = vld [vmem:[%s18412_s6 + $0x20] sm:$0xff]   ;;  %v12486_v57 = vld [vmem:[%s18412_s6 + $0xc8] sm:$0xff]   ;;  %454 = vst [vmem:[#allocation3 + $0x28] sm:$0x1] %v453_v41  ;;  %v12489_v29 = vld [vmem:[%s18412_s6 + $0x10] sm:$0xff]  }
 0x7b5   : > { %v7842_v21 = vpop.permute.xlu0 %7841  ;;  %v7780_v54 = vpop.permute.xlu1 %7779  ;;  %11930 = vmatpush3.bf16.msra.mxu1 %v12468_v40  ;;  %11868 = vmatpush3.bf16.msra.mxu0 %v12477_v59  ;;  %v479_v59 = vld [vmem:[#allocation3 + $0x80] sm:$0x1]  ;;  %v12513_v5 = vld [vmem:[%s18412_s6 + $0x1f8] sm:$0xff]  }
 0x7b6   : > { %v7974_v22 = vsel %vm1531_vm13, %v11188_v36, %v7842_v21  ;;  %11931 = vmatprep.subr.bf16.mxu1 %v12470_v15  ;;  %11869 = vmatprep.subr.bf16.mxu0 %v12479_v3  ;;  %v519_v15 = vld [vmem:[#allocation3 + $0x6c] sm:$0x1]  ;;  %v483_v3 = vsel %vm17267_vm6, 0, %v482_v12  ;;  %v17445_v41 = vld [vmem:[%s18411_s5] ss:$0 sm:$0xff] }
 0x7b7   : > { %484 = vst [vmem:[#allocation3 + $0x88] sm:$0x1] %v483_v3  ;;  %v17447_v36 = vld [vmem:[#allocation3] sm:$0xf] }
 0x7b9   : > { %v7880_v30 = vpop.permute.xlu0 %7879  ;;  %v7740_v55 = vpop.permute.xlu1 %7739  ;;  %11932 = vmatpush3.bf16.msra.mxu1 %v12472_v51  ;;  %11870 = vmatpush3.bf16.msra.mxu0 %v12481_v39  ;;  %v485_v39 = vld [vmem:[#allocation3 + $0x90] sm:$0x1] }
 0x7ba   : > { %v8010_v2 = vsel %vm1573_vm15, %v7988_v42, %v7880_v30  ;;  %v7910_v27 = vsel %vm1531_vm13, %v17093_v16, %v7740_v55  ;;  %vm17276_vm13 = vmand %vm438_vm2, %vm378_vm3  ;;  %11933 = vmatprep.subr.bf16.mxu1 %v12474_v26  ;;  %11871 = vmatprep.subr.bf16.mxu0 %v12483_v58  ;;  %v12490_v30 = vld [vmem:[%s18412_s6 + $0xc0] sm:$0xff]   ;;  %v455_v42 = vld [vmem:[#allocation3 + $0x30] sm:$0x1]  ;;  %v486_v58 = vsel %vm17267_vm6, 0, %v485_v39 }
 0x7bb   : > { %8270 = vmatprep.mubr.bf16.mxu1 %v8010_v2  ;;  %v7926_v16 = vsel %vm1556_vm14, %v7910_v27, %v7780_v54  ;;  %v490_v47 = vsel %vm17276_vm13, 0, %v489_v7  ;;  %v493_v61 = vsel %vm17276_vm13, 0, %v492_v20  ;;  %v496_v62 = vsel %vm17276_vm13, 0, %v495_v44  ;;  %v12487_v54 = vld [vmem:[%s18412_s6 + $0x50] sm:$0xff]   ;;  %v12492_v27 = vld [vmem:[%s18412_s6 + $0x80] sm:$0xff]   ;;  %v12499_v20 = vld [vmem:[%s18412_s6 + $0x178] sm:$0xff]  }
 0x7bc   : > { %8271 = vmatmul.mubr.bf16.gmra.mxu1 %v7946_v37  ;;  %491 = vst [vmem:[#allocation3 + $0xc] sm:$0x1] %v490_v47  ;;  %494 = vst [vmem:[#allocation3 + $0x14] sm:$0x1] %v493_v61  ;;  %v499_v9 = vsel %vm17276_vm13, 0, %v498_v13  ;;  %v502_v21 = vsel %vm17276_vm13, 0, %v501_v45  ;;  %v12221_v45 = vpop.f32.mrf.mxu0 }
 0x7bd   : > { %v7862_v43 = vpop.permute.xlu0 %7861  ;;  %v7806_v33 = vpop.permute.xlu1 %7805  ;;  %497 = vst [vmem:[#allocation3 + $0x1c] sm:$0x1] %v496_v62  ;;  %11934 = vmatpush3.bf16.msra.mxu1 %v12476_v18  ;;  %500 = vst [vmem:[#allocation3 + $0x24] sm:$0x1] %v499_v9  ;;  %11872 = vmatpush3.bf16.msra.mxu0 %v12485_v11  ;;  %v504_v55 = vld [vmem:[#allocation3 + $0x34] sm:$0x1] }
 0x7be   : > { %v7990_v32 = vsel %vm1556_vm14, %v7974_v22, %v7862_v43  ;;  %v7949_v4 = vsel %vm1573_vm15, %v7926_v16, %v7806_v33  ;;  %11935 = vmatprep.subr.bf16.mxu1 %v12478_v53  ;;  %503 = vst [vmem:[#allocation3 + $0x2c] sm:$0x1] %v502_v21  ;;  %11873 = vmatprep.subr.bf16.mxu0 %v12487_v54  ;;  %v456_v2 = vsel %vm17267_vm6, 0, %v455_v42  ;;  %v505_v37 = vsel %vm17276_vm13, 0, %v504_v55  ;;  %v12491_v43 = vld [vmem:[%s18412_s6 + $0x48] sm:$0xff]   ;;  %vm17454_vm14 = vmand %vm8608_vm1, %vm378_vm3 }
 0x7bf   : > { %457 = vst [vmem:[#allocation3 + $0x30] sm:$0x1] %v456_v2  ;;  %506 = vst [vmem:[#allocation3 + $0x34] sm:$0x1] %v505_v37  ;;  %v12493_v22 = vld [vmem:[%s18412_s6 + $0x8] sm:$0xff]   ;;  %v508_v7 = vsel %vm17276_vm13, 0, %v507_v24 }
 0x7c0   : > { %v458_v33 = vld [vmem:[#allocation3 + $0x38] sm:$0x1]  ;;  %509 = vst [vmem:[#allocation3 + $0x3c] sm:$0x1] %v508_v7  ;;  %v461_v16 = vld [vmem:[#allocation3 + $0x40] sm:$0x1] }
 0x7c1   : > { %v7882_v48 = vpop.permute.xlu0 %7881  ;;  %11936 = vmatpush3.bf16.msra.mxu1 %v12480_v25  ;;  %11874 = vmatpush3.bf16.msra.mxu0 %v12489_v29  ;;  %v459_v23 = vsel %vm17267_vm6, 0, %v458_v33  ;;  %v464_v47 = vld [vmem:[#allocation3 + $0x58] sm:$0x1]  ;;  %v514_v34 = vsel %vm17276_vm13, 0, %v513_v52  ;;  %v468_v61 = vsel %vm17267_vm6, 0, %v467_v14  ;;  %v517_v40 = vsel %vm17276_vm13, 0, %v516_v56 }
 0x7c2   : > { %v8013_v19 = vsel %vm1573_vm15, %v7990_v32, %v7882_v48  ;;  %11937 = vmatprep.subr.bf16.mxu1 %v12482_v6  ;;  %11875 = vmatprep.subr.bf16.mxu0 %v12491_v43  ;;  %460 = vst [vmem:[#allocation3 + $0x38] sm:$0x1] %v459_v23  ;;  %v12495_v32 = vld [vmem:[%s18412_s6 + $0x40] sm:$0xff]   ;;  %v465_v46 = vsel %vm17267_vm6, 0, %v464_v47  ;;  %515 = vst [vmem:[#allocation3 + $0x5c] sm:$0x1] %v514_v34 }
 0x7c3   : > { %8278 = vmatprep.mubr.bf16.mxu1 %v8013_v19  ;;  %v12496_v48 = vld [vmem:[%s18412_s6] sm:$0xff]   ;;  %v462_v19 = vsel %vm17267_vm6, 0, %v461_v16  ;;  %466 = vst [vmem:[#allocation3 + $0x58] sm:$0x1] %v465_v46  ;;  %469 = vst [vmem:[#allocation3 + $0x60] sm:$0x1] %v468_v61 }
 0x7c4   : > { %8279 = vmatmul.mubr.bf16.gmra.mxu1 %v7949_v4  ;;  %463 = vst [vmem:[#allocation3 + $0x40] sm:$0x1] %v462_v19  ;;  %v511_v4 = vsel %vm17276_vm13, 0, %v510_v17  ;;  %518 = vst [vmem:[#allocation3 + $0x64] sm:$0x1] %v517_v40  ;;  %v520_v51 = vsel %vm17276_vm13, 0, %v519_v15 }
 0x7c5   : > { %11938 = vmatpush3.bf16.msra.mxu1 %v12484_v31  ;;  %11876 = vmatpush3.bf16.msra.mxu0 %v12493_v22  ;;  %512 = vst [vmem:[#allocation3 + $0x44] sm:$0x1] %v511_v4  ;;  %521 = vst [vmem:[#allocation3 + $0x6c] sm:$0x1] %v520_v51  ;;  %v522_v26 = vld [vmem:[#allocation3 + $0x74] sm:$0x1] }
 0x7c6   : > { %11939 = vmatprep.subr.bf16.mxu1 %v12486_v57  ;;  %11877 = vmatprep.subr.bf16.mxu0 %v12495_v32  ;;  %v523_v38 = vsel %vm17276_vm13, 0, %v522_v26  ;;  %v476_v44 = vld [vmem:[#allocation3 + $0x78] sm:$0x1]  ;;  %v525_v62 = vld [vmem:[#allocation3 + $0x7c] sm:$0x1]  ;;  %v480_v53 = vsel %vm17267_vm6, 0, %v479_v59  ;;  %v8321_v57 = vpop.f32.mrf.mxu0 }
 0x7c7   : > { %524 = vst [vmem:[#allocation3 + $0x74] sm:$0x1] %v523_v38  ;;  %v477_v35 = vsel %vm17267_vm6, 0, %v476_v44  ;;  %v526_v18 = vsel %vm17276_vm13, 0, %v525_v62  ;;  %481 = vst [vmem:[#allocation3 + $0x80] sm:$0x1] %v480_v53 }
 0x7c8   : > { %478 = vst [vmem:[#allocation3 + $0x78] sm:$0x1] %v477_v35  ;;  %527 = vst [vmem:[#allocation3 + $0x7c] sm:$0x1] %v526_v18  ;;  %v529_v13 = vsel %vm17276_vm13, 0, %v528_v1  ;;  %v8747_v37 = vshrl.u32 %v17447_v36, 16 }
 0x7c9   : > { %11940 = vmatpush3.bf16.msra.mxu1 %v12488_v49  ;;  %11878 = vmatpush3.bf16.msra.mxu0 %v12496_v48  ;;  %530 = vst [vmem:[#allocation3 + $0x84] sm:$0x1] %v529_v13  ;;  %v531_v9 = vld [vmem:[#allocation3 + $0x8c] sm:$0x1]  ;;  %v534_v6 = vld [vmem:[#allocation3 + $0x94] sm:$0x1] }
 0x7ca   : > { %11941 = vmatprep.subr.bf16.mxu1 %v12490_v30  ;;  %11991 = vmatprep.subr.bf16.mxu0 %v12499_v20  ;;  %v532_v25 = vsel %vm17276_vm13, 0, %v531_v9  ;;  %v535_v31 = vsel %vm17276_vm13, 0, %v534_v6  ;;  %487 = vst [vmem:[#allocation3 + $0x90] sm:$0x1] %v486_v58  ;;  %v12222_v30 = vpop.f32.mrf.mxu0  ;;  %v8750_v43 = vshll.u32 %v17447_v36, 16  ;;  %v8749_v7 = vrot.slane %v8747_v37, 4 }
 0x7cb   : > { %533 = vst [vmem:[#allocation3 + $0x8c] sm:$0x1] %v532_v25  ;;  %536 = vst [vmem:[#allocation3 + $0x94] sm:$0x1] %v535_v31  ;;  %v8707_v4 = vld [vmem:[#allocation3 + $0x4] sm:$0x1] }
 0x7cc   : > { %v8324_v33 = vpop.f32.mrf.mxu0  ;;  %v8752_v32 = vrot.slane %v8750_v43, 5  ;;  %v8610_v52 = vld [vmem:[#allocation3 + $0x8] sm:$0xf]  ;;  %v8613_v46 = vld [vmem:[#allocation3 + $0xc] sm:$0x1]  ;;  %v8756_v20 = vshll.u32 %v8707_v4, 16 }
 0x7cd   : > { %11942 = vmatpush3.bf16.msra.mxu1 %v12492_v27  ;;  %v17462_v38 = vld [vmem:[#allocation3 + $0x50] sm:$0xf]  ;;  %v17464_v44 = vld [vmem:[#allocation3 + $0x54] sm:$0x1]  ;;  %v11246_v59 = vrot.slane %v17447_v36, 9  ;;  %v9004_v53 = vrot.slane %v8707_v4, 5 }
 0x7ce   : > { %12055 = vmatprep.subr.bf16.mxu1 %v12513_v5  ;;  %v8753_v40 = vor.u32 %v8752_v32, %v8749_v7  ;;  %v8619_v62 = vld [vmem:[#allocation3 + $0x14] sm:$0x1]  ;;  %v17468_v1 = vrot.slane %v8756_v20, 5  ;;  %v11254_v39 = vrot.slane %v17462_v38, 9  ;;  %v9036_v6 = vrot.slane %v17464_v44, 5 }
 0x7cf   : > { %v8859_v58 = vshrl.u32 %v17462_v38, 16  ;;  %v8868_v37 = vshll.u32 %v17464_v44, 16  ;;  %v8622_v32 = vld [vmem:[#allocation3 + $0x18] sm:$0xf]  ;;  %v8625_v4 = vld [vmem:[#allocation3 + $0x1c] sm:$0x1] }
 0x7d0   : > { %v17470_v3 = vrot.slane %v8753_v40, 4 }
 0x840   : > { %v11805_v11 = vpop.f32.mrf.mxu1 }
 0x842   : > { %v11806_v21 = vpop.f32.mrf.mxu1 }
 0x843   : > { %v11807_v54 = vadd.f32 %v11806_v21, %v11805_v11  ;;  %v17481_v21 = vpop.f32.mrf.mxu0 }
 0x844   : > { %v11808_v49 = vpop.f32.mrf.mxu1 }
 0x845   : > { %v8225_v29 = vadd.f32 %v11807_v54, %v17445_v41 }
 0x846   : > { %v11809_v42 = vpop.f32.mrf.mxu1 }
 0x847   : > { %v8322_v55 = vadd.f32 %v8321_v57, %v8225_v29  ;;  %v11810_v2 = vadd.f32 %v11809_v42, %v11808_v49  ;;  %v8862_v57 = vshll.u32 %v17462_v38, 16  ;;  %v9005_v49 = vsel %vm12936_vm9, %v11246_v59, %v9004_v53  ;;  %v8631_v59 = vld [vmem:[#allocation3 + $0x24] sm:$0x1] }
 0x849   : > { %v11477_v27 = vpack.c.bf16 %v8322_v55, %v8322_v55  ;;  %v8228_v22 = vadd.f32 %v11810_v2, %v17445_v41  ;;  %v8759_v55 = vsel %vm13046_vm12, %v17470_v3, %v17468_v1  ;;  %v17489_v2 = vrot.slane %v8859_v58, 4  ;;  %v12503_v1 = vld [vmem:[%s18412_s6 + $0x170] sm:$0xff]  }
 0x84b   : > { %v8449_v23 = vshrl.u32 %v11477_v27, 16  ;;  %v8325_v24 = vadd.f32 %v8324_v33, %v8228_v22  ;;  %v8452_v19 = vshll.u32 %v11477_v27, 16 }
 0x84c   : > { %v11811_v48 = vpop.f32.mrf.mxu1 }
 0x84d   : > { %v8451_v16 = vrot.slane %v8449_v23, 7  ;;  %v11478_v17 = vpack.c.bf16 %v8325_v24, %v8325_v24  ;;  %v17498_v23 = vrot.slane %v8862_v57, 5  ;;  %v8337_v24 = vpop.f32.mrf.mxu0 }
 0x84e   : > { %v11812_v34 = vpop.f32.mrf.mxu1 }
 0x84f   : > { %v8454_v14 = vor.u32 %v8452_v19, %v8451_v16  ;;  %v8455_v61 = vrot.slane %v8451_v16, 4  ;;  %v8457_v56 = vshrl.u32 %v11478_v17, 16  ;;  %v11813_v15 = vadd.f32 %v11812_v34, %v11811_v48 }
 0x850   : > { %v11814_v8 = vpop.f32.mrf.mxu1  ;;  %v8460_v26 = vshll.u32 %v11478_v17, 16 }
 0x851   : > { %v8611_v51 = vsel %vm17454_vm14, %v8454_v14, %v8610_v52  ;;  %v8614_v60 = vsel %vm17267_vm6, %v8455_v61, %v8613_v46  ;;  %v8459_v0 = vrot.slane %v8457_v56, 7  ;;  %v8233_v35 = vadd.f32 %v11813_v15, %v17445_v41 }
 0x852   : > { %8612 = vst [vmem:[#allocation3 + $0x8] sm:$0xf] %v8611_v51  ;;  %8615 = vst [vmem:[#allocation3 + $0xc] sm:$0x1] %v8614_v60  ;;  %v11815_v18 = vpop.f32.mrf.mxu1 }
 0x853   : > { %v8462_v13 = vor.u32 %v8460_v26, %v8459_v0  ;;  %v8463_v12 = vrot.slane %v8459_v0, 4  ;;  %v11816_v9 = vadd.f32 %v11815_v18, %v11814_v8  ;;  %v8330_v25 = vadd.f32 %v12221_v45, %v8233_v35  ;;  %v17511_v26 = vpop.f32.mrf.mxu0  ;;  %v8628_v18 = vld [vmem:[#allocation3 + $0x20] sm:$0xf] }
 0x855   : > { %v8617_v31 = vsel %vm17454_vm14, %v8462_v13, %v8616_v10  ;;  %v8620_v5 = vsel %vm17267_vm6, %v8463_v12, %v8619_v62  ;;  %v8236_v11 = vadd.f32 %v11816_v9, %v17445_v41  ;;  %v11479_v45 = vpack.c.bf16 %v8330_v25, %v8330_v25  ;;  %v12514_v9 = vld [vmem:[%s18412_s6 + $0x1b8] sm:$0xff]  }
 0x856   : > { %8618 = vst [vmem:[#allocation3 + $0x10] sm:$0xf] %v8617_v31  ;;  %8621 = vst [vmem:[#allocation3 + $0x14] sm:$0x1] %v8620_v5  ;;  %v12516_v5 = vld [vmem:[%s18412_s6 + $0x1f0] sm:$0xff]  }
 0x857   : > { %v8333_v54 = vadd.f32 %v12222_v30, %v8236_v11  ;;  %v8465_v29 = vshrl.u32 %v11479_v45, 16  ;;  %v8468_v43 = vshll.u32 %v11479_v45, 16  ;;  %v17496_v30 = vsel %vm12936_vm9, %v11254_v39, %v9036_v6 }
 0x858   : > { %v11817_v42 = vpop.f32.mrf.mxu1 }
 0x859   : > { %v11480_v27 = vpack.c.bf16 %v8333_v54, %v8333_v54  ;;  %v17492_v22 = vld [vmem:[#allocation3 + $0x8] sm:$0xf]  ;;  %v8709_v33 = vld [vmem:[#allocation3 + $0xc] sm:$0x1]  ;;  %v8467_v7 = vrot.slane %v8465_v29, 7 }
 0x85a   : > { %v11818_v48 = vpop.f32.mrf.mxu1  ;;  %v11247_v16 = vrot.slane %v17492_v22, 9  ;;  %v9008_v19 = vrot.slane %v8709_v33, 5  ;;  %v8761_v17 = vshrl.u32 %v17492_v22, 16  ;;  %v8764_v20 = vshll.u32 %v17492_v22, 16 }
 0x85b   : > { %v8473_v52 = vshrl.u32 %v11480_v27, 16  ;;  %v8476_v46 = vshll.u32 %v11480_v27, 16  ;;  %v11819_v34 = vadd.f32 %v11818_v48, %v11817_v42  ;;  %v8470_v14 = vor.u32 %v8468_v43, %v8467_v7 }
 0x85c   : > { %v8471_v61 = vrot.slane %v8467_v7, 4  ;;  %v11820_v56 = vpop.f32.mrf.mxu1  ;;  %v17505_v40 = vsel %vm12936_vm9, %v11247_v16, %v9008_v19  ;;  %v8763_v10 = vrot.slane %v8761_v17, 4  ;;  %v8766_v0 = vrot.slane %v8764_v20, 5  ;;  %v12519_v19 = vld [vmem:[%s18412_s6 + $0x1b0] sm:$0xff]  }
 0x85d   : > { %v8475_v15 = vrot.slane %v8473_v52, 7  ;;  %v8241_v8 = vadd.f32 %v11819_v34, %v17445_v41  ;;  %v17508_v51 = vld [vmem:[#allocation3 + $0x10] sm:$0xf]  ;;  %v11282_v60 = vcombine.low %v9005_v49, %v17505_v40  ;;  %v8623_v62 = vsel %vm17454_vm14, %v8470_v14, %v8622_v32  ;;  %v17522_v31 = vld [vmem:[#allocation3 + $0x14] sm:$0x1]  ;;  %v12521_v34 = vld [vmem:[%s18412_s6 + $0x1e8] sm:$0xff]  }
 0x85e   : > { %v8626_v35 = vsel %vm17267_vm6, %v8471_v61, %v8625_v4  ;;  %v11821_v53 = vpop.f32.mrf.mxu1  ;;  %v11290_v13 = vcombine.low %v17492_v22, %v17508_v51  ;;  %v8770_v12 = vshll.u32 %v8709_v33, 16  ;;  %8624 = vst [vmem:[#allocation3 + $0x18] sm:$0xf] %v8623_v62  ;;  %v8767_v57 = vor.u32 %v8766_v0, %v8763_v10  ;;  %v8340_v33 = vpop.f32.mrf.mxu0 }
 0x85f   : > { %8627 = vst [vmem:[#allocation3 + $0x1c] sm:$0x1] %v8626_v35  ;;  %v8478_v25 = vor.u32 %v8476_v46, %v8475_v15  ;;  %v8479_v39 = vrot.slane %v8475_v15, 4  ;;  %v8338_v6 = vadd.f32 %v8337_v24, %v8241_v8  ;;  %v11822_v58 = vadd.f32 %v11821_v53, %v11820_v56  ;;  %v8634_v8 = vld [vmem:[#allocation3 + $0x28] sm:$0xf] }
 0x860   : > { %v11823_v11 = vpop.f32.mrf.mxu1  ;;  %10026 = vmatprep.mubr.bf16.mxu1 %v11290_v13  ;;  %v8772_v45 = vrot.slane %v8770_v12, 5  ;;  %v11248_v54 = vrot.slane %v17508_v51, 9  ;;  %v8865_v49 = vor.u32 %v17498_v23, %v17489_v2  ;;  %v8768_v7 = vrot.slane %v8767_v57, 4  ;;  %v12524_v57 = vld [vmem:[%s18412_s6 + $0x1e0] sm:$0xff]  }
 0x861   : > { %v8629_v29 = vsel %vm17454_vm14, %v8478_v25, %v8628_v18  ;;  %v8632_v42 = vsel %vm17267_vm6, %v8479_v39, %v8631_v59  ;;  %v11481_v43 = vpack.c.bf16 %v8338_v6, %v8338_v6  ;;  %v8244_v27 = vadd.f32 %v11822_v58, %v17445_v41  ;;  %10027 = vmatmul.mubr.bf16.vlgmr.msra.gmra.mxu1 %v11282_v60  ;;  %v8637_v60 = vld [vmem:[#allocation3 + $0x2c] sm:$0x1]  ;;  %v12501_v18 = vld [vmem:[%s18412_s6 + $0x138] sm:$0xff]  }
 0x862   : > { %8630 = vst [vmem:[#allocation3 + $0x20] sm:$0xf] %v8629_v29  ;;  %8633 = vst [vmem:[#allocation3 + $0x24] sm:$0x1] %v8632_v42  ;;  %v11824_v24 = vpop.f32.mrf.mxu1  ;;  %v9012_v32 = vrot.slane %v17522_v31, 5  ;;  %v8775_v48 = vshrl.u32 %v17508_v51, 16  ;;  %12056 = vmatpush3.bf16.msra.mxu1 %v12514_v9  ;;  %v17546_v14 = vsel %vm13046_vm12, %v8768_v7, %v8772_v45  ;;  %v11266_v53 = vcombine.low %v17447_v36, %v17492_v22 }
 0x863   : > { %v8778_v16 = vshll.u32 %v17508_v51, 16  ;;  %v8481_v17 = vshrl.u32 %v11481_v43, 16  ;;  %v8484_v4 = vshll.u32 %v11481_v43, 16  ;;  %v8341_v52 = vadd.f32 %v8340_v33, %v8244_v27  ;;  %12057 = vmatprep.subr.bf16.mxu1 %v12516_v5  ;;  %v12522_v36 = vld [vmem:[%s18412_s6 + $0x1a8] sm:$0xff]   ;;  %v12504_v43 = vld [vmem:[%s18412_s6 + $0x130] sm:$0xff]   ;;  %v17592_v27 = vpop.f32.mrf.mxu0 }
 0x864   : > { %v11825_v46 = vadd.f32 %v11824_v24, %v11823_v11  ;;  %v11826_v20 = vpop.f32.mrf.mxu1  ;;  %v17550_v61 = vsel %vm12936_vm9, %v11248_v54, %v9012_v32  ;;  %v8777_v56 = vrot.slane %v8775_v48, 4  ;;  %v11274_v35 = vcombine.low %v8759_v55, %v17546_v14  ;;  %v8640_v33 = vld [vmem:[#allocation3 + $0x30] sm:$0xf]  ;;  %v8643_v24 = vld [vmem:[#allocation3 + $0x34] sm:$0x1] }
 0x865   : > { %v8780_v10 = vrot.slane %v8778_v16, 5  ;;  %v8483_v15 = vrot.slane %v8481_v17, 7  ;;  %v11482_v0 = vpack.c.bf16 %v8341_v52, %v8341_v52  ;;  %v17564_v13 = vld [vmem:[#allocation3 + $0x18] sm:$0xf]  ;;  %v8784_v25 = vshll.u32 %v17522_v31, 16 }
 0x866   : > { %v8249_v62 = vadd.f32 %v11825_v46, %v17445_v41  ;;  %v11827_v59 = vpop.f32.mrf.mxu1  ;;  %v17566_v12 = vld [vmem:[#allocation3 + $0x1c] sm:$0x1]  ;;  %12058 = vmatpush3.bf16.msra.mxu1 %v12519_v19  ;;  %9929 = vmatprep.mubr.bf16.mxu0 %v11274_v35  ;;  %v11249_v5 = vrot.slane %v17564_v13, 9  ;;  %v12507_v19 = vld [vmem:[%s18412_s6 + $0x168] sm:$0xff]   ;;  %v8792_v35 = vshll.u32 %v17564_v13, 16 }
 0x867   : > { %v8781_v9 = vor.u32 %v8780_v10, %v8777_v56  ;;  %v8486_v55 = vor.u32 %v8484_v4, %v8483_v15  ;;  %v8487_v39 = vrot.slane %v8483_v15, 4  ;;  %v8489_v6 = vshrl.u32 %v11482_v0, 16  ;;  %12059 = vmatprep.subr.bf16.mxu1 %v12521_v34  ;;  %9930 = vmatmul.mubr.bf16.vlgmr.msra.gmra.mxu0 %v11266_v53  ;;  %v12527_v34 = vld [vmem:[%s18412_s6 + $0x1a0] sm:$0xff]  }
 0x868   : > { %v8492_v58 = vshll.u32 %v11482_v0, 16  ;;  %v8346_v22 = vadd.f32 %v17481_v21, %v8249_v62  ;;  %v11828_v31 = vadd.f32 %v11827_v59, %v11826_v20  ;;  %v9016_v11 = vrot.slane %v17566_v12, 5  ;;  %11992 = vmatpush3.bf16.msra.mxu0 %v12501_v18  ;;  %v12508_v18 = vld [vmem:[%s18412_s6 + $0x128] sm:$0xff]   ;;  %v8353_v59 = vpop.f32.mrf.mxu0 }
 0x869   : > { %v8635_v45 = vsel %vm17454_vm14, %v8486_v55, %v8634_v8  ;;  %v8638_v54 = vsel %vm17267_vm6, %v8487_v39, %v8637_v60  ;;  %v8491_v29 = vrot.slane %v8489_v6, 7  ;;  %v17587_v42 = vld [vmem:[#allocation3 + $0x20] sm:$0xf]  ;;  %v8782_v21 = vrot.slane %v8781_v9, 4  ;;  %11993 = vmatprep.subr.bf16.mxu0 %v12503_v1  ;;  %v12529_v60 = vld [vmem:[%s18412_s6 + $0x1d8] sm:$0xff]  }
 0x86a   : > { %8636 = vst [vmem:[#allocation3 + $0x28] sm:$0xf] %v8635_v45  ;;  %8639 = vst [vmem:[#allocation3 + $0x2c] sm:$0x1] %v8638_v54  ;;  %v11483_v7 = vpack.c.bf16 %v8346_v22, %v8346_v22  ;;  %v8252_v32 = vadd.f32 %v11828_v31, %v17445_v41  ;;  %v11291_v48 = vcombine.low %v17564_v13, %v17587_v42  ;;  %v8786_v46 = vrot.slane %v8784_v25, 5  ;;  %v12510_v6 = vld [vmem:[%s18412_s6 + $0x160] sm:$0xff]  }
 0x86b   : > { %v17599_v16 = vsel %vm12936_vm9, %v11249_v5, %v9016_v11  ;;  %v8494_v17 = vor.u32 %v8492_v58, %v8491_v29  ;;  %v8495_v4 = vrot.slane %v8491_v29, 4  ;;  %12060 = vmatpush3.bf16.msra.mxu1 %v12522_v36  ;;  %v8789_v8 = vshrl.u32 %v17564_v13, 16  ;;  %v8646_v9 = vld [vmem:[#allocation3 + $0x38] sm:$0xf]  ;;  %v8649_v58 = vld [vmem:[#allocation3 + $0x3c] sm:$0x1] }
 0x86c   : > { %v17606_v52 = vcombine.low %v17550_v61, %v17599_v16  ;;  %v8497_v20 = vshrl.u32 %v11483_v7, 16  ;;  %v8500_v56 = vshll.u32 %v11483_v7, 16  ;;  %v8349_v10 = vadd.f32 %v17511_v26, %v8252_v32  ;;  %v11829_v15 = vpop.f32.mrf.mxu1  ;;  %10034 = vmatprep.mubr.bf16.mxu1 %v11291_v48  ;;  %12061 = vmatprep.subr.bf16.mxu1 %v12524_v57  ;;  %v17639_v11 = vld [vmem:[#allocation3 + $0x24] sm:$0x1] }
 0x86d   : > { %v8641_v0 = vsel %vm17454_vm14, %v8494_v17, %v8640_v33  ;;  %v8644_v62 = vsel %vm17267_vm6, %v8495_v4, %v8643_v24  ;;  %v17623_v26 = vsel %vm13046_vm12, %v8782_v21, %v8786_v46  ;;  %11994 = vmatpush3.bf16.msra.mxu0 %v12504_v43  ;;  %v8791_v55 = vrot.slane %v8789_v8, 4  ;;  %v12511_v43 = vld [vmem:[%s18412_s6 + $0x120] sm:$0xff]  }
 0x86e   : > { %18527 = vst [vmem:[#allocation26_spill] sm:$0xff] %v17606_v52  ;;  %10035 = vmatmul.mubr.bf16.gmra.mxu1 %v17606_v52  ;;  %8642 = vst [vmem:[#allocation3 + $0x30] sm:$0xf] %v8641_v0  ;;  %v8499_v53 = vrot.slane %v8497_v20, 7  ;;  %v11484_v25 = vpack.c.bf16 %v8349_v10, %v8349_v10  ;;  %v11830_v1 = vpop.f32.mrf.mxu1  ;;  %v8798_v39 = vshll.u32 %v17566_v12, 16  ;;  %11995 = vmatprep.subr.bf16.mxu0 %v12507_v19  ;;  %v8794_v22 = vrot.slane %v8792_v35, 5  ;;  %v17656_v19 = vpop.f32.mrf.mxu0 }
 0x86f   : > { %8645 = vst [vmem:[#allocation3 + $0x34] sm:$0x1] %v8644_v62  ;;  %v11831_v36 = vadd.f32 %v11830_v1, %v11829_v15  ;;  %v17637_v5 = vcombine.low %v17508_v51, %v17564_v13  ;;  %12062 = vmatpush3.bf16.msra.mxu1 %v12527_v34  ;;  %v12530_v12 = vld [vmem:[%s18412_s6 + $0x198] sm:$0xff]   ;;  %v12532_v51 = vld [vmem:[%s18412_s6 + $0x1d0] sm:$0xff]   ;;  %v11250_v48 = vrot.slane %v17587_v42, 9 }
 0x870   : > { %v8502_v57 = vor.u32 %v8500_v56, %v8499_v53  ;;  %v8503_v45 = vrot.slane %v8499_v53, 4  ;;  %v8505_v54 = vshrl.u32 %v11484_v25, 16  ;;  %v8508_v29 = vshll.u32 %v11484_v25, 16  ;;  %v11832_v21 = vpop.f32.mrf.mxu1  ;;  %12063 = vmatprep.subr.bf16.mxu1 %v12529_v60  ;;  %v8652_v34 = vld [vmem:[#allocation3 + $0x40] sm:$0xf]  ;;  %v12515_v10 = vld [vmem:[%s18412_s6 + $0x158] sm:$0xff]  }
 0x871   : > { %v8257_v13 = vadd.f32 %v11831_v36, %v17445_v41  ;;  %v8795_v33 = vor.u32 %v8794_v22, %v8791_v55  ;;  %v8800_v24 = vrot.slane %v8798_v39, 5  ;;  %v17651_v7 = vld [vmem:[#allocation3 + $0x28] sm:$0xf]  ;;  %v17653_v32 = vld [vmem:[#allocation3 + $0x2c] sm:$0x1]  ;;  %11996 = vmatpush3.bf16.msra.mxu0 %v12508_v18  ;;  %v9020_v56 = vrot.slane %v17639_v11, 5  ;;  %v8356_v22 = vpop.f32.mrf.mxu0 }
 0x872   : > { %v8647_v17 = vsel %vm17454_vm14, %v8502_v57, %v8646_v9  ;;  %v8650_v4 = vsel %vm17267_vm6, %v8503_v45, %v8649_v58  ;;  %v8507_v46 = vrot.slane %v8505_v54, 7  ;;  %v11833_v20 = vpop.f32.mrf.mxu1  ;;  %11997 = vmatprep.subr.bf16.mxu0 %v12510_v6  ;;  %v8655_v15 = vld [vmem:[#allocation3 + $0x44] sm:$0x1]  ;;  %v11251_v62 = vrot.slane %v17651_v7, 9  ;;  %v12535_v35 = vld [vmem:[%s18412_s6 + $0x190] sm:$0xff]   ;;  %v12537_v36 = vld [vmem:[%s18412_s6 + $0x1c8] sm:$0xff]  }
 0x873   : > { %8648 = vst [vmem:[#allocation3 + $0x38] sm:$0xf] %v8647_v17  ;;  %8651 = vst [vmem:[#allocation3 + $0x3c] sm:$0x1] %v8650_v4  ;;  %v8354_v8 = vadd.f32 %v8353_v59, %v8257_v13  ;;  %v8796_v60 = vrot.slane %v8795_v33, 4  ;;  %v11834_v0 = vadd.f32 %v11833_v20, %v11832_v21  ;;  %12064 = vmatpush3.bf16.msra.mxu1 %v12530_v12  ;;  %v9024_v1 = vrot.slane %v17653_v32, 5 }
 0x874   : > { %v8510_v18 = vor.u32 %v8508_v29, %v8507_v46  ;;  %v8511_v53 = vrot.slane %v8507_v46, 4  ;;  %v11835_v9 = vpop.f32.mrf.mxu1  ;;  %v17672_v25 = vsel %vm12936_vm9, %v11250_v48, %v9020_v56  ;;  %12065 = vmatprep.subr.bf16.mxu1 %v12532_v51  ;;  %v8803_v58 = vshrl.u32 %v17587_v42, 16  ;;  %v12518_v21 = vld [vmem:[%s18412_s6 + $0x118] sm:$0xff]   ;;  %v12538_v20 = vld [vmem:[%s18412_s6 + $0x188] sm:$0xff]  }
 0x875   : > { %v11485_v59 = vpack.c.bf16 %v8354_v8, %v8354_v8  ;;  %v17677_v55 = vsel %vm13046_vm12, %v8796_v60, %v8800_v24  ;;  %v8260_v39 = vadd.f32 %v11834_v0, %v17445_v41  ;;  %v17680_v6 = vld [vmem:[#allocation3 + $0x30] sm:$0xf]  ;;  %11998 = vmatpush3.bf16.msra.mxu0 %v12511_v43  ;;  %v17705_v17 = vsel %vm12936_vm9, %v11251_v62, %v9024_v1 }
 0x876   : > { %v8653_v12 = vsel %vm17454_vm14, %v8510_v18, %v8652_v34  ;;  %v8656_v57 = vsel %vm17267_vm6, %v8511_v53, %v8655_v15  ;;  %v17692_v45 = vcombine.low %v17623_v26, %v17677_v55  ;;  %v11836_v54 = vpop.f32.mrf.mxu1  ;;  %v11292_v29 = vcombine.low %v17651_v7, %v17680_v6  ;;  %11999 = vmatprep.subr.bf16.mxu0 %v12515_v10  ;;  %v12523_v24 = vld [vmem:[%s18412_s6 + $0x150] sm:$0xff]   ;;  %v8658_v10 = vld [vmem:[#allocation3 + $0x58] sm:$0xf]  ;;  %v8661_v15 = vld [vmem:[#allocation3 + $0x5c] sm:$0x1] }
 0x877   : > { %8654 = vst [vmem:[#allocation3 + $0x40] sm:$0xf] %v8653_v12  ;;  %8657 = vst [vmem:[#allocation3 + $0x44] sm:$0x1] %v8656_v57  ;;  %v8513_v43 = vshrl.u32 %v11485_v59, 16  ;;  %v8516_v51 = vshll.u32 %v11485_v59, 16  ;;  %v8357_v13 = vadd.f32 %v8356_v22, %v8260_v39  ;;  %v11837_v33 = vadd.f32 %v11836_v54, %v11835_v9  ;;  %12066 = vmatpush3.bf16.msra.mxu1 %v12535_v35 }
 0x878   : > { %9937 = vmatprep.mubr.bf16.mxu0 %v17692_v45  ;;  %v11838_v48 = vpop.f32.mrf.mxu1  ;;  %10042 = vmatprep.mubr.bf16.mxu1 %v11292_v29  ;;  %v8805_v4 = vrot.slane %v8803_v58, 4  ;;  %v8806_v46 = vshll.u32 %v17587_v42, 16  ;;  %v8812_v34 = vshll.u32 %v17639_v11, 16  ;;  %v17716_v0 = vcombine.low %v17672_v25, %v17705_v17  ;;  %v12540_v11 = vld [vmem:[%s18412_s6 + $0x1c0] sm:$0xff]   ;;  %v12526_v1 = vld [vmem:[%s18412_s6 + $0x110] sm:$0xff]   ;;  %v12531_v22 = vld [vmem:[%s18412_s6 + $0x148] sm:$0xff]  }
 0x879   : > { %v8515_v56 = vrot.slane %v8513_v43, 7  ;;  %v11486_v8 = vpack.c.bf16 %v8357_v13, %v8357_v13  ;;  %9938 = vmatmul.mubr.bf16.gmra.mxu0 %v17637_v5  ;;  %v8265_v60 = vadd.f32 %v11837_v33, %v17445_v41  ;;  %12067 = vmatprep.subr.bf16.mxu1 %v12537_v36  ;;  %v8817_v53 = vshrl.u32 %v17651_v7, 16  ;;  %v12543_v43 = vld [vmem:[%s18412_s6 + $0x180] sm:$0xff]  }
 0x87a   : > { %18528 = vst [vmem:[#allocation24_spill] sm:$0xff] %v17716_v0  ;;  %v11839_v62 = vpop.f32.mrf.mxu1  ;;  %v8808_v35 = vrot.slane %v8806_v46, 5  ;;  %v8814_v18 = vrot.slane %v8812_v34, 5  ;;  %v8820_v9 = vshll.u32 %v17651_v7, 16  ;;  %12000 = vmatpush3.bf16.msra.mxu0 %v12518_v21  ;;  %10043 = vmatmul.mubr.bf16.gmra.mxu1 %v17716_v0 }
 0x87b   : > { %v8518_v59 = vor.u32 %v8516_v51, %v8515_v56  ;;  %v8519_v39 = vrot.slane %v8515_v56, 4  ;;  %v8521_v58 = vshrl.u32 %v11486_v8, 16  ;;  %v8524_v36 = vshll.u32 %v11486_v8, 16  ;;  %12001 = vmatprep.subr.bf16.mxu0 %v12523_v24  ;;  %12068 = vmatpush3.bf16.msra.mxu1 %v12538_v20  ;;  %v8664_v24 = vld [vmem:[#allocation3 + $0x60] sm:$0xf] }
 0x87c   : > { %v8362_v12 = vadd.f32 %v17592_v27, %v8265_v60  ;;  %v11840_v57 = vadd.f32 %v11839_v62, %v11838_v48  ;;  %v11841_v54 = vpop.f32.mrf.mxu1  ;;  %v8809_v29 = vor.u32 %v8808_v35, %v8805_v4  ;;  %v8819_v21 = vrot.slane %v8817_v53, 4  ;;  %12069 = vmatprep.subr.bf16.mxu1 %v12540_v11  ;;  %v17738_v27 = vpop.f32.mrf.mxu0  ;;  %v8667_v48 = vld [vmem:[#allocation3 + $0x64] sm:$0x1] }
 0x87d   : > { %v8659_v51 = vsel %vm17454_vm14, %v8518_v59, %v8658_v10  ;;  %v8662_v13 = vsel %vm17267_vm6, %v8519_v39, %v8661_v15  ;;  %v8523_v33 = vrot.slane %v8521_v58, 7  ;;  %v8822_v46 = vrot.slane %v8820_v9, 5  ;;  %v12534_v10 = vld [vmem:[%s18412_s6 + $0x108] sm:$0xff]   ;;  %v12539_v35 = vld [vmem:[%s18412_s6 + $0x140] sm:$0xff]  }
 0x87e   : > { %8660 = vst [vmem:[#allocation3 + $0x58] sm:$0xf] %v8659_v51  ;;  %8663 = vst [vmem:[#allocation3 + $0x5c] sm:$0x1] %v8662_v13  ;;  %v11487_v4 = vpack.c.bf16 %v8362_v12, %v8362_v12  ;;  %v8268_v34 = vadd.f32 %v11840_v57, %v17445_v41  ;;  %v8810_v20 = vrot.slane %v8809_v29, 4  ;;  %v8826_v56 = vshll.u32 %v17653_v32, 16  ;;  %v11842_v8 = vpop.f32.mrf.mxu1  ;;  %12002 = vmatpush3.bf16.msra.mxu0 %v12526_v1 }
 0x87f   : > { %v8526_v15 = vor.u32 %v8524_v36, %v8523_v33  ;;  %v8527_v60 = vrot.slane %v8523_v33, 4  ;;  %v8823_v11 = vor.u32 %v8822_v46, %v8819_v21  ;;  %v11843_v62 = vadd.f32 %v11842_v8, %v11841_v54  ;;  %12003 = vmatprep.subr.bf16.mxu0 %v12531_v22  ;;  %v17753_v39 = vld [vmem:[#allocation3 + $0x40] sm:$0xf]  ;;  %12070 = vmatpush3.bf16.msra.mxu1 %v12543_v43  ;;  %v8670_v22 = vld [vmem:[#allocation3 + $0x68] sm:$0xf]  ;;  %v8369_v54 = vpop.f32.mrf.mxu0 }
 0x880   : > { %v8529_v53 = vshrl.u32 %v11487_v4, 16  ;;  %v8532_v9 = vshll.u32 %v11487_v4, 16  ;;  %v8365_v59 = vadd.f32 %v17656_v19, %v8268_v34  ;;  %v17751_v32 = vsel %vm13046_vm12, %v8810_v20, %v8814_v18  ;;  %v11844_v1 = vpop.f32.mrf.mxu1  ;;  %v17762_v43 = vld [vmem:[#allocation3 + $0x38] sm:$0xf]  ;;  %v17764_v51 = vld [vmem:[#allocation3 + $0x34] sm:$0x1] }
 0x881   : > { %v8665_v58 = vsel %vm17454_vm14, %v8526_v15, %v8664_v24  ;;  %v8668_v36 = vsel %vm17267_vm6, %v8527_v60, %v8667_v48  ;;  %v8824_v12 = vrot.slane %v8823_v11, 4  ;;  %v8828_v57 = vrot.slane %v8826_v56, 5  ;;  %v12542_v33 = vld [vmem:[%s18412_s6 + $0x100] sm:$0xff]   ;;  %v8673_v24 = vld [vmem:[#allocation3 + $0x6c] sm:$0x1]  ;;  %v17785_v56 = vld [vmem:[%s18412_s6 + $0x238] sm:$0xff]  }
 0x882   : > { %8666 = vst [vmem:[#allocation3 + $0x60] sm:$0xf] %v8665_v58  ;;  %8669 = vst [vmem:[#allocation3 + $0x64] sm:$0x1] %v8668_v36  ;;  %v8531_v19 = vrot.slane %v8529_v53, 7  ;;  %v11488_v29 = vpack.c.bf16 %v8365_v59, %v8365_v59  ;;  %v8273_v21 = vadd.f32 %v11843_v62, %v17445_v41  ;;  %v11845_v13 = vpop.f32.mrf.mxu1  ;;  %12004 = vmatpush3.bf16.msra.mxu0 %v12534_v10  ;;  %v11252_v20 = vrot.slane %v17680_v6, 9  ;;  %v17793_v53 = vpop.f32.mrf.mxu0 }
 0x883   : > { %v17771_v46 = vsel %vm13046_vm12, %v8824_v12, %v8828_v57  ;;  %v17775_v48 = vcombine.low %v17587_v42, %v17651_v7  ;;  %v11293_v4 = vcombine.low %v17762_v43, %v17753_v39  ;;  %v17779_v34 = vld [vmem:[#allocation3 + $0x3c] sm:$0x1]  ;;  %12005 = vmatprep.subr.bf16.mxu0 %v12539_v35  ;;  %v9028_v62 = vrot.slane %v17764_v51, 5  ;;  %v8676_v57 = vld [vmem:[#allocation3 + $0x70] sm:$0xf] }
 0x884   : > { %v8534_v8 = vor.u32 %v8532_v9, %v8531_v19  ;;  %v8535_v10 = vrot.slane %v8531_v19, 4  ;;  %v8537_v15 = vshrl.u32 %v11488_v29, 16  ;;  %v8540_v60 = vshll.u32 %v11488_v29, 16  ;;  %v11847_v11 = vpop.f32.mrf.mxu1  ;;  %v8685_v18 = vld [vmem:[#allocation3 + $0x7c] sm:$0x1] }
 0x885   : > { %v17789_v42 = vcombine.low %v17751_v32, %v17771_v46  ;;  %v8370_v7 = vadd.f32 %v8369_v54, %v8273_v21  ;;  %10050 = vmatprep.mubr.bf16.mxu1 %v11293_v4  ;;  %v11253_v35 = vrot.slane %v17762_v43, 9  ;;  %v9032_v36 = vrot.slane %v17779_v34, 5  ;;  %v8679_v54 = vld [vmem:[#allocation3 + $0x74] sm:$0x1] }
 0x886   : > { %v8671_v59 = vsel %vm17454_vm14, %v8534_v8, %v8670_v22  ;;  %v8674_v9 = vsel %vm17267_vm6, %v8535_v10, %v8673_v24  ;;  %v8539_v58 = vrot.slane %v8537_v15, 7  ;;  %v11848_v12 = vpop.f32.mrf.mxu1  ;;  %12006 = vmatpush3.bf16.msra.mxu0 %v12542_v33  ;;  %v17803_v29 = vsel %vm12936_vm9, %v11252_v20, %v9028_v62 }
 0x887   : > { %8672 = vst [vmem:[#allocation3 + $0x68] sm:$0xf] %v8671_v59  ;;  %8675 = vst [vmem:[#allocation3 + $0x6c] sm:$0x1] %v8674_v9  ;;  %9945 = vmatprep.mubr.bf16.mxu0 %v17789_v42  ;;  %v11489_v19 = vpack.c.bf16 %v8370_v7, %v8370_v7  ;;  %v11846_v22 = vadd.f32 %v11845_v13, %v11844_v1  ;;  %v8831_v21 = vshrl.u32 %v17680_v6, 16  ;;  %12235 = vmatprep.subr.bf16.mxu0 %v17785_v56  ;;  %v8372_v13 = vpop.f32.mrf.mxu0 }
 0x888   : > { %v8542_v24 = vor.u32 %v8540_v60, %v8539_v58  ;;  %v8543_v4 = vrot.slane %v8539_v58, 4  ;;  %9946 = vmatmul.mubr.bf16.gmra.mxu0 %v17775_v48  ;;  %v17810_v33 = vsel %vm12936_vm9, %v11253_v35, %v9032_v36  ;;  %v8834_v8 = vshll.u32 %v17680_v6, 16  ;;  %v11850_v59 = vpop.f32.mrf.mxu1 }
 0x889   : > { %v8545_v10 = vshrl.u32 %v11489_v19, 16  ;;  %v8548_v15 = vshll.u32 %v11489_v19, 16  ;;  %v17815_v20 = vcombine.low %v17803_v29, %v17810_v33  ;;  %v8276_v1 = vadd.f32 %v11846_v22, %v17445_v41  ;;  %v8682_v22 = vld [vmem:[#allocation3 + $0x78] sm:$0xf] }
 0x88a   : > { %v8677_v60 = vsel %vm17454_vm14, %v8542_v24, %v8676_v57  ;;  %v8680_v7 = vsel %vm17267_vm6, %v8543_v4, %v8679_v54  ;;  %v8833_v62 = vrot.slane %v8831_v21, 4  ;;  %v8836_v35 = vrot.slane %v8834_v8, 5 }
 0x88b   : > { %18529 = vst [vmem:[#allocation23_spill] sm:$0xff] %v17815_v20  ;;  %8678 = vst [vmem:[#allocation3 + $0x70] sm:$0xf] %v8677_v60  ;;  %v8547_v9 = vrot.slane %v8545_v10, 7  ;;  %10051 = vmatmul.mubr.bf16.gmra.mxu1 %v17815_v20  ;;  %v8373_v58 = vadd.f32 %v8372_v13, %v8276_v1  ;;  %v8840_v36 = vshll.u32 %v17764_v51, 16  ;;  %v8845_v19 = vshrl.u32 %v17762_v43, 16  ;;  %v11851_v60 = vpop.f32.mrf.mxu1 }
 0x88c   : > { %8681 = vst [vmem:[#allocation3 + $0x74] sm:$0x1] %v8680_v7  ;;  %v8837_v31 = vor.u32 %v8836_v35, %v8833_v62  ;;  %v8848_v57 = vshll.u32 %v17762_v43, 16  ;;  %v8854_v54 = vshll.u32 %v17779_v34, 16  ;;  %v11849_v21 = vadd.f32 %v11848_v12, %v11847_v11  ;;  %v17831_v7 = vld [vmem:[#allocation3 + $0x60] sm:$0xf] }
 0x88d   : > { %v8550_v24 = vor.u32 %v8548_v15, %v8547_v9  ;;  %v8551_v4 = vrot.slane %v8547_v9, 4  ;;  %v11490_v8 = vpack.c.bf16 %v8373_v58, %v8373_v58  ;;  %v17829_v10 = vrot.slane %v8868_v37, 5  ;;  %v17842_v12 = vld [vmem:[#allocation3 + $0x58] sm:$0xf] }
 0x88e   : > { %v8838_v1 = vrot.slane %v8837_v31, 4  ;;  %v8847_v13 = vrot.slane %v8845_v19, 4  ;;  %v8850_v51 = vrot.slane %v8848_v57, 5  ;;  %v17836_v62 = vrot.slane %v8865_v49, 4  ;;  %v8729_v31 = vld [vmem:[#allocation3 + $0x5c] sm:$0x1] }
 0x88f   : > { %v8683_v34 = vsel %vm17454_vm14, %v8550_v24, %v8682_v22  ;;  %v8686_v11 = vsel %vm17267_vm6, %v8551_v4, %v8685_v18  ;;  %v8553_v44 = vshrl.u32 %v11490_v8, 16  ;;  %v8842_v37 = vrot.slane %v8840_v36, 5  ;;  %v8688_v49 = vld [vmem:[#allocation3 + $0x80] sm:$0xf]  ;;  %v8691_v36 = vld [vmem:[#allocation3 + $0x84] sm:$0x1] }
 0x890   : > { %8684 = vst [vmem:[#allocation3 + $0x78] sm:$0xf] %v8683_v34  ;;  %8687 = vst [vmem:[#allocation3 + $0x7c] sm:$0x1] %v8686_v11  ;;  %v8556_v15 = vshll.u32 %v11490_v8, 16  ;;  %v8851_v35 = vor.u32 %v8850_v51, %v8847_v13  ;;  %v8856_v9 = vrot.slane %v8854_v54, 5  ;;  %v8281_v2 = vadd.f32 %v11849_v21, %v17445_v41 }
 0x891   : > { %v8555_v23 = vrot.slane %v8553_v44, 7  ;;  %v17847_v58 = vsel %vm13046_vm12, %v8838_v1, %v8842_v37  ;;  %v11852_v19 = vadd.f32 %v11851_v60, %v11850_v59  ;;  %v11294_v18 = vcombine.low %v17842_v12, %v17831_v7  ;;  %v17875_v37 = vld [vmem:[#allocation3 + $0x64] sm:$0x1] }
 0x892   : > { %v8852_v22 = vrot.slane %v8851_v35, 4  ;;  %v8378_v57 = vadd.f32 %v17738_v27, %v8281_v2  ;;  %v11255_v24 = vrot.slane %v17842_v12, 9  ;;  %v9040_v4 = vrot.slane %v8729_v31, 5  ;;  %v17873_v44 = vld [vmem:[#allocation3 + $0x70] sm:$0xf] }
 0x893   : > { %v8558_v54 = vor.u32 %v8556_v15, %v8555_v23  ;;  %v8559_v8 = vrot.slane %v8555_v23, 4  ;;  %v8284_v21 = vadd.f32 %v11852_v19, %v17445_v41  ;;  %10058 = vmatprep.mubr.bf16.mxu1 %v11294_v18  ;;  %v8873_v13 = vshrl.u32 %v17842_v12, 16  ;;  %v17884_v18 = vld [vmem:[#allocation3 + $0x68] sm:$0xf] }
 0x894   : > { %v17857_v59 = vsel %vm13046_vm12, %v8852_v22, %v8856_v9  ;;  %v11491_v1 = vpack.c.bf16 %v8378_v57, %v8378_v57  ;;  %v17861_v51 = vsel %vm12936_vm9, %v11255_v24, %v9040_v4  ;;  %v8876_v27 = vshll.u32 %v17842_v12, 16  ;;  %v8694_v57 = vld [vmem:[#allocation3 + $0x88] sm:$0xf]  ;;  %v8697_v24 = vld [vmem:[#allocation3 + $0x8c] sm:$0x1] }
 0x895   : > { %v8689_v60 = vsel %vm17454_vm14, %v8558_v54, %v8688_v49  ;;  %v8692_v41 = vsel %vm17267_vm6, %v8559_v8, %v8691_v36  ;;  %v17870_v34 = vcombine.low %v17847_v58, %v17857_v59  ;;  %v8381_v11 = vadd.f32 %v17793_v53, %v8284_v21 }
 0x896   : > { %8690 = vst [vmem:[#allocation3 + $0x80] sm:$0xf] %v8689_v60  ;;  %8693 = vst [vmem:[#allocation3 + $0x84] sm:$0x1] %v8692_v41  ;;  %v8561_v15 = vshrl.u32 %v11491_v1, 16  ;;  %v17879_v35 = vcombine.low %v17680_v6, %v17762_v43  ;;  %v11286_v9 = vcombine.low %v17496_v30, %v17861_v51  ;;  %v8875_v2 = vrot.slane %v8873_v13, 4 }
 0x897   : > { %9953 = vmatprep.mubr.bf16.mxu0 %v17870_v34  ;;  %v8564_v23 = vshll.u32 %v11491_v1, 16  ;;  %v11492_v49 = vpack.c.bf16 %v8381_v11, %v8381_v11  ;;  %v8878_v53 = vrot.slane %v8876_v27, 5  ;;  %v8882_v19 = vshll.u32 %v8729_v31, 16  ;;  %v17889_v43 = vld [vmem:[#allocation3 + $0x6c] sm:$0x1] }
 0x898   : > { %v8563_v36 = vrot.slane %v8561_v15, 7  ;;  %9954 = vmatmul.mubr.bf16.gmra.mxu0 %v17879_v35  ;;  %10059 = vmatmul.mubr.bf16.gmra.mxu1 %v11286_v9  ;;  %v11295_v6 = vcombine.low %v17884_v18, %v17873_v44  ;;  %v11256_v30 = vrot.slane %v17831_v7, 9  ;;  %v9044_v22 = vrot.slane %v17875_v37, 5 }
 0x899   : > { %v8569_v4 = vshrl.u32 %v11492_v49, 16  ;;  %v8572_v54 = vshll.u32 %v11492_v49, 16  ;;  %v8871_v31 = vsel %vm13046_vm12, %v17836_v62, %v17829_v10  ;;  %v8879_v8 = vor.u32 %v8878_v53, %v8875_v2  ;;  %v8700_v10 = vld [vmem:[#allocation3 + $0x90] sm:$0xf]  ;;  %v8703_v62 = vld [vmem:[#allocation3 + $0x94] sm:$0x1] }
 0x89a   : > { %v8566_v21 = vor.u32 %v8564_v23, %v8563_v36  ;;  %v8567_v13 = vrot.slane %v8563_v36, 4  ;;  %v8884_v1 = vrot.slane %v8882_v19, 5  ;;  %10066 = vmatprep.mubr.bf16.mxu1 %v11295_v6  ;;  %v11257_v27 = vrot.slane %v17884_v18, 9 }
 0x89b   : > { %v8571_v60 = vrot.slane %v8569_v4, 7  ;;  %v8880_v41 = vrot.slane %v8879_v8, 4  ;;  %v9048_v11 = vrot.slane %v17889_v43, 5  ;;  %v8887_v15 = vshrl.u32 %v17831_v7, 16 }
 0x89c   : > { %v8695_v9 = vsel %vm17454_vm14, %v8566_v21, %v8694_v57  ;;  %v8698_v49 = vsel %vm17267_vm6, %v8567_v13, %v8697_v24  ;;  %v17906_v2 = vsel %vm12936_vm9, %v11256_v30, %v9044_v22  ;;  %v8890_v23 = vshll.u32 %v17831_v7, 16 }
 0x89d   : > { %8696 = vst [vmem:[#allocation3 + $0x88] sm:$0xf] %v8695_v9  ;;  %8699 = vst [vmem:[#allocation3 + $0x8c] sm:$0x1] %v8698_v49  ;;  %v8574_v53 = vor.u32 %v8572_v54, %v8571_v60  ;;  %v8575_v19 = vrot.slane %v8571_v60, 4  ;;  %v17911_v36 = vsel %vm13046_vm12, %v8880_v41, %v8884_v1  ;;  %v17915_v6 = vsel %vm12936_vm9, %v11257_v27, %v9048_v11 }
 0x89e   : > { %v11278_v57 = vcombine.low %v8871_v31, %v17911_v36  ;;  %v17920_v30 = vcombine.low %v17906_v2, %v17915_v6  ;;  %v8889_v22 = vrot.slane %v8887_v15, 4  ;;  %v8892_v24 = vrot.slane %v8890_v23, 5  ;;  %v17922_v4 = vld [vmem:[#allocation3 + $0x80] sm:$0xf]  ;;  %v17924_v54 = vld [vmem:[#allocation3 + $0x74] sm:$0x1] }
 0x89f   : > { %v8701_v8 = vsel %vm17454_vm14, %v8574_v53, %v8700_v10  ;;  %v8704_v21 = vsel %vm17267_vm6, %v8575_v19, %v8703_v62  ;;  %v11270_v13 = vcombine.low %v17462_v38, %v17842_v12  ;;  %v8901_v31 = vshrl.u32 %v17884_v18, 16  ;;  %v17933_v1 = vld [vmem:[#allocation3 + $0x78] sm:$0xf]  ;;  %v8737_v41 = vld [vmem:[#allocation3 + $0x7c] sm:$0x1] }
 0x8a0   : > { %18530 = vst [vmem:[#allocation22_spill] sm:$0xff] %v17920_v30  ;;  %8702 = vst [vmem:[#allocation3 + $0x90] sm:$0xf] %v8701_v8  ;;  %9961 = vmatprep.mubr.bf16.mxu0 %v11278_v57  ;;  %10067 = vmatmul.mubr.bf16.gmra.mxu1 %v17920_v30  ;;  %v8893_v27 = vor.u32 %v8892_v24, %v8889_v22  ;;  %v8896_v60 = vshll.u32 %v17875_v37, 16  ;;  %v8904_v47 = vshll.u32 %v17884_v18, 16  ;;  %v11258_v12 = vrot.slane %v17873_v44, 9 }
 0x8a1   : > { %8705 = vst [vmem:[#allocation3 + $0x94] sm:$0x1] %v8704_v21  ;;  %9962 = vmatmul.mubr.bf16.gmra.mxu0 %v11270_v13  ;;  %v8903_v50 = vrot.slane %v8901_v31, 4  ;;  %v11296_v38 = vcombine.low %v17933_v1, %v17922_v4  ;;  %v9052_v11 = vrot.slane %v17924_v54, 5  ;;  %v17942_v15 = vld [vmem:[#allocation3 + $0x48] sm:$0xf] }
 0x8a2   : > { %v8906_v9 = vrot.slane %v8904_v47, 5  ;;  %v8910_v49 = vshll.u32 %v17889_v43, 16  ;;  %v11259_v10 = vrot.slane %v17933_v1, 9  ;;  %v8894_v37 = vrot.slane %v8893_v27, 4  ;;  %v8739_v31 = vld [vmem:[#allocation3 + $0x84] sm:$0x1] }
 0x8a3   : > { %10074 = vmatprep.mubr.bf16.mxu1 %v11296_v38  ;;  %v9056_v62 = vrot.slane %v8737_v41, 5  ;;  %v8915_v23 = vshrl.u32 %v17873_v44, 16  ;;  %v8918_v53 = vshll.u32 %v17873_v44, 16  ;;  %v8898_v19 = vrot.slane %v8896_v60, 5 }
 0x8a4   : > { %v8907_v57 = vor.u32 %v8906_v9, %v8903_v50  ;;  %v8929_v22 = vshrl.u32 %v17933_v1, 16  ;;  %v11264_v24 = vrot.slane %v17942_v15, 9  ;;  %v17952_v8 = vsel %vm12936_vm9, %v11258_v12, %v9052_v11  ;;  %v17963_v38 = vld [vmem:[#allocation3 + $0x88] sm:$0xf] }
 0x8a5   : > { %v17956_v43 = vsel %vm12936_vm9, %v11259_v10, %v9056_v62  ;;  %v8917_v21 = vrot.slane %v8915_v23, 4  ;;  %v8920_v13 = vrot.slane %v8918_v53, 5  ;;  %v8912_v47 = vrot.slane %v8910_v49, 5  ;;  %v8741_v23 = vld [vmem:[#allocation3 + $0x8c] sm:$0x1] }
 0x8a6   : > { %v8908_v27 = vrot.slane %v8907_v57, 4  ;;  %v17960_v60 = vcombine.low %v17952_v8, %v17956_v43  ;;  %v8924_v50 = vshll.u32 %v17924_v54, 16  ;;  %v17967_v12 = vsel %vm13046_vm12, %v8894_v37, %v8898_v19  ;;  %v17980_v19 = vld [vmem:[#allocation3 + $0x4c] sm:$0x1] }
 0x8a7   : > { %v8921_v11 = vor.u32 %v8920_v13, %v8917_v21  ;;  %v8931_v9 = vrot.slane %v8929_v22, 4  ;;  %v8932_v10 = vshll.u32 %v17933_v1, 16  ;;  %v17970_v62 = vld [vmem:[#allocation3 + $0x90] sm:$0xf]  ;;  %v8938_v54 = vshll.u32 %v8737_v41, 16 }
 0x8a8   : > { %18531 = vst [vmem:[#allocation25_spill] sm:$0xff] %v17960_v60  ;;  %v17974_v49 = vsel %vm13046_vm12, %v8908_v27, %v8912_v47  ;;  %10075 = vmatmul.mubr.bf16.gmra.mxu1 %v17960_v60  ;;  %v11297_v53 = vcombine.low %v17963_v38, %v17970_v62  ;;  %v11260_v37 = vrot.slane %v17922_v4, 9  ;;  %v9060_v13 = vrot.slane %v8739_v31, 5 }
 0x8a9   : > { %v17984_v57 = vcombine.low %v17967_v12, %v17974_v49  ;;  %v8922_v22 = vrot.slane %v8921_v11, 4  ;;  %v8934_v21 = vrot.slane %v8932_v10, 5  ;;  %v17988_v27 = vcombine.low %v17831_v7, %v17884_v18 }
 0x8aa   : > { %10082 = vmatprep.mubr.bf16.mxu1 %v11297_v53  ;;  %v11261_v41 = vrot.slane %v17963_v38, 9  ;;  %v9064_v47 = vrot.slane %v8741_v23, 5  ;;  %v8943_v3 = vshrl.u32 %v17922_v4, 16  ;;  %v8926_v60 = vrot.slane %v8924_v50, 5 }
 0x8ab   : > { %9969 = vmatprep.mubr.bf16.mxu0 %v17984_v57  ;;  %v8935_v30 = vor.u32 %v8934_v21, %v8931_v9  ;;  %v8946_v20 = vshll.u32 %v17922_v4, 16  ;;  %v9140_v11 = vrot.slane %v17980_v19, 5  ;;  %v8940_v10 = vrot.slane %v8938_v54, 5 }
 0x8ac   : > { %9970 = vmatmul.mubr.bf16.gmra.mxu0 %v17988_v27  ;;  %v17998_v7 = vsel %vm12936_vm9, %v11261_v41, %v9064_v47  ;;  %v8945_v18 = vrot.slane %v8943_v3, 4  ;;  %v8957_v53 = vshrl.u32 %v17963_v38, 16  ;;  %v18003_v0 = vsel %vm13046_vm12, %v8922_v22, %v8926_v60 }
 0x8ad   : > { %v8936_v50 = vrot.slane %v8935_v30, 4  ;;  %v18007_v9 = vsel %vm12936_vm9, %v11260_v37, %v9060_v13  ;;  %v8948_v21 = vrot.slane %v8946_v20, 5  ;;  %v8952_v52 = vshll.u32 %v8739_v31, 16  ;;  %v8723_v37 = vld [vmem:[#allocation3 + $0x44] sm:$0x1] }
 0x8ae   : > { %v18011_v54 = vcombine.low %v18007_v9, %v17998_v7  ;;  %v8959_v41 = vrot.slane %v8957_v53, 4  ;;  %v8960_v3 = vshll.u32 %v17963_v38, 16  ;;  %v8966_v22 = vshll.u32 %v8741_v23, 16 }
 0x8af   : > { %v18016_v47 = vsel %vm13046_vm12, %v8936_v50, %v8940_v10  ;;  %v8949_v60 = vor.u32 %v8948_v21, %v8945_v18  ;;  %v11262_v13 = vrot.slane %v17753_v39, 9  ;;  %v18029_v10 = vsel %vm12936_vm9, %v11264_v24, %v9140_v11 }
 0x8b0   : > { %18532 = vst [vmem:[#allocation27_spill] sm:$0xff] %v18011_v54  ;;  %v18022_v20 = vcombine.low %v18003_v0, %v18016_v47  ;;  %10083 = vmatmul.mubr.bf16.gmra.mxu1 %v18011_v54  ;;  %v8962_v31 = vrot.slane %v8960_v3, 5  ;;  %v18034_v23 = vcombine.low %v17873_v44, %v17933_v1  ;;  %v9100_v50 = vrot.slane %v8723_v37, 5 }
 0x8b1   : > { %10220 = vmatprep.mubr.bf16.mxu1 %v17692_v45  ;;  %v8950_v18 = vrot.slane %v8949_v60, 4  ;;  %v8954_v21 = vrot.slane %v8952_v52, 5  ;;  %v8968_v30 = vrot.slane %v8966_v22, 5  ;;  %v9107_v3 = vshrl.u32 %v17942_v15, 16 }
 0x8b2   : > { %9977 = vmatprep.mubr.bf16.mxu0 %v18022_v20  ;;  %v8963_v53 = vor.u32 %v8962_v31, %v8959_v41  ;;  %v9110_v45 = vshll.u32 %v17942_v15, 16  ;;  %v9067_v24 = vshrl.u32 %v17753_v39, 16  ;;  %v9070_v11 = vshll.u32 %v17753_v39, 16 }
 0x8b3   : > { %v18043_v44 = vsel %vm12936_vm9, %v11262_v13, %v9100_v50  ;;  %v18051_v41 = vsel %vm13046_vm12, %v8950_v18, %v8954_v21  ;;  %v18062_v50 = vld [vmem:[#allocation3 + $0x94] sm:$0x1]  ;;  %v11263_v18 = vrot.slane %v17970_v62, 9 }
 0x8b4   : > { %9978 = vmatmul.mubr.bf16.gmra.mxu0 %v18034_v23  ;;  %v8964_v54 = vrot.slane %v8963_v53, 4  ;;  %v11309_v1 = vcombine.low %v17810_v33, %v18043_v44  ;;  %v11318_v52 = vcombine.low %v18043_v44, %v18029_v10  ;;  %v9069_v31 = vrot.slane %v9067_v24, 4 }
 0x8b5   : > { %v9072_v13 = vrot.slane %v9070_v11, 5  ;;  %v9109_v33 = vrot.slane %v9107_v3, 4  ;;  %v9112_v53 = vrot.slane %v9110_v45, 5  ;;  %v9116_v3 = vshll.u32 %v17980_v19, 16 }
 0x8b6   : > { %v18055_v60 = vsel %vm13046_vm12, %v8964_v54, %v8968_v30  ;;  %v18069_v54 = vcombine.low %v17922_v4, %v17963_v38  ;;  %v9104_v30 = vrot.slane %v18062_v50, 5  ;;  %v18533_v45 = vcombine.low %v17505_v40, %v17550_v61  ;;  %v12545_v40 = vld [vmem:[%s18412_s6 + $0x230] sm:$0xff]  }
 0x8b7   : > { %v18059_v22 = vcombine.low %v18051_v41, %v18055_v60  ;;  %v9113_v21 = vor.u32 %v9112_v53, %v9109_v33  ;;  %v9076_v24 = vshll.u32 %v8723_v37, 16  ;;  %v11307_v19 = vcombine.low %v17599_v16, %v17672_v25 }
 0x8b8   : > { %10221 = vmatmul.mubr.bf16.vlgmr.msra.gmra.mxu1 %v17637_v5  ;;  %v9073_v5 = vor.u32 %v9072_v13, %v9069_v31  ;;  %v9118_v31 = vrot.slane %v9116_v3, 5  ;;  %v18534_v37 = vcombine.low %v17546_v14, %v17623_v26  ;;  %v12548_v14 = vld [vmem:[%s18412_s6 + $0x220] sm:$0xff]   ;;  %v18535_v16 = vcombine.low %v17677_v55, %v17751_v32 }
 0x8b9   : > { %9985 = vmatprep.mubr.bf16.mxu0 %v18059_v22  ;;  %10228 = vmatprep.mubr.bf16.mxu1 %v17789_v42  ;;  %v18079_v42 = vsel %vm12936_vm9, %v11263_v18, %v9104_v30  ;;  %v9114_v11 = vrot.slane %v9113_v21, 4  ;;  %v9078_v61 = vrot.slane %v9076_v24, 5  ;;  %v18536_v26 = vcombine.low %v17705_v17, %v17803_v29  ;;  %v12550_v17 = vld [vmem:[%s18412_s6 + $0x210] sm:$0xff]   ;;  %v8745_v21 = vld [vmem:[#allocation3 + $0x9c] sm:$0x1] }
 0x8ba   : > { %v11313_v4 = vcombine.low %v17998_v7, %v18079_v42  ;;  %v9074_v38 = vrot.slane %v9073_v5, 4  ;;  %v11314_v25 = vcombine.low %v17753_v39, %v17942_v15  ;;  %v11300_v55 = vcombine.low %v17771_v46, %v17847_v58  ;;  %v12551_v46 = vld [vmem:[%s18412_s6 + $0x208] sm:$0xff]  }
 0x8bb   : > { %v9119_v13 = vsel %vm13046_vm12, %v9114_v11, %v9118_v31  ;;  %v9081_v32 = vshrl.u32 %v17970_v62, 16  ;;  %v9084_v39 = vshll.u32 %v17970_v62, 16  ;;  %v11310_v5 = vcombine.low %v17861_v51, %v17906_v2  ;;  %v18541_v7 = vld [vmem:[#allocation25_spill] sm:$0xff] }
 0x8bc   : > { %9986 = vmatmul.mubr.bf16.gmra.mxu0 %v18069_v54  ;;  %v11302_v51 = vcombine.low %v17911_v36, %v17967_v12  ;;  %v11311_v11 = vcombine.low %v17915_v6, %v17952_v8  ;;  %v11312_v36 = vcombine.low %v17956_v43, %v18007_v9  ;;  %v11304_v28 = vcombine.low %v18016_v47, %v18051_v41  ;;  %v18538_v43 = vld [vmem:[#allocation24_spill] sm:$0xff]  ;;  %v18539_v12 = vld [vmem:[#allocation23_spill] sm:$0xff] }
 0x8bd   : > { %10123 = vmatprep.mubr.bf16.mxu0 %v18533_v45  ;;  %v9083_v58 = vrot.slane %v9081_v32, 4  ;;  %v9130_v45 = vshll.u32 %v8745_v21, 16  ;;  %v9144_v9 = vrot.slane %v8745_v21, 5  ;;  %v18542_v47 = vld [vmem:[#allocation27_spill] sm:$0xff] }
 0x8c0   : > { %10229 = vmatmul.mubr.bf16.gmra.mxu1 %v17775_v48  ;;  %v9079_v48 = vsel %vm13046_vm12, %v9074_v38, %v9078_v61  ;;  %v9132_v38 = vrot.slane %v9130_v45, 5 }
 0x8c1   : > { %10236 = vmatprep.mubr.bf16.mxu1 %v17870_v34  ;;  %v12546_v34 = vld [vmem:[%s18412_s6 + $0x228] sm:$0xff]   ;;  %v11316_v33 = vcombine.low %v9079_v48, %v9119_v13  ;;  %v11301_v30 = vcombine.low %v17857_v59, %v9079_v48 }
 0x8c4   : > { %10124 = vmatmul.mubr.bf16.vlgmr.msra.gmra.mxu0 %v18534_v37 }
 0x8c5   : > { %12236 = vmatpush3.bf16.msra.mxu0 %v17785_v56  ;;  %10131 = vmatprep.mubr.bf16.mxu0 %v11307_v19  ;;  %v12549_v56 = vld [vmem:[%s18412_s6 + $0x218] sm:$0xff]   ;;  %v18179_v19 = vld [vmem:[%s18413_s7] ss:$0 sm:$0xff] }
 0x8c6   : > { %12237 = vmatprep.subr.bf16.mxu0 %v12545_v40 }
 0x8c8   : > { %10237 = vmatmul.mubr.bf16.gmra.mxu1 %v17879_v35  ;;  %v18117_v35 = vld [vmem:[#allocation3 + $0x98] sm:$0xf] }
 0x8c9   : > { %12238 = vmatpush3.bf16.msra.mxu0 %v12545_v40  ;;  %10244 = vmatprep.mubr.bf16.mxu1 %v11316_v33  ;;  %v9121_v29 = vshrl.u32 %v18117_v35, 16  ;;  %v9124_v15 = vshll.u32 %v18117_v35, 16  ;;  %v11315_v6 = vcombine.low %v17970_v62, %v18117_v35  ;;  %v18540_v62 = vld [vmem:[#allocation22_spill] sm:$0xff] }
 0x8ca   : > { %12239 = vmatprep.subr.bf16.mxu0 %v12546_v34 }
 0x8cb   : > { %v9123_v53 = vrot.slane %v9121_v29, 4  ;;  %v9126_v18 = vrot.slane %v9124_v15, 5 }
 0x8cc   : > { %10132 = vmatmul.mubr.bf16.gmra.mxu0 %v18535_v16 }
 0x8cd   : > { %10139 = vmatprep.mubr.bf16.mxu0 %v18536_v26  ;;  %12240 = vmatpush3.bf16.msra.mxu0 %v12546_v34  ;;  %v9127_v3 = vor.u32 %v9126_v18, %v9123_v53 }
 0x8ce   : > { %12241 = vmatprep.subr.bf16.mxu0 %v12548_v14 }
 0x8cf   : > { %v9128_v24 = vrot.slane %v9127_v3, 4 }
 0x8d0   : > { %10245 = vmatmul.mubr.bf16.gmra.mxu1 %v11314_v25 }
 0x8d1   : > { %10252 = vmatprep.mubr.bf16.mxu1 %v17984_v57  ;;  %12242 = vmatpush3.bf16.msra.mxu0 %v12548_v14  ;;  %v9086_v57 = vrot.slane %v9084_v39, 5 }
 0x8d2   : > { %12243 = vmatprep.subr.bf16.mxu0 %v12549_v56 }
 0x8d4   : > { %10140 = vmatmul.mubr.bf16.gmra.mxu0 %v11300_v55 }
 0x8d5   : > { %10147 = vmatprep.mubr.bf16.mxu0 %v11309_v1  ;;  %12244 = vmatpush3.bf16.msra.mxu0 %v12549_v56  ;;  %v12553_v1 = vld [vmem:[%s18412_s6 + $0x200] sm:$0xff]  }
 0x8d6   : > { %12245 = vmatprep.subr.bf16.mxu0 %v12550_v17 }
 0x8d8   : > { %10253 = vmatmul.mubr.bf16.gmra.mxu1 %v17988_v27  ;;  %v9087_v27 = vor.u32 %v9086_v57, %v9083_v58 }
 0x8d9   : > { %10260 = vmatprep.mubr.bf16.mxu1 %v18022_v20  ;;  %12246 = vmatpush3.bf16.msra.mxu0 %v12550_v17  ;;  %v9090_v20 = vshll.u32 %v18062_v50, 16 }
 0x8da   : > { %12247 = vmatprep.subr.bf16.mxu0 %v12551_v46  ;;  %v9088_v59 = vrot.slane %v9087_v27, 4 }
 0x8db   : > { %v9092_v2 = vrot.slane %v9090_v20, 5 }
 0x8dc   : > { %10148 = vmatmul.mubr.bf16.gmra.mxu0 %v11301_v30 }
 0x8dd   : > { %10155 = vmatprep.mubr.bf16.mxu0 %v11310_v5  ;;  %12248 = vmatpush3.bf16.msra.mxu0 %v12551_v46  ;;  %v9093_v50 = vsel %vm13046_vm12, %v9088_v59, %v9092_v2 }
 0x8de   : > { %12249 = vmatprep.subr.bf16.mxu0 %v12553_v1  ;;  %v11305_v8 = vcombine.low %v18055_v60, %v9093_v50 }
 0x8e0   : > { %10261 = vmatmul.mubr.bf16.gmra.mxu1 %v18034_v23  ;;  %v9133_v23 = vsel %vm13046_vm12, %v9128_v24, %v9132_v38 }
 0x8e1   : > { %10268 = vmatprep.mubr.bf16.mxu1 %v18059_v22  ;;  %12250 = vmatpush3.bf16.msra.mxu0 %v12553_v1  ;;  %v11317_v31 = vcombine.low %v9093_v50, %v9133_v23  ;;  %v11303_v22 = vcombine.low %v17974_v49, %v18003_v0  ;;  %v18537_v0 = vld [vmem:[#allocation26_spill] sm:$0xff]  ;;  %v11265_v49 = vrot.slane %v18117_v35, 9 }
 0x8e3   : > { %v9145_v41 = vsel %vm12936_vm9, %v11265_v49, %v9144_v9 }
 0x8e4   : > { %10156 = vmatmul.mubr.bf16.gmra.mxu0 %v11302_v51  ;;  %v11319_v60 = vcombine.low %v18079_v42, %v9145_v41 }
 0x8e5   : > { %10163 = vmatprep.mubr.bf16.mxu0 %v11311_v11 }
 0x8e8   : > { %10269 = vmatmul.mubr.bf16.gmra.mxu1 %v18069_v54 }
 0x8e9   : > { %10276 = vmatprep.mubr.bf16.mxu1 %v11317_v31 }
 0x8ec   : > { %10164 = vmatmul.mubr.bf16.gmra.mxu0 %v11303_v22 }
 0x8ed   : > { %10171 = vmatprep.mubr.bf16.mxu0 %v11312_v36 }
 0x8f0   : > { %10277 = vmatmul.mubr.bf16.gmra.mxu1 %v11315_v6 }
 0x8f4   : > { %10172 = vmatmul.mubr.bf16.gmra.mxu0 %v11304_v28 }
 0x8f5   : > { %10179 = vmatprep.mubr.bf16.mxu0 %v11313_v4 }
 0x8fc   : > { %10180 = vmatmul.mubr.bf16.gmra.mxu0 %v11305_v8 }
 0x8fd   : > { %12251 = vmatprep.mubr.bf16.mxu0 %v18537_v0 }
 0x904   : > { %12252 = vmatmul.mubr.bf16.vlgmr.msra.gmra.mxu0 %v18538_v43 }
 0x905   : > { %12255 = vmatprep.mubr.bf16.mxu0 %v18539_v12 }
 0x90c   : > { %12256 = vmatmul.mubr.bf16.gmra.mxu0 %v11318_v52 }
 0x90d   : > { %12259 = vmatprep.mubr.bf16.mxu0 %v18540_v62 }
 0x914   : > { %12260 = vmatmul.mubr.bf16.gmra.mxu0 %v18541_v7 }
 0x915   : > { %12263 = vmatprep.mubr.bf16.mxu0 %v18542_v47 }
 0x91c   : > { %12264 = vmatmul.mubr.bf16.gmra.mxu0 %v11319_v60 }
 0x921   : > { %v11943_v54 = vpop.f32.mrf.mxu1 }
 0x923   : > { %v11944_v4 = vpop.f32.mrf.mxu1 }
 0x924   : > { %v11945_v40 = vadd.f32 %v11944_v4, %v11943_v54 }
 0x925   : > { %v11946_v10 = vpop.f32.mrf.mxu1 }
 0x927   : > { %v11947_v44 = vpop.f32.mrf.mxu1  ;;  %v11879_v52 = vpop.f32.mrf.mxu0 }
 0x928   : > { %v11948_v61 = vadd.f32 %v11947_v44, %v11946_v10 }
 0x929   : > { %v11880_v37 = vpop.f32.mrf.mxu0 }
 0x92a   : > { %v11881_v48 = vadd.f32 %v11880_v37, %v11879_v52 }
 0x92b   : > { %v11882_v13 = vpop.f32.mrf.mxu0 }
 0x92c   : > { %v9932_v63 = vadd.f32 %v11881_v48, %v18179_v19 }
 0x92d   : > { %v11883_v42 = vpop.f32.mrf.mxu0 }
 0x92e   : > { %v11949_v34 = vpop.f32.mrf.mxu1  ;;  %v11884_v33 = vadd.f32 %v11883_v42, %v11882_v13  ;;  %v18182_v16 = vadd.f32 %v11945_v40, %v9932_v63 }
 0x930   : > { %v11950_v14 = vpop.f32.mrf.mxu1  ;;  %v9935_v25 = vadd.f32 %v11884_v33, %v18179_v19 }
 0x931   : > { %v11951_v26 = vadd.f32 %v11950_v14, %v11949_v34 }
 0x932   : > { %v11952_v56 = vpop.f32.mrf.mxu1  ;;  %v18185_v55 = vadd.f32 %v11948_v61, %v9935_v25 }
 0x934   : > { %v11953_v35 = vpop.f32.mrf.mxu1 }
 0x935   : > { %v11954_v17 = vadd.f32 %v11953_v35, %v11952_v56 }
 0x939   : > { %v11885_v32 = vpop.f32.mrf.mxu0 }
 0x93a   : > { %v11955_v29 = vpop.f32.mrf.mxu1 }
 0x93b   : > { %v11886_v39 = vpop.f32.mrf.mxu0 }
 0x93c   : > { %v11887_v15 = vadd.f32 %v11886_v39, %v11885_v32  ;;  %v11956_v58 = vpop.f32.mrf.mxu1 }
 0x93d   : > { %v11888_v46 = vpop.f32.mrf.mxu0  ;;  %v11957_v53 = vadd.f32 %v11956_v58, %v11955_v29 }
 0x93e   : > { %v9940_v57 = vadd.f32 %v11887_v15, %v18179_v19  ;;  %v11958_v30 = vpop.f32.mrf.mxu1 }
 0x93f   : > { %v11889_v18 = vpop.f32.mrf.mxu0 }
 0x940   : > { %v11890_v1 = vadd.f32 %v11889_v18, %v11888_v46  ;;  %v18188_v5 = vadd.f32 %v11951_v26, %v9940_v57  ;;  %v11959_v21 = vpop.f32.mrf.mxu1 }
 0x941   : > { %v11960_v3 = vadd.f32 %v11959_v21, %v11958_v30 }
 0x942   : > { %v9943_v27 = vadd.f32 %v11890_v1, %v18179_v19 }
 0x944   : > { %v18191_v45 = vadd.f32 %v11954_v17, %v9943_v27 }
 0x948   : > { %v11891_v20 = vpop.f32.mrf.mxu0 }
 0x94a   : > { %v11892_v59 = vpop.f32.mrf.mxu0 }
 0x94b   : > { %v11893_v24 = vadd.f32 %v11892_v59, %v11891_v20  ;;  %v11961_v38 = vpop.f32.mrf.mxu1 }
 0x94c   : > { %v11894_v51 = vpop.f32.mrf.mxu0 }
 0x94d   : > { %v9948_v2 = vadd.f32 %v11893_v24, %v18179_v19  ;;  %v11962_v11 = vpop.f32.mrf.mxu1 }
 0x94e   : > { %v11963_v50 = vadd.f32 %v11962_v11, %v11961_v38  ;;  %v11895_v23 = vpop.f32.mrf.mxu0 }
 0x94f   : > { %v11896_v31 = vadd.f32 %v11895_v23, %v11894_v51  ;;  %v11964_v22 = vpop.f32.mrf.mxu1  ;;  %v18194_v36 = vadd.f32 %v11957_v53, %v9948_v2 }
 0x951   : > { %v9951_v6 = vadd.f32 %v11896_v31, %v18179_v19  ;;  %v11965_v28 = vpop.f32.mrf.mxu1 }
 0x952   : > { %v11966_v8 = vadd.f32 %v11965_v28, %v11964_v22 }
 0x953   : > { %v18197_v0 = vadd.f32 %v11960_v3, %v9951_v6 }
 0x958   : > { %v11897_v43 = vpop.f32.mrf.mxu0  ;;  %v11967_v12 = vpop.f32.mrf.mxu1 }
 0x95a   : > { %v11898_v62 = vpop.f32.mrf.mxu0  ;;  %v11968_v49 = vpop.f32.mrf.mxu1 }
 0x95b   : > { %v11899_v9 = vadd.f32 %v11898_v62, %v11897_v43  ;;  %v11969_v7 = vadd.f32 %v11968_v49, %v11967_v12 }
 0x95c   : > { %v11900_v47 = vpop.f32.mrf.mxu0  ;;  %v11970_v41 = vpop.f32.mrf.mxu1 }
 0x95d   : > { %v9956_v60 = vadd.f32 %v11899_v9, %v18179_v19 }
 0x95e   : > { %v11901_v54 = vpop.f32.mrf.mxu0  ;;  %v11971_v4 = vpop.f32.mrf.mxu1 }
 0x95f   : > { %v11902_v40 = vadd.f32 %v11901_v54, %v11900_v47  ;;  %v11972_v10 = vadd.f32 %v11971_v4, %v11970_v41  ;;  %v18200_v44 = vadd.f32 %v11963_v50, %v9956_v60 }
 0x960   : > { %v11973_v52 = vpop.f32.mrf.mxu1 }
 0x961   : > { %v9959_v61 = vadd.f32 %v11902_v40, %v18179_v19  ;;  %v11903_v37 = vpop.f32.mrf.mxu0 }
 0x962   : > { %v11974_v48 = vpop.f32.mrf.mxu1 }
 0x963   : > { %v11904_v13 = vpop.f32.mrf.mxu0  ;;  %v11975_v63 = vadd.f32 %v11974_v48, %v11973_v52  ;;  %v18203_v34 = vadd.f32 %v11966_v8, %v9959_v61 }
 0x964   : > { %v11905_v42 = vadd.f32 %v11904_v13, %v11903_v37  ;;  %v11976_v33 = vpop.f32.mrf.mxu1 }
 0x965   : > { %v11906_v14 = vpop.f32.mrf.mxu0 }
 0x966   : > { %v9964_v26 = vadd.f32 %v11905_v42, %v18179_v19  ;;  %v11977_v25 = vpop.f32.mrf.mxu1 }
 0x967   : > { %v11907_v56 = vpop.f32.mrf.mxu0  ;;  %v11978_v35 = vadd.f32 %v11977_v25, %v11976_v33 }
 0x968   : > { %v11908_v17 = vadd.f32 %v11907_v56, %v11906_v14  ;;  %v11979_v32 = vpop.f32.mrf.mxu1  ;;  %v18206_v39 = vadd.f32 %v11969_v7, %v9964_v26 }
 0x96a   : > { %18543 = vst [vmem:[#allocation29_spill] sm:$0xff] %v18206_v39  ;;  %v9967_v29 = vadd.f32 %v11908_v17, %v18179_v19  ;;  %v11980_v15 = vpop.f32.mrf.mxu1 }
 0x96b   : > { %v11981_v46 = vadd.f32 %v11980_v15, %v11979_v32 }
 0x96c   : > { %v11909_v58 = vpop.f32.mrf.mxu0  ;;  %v11982_v57 = vpop.f32.mrf.mxu1  ;;  %v18209_v53 = vadd.f32 %v11972_v10, %v9967_v29 }
 0x96e   : > { %18544 = vst [vmem:[#allocation28_spill] sm:$0xff] %v18209_v53  ;;  %v11910_v18 = vpop.f32.mrf.mxu0  ;;  %v11983_v30 = vpop.f32.mrf.mxu1 }
 0x96f   : > { %v11911_v1 = vadd.f32 %v11910_v18, %v11909_v58  ;;  %v11984_v21 = vadd.f32 %v11983_v30, %v11982_v57 }
 0x970   : > { %v11912_v27 = vpop.f32.mrf.mxu0  ;;  %v18211_v3 = vpop.f32.mrf.mxu1 }
 0x971   : > { %18545 = vst [vmem:[#allocation30_spill] sm:$0xff] %v18211_v3  ;;  %v9972_v20 = vadd.f32 %v11911_v1, %v18179_v19 }
 0x972   : > { %v11913_v59 = vpop.f32.mrf.mxu0  ;;  %v18214_v24 = vpop.f32.mrf.mxu1 }
 0x973   : > { %18546 = vst [vmem:[#allocation32_spill] sm:$0xff] %v18214_v24  ;;  %v11914_v38 = vadd.f32 %v11913_v59, %v11912_v27  ;;  %v18216_v51 = vadd.f32 %v11975_v63, %v9972_v20 }
 0x974   : > { %v11915_v2 = vpop.f32.mrf.mxu0  ;;  %v18218_v11 = vpop.f32.mrf.mxu1 }
 0x975   : > { %18547 = vst [vmem:[#allocation31_spill] sm:$0xff] %v18218_v11  ;;  %v9975_v50 = vadd.f32 %v11914_v38, %v18179_v19 }
 0x976   : > { %v11916_v23 = vpop.f32.mrf.mxu0  ;;  %v18221_v31 = vpop.f32.mrf.mxu1 }
 0x977   : > { %18548 = vst [vmem:[#allocation8_spill] sm:$0xff] %v18221_v31  ;;  %v11917_v22 = vadd.f32 %v11916_v23, %v11915_v2  ;;  %v18223_v6 = vadd.f32 %v11978_v35, %v9975_v50 }
 0x978   : > { %v11918_v28 = vpop.f32.mrf.mxu0  ;;  %v18225_v8 = vpop.f32.mrf.mxu1 }
 0x979   : > { %18549 = vst [vmem:[#allocation6_spill] sm:$0xff] %v18223_v6  ;;  %v9980_v43 = vadd.f32 %v11917_v22, %v18179_v19 }
 0x97a   : > { %v11919_v12 = vpop.f32.mrf.mxu0  ;;  %v18228_v62 = vpop.f32.mrf.mxu1 }
 0x97b   : > { %v11920_v49 = vadd.f32 %v11919_v12, %v11918_v28  ;;  %v18230_v9 = vadd.f32 %v11981_v46, %v9980_v43 }
 0x97c   : > { %v11921_v7 = vpop.f32.mrf.mxu0  ;;  %v18232_v47 = vpop.f32.mrf.mxu1 }
 0x97d   : > { %18550 = vst [vmem:[#allocation9_spill] sm:$0xff] %v18230_v9  ;;  %v9983_v41 = vadd.f32 %v11920_v49, %v18179_v19 }
 0x97e   : > { %v11922_v60 = vpop.f32.mrf.mxu0  ;;  %v18235_v54 = vpop.f32.mrf.mxu1 }
 0x97f   : > { %v18237_v4 = vadd.f32 %v11922_v60, %v11921_v7  ;;  %v18239_v40 = vadd.f32 %v11984_v21, %v9983_v41 }
 0x980   : > { %v11924_v10 = vpop.f32.mrf.mxu0  ;;  %v12077_v52 = vpop.f32.mrf.mxu1 }
 0x981   : > { %18551 = vst [vmem:[#allocation7_spill] sm:$0xff] %v18239_v40 }
 0x982   : > { %v11925_v61 = vpop.f32.mrf.mxu0  ;;  %v12078_v37 = vpop.f32.mrf.mxu1 }
 0x983   : > { %v18241_v48 = vadd.f32 %v11925_v61, %v11924_v10 }
 0x984   : > { %v12007_v13 = vpop.f32.mrf.mxu0  ;;  %v18243_v63 = vpop.f32.mrf.mxu1 }
 0x985   : > { %18552 = vst [vmem:[#allocation10_spill] sm:$0xff] %v18241_v48 }
 0x986   : > { %v12008_v42 = vpop.f32.mrf.mxu0  ;;  %v18245_v33 = vpop.f32.mrf.mxu1 }
 0x987   : > { %v12009_v24 = vadd.f32 %v12008_v42, %v12007_v13  ;;  %v12073_v13 = vadd.f32 %v18228_v62, %v18225_v8 }
 0x988   : > { %v12010_v14 = vpop.f32.mrf.mxu0  ;;  %v18247_v26 = vpop.f32.mrf.mxu1 }
 0x98a   : > { %v12011_v25 = vpop.f32.mrf.mxu0  ;;  %v18249_v56 = vpop.f32.mrf.mxu1 }
 0x98c   : > { %v12013_v35 = vpop.f32.mrf.mxu0  ;;  %v18251_v17 = vpop.f32.mrf.mxu1 }
 0x98e   : > { %v12014_v32 = vpop.f32.mrf.mxu0  ;;  %v18253_v29 = vpop.f32.mrf.mxu1 }
 0x990   : > { %v12016_v15 = vpop.f32.mrf.mxu0  ;;  %v18255_v46 = vpop.f32.mrf.mxu1 }
 0x992   : > { %v12017_v58 = vpop.f32.mrf.mxu0  ;;  %v18257_v57 = vpop.f32.mrf.mxu1 }
 0x994   : > { %v12019_v18 = vpop.f32.mrf.mxu0  ;;  %v18259_v1 = vpop.f32.mrf.mxu1 }
 0x996   : > { %v12020_v30 = vpop.f32.mrf.mxu0  ;;  %v18263_v20 = vpop.f32.mrf.mxu1 }
 0x998   : > { %v18261_v21 = vpop.f32.mrf.mxu0  ;;  %v18265_v2 = vpop.f32.mrf.mxu1 }
 0x999   : > { %18553 = vst [vmem:[#allocation5_spill] sm:$0xff] %v18265_v2 }
 0x99a   : > { %v12023_v27 = vpop.f32.mrf.mxu0  ;;  %v18267_v23 = vpop.f32.mrf.mxu1 }
 0x99b   : > { %18554 = vst [vmem:[#allocation4_spill] sm:$0xff] %v18267_v23  ;;  %v12015_v23 = vadd.f32 %v12014_v32, %v12013_v35 }
 0x99c   : > { %v12025_v59 = vpop.f32.mrf.mxu0  ;;  %v18271_v43 = vpop.f32.mrf.mxu1 }
 0x99d   : > { %18555 = vst [vmem:[#allocation12_spill] sm:$0xff] %v18271_v43 }
 0x99e   : > { %v12026_v38 = vpop.f32.mrf.mxu0  ;;  %v18277_v7 = vpop.f32.mrf.mxu1 }
 0x99f   : > { %18556 = vst [vmem:[#allocation13_spill] sm:$0xff] %v18277_v7  ;;  %v12027_v32 = vadd.f32 %v12026_v38, %v12025_v59 }
 0x9a0   : > { %v12028_v50 = vpop.f32.mrf.mxu0  ;;  %v18281_v10 = vpop.f32.mrf.mxu1 }
 0x9a1   : > { %18557 = vst [vmem:[#allocation11_spill] sm:$0xff] %v18281_v10  ;;  %v12012_v10 = vadd.f32 %v12011_v25, %v12010_v14 }
 0x9a2   : > { %v12029_v22 = vpop.f32.mrf.mxu0  ;;  %v18285_v9 = vpop.f32.mrf.mxu1 }
 0x9a3   : > { %18558 = vst [vmem:[#allocation20_spill] sm:$0xff] %v18285_v9  ;;  %v12030_v14 = vadd.f32 %v12029_v22, %v12028_v50 }
 0x9a4   : > { %v18269_v28 = vpop.f32.mrf.mxu0  ;;  %v18291_v43 = vpop.f32.mrf.mxu1 }
 0x9a5   : > { %18560 = vst [vmem:[#allocation15_spill] sm:$0xff] %v18291_v43  ;;  %v12018_v43 = vadd.f32 %v12017_v58, %v12016_v15 }
 0x9a6   : > { %v18273_v12 = vpop.f32.mrf.mxu0  ;;  %v18297_v7 = vpop.f32.mrf.mxu1 }
 0x9a7   : > { %18563 = vst [vmem:[#allocation17_spill] sm:$0xff] %v18297_v7  ;;  %v12079_v7 = vadd.f32 %v12078_v37, %v12077_v52  ;;  %v10137_v42 = vadd.f32 %v12018_v43, %v18191_v45  ;;  %v12021_v52 = vadd.f32 %v12020_v30, %v12019_v18  ;;  %v12076_v45 = vadd.f32 %v18235_v54, %v18232_v47 }
 0x9a8   : > { %v18275_v49 = vpop.f32.mrf.mxu0  ;;  %v18303_v3 = vpop.f32.mrf.mxu1  ;;  %v10150_v37 = vadd.f32 %v12027_v32, %v18200_v44  ;;  %v12024_v47 = vadd.f32 %v12023_v27, %v18261_v21  ;;  %v12085_v44 = vadd.f32 %v18249_v56, %v18247_v26  ;;  %v10153_v18 = vadd.f32 %v12030_v14, %v18203_v34  ;;  %v18571_v32 = vld [vmem:[#allocation4_spill] sm:$0xff] }
 0x9a9   : > { %18564 = vst [vmem:[#allocation18_spill] sm:$0xff] %v18303_v3  ;;  %v12033_v27 = vadd.f32 %v18273_v12, %v18269_v28  ;;  %v12088_v34 = vadd.f32 %v18253_v29, %v18251_v17  ;;  %v9988_v28 = vadd.f32 %v18237_v4, %v18179_v19  ;;  %v18566_v29 = vld [vmem:[#allocation11_spill] sm:$0xff] }
 0x9aa   : > { %v18279_v41 = vpop.f32.mrf.mxu0  ;;  %v18311_v39 = vpop.f32.mrf.mxu1  ;;  %v10145_v21 = vadd.f32 %v12024_v47, %v18197_v0 }
 0x9ab   : > { %v12036_v43 = vadd.f32 %v18279_v41, %v18275_v49 }
 0x9ac   : > { %v12037_v60 = vpop.f32.mrf.mxu0 }
 0x9ae   : > { %v12038_v61 = vpop.f32.mrf.mxu0 }
 0x9af   : > { %v12039_v30 = vadd.f32 %v12038_v61, %v12037_v60  ;;  %v18567_v60 = vld [vmem:[#allocation20_spill] sm:$0xff]  ;;  %v10242_v61 = vadd.f32 %v12088_v34, %v10145_v21 }
 0x9b0   : > { %v18283_v40 = vpop.f32.mrf.mxu0 }
 0x9b1   : > { %v10166_v22 = vadd.f32 %v12039_v30, %v18216_v51  ;;  %v18582_v30 = vld [vmem:[#allocation13_spill] sm:$0xff] }
 0x9b2   : > { %v18287_v31 = vpop.f32.mrf.mxu0 }
 0x9b4   : > { %v18289_v11 = vpop.f32.mrf.mxu0 }
 0x9b5   : > { %18559 = vst [vmem:[#allocation14_spill] sm:$0xff] %v18289_v11  ;;  %v10134_v11 = vadd.f32 %v12015_v23, %v18188_v5  ;;  %v10129_v5 = vadd.f32 %v12012_v10, %v18185_v55  ;;  %v12103_v10 = vadd.f32 %v18567_v60, %v18566_v29 }
 0x9b6   : > { %v18293_v53 = vpop.f32.mrf.mxu0 }
 0x9b7   : > { %18561 = vst [vmem:[#allocation21_spill] sm:$0xff] %v18293_v53  ;;  %v10231_v3 = vadd.f32 %v12079_v7, %v10134_v11  ;;  %v18330_v11 = vpop.f32.mrf.mxu1  ;;  %v10226_v59 = vadd.f32 %v12076_v45, %v10129_v5  ;;  %v18565_v7 = vld [vmem:[#allocation29_spill] sm:$0xff] }
 0x9b8   : > { %v18295_v48 = vpop.f32.mrf.mxu0  ;;  %v10158_v17 = vadd.f32 %v12033_v27, %v18565_v7 }
 0x9b9   : > { %18562 = vst [vmem:[#allocation16_spill] sm:$0xff] %v18295_v48  ;;  %v10126_v48 = vadd.f32 %v12009_v24, %v18182_v16  ;;  %v12082_v24 = vadd.f32 %v18245_v33, %v18243_v63  ;;  %v10142_v63 = vadd.f32 %v12021_v52, %v18194_v36 }
 0x9ba   : > { %v18299_v6 = vpop.f32.mrf.mxu0 }
 0x9bb   : > { %v10223_v62 = vadd.f32 %v12073_v13, %v10126_v48  ;;  %v10234_v15 = vadd.f32 %v12082_v24, %v10137_v42  ;;  %v18341_v48 = vpop.f32.mrf.mxu1  ;;  %v10239_v56 = vadd.f32 %v12085_v44, %v10142_v63  ;;  %v18570_v42 = vld [vmem:[#allocation5_spill] sm:$0xff]  ;;  %v18572_v24 = vld [vmem:[#allocation6_spill] sm:$0xff]  ;;  %v18580_v44 = vld [vmem:[#allocation8_spill] sm:$0xff] }
 0x9bc   : > { %v18301_v2 = vpop.f32.mrf.mxu0  ;;  %v12097_v5 = vadd.f32 %v18571_v32, %v18570_v42  ;;  %v18577_v63 = vld [vmem:[#allocation14_spill] sm:$0xff] }
 0x9bd   : > { %v12113_v50 = vpop.f32.mrf.mxu1 }
 0x9be   : > { %v18305_v9 = vpop.f32.mrf.mxu0 }
 0x9bf   : > { %v12114_v4 = vpop.f32.mrf.mxu1  ;;  %v12051_v41 = vadd.f32 %v18305_v9, %v18301_v2  ;;  %v10255_v9 = vadd.f32 %v12097_v5, %v10158_v17  ;;  %v18579_v2 = vld [vmem:[#allocation31_spill] sm:$0xff] }
 0x9c0   : > { %v18308_v53 = vpop.f32.mrf.mxu0 }
 0x9c2   : > { %v18313_v35 = vpop.f32.mrf.mxu0 }
 0x9c4   : > { %v12253_v16 = vpop.f32.mrf.mxu0 }
 0x9c5   : > { %v10328_v8 = vadd.f32 %v12253_v16, %v10231_v3  ;;  %v12091_v3 = vadd.f32 %v18257_v57, %v18255_v46  ;;  %v12094_v46 = vadd.f32 %v18263_v20, %v18259_v1  ;;  %v12042_v1 = vadd.f32 %v18287_v31, %v18283_v40  ;;  %v18568_v31 = vld [vmem:[#allocation30_spill] sm:$0xff]  ;;  %v18569_v40 = vld [vmem:[#allocation32_spill] sm:$0xff] }
 0x9c6   : > { %v10319_v55 = vpop.f32.mrf.mxu0  ;;  %v11987_v13 = vadd.f32 %v18569_v40, %v18568_v31  ;;  %v12112_v40 = vadd.f32 %v18341_v48, %v18330_v11 }
 0x9c7   : > { %10384 = vst [vmem:[%s18324_s22 + $0x10] sm:$0xff] %v10328_v8  ;;  %v10320_v25 = vadd.f32 %v10319_v55, %v10223_v62  ;;  %v10247_v38 = vadd.f32 %v12091_v3, %v10150_v37  ;;  %v10250_v0 = vadd.f32 %v12094_v46, %v10153_v18  ;;  %v10169_v49 = vadd.f32 %v12042_v1, %v18572_v24  ;;  %v18573_v62 = vld [vmem:[#allocation10_spill] sm:$0xff]  ;;  %v18574_v55 = vld [vmem:[#allocation28_spill] sm:$0xff]  ;;  %v18578_v3 = vld [vmem:[#allocation21_spill] sm:$0xff] }
 0x9c8   : > { %v12254_v58 = vpop.f32.mrf.mxu0  ;;  %v10263_v8 = vadd.f32 %v12103_v10, %v10166_v22  ;;  %v9991_v45 = vadd.f32 %v18573_v62, %v18179_v19  ;;  %v10161_v37 = vadd.f32 %v12036_v43, %v18574_v55  ;;  %v10085_v14 = vadd.f32 %v11987_v13, %v9988_v28  ;;  %v18581_v18 = vld [vmem:[#allocation12_spill] sm:$0xff]  ;;  %v18586_v10 = vld [vmem:[#allocation7_spill] sm:$0xff] }
 0x9c9   : > { %10382 = vst [vmem:[%s18324_s22] sm:$0xff] %v10320_v25  ;;  %v10331_v54 = vadd.f32 %v12254_v58, %v10234_v15  ;;  %v18575_v15 = vld [vmem:[#allocation15_spill] sm:$0xff]  ;;  %v18576_v58 = vld [vmem:[#allocation17_spill] sm:$0xff]  ;;  %v12045_v47 = vadd.f32 %v18578_v3, %v18577_v63  ;;  %v12100_v19 = vadd.f32 %v18582_v30, %v18581_v18  ;;  %v12115_v1 = vadd.f32 %v12114_v4, %v12113_v50 }
 0x9ca   : > { %v10322_v33 = vpop.f32.mrf.mxu0  ;;  %v10182_v46 = vadd.f32 %v12051_v41, %v10085_v14 }
 0x9cb   : > { %10385 = vst [vmem:[%s18324_s22 + $0x18] sm:$0xff] %v10331_v54  ;;  %v10323_v36 = vadd.f32 %v10322_v33, %v10226_v59  ;;  %v12106_v59 = vadd.f32 %v18576_v58, %v18575_v15  ;;  %v11990_v33 = vadd.f32 %v18580_v44, %v18579_v2  ;;  %v10258_v34 = vadd.f32 %v12100_v19, %v10161_v37 }
 0x9cc   : > { %v12257_v57 = vpop.f32.mrf.mxu0  ;;  %v10279_v29 = vadd.f32 %v12115_v1, %v10182_v46 }
 0x9cd   : > { %10383 = vst [vmem:[%s18324_s22 + $0x8] sm:$0xff] %v10323_v36  ;;  %v10344_v26 = vadd.f32 %v12257_v57, %v10247_v38  ;;  %v12116_v36 = vpop.f32.mrf.mxu1  ;;  %v12054_v57 = vadd.f32 %v18313_v35, %v18308_v53  ;;  %v10266_v27 = vadd.f32 %v12106_v59, %v10169_v49  ;;  %v18585_v53 = vld [vmem:[#allocation18_spill] sm:$0xff] }
 0x9ce   : > { %v10335_v23 = vpop.f32.mrf.mxu0  ;;  %v12109_v35 = vadd.f32 %v18311_v39, %v18585_v53 }
 0x9cf   : > { %10388 = vst [vmem:[%s18324_s22 + $0x30] sm:$0xff] %v10344_v26  ;;  %v10336_v20 = vadd.f32 %v10335_v23, %v10239_v56  ;;  %v10088_v26 = vadd.f32 %v11990_v33, %v9991_v45  ;;  %v18583_v23 = vld [vmem:[#allocation9_spill] sm:$0xff]  ;;  %v12117_v43 = vpop.f32.mrf.mxu1 }
 0x9d0   : > { %v12258_v12 = vpop.f32.mrf.mxu0  ;;  %v10174_v22 = vadd.f32 %v12045_v47, %v18583_v23 }
 0x9d1   : > { %10386 = vst [vmem:[%s18324_s22 + $0x20] sm:$0xff] %v10336_v20  ;;  %v10347_v51 = vadd.f32 %v12258_v12, %v10250_v0  ;;  %v18584_v20 = vld [vmem:[#allocation16_spill] sm:$0xff]  ;;  %v10185_v7 = vadd.f32 %v12054_v57, %v10088_v26 }
 0x9d2   : > { %v10338_v16 = vpop.f32.mrf.mxu0  ;;  %v12048_v0 = vadd.f32 %v18299_v6, %v18584_v20 }
 0x9d3   : > { %10389 = vst [vmem:[%s18324_s22 + $0x38] sm:$0xff] %v10347_v51  ;;  %v10339_v52 = vadd.f32 %v10338_v16, %v10242_v61  ;;  %v12118_v51 = vadd.f32 %v12117_v43, %v12116_v36  ;;  %v10271_v61 = vadd.f32 %v12109_v35, %v10174_v22 }
 0x9d4   : > { %v12261_v25 = vpop.f32.mrf.mxu0  ;;  %v10177_v50 = vadd.f32 %v12048_v0, %v18586_v10 }
 0x9d5   : > { %10387 = vst [vmem:[%s18324_s22 + $0x28] sm:$0xff] %v10339_v52  ;;  %v10360_v54 = vadd.f32 %v12261_v25, %v10263_v8  ;;  %v10282_v13 = vadd.f32 %v12118_v51, %v10185_v7 }
 0x9d6   : > { %v10351_v38 = vpop.f32.mrf.mxu0  ;;  %v10274_v5 = vadd.f32 %v12112_v40, %v10177_v50 }
 0x9d7   : > { %10392 = vst [vmem:[%s18324_s22 + $0x50] sm:$0xff] %v10360_v54  ;;  %v10352_v21 = vadd.f32 %v10351_v38, %v10255_v9 }
 0x9d8   : > { %v12262_v56 = vpop.f32.mrf.mxu0 }
 0x9d9   : > { %10390 = vst [vmem:[%s18324_s22 + $0x40] sm:$0xff] %v10352_v21  ;;  %v10363_v28 = vadd.f32 %v12262_v56, %v10266_v27 }
 0x9da   : > { %v10354_v12 = vpop.f32.mrf.mxu0 }
 0x9db   : > { %10393 = vst [vmem:[%s18324_s22 + $0x58] sm:$0xff] %v10363_v28  ;;  %v10355_v17 = vadd.f32 %v10354_v12, %v10258_v34 }
 0x9dc   : > { %v12265_v60 = vpop.f32.mrf.mxu0 }
 0x9dd   : > { %10391 = vst [vmem:[%s18324_s22 + $0x48] sm:$0xff] %v10355_v17  ;;  %v10376_v6 = vadd.f32 %v12265_v60, %v10279_v29 }
 0x9de   : > { %v10367_v31 = vpop.f32.mrf.mxu0 }
 0x9df   : > { %10396 = vst [vmem:[%s18324_s22 + $0x70] sm:$0xff] %v10376_v6  ;;  %v10368_v39 = vadd.f32 %v10367_v31, %v10271_v61 }
 0x9e0   : > { %v12266_v42 = vpop.f32.mrf.mxu0 }
 0x9e1   : > { %10394 = vst [vmem:[%s18324_s22 + $0x60] sm:$0xff] %v10368_v39  ;;  %v10379_v32 = vadd.f32 %v12266_v42, %v10282_v13 }
 0x9e2   : > { %v10370_v4 = vpop.f32.mrf.mxu0 }
 0x9e3   : > { %10397 = vst [vmem:[%s18324_s22 + $0x78] sm:$0xff] %v10379_v32  ;;  %v10371_v16 = vadd.f32 %v10370_v4, %v10274_v5 }
 0x9e5   : > { %10395 = vst [vmem:[%s18324_s22 + $0x68] sm:$0xff] %v10371_v16 }
 0x9e6 PF: > { %s18_s27 = sadd.s32 1, %s12726_s27  }
 0x9e7   : > { %p15_p4 = scmp.ge.s32.totalorder %s18_s27, 4  }
 0x9e9   :  { %17 = sbr.rel (!%p15_p4) target bundleno = 1 (0x1), region = 93 }

</bundles_post_ra>
